<compile_context>
chip_gen: v7x
topology: tpu7x:2x2x1
jax: 0.10.0
libtpu: 0.0.40
codegen_flags: <defaults>
</compile_context>

<pallas_src>
import functools
import math

import jax
import jax.numpy as jnp
from jax import lax
from jax.experimental import pallas as pl
from jax.experimental.pallas import tpu as pltpu

EPS = 1e-5
NEG_INF = -1e30


# ----------------------------- in-kernel helpers -----------------------------

def _rmsnorm_f32(x, w):
    """x: (R, D) f32, w: (1, D) f32 -> f32."""
    ms = jnp.mean(x * x, axis=-1, keepdims=True)
    return x * lax.rsqrt(ms + EPS) * w


def _matmul_nt(a, b):
    """a: (M, K), b: (N, K) -> a @ b.T in f32. bf16 MXU operands, f32 accum."""
    return lax.dot_general(a.astype(jnp.bfloat16), b.astype(jnp.bfloat16),
                           (((1,), (1,)), ((), ())),
                           preferred_element_type=jnp.float32)


def _matmul_nn(a, b):
    """a: (M, K), b: (K, N) -> a @ b in f32. bf16 MXU operands, f32 accum."""
    return jnp.dot(a.astype(jnp.bfloat16), b.astype(jnp.bfloat16),
                   preferred_element_type=jnp.float32)


# ----------------------------- Pallas kernels -----------------------------

def qkv_rope_kernel(x_ref, n1w_ref, wq_ref, wk_ref, wv_ref,
                    cos_ref, sin_ref, pswap_ref,
                    q_ref, k_ref, v_ref, *, scale):
    """RMSNorm -> QKV projection -> full-width RoPE (q, k) for one row tile."""
    x = x_ref[0]                                 # (TS, D) f32
    h = _rmsnorm_f32(x, n1w_ref[...])
    hb = h.astype(jnp.bfloat16)

    q = _matmul_nt(hb, wq_ref[...])              # (TS, D) f32
    k = _matmul_nt(hb, wk_ref[...])
    v = _matmul_nt(hb, wv_ref[...])

    cos = cos_ref[...]                           # (TS, D) f32 (cos dup'd per pair)
    sin = sin_ref[...]                           # (TS, D) f32 ((-sin,+sin) per pair)
    pswap = pswap_ref[...]                       # (D, D) bf16 pair-swap permutation

    # interleaved RoPE:  out = x*cos + pair_swap(x)*sin_signed
    q_rot = q * cos + _matmul_nn(q, pswap) * sin
    k_rot = k * cos + _matmul_nn(k, pswap) * sin

    q_ref[0] = (q_rot * scale).astype(jnp.bfloat16)   # fold 1/sqrt(d_head) into q
    k_ref[0] = k_rot.astype(jnp.bfloat16)
    v_ref[0] = v.astype(jnp.bfloat16)


def flash_attn_kernel(q_ref, k_ref, v_ref, o_ref, m_sc, l_sc, acc_sc, *, tq, tkv):
    """Causal flash attention for one (batch, head, q-tile); kv axis innermost."""
    qi = pl.program_id(2)
    ki = pl.program_id(3)

    @pl.when(ki == 0)
    def _():
        m_sc[...] = jnp.full(m_sc.shape, -jnp.inf, dtype=jnp.float32)
        l_sc[...] = jnp.zeros(l_sc.shape, dtype=jnp.float32)
        acc_sc[...] = jnp.zeros(acc_sc.shape, dtype=jnp.float32)

    # Skip kv tiles that lie entirely above the causal diagonal.
    @pl.when(ki * tkv <= qi * tq + (tq - 1))
    def _():
        qb = q_ref[0]                            # (TQ, dh) bf16 (pre-scaled)
        kb = k_ref[0]                            # (TKV, dh) bf16
        vb = v_ref[0]                            # (TKV, dh) bf16

        s = lax.dot_general(qb, kb, (((1,), (1,)), ((), ())),
                            preferred_element_type=jnp.float32)   # (TQ, TKV) f32
        row = qi * tq + lax.broadcasted_iota(jnp.int32, (tq, tkv), 0)
        col = ki * tkv + lax.broadcasted_iota(jnp.int32, (tq, tkv), 1)
        s = jnp.where(col <= row, s, NEG_INF)

        m_prev = m_sc[...]
        m_new = jnp.maximum(m_prev, jnp.max(s, axis=-1, keepdims=True))
        alpha = jnp.exp(m_prev - m_new)
        p = jnp.exp(s - m_new)
        l_sc[...] = alpha * l_sc[...] + jnp.sum(p, axis=-1, keepdims=True)
        acc_sc[...] = alpha * acc_sc[...] + jnp.dot(
            p.astype(jnp.bfloat16), vb, preferred_element_type=jnp.float32)
        m_sc[...] = m_new

    @pl.when(ki == pl.num_programs(3) - 1)
    def _():
        inv_l = pl.reciprocal(l_sc[...], approx=True)
        o_ref[0] = (acc_sc[...] * inv_l).astype(o_ref.dtype)


def proj_ffn_kernel(x_ref, attn_ref, wo_ref, n2w_ref, w1_ref, w3_ref, w2_ref,
                    out_ref, xnew_sc, h2_sc, acc_sc):
    """x + attn@wo.T, then RMSNorm -> SwiGLU tiled over d_ff (reduction axis)."""
    fi = pl.program_id(2)

    @pl.when(fi == 0)
    def _():
        xnew = x_ref[0] + _matmul_nt(attn_ref[0], wo_ref[...])   # (TR, D) f32
        xnew_sc[...] = xnew
        h2_sc[...] = _rmsnorm_f32(xnew, n2w_ref[...]).astype(jnp.bfloat16)
        acc_sc[...] = jnp.zeros(acc_sc.shape, dtype=jnp.float32)

    h2 = h2_sc[...]                               # (TR, D) bf16
    a = _matmul_nt(h2, w1_ref[...])               # (TR, TF) f32
    b = _matmul_nt(h2, w3_ref[...])               # (TR, TF) f32
    sig = pl.reciprocal(1.0 + jnp.exp(-a), approx=True)   # sigmoid via EUP
    acc_sc[...] += _matmul_nt(a * sig * b, w2_ref[...])   # += g @ w2_tile.T

    @pl.when(fi == pl.num_programs(2) - 1)
    def _():
        out_ref[0] = xnew_sc[...] + acc_sc[...]


# ----------------------------- wrappers -----------------------------

def run_qkv_rope(x, n1w, wq, wk, wv, cosf, sinf, pswap, *, num_heads, ts):
    B, S, D = x.shape
    d_head = D // num_heads
    scale = 1.0 / math.sqrt(d_head)
    # TODO(synk): for very large D, tile the (D, D) projection weights over the
    # contraction dim with a reduction grid axis instead of keeping them resident.
    full = lambda shape: pl.BlockSpec(shape, lambda b, s: (0,) * len(shape))
    out_sd = jax.ShapeDtypeStruct((B, S, D), jnp.bfloat16)
    row_spec = pl.BlockSpec((1, ts, D), lambda b, s: (b, s, 0))
    return pl.pallas_call(
        functools.partial(qkv_rope_kernel, scale=scale),
        out_shape=(out_sd, out_sd, out_sd),
        grid=(B, S // ts),
        in_specs=[
            row_spec,                                       # x
            full((1, D)),                                   # norm1 weight
            full((D, D)), full((D, D)), full((D, D)),       # wq wk wv (bf16)
            pl.BlockSpec((ts, D), lambda b, s: (s, 0)),     # cos table
            pl.BlockSpec((ts, D), lambda b, s: (s, 0)),     # sin table
            full((D, D)),                                   # pair-swap perm (bf16)
        ],
        out_specs=(row_spec, row_spec, row_spec),
        compiler_params=pltpu.CompilerParams(
            dimension_semantics=("parallel", "parallel")),
    )(x, n1w, wq, wk, wv, cosf, sinf, pswap)


def run_flash_attention(q, k, v, *, num_heads, tq, tkv):
    B, S, D = q.shape
    d_head = D // num_heads
    # Heads are sliced lane-densely straight out of the (B, S, D) layout.
    # TODO(synk): for d_head not a multiple of 128, transpose q/k/v to
    # (B, H, S, d_head) in the wrapper and index the head as a leading grid dim.
    assert d_head % 128 == 0, "BlockSpec head slicing requires lane-aligned d_head"
    return pl.pallas_call(
        functools.partial(flash_attn_kernel, tq=tq, tkv=tkv),
        out_shape=jax.ShapeDtypeStruct((B, S, D), jnp.bfloat16),
        grid=(B, num_heads, S // tq, S // tkv),
        in_specs=[
            pl.BlockSpec((1, tq, d_head), lambda b, h, qi, ki: (b, qi, h)),
            pl.BlockSpec((1, tkv, d_head), lambda b, h, qi, ki: (b, ki, h)),
            pl.BlockSpec((1, tkv, d_head), lambda b, h, qi, ki: (b, ki, h)),
        ],
        out_specs=pl.BlockSpec((1, tq, d_head), lambda b, h, qi, ki: (b, qi, h)),
        scratch_shapes=[
            pltpu.VMEM((tq, 1), jnp.float32),        # running max m
            pltpu.VMEM((tq, 1), jnp.float32),        # running sum l
            pltpu.VMEM((tq, d_head), jnp.float32),   # output accumulator
        ],
        compiler_params=pltpu.CompilerParams(
            dimension_semantics=("parallel", "parallel", "parallel", "arbitrary")),
    )(q, k, v)


def run_proj_ffn(x, attn, wo, n2w, w1, w3, w2, *, tr, tf):
    B, S, D = x.shape
    F = w1.shape[0]
    row_spec = pl.BlockSpec((1, tr, D), lambda b, r, f: (b, r, 0))
    return pl.pallas_call(
        proj_ffn_kernel,
        out_shape=jax.ShapeDtypeStruct((B, S, D), jnp.float32),
        grid=(B, S // tr, F // tf),
        in_specs=[
            row_spec,                                        # x (residual)
            row_spec,                                        # attention output
            pl.BlockSpec((D, D), lambda b, r, f: (0, 0)),    # wo (bf16)
            pl.BlockSpec((1, D), lambda b, r, f: (0, 0)),    # norm2 weight
            pl.BlockSpec((tf, D), lambda b, r, f: (f, 0)),   # w1 tile (bf16)
            pl.BlockSpec((tf, D), lambda b, r, f: (f, 0)),   # w3 tile (bf16)
            pl.BlockSpec((D, tf), lambda b, r, f: (0, f)),   # w2 tile (bf16)
        ],
        out_specs=row_spec,
        scratch_shapes=[
            pltpu.VMEM((tr, D), jnp.float32),     # x + attn @ wo.T
            pltpu.VMEM((tr, D), jnp.bfloat16),    # rmsnorm(xnew) as MXU operand
            pltpu.VMEM((tr, D), jnp.float32),     # FFN accumulator
        ],
        compiler_params=pltpu.CompilerParams(
            dimension_semantics=("parallel", "parallel", "arbitrary")),
    )(x, attn, wo, n2w, w1, w3, w2)


def rope_tables(S, d_head, num_heads, theta):
    """Full-width (S, D) cos / signed-sin tables and a (D, D) pair-swap perm."""
    pos = jnp.arange(S, dtype=jnp.float32)[:, None]
    idx = jnp.arange(d_head // 2, dtype=jnp.float32)[None, :]
    inv_freq = theta ** (-2.0 * idx / d_head)
    ang = pos * inv_freq                                        # (S, d_head/2)
    cos = jnp.repeat(jnp.cos(ang), 2, axis=1)                   # (S, d_head)
    sin = jnp.stack([-jnp.sin(ang), jnp.sin(ang)], axis=-1).reshape(S, d_head)
    cosf = jnp.tile(cos, (1, num_heads))                        # (S, D)
    sinf = jnp.tile(sin, (1, num_heads))
    D = d_head * num_heads
    perm = jnp.arange(D).reshape(D // 2, 2)[:, ::-1].reshape(D)
    pswap = jnp.eye(D, dtype=jnp.float32)[perm].astype(jnp.bfloat16)
    return cosf, sinf, pswap


@functools.partial(jax.jit,
                   static_argnames=("num_heads", "theta", "ts", "tq", "tkv",
                                    "tr", "tf"))
def transformer_block_forward(x, params, *, num_heads, theta,
                              ts=128, tq=128, tkv=128, tr=128, tf=256):
    B, S, D = x.shape
    d_head = D // num_heads
    cosf, sinf, pswap = rope_tables(S, d_head, num_heads, theta)
    bf = lambda a: a.astype(jnp.bfloat16)   # weights go to the MXU as bf16

    q, k, v = run_qkv_rope(x, params["n1w"], bf(params["wq"]), bf(params["wk"]),
                           bf(params["wv"]), cosf, sinf, pswap,
                           num_heads=num_heads, ts=ts)
    attn = run_flash_attention(q, k, v, num_heads=num_heads, tq=tq, tkv=tkv)
    return run_proj_ffn(x, attn, bf(params["wo"]), params["n2w"],
                        bf(params["w1"]), bf(params["w3"]), bf(params["w2"]),
                        tr=tr, tf=tf)


# ----------------------------- pure-JAX reference -----------------------------

def ref_block_forward(x, params, *, num_heads, theta):
    with jax.default_matmul_precision("highest"):
        B, S, D = x.shape
        d_head = D // num_heads
        pos = jnp.arange(S, dtype=jnp.float32)[:, None]
        idx = jnp.arange(d_head // 2, dtype=jnp.float32)[None, :]
        ang = pos * theta ** (-2.0 * idx / d_head)
        cos, sin = jnp.cos(ang)[:, None, :], jnp.sin(ang)[:, None, :]

        def rms(v, w):
            return v * lax.rsqrt(jnp.mean(v * v, -1, keepdims=True) + EPS) * w

        def rope(t):                                       # (B, S, H, d_head)
            te, to = t[..., 0::2], t[..., 1::2]
            re = te * cos - to * sin
            ro = te * sin + to * cos
            return jnp.stack([re, ro], axis=-1).reshape(t.shape)

        mask = jnp.tril(jnp.ones((S, S), bool))
        h = rms(x, params["n1w"][0])
        q = (h @ params["wq"].T).reshape(B, S, num_heads, d_head)
        k = (h @ params["wk"].T).reshape(B, S, num_heads, d_head)
        v = (h @ params["wv"].T).reshape(B, S, num_heads, d_head)
        q, k = rope(q), rope(k)
        sc = jnp.einsum("bqhd,bkhd->bhqk", q, k) / (d_head ** 0.5)
        sc = jnp.where(mask, sc, NEG_INF)
        p = jax.nn.softmax(sc, axis=-1)
        o = jnp.einsum("bhqk,bkhd->bqhd", p, v).reshape(B, S, D)
        x = x + o @ params["wo"].T
        h2 = rms(x, params["n2w"][0])
        a, b = h2 @ params["w1"].T, h2 @ params["w3"].T
        return x + (jax.nn.silu(a) * b) @ params["w2"].T


# ----------------------------- main -----------------------------

if __name__ == "__main__":
    B, S = 2, 256                            # batch, sequence (lane/tile friendly)
    d_model, num_heads, d_ff = 256, 2, 512   # d_head = 128 (lane dense)
    theta = 10000.0

    key = jax.random.PRNGKey(0)
    ks = iter(jax.random.split(key, 16))

    def rnd(shape, std):
        return (std * jax.random.normal(next(ks), shape)).astype(jnp.float32)

    wstd = 0.02
    params = {
        "n1w": 1.0 + rnd((1, d_model), 0.1),
        "wq": rnd((d_model, d_model), wstd),
        "wk": rnd((d_model, d_model), wstd),
        "wv": rnd((d_model, d_model), wstd),
        "wo": rnd((d_model, d_model), wstd),
        "n2w": 1.0 + rnd((1, d_model), 0.1),
        "w1": rnd((d_ff, d_model), wstd),
        "w3": rnd((d_ff, d_model), wstd),
        "w2": rnd((d_model, d_ff), wstd),
    }
    x = rnd((B, S, d_model), 1.0)

    out = transformer_block_forward(x, params, num_heads=num_heads, theta=theta,
                                    ts=128, tq=128, tkv=128, tr=128, tf=256)
    out = jax.block_until_ready(out)

    ref = jax.block_until_ready(
        ref_block_forward(x, params, num_heads=num_heads, theta=theta))

    assert out.shape == (B, S, d_model), out.shape
    assert bool(jnp.all(jnp.isfinite(out)))
    max_err = float(jnp.max(jnp.abs(out - ref)))
    assert bool(jnp.allclose(out, ref, rtol=2e-2, atol=2e-2)), \
        f"max abs diff {max_err}"

    print("KERNEL_OK")
</pallas_src>

<mosaic_0001>
module attributes {stable_mosaic.version = 11 : i64} {
  func.func @qkv_rope_kernel(%arg0: i32, %arg1: i32, %arg2: memref<1x128x256xf32, #tpu.memory_space<vmem>>, %arg3: memref<1x256xf32, #tpu.memory_space<vmem>>, %arg4: memref<256x256xbf16, #tpu.memory_space<vmem>>, %arg5: memref<256x256xbf16, #tpu.memory_space<vmem>>, %arg6: memref<256x256xbf16, #tpu.memory_space<vmem>>, %arg7: memref<128x256xf32, #tpu.memory_space<vmem>>, %arg8: memref<128x256xf32, #tpu.memory_space<vmem>>, %arg9: memref<256x256xbf16, #tpu.memory_space<vmem>>, %arg10: memref<1x128x256xbf16, #tpu.memory_space<vmem>>, %arg11: memref<1x128x256xbf16, #tpu.memory_space<vmem>>, %arg12: memref<1x128x256xbf16, #tpu.memory_space<vmem>>) attributes {dimension_semantics = [#tpu.dimension_semantics<parallel>, #tpu.dimension_semantics<parallel>], iteration_bounds = array<i64: 2, 2>, scalar_prefetch = 0 : i64, scratch_operands = 0 : i64, tpu.core_type = #tpu.core_type<tc>, window_params = [{transform_indices = @transform_0, window_bounds = array<i64: 1, 128, 256>}, {pipeline_mode = #tpu.pipeline_mode<synchronous>, transform_indices = @transform_1, window_bounds = array<i64: 1, 256>}, {pipeline_mode = #tpu.pipeline_mode<synchronous>, transform_indices = @transform_2, window_bounds = array<i64: 256, 256>}, {pipeline_mode = #tpu.pipeline_mode<synchronous>, transform_indices = @transform_3, window_bounds = array<i64: 256, 256>}, {pipeline_mode = #tpu.pipeline_mode<synchronous>, transform_indices = @transform_4, window_bounds = array<i64: 256, 256>}, {transform_indices = @transform_5, window_bounds = array<i64: 128, 256>}, {transform_indices = @transform_6, window_bounds = array<i64: 128, 256>}, {pipeline_mode = #tpu.pipeline_mode<synchronous>, transform_indices = @transform_7, window_bounds = array<i64: 256, 256>}, {transform_indices = @transform_8, window_bounds = array<i64: 1, 128, 256>}, {transform_indices = @transform_9, window_bounds = array<i64: 1, 128, 256>}, {transform_indices = @transform_10, window_bounds = array<i64: 1, 128, 256>}]} {
    %c0 = arith.constant 0 : index
    %c0_0 = arith.constant 0 : index
    %c0_1 = arith.constant 0 : index
    %0 = vector.load %arg2[%c0, %c0_0, %c0_1] : memref<1x128x256xf32, #tpu.memory_space<vmem>>, vector<1x128x256xf32>
    %1 = vector.shape_cast %0 : vector<1x128x256xf32> to vector<128x256xf32>
    %c0_2 = arith.constant 0 : index
    %c0_3 = arith.constant 0 : index
    %2 = vector.load %arg3[%c0_2, %c0_3] : memref<1x256xf32, #tpu.memory_space<vmem>>, vector<1x256xf32>
    %3 = arith.mulf %1, %1 : vector<128x256xf32>
    %cst = arith.constant dense<0.000000e+00> : vector<128xf32>
    %4 = vector.multi_reduction <add>, %3, %cst [1] : vector<128x256xf32> to vector<128xf32>
    %5 = vector.shape_cast %4 : vector<128xf32> to vector<128x1xf32>
    %cst_4 = arith.constant 2.560000e+02 : f32
    %6 = vector.broadcast %cst_4 : f32 to vector<128x1xf32>
    %7 = arith.divf %5, %6 : vector<128x1xf32>
    %cst_5 = arith.constant 9.99999974E-6 : f32
    %8 = vector.broadcast %cst_5 : f32 to vector<128x1xf32>
    %9 = arith.addf %7, %8 : vector<128x1xf32>
    %10 = math.rsqrt %9 : vector<128x1xf32>
    %11 = vector.broadcast %10 : vector<128x1xf32> to vector<128x256xf32>
    %12 = arith.mulf %1, %11 : vector<128x256xf32>
    %13 = vector.broadcast %2 : vector<1x256xf32> to vector<128x256xf32>
    %14 = arith.mulf %12, %13 : vector<128x256xf32>
    %15 = arith.truncf %14 : vector<128x256xf32> to vector<128x256xbf16>
    %c0_6 = arith.constant 0 : index
    %c0_7 = arith.constant 0 : index
    %16 = vector.load %arg4[%c0_6, %c0_7] : memref<256x256xbf16, #tpu.memory_space<vmem>>, vector<256x256xbf16>
    %cst_8 = arith.constant dense<0.000000e+00> : vector<128x256xf32>
    %17 = tpu.matmul %15, %16, %cst_8 {dimension_numbers = #tpu.dot_dimension_numbers<[1], [1], [0], [0], [0, 0, 1, 0], [], []>} : vector<128x256xbf16>, vector<256x256xbf16>, vector<128x256xf32> -> vector<128x256xf32>
    %c0_9 = arith.constant 0 : index
    %c0_10 = arith.constant 0 : index
    %18 = vector.load %arg5[%c0_9, %c0_10] : memref<256x256xbf16, #tpu.memory_space<vmem>>, vector<256x256xbf16>
    %cst_11 = arith.constant dense<0.000000e+00> : vector<128x256xf32>
    %19 = tpu.matmul %15, %18, %cst_11 {dimension_numbers = #tpu.dot_dimension_numbers<[1], [1], [0], [0], [0, 0, 1, 0], [], []>} : vector<128x256xbf16>, vector<256x256xbf16>, vector<128x256xf32> -> vector<128x256xf32>
    %c0_12 = arith.constant 0 : index
    %c0_13 = arith.constant 0 : index
    %20 = vector.load %arg6[%c0_12, %c0_13] : memref<256x256xbf16, #tpu.memory_space<vmem>>, vector<256x256xbf16>
    %cst_14 = arith.constant dense<0.000000e+00> : vector<128x256xf32>
    %21 = tpu.matmul %15, %20, %cst_14 {dimension_numbers = #tpu.dot_dimension_numbers<[1], [1], [0], [0], [0, 0, 1, 0], [], []>} : vector<128x256xbf16>, vector<256x256xbf16>, vector<128x256xf32> -> vector<128x256xf32>
    %c0_15 = arith.constant 0 : index
    %c0_16 = arith.constant 0 : index
    %22 = vector.load %arg7[%c0_15, %c0_16] : memref<128x256xf32, #tpu.memory_space<vmem>>, vector<128x256xf32>
    %c0_17 = arith.constant 0 : index
    %c0_18 = arith.constant 0 : index
    %23 = vector.load %arg8[%c0_17, %c0_18] : memref<128x256xf32, #tpu.memory_space<vmem>>, vector<128x256xf32>
    %c0_19 = arith.constant 0 : index
    %c0_20 = arith.constant 0 : index
    %24 = vector.load %arg9[%c0_19, %c0_20] : memref<256x256xbf16, #tpu.memory_space<vmem>>, vector<256x256xbf16>
    %25 = arith.mulf %17, %22 : vector<128x256xf32>
    %26 = arith.truncf %17 : vector<128x256xf32> to vector<128x256xbf16>
    %cst_21 = arith.constant dense<0.000000e+00> : vector<128x256xf32>
    %27 = tpu.matmul %26, %24, %cst_21 {dimension_numbers = #tpu.dot_dimension_numbers<[1], [0], [0], [1], [0, 0, 1, 1], [], []>} : vector<128x256xbf16>, vector<256x256xbf16>, vector<128x256xf32> -> vector<128x256xf32>
    %28 = arith.mulf %27, %23 : vector<128x256xf32>
    %29 = arith.addf %25, %28 : vector<128x256xf32>
    %30 = arith.mulf %19, %22 : vector<128x256xf32>
    %31 = arith.truncf %19 : vector<128x256xf32> to vector<128x256xbf16>
    %cst_22 = arith.constant dense<0.000000e+00> : vector<128x256xf32>
    %32 = tpu.matmul %31, %24, %cst_22 {dimension_numbers = #tpu.dot_dimension_numbers<[1], [0], [0], [1], [0, 0, 1, 1], [], []>} : vector<128x256xbf16>, vector<256x256xbf16>, vector<128x256xf32> -> vector<128x256xf32>
    %33 = arith.mulf %32, %23 : vector<128x256xf32>
    %34 = arith.addf %30, %33 : vector<128x256xf32>
    %cst_23 = arith.constant 0.0883883461 : f32
    %35 = vector.broadcast %cst_23 : f32 to vector<128x256xf32>
    %36 = arith.mulf %29, %35 : vector<128x256xf32>
    %37 = arith.truncf %36 : vector<128x256xf32> to vector<128x256xbf16>
    %c0_24 = arith.constant 0 : index
    %c0_25 = arith.constant 0 : index
    %c0_26 = arith.constant 0 : index
    %38 = vector.load %arg10[%c0_24, %c0_25, %c0_26] : memref<1x128x256xbf16, #tpu.memory_space<vmem>>, vector<1x128x256xbf16>
    %39 = vector.shape_cast %38 : vector<1x128x256xbf16> to vector<128x256xbf16>
    %40 = vector.shape_cast %37 : vector<128x256xbf16> to vector<1x128x256xbf16>
    tpu.vector_store %arg10[%c0_24, %c0_25, %c0_26], %40 {strides = array<i32>} : memref<1x128x256xbf16, #tpu.memory_space<vmem>>, vector<1x128x256xbf16>,
    %41 = arith.truncf %34 : vector<128x256xf32> to vector<128x256xbf16>
    %c0_27 = arith.constant 0 : index
    %c0_28 = arith.constant 0 : index
    %c0_29 = arith.constant 0 : index
    %42 = vector.load %arg11[%c0_27, %c0_28, %c0_29] : memref<1x128x256xbf16, #tpu.memory_space<vmem>>, vector<1x128x256xbf16>
    %43 = vector.shape_cast %42 : vector<1x128x256xbf16> to vector<128x256xbf16>
    %44 = vector.shape_cast %41 : vector<128x256xbf16> to vector<1x128x256xbf16>
    tpu.vector_store %arg11[%c0_27, %c0_28, %c0_29], %44 {strides = array<i32>} : memref<1x128x256xbf16, #tpu.memory_space<vmem>>, vector<1x128x256xbf16>,
    %45 = arith.truncf %21 : vector<128x256xf32> to vector<128x256xbf16>
    %c0_30 = arith.constant 0 : index
    %c0_31 = arith.constant 0 : index
    %c0_32 = arith.constant 0 : index
    %46 = vector.load %arg12[%c0_30, %c0_31, %c0_32] : memref<1x128x256xbf16, #tpu.memory_space<vmem>>, vector<1x128x256xbf16>
    %47 = vector.shape_cast %46 : vector<1x128x256xbf16> to vector<128x256xbf16>
    %48 = vector.shape_cast %45 : vector<128x256xbf16> to vector<1x128x256xbf16>
    tpu.vector_store %arg12[%c0_30, %c0_31, %c0_32], %48 {strides = array<i32>} : memref<1x128x256xbf16, #tpu.memory_space<vmem>>, vector<1x128x256xbf16>,
    return
  }
  func.func @transform_0(%arg0: i32, %arg1: i32) -> (i32, i32, i32) {
    %c0_i32 = arith.constant 0 : i32
    %c0_i32_0 = arith.constant 0 : i32
    return %arg0, %arg1, %c0_i32 : i32, i32, i32
  }
  func.func @transform_1(%arg0: i32, %arg1: i32) -> (i32, i32) {
    %c0_i32 = arith.constant 0 : i32
    %c0_i32_0 = arith.constant 0 : i32
    %c0_i32_1 = arith.constant 0 : i32
    return %c0_i32, %c0_i32_0 : i32, i32
  }
  func.func @transform_2(%arg0: i32, %arg1: i32) -> (i32, i32) {
    %c0_i32 = arith.constant 0 : i32
    %c0_i32_0 = arith.constant 0 : i32
    %c0_i32_1 = arith.constant 0 : i32
    return %c0_i32, %c0_i32_0 : i32, i32
  }
  func.func @transform_3(%arg0: i32, %arg1: i32) -> (i32, i32) {
    %c0_i32 = arith.constant 0 : i32
    %c0_i32_0 = arith.constant 0 : i32
    %c0_i32_1 = arith.constant 0 : i32
    return %c0_i32, %c0_i32_0 : i32, i32
  }
  func.func @transform_4(%arg0: i32, %arg1: i32) -> (i32, i32) {
    %c0_i32 = arith.constant 0 : i32
    %c0_i32_0 = arith.constant 0 : i32
    %c0_i32_1 = arith.constant 0 : i32
    return %c0_i32, %c0_i32_0 : i32, i32
  }
  func.func @transform_5(%arg0: i32, %arg1: i32) -> (i32, i32) {
    %c0_i32 = arith.constant 0 : i32
    %c0_i32_0 = arith.constant 0 : i32
    return %arg1, %c0_i32 : i32, i32
  }
  func.func @transform_6(%arg0: i32, %arg1: i32) -> (i32, i32) {
    %c0_i32 = arith.constant 0 : i32
    %c0_i32_0 = arith.constant 0 : i32
    return %arg1, %c0_i32 : i32, i32
  }
  func.func @transform_7(%arg0: i32, %arg1: i32) -> (i32, i32) {
    %c0_i32 = arith.constant 0 : i32
    %c0_i32_0 = arith.constant 0 : i32
    %c0_i32_1 = arith.constant 0 : i32
    return %c0_i32, %c0_i32_0 : i32, i32
  }
  func.func @transform_8(%arg0: i32, %arg1: i32) -> (i32, i32, i32) {
    %c0_i32 = arith.constant 0 : i32
    %c0_i32_0 = arith.constant 0 : i32
    return %arg0, %arg1, %c0_i32 : i32, i32, i32
  }
  func.func @transform_9(%arg0: i32, %arg1: i32) -> (i32, i32, i32) {
    %c0_i32 = arith.constant 0 : i32
    %c0_i32_0 = arith.constant 0 : i32
    return %arg0, %arg1, %c0_i32 : i32, i32, i32
  }
  func.func @transform_10(%arg0: i32, %arg1: i32) -> (i32, i32, i32) {
    %c0_i32 = arith.constant 0 : i32
    %c0_i32_0 = arith.constant 0 : i32
    return %arg0, %arg1, %c0_i32 : i32, i32, i32
  }
}

module attributes {stable_mosaic.version = 11 : i64} {
  func.func @flash_attn_kernel(%arg0: i32, %arg1: i32, %arg2: i32, %arg3: i32, %arg4: memref<1x128x128xbf16, #tpu.memory_space<vmem>>, %arg5: memref<1x128x128xbf16, #tpu.memory_space<vmem>>, %arg6: memref<1x128x128xbf16, #tpu.memory_space<vmem>>, %arg7: memref<1x128x128xbf16, #tpu.memory_space<vmem>>, %arg8: memref<128x1xf32, #tpu.memory_space<vmem>>, %arg9: memref<128x1xf32, #tpu.memory_space<vmem>>, %arg10: memref<128x128xf32, #tpu.memory_space<vmem>>) attributes {dimension_semantics = [#tpu.dimension_semantics<parallel>, #tpu.dimension_semantics<parallel>, #tpu.dimension_semantics<parallel>, #tpu.dimension_semantics<arbitrary>], iteration_bounds = array<i64: 2, 2, 2, 2>, scalar_prefetch = 0 : i64, scratch_operands = 3 : i64, tpu.core_type = #tpu.core_type<tc>, window_params = [{transform_indices = @transform_0, window_bounds = array<i64: 1, 128, 128>}, {transform_indices = @transform_1, window_bounds = array<i64: 1, 128, 128>}, {transform_indices = @transform_2, window_bounds = array<i64: 1, 128, 128>}, {transform_indices = @transform_3, window_bounds = array<i64: 1, 128, 128>}]} {
    %c0_i32 = arith.constant 0 : i32
    %0 = arith.cmpi eq, %arg3, %c0_i32 : i32
    %1 = arith.extui %0 : i1 to i32
    %c0_i32_0 = arith.constant 0 : i32
    %2 = arith.cmpi ne, %1, %c0_i32_0 : i32
    scf.if %2 {
      %cst = arith.constant 0xFF800000 : f32
      %12 = vector.broadcast %cst : f32 to vector<128x1xf32>
      %c0 = arith.constant 0 : index
      %c0_4 = arith.constant 0 : index
      %13 = vector.load %arg8[%c0, %c0_4] : memref<128x1xf32, #tpu.memory_space<vmem>>, vector<128x1xf32>
      tpu.vector_store %arg8[%c0, %c0_4], %12 {strides = array<i32>} : memref<128x1xf32, #tpu.memory_space<vmem>>, vector<128x1xf32>,
      %cst_5 = arith.constant 0.000000e+00 : f32
      %14 = vector.broadcast %cst_5 : f32 to vector<128x1xf32>
      %c0_6 = arith.constant 0 : index
      %c0_7 = arith.constant 0 : index
      %15 = vector.load %arg9[%c0_6, %c0_7] : memref<128x1xf32, #tpu.memory_space<vmem>>, vector<128x1xf32>
      tpu.vector_store %arg9[%c0_6, %c0_7], %14 {strides = array<i32>} : memref<128x1xf32, #tpu.memory_space<vmem>>, vector<128x1xf32>,
      %cst_8 = arith.constant 0.000000e+00 : f32
      %16 = vector.broadcast %cst_8 : f32 to vector<128x128xf32>
      %c0_9 = arith.constant 0 : index
      %c0_10 = arith.constant 0 : index
      %17 = vector.load %arg10[%c0_9, %c0_10] : memref<128x128xf32, #tpu.memory_space<vmem>>, vector<128x128xf32>
      tpu.vector_store %arg10[%c0_9, %c0_10], %16 {strides = array<i32>} : memref<128x128xf32, #tpu.memory_space<vmem>>, vector<128x128xf32>,
    } else {
    }
    %c128_i32 = arith.constant 128 : i32
    %3 = arith.muli %arg3, %c128_i32 : i32
    %c128_i32_1 = arith.constant 128 : i32
    %4 = arith.muli %arg2, %c128_i32_1 : i32
    %c127_i32 = arith.constant 127 : i32
    %5 = arith.addi %4, %c127_i32 : i32
    %6 = arith.cmpi sle, %3, %5 : i32
    %7 = arith.extui %6 : i1 to i32
    %c0_i32_2 = arith.constant 0 : i32
    %8 = arith.cmpi ne, %7, %c0_i32_2 : i32
    scf.if %8 {
      %c0 = arith.constant 0 : index
      %c0_4 = arith.constant 0 : index
      %c0_5 = arith.constant 0 : index
      %12 = vector.load %arg4[%c0, %c0_4, %c0_5] : memref<1x128x128xbf16, #tpu.memory_space<vmem>>, vector<1x128x128xbf16>
      %13 = vector.shape_cast %12 : vector<1x128x128xbf16> to vector<128x128xbf16>
      %c0_6 = arith.constant 0 : index
      %c0_7 = arith.constant 0 : index
      %c0_8 = arith.constant 0 : index
      %14 = vector.load %arg5[%c0_6, %c0_7, %c0_8] : memref<1x128x128xbf16, #tpu.memory_space<vmem>>, vector<1x128x128xbf16>
      %15 = vector.shape_cast %14 : vector<1x128x128xbf16> to vector<128x128xbf16>
      %c0_9 = arith.constant 0 : index
      %c0_10 = arith.constant 0 : index
      %c0_11 = arith.constant 0 : index
      %16 = vector.load %arg6[%c0_9, %c0_10, %c0_11] : memref<1x128x128xbf16, #tpu.memory_space<vmem>>, vector<1x128x128xbf16>
      %17 = vector.shape_cast %16 : vector<1x128x128xbf16> to vector<128x128xbf16>
      %cst = arith.constant dense<0.000000e+00> : vector<128x128xf32>
      %18 = tpu.matmul %13, %15, %cst {dimension_numbers = #tpu.dot_dimension_numbers<[1], [1], [0], [0], [0, 0, 1, 0], [], []>} : vector<128x128xbf16>, vector<128x128xbf16>, vector<128x128xf32> -> vector<128x128xf32>
      %c128_i32_12 = arith.constant 128 : i32
      %19 = arith.muli %arg2, %c128_i32_12 : i32
      %20 = tpu.iota {dimensions = array<i32: 0>} : vector<128x128xi32>
      %21 = vector.broadcast %19 : i32 to vector<128x128xi32>
      %22 = arith.addi %21, %20 : vector<128x128xi32>
      %c128_i32_13 = arith.constant 128 : i32
      %23 = arith.muli %arg3, %c128_i32_13 : i32
      %24 = tpu.iota {dimensions = array<i32: 1>} : vector<128x128xi32>
      %25 = vector.broadcast %23 : i32 to vector<128x128xi32>
      %26 = arith.addi %25, %24 : vector<128x128xi32>
      %27 = arith.cmpi sle, %26, %22 : vector<128x128xi32>
      %cst_14 = arith.constant -1.000000e+30 : f32
      %28 = vector.broadcast %cst_14 : f32 to vector<128x128xf32>
      %29 = arith.select %27, %18, %28 : vector<128x128xi1>, vector<128x128xf32>
      %c0_15 = arith.constant 0 : index
      %c0_16 = arith.constant 0 : index
      %30 = vector.load %arg8[%c0_15, %c0_16] : memref<128x1xf32, #tpu.memory_space<vmem>>, vector<128x1xf32>
      %cst_17 = arith.constant dense<0xFF800000> : vector<128xf32>
      %31 = vector.multi_reduction <maximumf>, %29, %cst_17 [1] : vector<128x128xf32> to vector<128xf32>
      %32 = vector.shape_cast %31 : vector<128xf32> to vector<128x1xf32>
      %33 = arith.maximumf %30, %32 : vector<128x1xf32>
      %34 = arith.subf %30, %33 : vector<128x1xf32>
      %35 = math.exp %34 : vector<128x1xf32>
      %36 = vector.broadcast %33 : vector<128x1xf32> to vector<128x128xf32>
      %37 = arith.subf %29, %36 : vector<128x128xf32>
      %38 = math.exp %37 : vector<128x128xf32>
      %c0_18 = arith.constant 0 : index
      %c0_19 = arith.constant 0 : index
      %39 = vector.load %arg9[%c0_18, %c0_19] : memref<128x1xf32, #tpu.memory_space<vmem>>, vector<128x1xf32>
      %40 = arith.mulf %35, %39 : vector<128x1xf32>
      %cst_20 = arith.constant dense<0.000000e+00> : vector<128xf32>
      %41 = vector.multi_reduction <add>, %38, %cst_20 [1] : vector<128x128xf32> to vector<128xf32>
      %42 = vector.shape_cast %41 : vector<128xf32> to vector<128x1xf32>
      %43 = arith.addf %40, %42 : vector<128x1xf32>
      %c0_21 = arith.constant 0 : index
      %c0_22 = arith.constant 0 : index
      %44 = vector.load %arg9[%c0_21, %c0_22] : memref<128x1xf32, #tpu.memory_space<vmem>>, vector<128x1xf32>
      tpu.vector_store %arg9[%c0_21, %c0_22], %43 {strides = array<i32>} : memref<128x1xf32, #tpu.memory_space<vmem>>, vector<128x1xf32>,
      %c0_23 = arith.constant 0 : index
      %c0_24 = arith.constant 0 : index
      %45 = vector.load %arg10[%c0_23, %c0_24] : memref<128x128xf32, #tpu.memory_space<vmem>>, vector<128x128xf32>
      %46 = vector.broadcast %35 : vector<128x1xf32> to vector<128x128xf32>
      %47 = arith.mulf %46, %45 : vector<128x128xf32>
      %48 = arith.truncf %38 : vector<128x128xf32> to vector<128x128xbf16>
      %cst_25 = arith.constant dense<0.000000e+00> : vector<128x128xf32>
      %49 = tpu.matmul %48, %17, %cst_25 {dimension_numbers = #tpu.dot_dimension_numbers<[1], [0], [0], [1], [0, 0, 1, 1], [], []>} : vector<128x128xbf16>, vector<128x128xbf16>, vector<128x128xf32> -> vector<128x128xf32>
      %50 = arith.addf %47, %49 : vector<128x128xf32>
      %c0_26 = arith.constant 0 : index
      %c0_27 = arith.constant 0 : index
      %51 = vector.load %arg10[%c0_26, %c0_27] : memref<128x128xf32, #tpu.memory_space<vmem>>, vector<128x128xf32>
      tpu.vector_store %arg10[%c0_26, %c0_27], %50 {strides = array<i32>} : memref<128x128xf32, #tpu.memory_space<vmem>>, vector<128x128xf32>,
      %c0_28 = arith.constant 0 : index
      %c0_29 = arith.constant 0 : index
      %52 = vector.load %arg8[%c0_28, %c0_29] : memref<128x1xf32, #tpu.memory_space<vmem>>, vector<128x1xf32>
      tpu.vector_store %arg8[%c0_28, %c0_29], %33 {strides = array<i32>} : memref<128x1xf32, #tpu.memory_space<vmem>>, vector<128x1xf32>,
    } else {
    }
    %c1_i32 = arith.constant 1 : i32
    %9 = arith.cmpi eq, %arg3, %c1_i32 : i32
    %10 = arith.extui %9 : i1 to i32
    %c0_i32_3 = arith.constant 0 : i32
    %11 = arith.cmpi ne, %10, %c0_i32_3 : i32
    scf.if %11 {
      %c0 = arith.constant 0 : index
      %c0_4 = arith.constant 0 : index
      %12 = vector.load %arg9[%c0, %c0_4] : memref<128x1xf32, #tpu.memory_space<vmem>>, vector<128x1xf32>
      %13 = tpu.reciprocal %12 {approx = true} : vector<128x1xf32> -> vector<128x1xf32>
      %c0_5 = arith.constant 0 : index
      %c0_6 = arith.constant 0 : index
      %14 = vector.load %arg10[%c0_5, %c0_6] : memref<128x128xf32, #tpu.memory_space<vmem>>, vector<128x128xf32>
      %15 = vector.broadcast %13 : vector<128x1xf32> to vector<128x128xf32>
      %16 = arith.mulf %14, %15 : vector<128x128xf32>
      %17 = arith.truncf %16 : vector<128x128xf32> to vector<128x128xbf16>
      %c0_7 = arith.constant 0 : index
      %c0_8 = arith.constant 0 : index
      %c0_9 = arith.constant 0 : index
      %18 = vector.load %arg7[%c0_7, %c0_8, %c0_9] : memref<1x128x128xbf16, #tpu.memory_space<vmem>>, vector<1x128x128xbf16>
      %19 = vector.shape_cast %18 : vector<1x128x128xbf16> to vector<128x128xbf16>
      %20 = vector.shape_cast %17 : vector<128x128xbf16> to vector<1x128x128xbf16>
      tpu.vector_store %arg7[%c0_7, %c0_8, %c0_9], %20 {strides = array<i32>} : memref<1x128x128xbf16, #tpu.memory_space<vmem>>, vector<1x128x128xbf16>,
    } else {
    }
    return
  }
  func.func @transform_0(%arg0: i32, %arg1: i32, %arg2: i32, %arg3: i32) -> (i32, i32, i32) {
    %c0_i32 = arith.constant 0 : i32
    return %arg0, %arg2, %arg1 : i32, i32, i32
  }
  func.func @transform_1(%arg0: i32, %arg1: i32, %arg2: i32, %arg3: i32) -> (i32, i32, i32) {
    %c0_i32 = arith.constant 0 : i32
    return %arg0, %arg3, %arg1 : i32, i32, i32
  }
  func.func @transform_2(%arg0: i32, %arg1: i32, %arg2: i32, %arg3: i32) -> (i32, i32, i32) {
    %c0_i32 = arith.constant 0 : i32
    return %arg0, %arg3, %arg1 : i32, i32, i32
  }
  func.func @transform_3(%arg0: i32, %arg1: i32, %arg2: i32, %arg3: i32) -> (i32, i32, i32) {
    %c0_i32 = arith.constant 0 : i32
    return %arg0, %arg2, %arg1 : i32, i32, i32
  }
}

module attributes {stable_mosaic.version = 11 : i64} {
  func.func @proj_ffn_kernel(%arg0: i32, %arg1: i32, %arg2: i32, %arg3: memref<1x128x256xf32, #tpu.memory_space<vmem>>, %arg4: memref<1x128x256xbf16, #tpu.memory_space<vmem>>, %arg5: memref<256x256xbf16, #tpu.memory_space<vmem>>, %arg6: memref<1x256xf32, #tpu.memory_space<vmem>>, %arg7: memref<256x256xbf16, #tpu.memory_space<vmem>>, %arg8: memref<256x256xbf16, #tpu.memory_space<vmem>>, %arg9: memref<256x256xbf16, #tpu.memory_space<vmem>>, %arg10: memref<1x128x256xf32, #tpu.memory_space<vmem>>, %arg11: memref<128x256xf32, #tpu.memory_space<vmem>>, %arg12: memref<128x256xbf16, #tpu.memory_space<vmem>>, %arg13: memref<128x256xf32, #tpu.memory_space<vmem>>) attributes {dimension_semantics = [#tpu.dimension_semantics<parallel>, #tpu.dimension_semantics<parallel>, #tpu.dimension_semantics<arbitrary>], iteration_bounds = array<i64: 2, 2, 2>, scalar_prefetch = 0 : i64, scratch_operands = 3 : i64, tpu.core_type = #tpu.core_type<tc>, window_params = [{transform_indices = @transform_0, window_bounds = array<i64: 1, 128, 256>}, {transform_indices = @transform_1, window_bounds = array<i64: 1, 128, 256>}, {pipeline_mode = #tpu.pipeline_mode<synchronous>, transform_indices = @transform_2, window_bounds = array<i64: 256, 256>}, {pipeline_mode = #tpu.pipeline_mode<synchronous>, transform_indices = @transform_3, window_bounds = array<i64: 1, 256>}, {transform_indices = @transform_4, window_bounds = array<i64: 256, 256>}, {transform_indices = @transform_5, window_bounds = array<i64: 256, 256>}, {transform_indices = @transform_6, window_bounds = array<i64: 256, 256>}, {transform_indices = @transform_7, window_bounds = array<i64: 1, 128, 256>}]} {
    %c0_i32 = arith.constant 0 : i32
    %0 = arith.cmpi eq, %arg2, %c0_i32 : i32
    %1 = arith.extui %0 : i1 to i32
    %c0_i32_0 = arith.constant 0 : i32
    %2 = arith.cmpi ne, %1, %c0_i32_0 : i32
    scf.if %2 {
      %c0_17 = arith.constant 0 : index
      %c0_18 = arith.constant 0 : index
      %c0_19 = arith.constant 0 : index
      %25 = vector.load %arg3[%c0_17, %c0_18, %c0_19] : memref<1x128x256xf32, #tpu.memory_space<vmem>>, vector<1x128x256xf32>
      %26 = vector.shape_cast %25 : vector<1x128x256xf32> to vector<128x256xf32>
      %c0_20 = arith.constant 0 : index
      %c0_21 = arith.constant 0 : index
      %c0_22 = arith.constant 0 : index
      %27 = vector.load %arg4[%c0_20, %c0_21, %c0_22] : memref<1x128x256xbf16, #tpu.memory_space<vmem>>, vector<1x128x256xbf16>
      %28 = vector.shape_cast %27 : vector<1x128x256xbf16> to vector<128x256xbf16>
      %c0_23 = arith.constant 0 : index
      %c0_24 = arith.constant 0 : index
      %29 = vector.load %arg5[%c0_23, %c0_24] : memref<256x256xbf16, #tpu.memory_space<vmem>>, vector<256x256xbf16>
      %cst_25 = arith.constant dense<0.000000e+00> : vector<128x256xf32>
      %30 = tpu.matmul %28, %29, %cst_25 {dimension_numbers = #tpu.dot_dimension_numbers<[1], [1], [0], [0], [0, 0, 1, 0], [], []>} : vector<128x256xbf16>, vector<256x256xbf16>, vector<128x256xf32> -> vector<128x256xf32>
      %31 = arith.addf %26, %30 : vector<128x256xf32>
      %c0_26 = arith.constant 0 : index
      %c0_27 = arith.constant 0 : index
      %32 = vector.load %arg11[%c0_26, %c0_27] : memref<128x256xf32, #tpu.memory_space<vmem>>, vector<128x256xf32>
      tpu.vector_store %arg11[%c0_26, %c0_27], %31 {strides = array<i32>} : memref<128x256xf32, #tpu.memory_space<vmem>>, vector<128x256xf32>,
      %c0_28 = arith.constant 0 : index
      %c0_29 = arith.constant 0 : index
      %33 = vector.load %arg6[%c0_28, %c0_29] : memref<1x256xf32, #tpu.memory_space<vmem>>, vector<1x256xf32>
      %34 = arith.mulf %31, %31 : vector<128x256xf32>
      %cst_30 = arith.constant dense<0.000000e+00> : vector<128xf32>
      %35 = vector.multi_reduction <add>, %34, %cst_30 [1] : vector<128x256xf32> to vector<128xf32>
      %36 = vector.shape_cast %35 : vector<128xf32> to vector<128x1xf32>
      %cst_31 = arith.constant 2.560000e+02 : f32
      %37 = vector.broadcast %cst_31 : f32 to vector<128x1xf32>
      %38 = arith.divf %36, %37 : vector<128x1xf32>
      %cst_32 = arith.constant 9.99999974E-6 : f32
      %39 = vector.broadcast %cst_32 : f32 to vector<128x1xf32>
      %40 = arith.addf %38, %39 : vector<128x1xf32>
      %41 = math.rsqrt %40 : vector<128x1xf32>
      %42 = vector.broadcast %41 : vector<128x1xf32> to vector<128x256xf32>
      %43 = arith.mulf %31, %42 : vector<128x256xf32>
      %44 = vector.broadcast %33 : vector<1x256xf32> to vector<128x256xf32>
      %45 = arith.mulf %43, %44 : vector<128x256xf32>
      %46 = arith.truncf %45 : vector<128x256xf32> to vector<128x256xbf16>
      %c0_33 = arith.constant 0 : index
      %c0_34 = arith.constant 0 : index
      %47 = vector.load %arg12[%c0_33, %c0_34] : memref<128x256xbf16, #tpu.memory_space<vmem>>, vector<128x256xbf16>
      tpu.vector_store %arg12[%c0_33, %c0_34], %46 {strides = array<i32>} : memref<128x256xbf16, #tpu.memory_space<vmem>>, vector<128x256xbf16>,
      %cst_35 = arith.constant 0.000000e+00 : f32
      %48 = vector.broadcast %cst_35 : f32 to vector<128x256xf32>
      %c0_36 = arith.constant 0 : index
      %c0_37 = arith.constant 0 : index
      %49 = vector.load %arg13[%c0_36, %c0_37] : memref<128x256xf32, #tpu.memory_space<vmem>>, vector<128x256xf32>
      tpu.vector_store %arg13[%c0_36, %c0_37], %48 {strides = array<i32>} : memref<128x256xf32, #tpu.memory_space<vmem>>, vector<128x256xf32>,
    } else {
    }
    %c0 = arith.constant 0 : index
    %c0_1 = arith.constant 0 : index
    %3 = vector.load %arg12[%c0, %c0_1] : memref<128x256xbf16, #tpu.memory_space<vmem>>, vector<128x256xbf16>
    %c0_2 = arith.constant 0 : index
    %c0_3 = arith.constant 0 : index
    %4 = vector.load %arg7[%c0_2, %c0_3] : memref<256x256xbf16, #tpu.memory_space<vmem>>, vector<256x256xbf16>
    %cst = arith.constant dense<0.000000e+00> : vector<128x256xf32>
    %5 = tpu.matmul %3, %4, %cst {dimension_numbers = #tpu.dot_dimension_numbers<[1], [1], [0], [0], [0, 0, 1, 0], [], []>} : vector<128x256xbf16>, vector<256x256xbf16>, vector<128x256xf32> -> vector<128x256xf32>
    %c0_4 = arith.constant 0 : index
    %c0_5 = arith.constant 0 : index
    %6 = vector.load %arg8[%c0_4, %c0_5] : memref<256x256xbf16, #tpu.memory_space<vmem>>, vector<256x256xbf16>
    %cst_6 = arith.constant dense<0.000000e+00> : vector<128x256xf32>
    %7 = tpu.matmul %3, %6, %cst_6 {dimension_numbers = #tpu.dot_dimension_numbers<[1], [1], [0], [0], [0, 0, 1, 0], [], []>} : vector<128x256xbf16>, vector<256x256xbf16>, vector<128x256xf32> -> vector<128x256xf32>
    %cst_7 = arith.constant 0.000000e+00 : f32
    %8 = vector.broadcast %cst_7 : f32 to vector<128x256xf32>
    %9 = arith.subf %8, %5 : vector<128x256xf32>
    %10 = math.exp %9 : vector<128x256xf32>
    %cst_8 = arith.constant 1.000000e+00 : f32
    %11 = vector.broadcast %cst_8 : f32 to vector<128x256xf32>
    %12 = arith.addf %11, %10 : vector<128x256xf32>
    %13 = tpu.reciprocal %12 {approx = true} : vector<128x256xf32> -> vector<128x256xf32>
    %c0_9 = arith.constant 0 : index
    %c0_10 = arith.constant 0 : index
    %14 = vector.load %arg13[%c0_9, %c0_10] : memref<128x256xf32, #tpu.memory_space<vmem>>, vector<128x256xf32>
    %15 = arith.mulf %5, %13 : vector<128x256xf32>
    %16 = arith.mulf %15, %7 : vector<128x256xf32>
    %c0_11 = arith.constant 0 : index
    %c0_12 = arith.constant 0 : index
    %17 = vector.load %arg9[%c0_11, %c0_12] : memref<256x256xbf16, #tpu.memory_space<vmem>>, vector<256x256xbf16>
    %18 = arith.truncf %16 : vector<128x256xf32> to vector<128x256xbf16>
    %cst_13 = arith.constant dense<0.000000e+00> : vector<128x256xf32>
    %19 = tpu.matmul %18, %17, %cst_13 {dimension_numbers = #tpu.dot_dimension_numbers<[1], [1], [0], [0], [0, 0, 1, 0], [], []>} : vector<128x256xbf16>, vector<256x256xbf16>, vector<128x256xf32> -> vector<128x256xf32>
    %20 = arith.addf %14, %19 : vector<128x256xf32>
    %c0_14 = arith.constant 0 : index
    %c0_15 = arith.constant 0 : index
    %21 = vector.load %arg13[%c0_14, %c0_15] : memref<128x256xf32, #tpu.memory_space<vmem>>, vector<128x256xf32>
    tpu.vector_store %arg13[%c0_14, %c0_15], %20 {strides = array<i32>} : memref<128x256xf32, #tpu.memory_space<vmem>>, vector<128x256xf32>,
    %c1_i32 = arith.constant 1 : i32
    %22 = arith.cmpi eq, %arg2, %c1_i32 : i32
    %23 = arith.extui %22 : i1 to i32
    %c0_i32_16 = arith.constant 0 : i32
    %24 = arith.cmpi ne, %23, %c0_i32_16 : i32
    scf.if %24 {
      %c0_17 = arith.constant 0 : index
      %c0_18 = arith.constant 0 : index
      %25 = vector.load %arg11[%c0_17, %c0_18] : memref<128x256xf32, #tpu.memory_space<vmem>>, vector<128x256xf32>
      %c0_19 = arith.constant 0 : index
      %c0_20 = arith.constant 0 : index
      %26 = vector.load %arg13[%c0_19, %c0_20] : memref<128x256xf32, #tpu.memory_space<vmem>>, vector<128x256xf32>
      %27 = arith.addf %25, %26 : vector<128x256xf32>
      %c0_21 = arith.constant 0 : index
      %c0_22 = arith.constant 0 : index
      %c0_23 = arith.constant 0 : index
      %28 = vector.load %arg10[%c0_21, %c0_22, %c0_23] : memref<1x128x256xf32, #tpu.memory_space<vmem>>, vector<1x128x256xf32>
      %29 = vector.shape_cast %28 : vector<1x128x256xf32> to vector<128x256xf32>
      %30 = vector.shape_cast %27 : vector<128x256xf32> to vector<1x128x256xf32>
      tpu.vector_store %arg10[%c0_21, %c0_22, %c0_23], %30 {strides = array<i32>} : memref<1x128x256xf32, #tpu.memory_space<vmem>>, vector<1x128x256xf32>,
    } else {
    }
    return
  }
  func.func @transform_0(%arg0: i32, %arg1: i32, %arg2: i32) -> (i32, i32, i32) {
    %c0_i32 = arith.constant 0 : i32
    %c0_i32_0 = arith.constant 0 : i32
    return %arg0, %arg1, %c0_i32 : i32, i32, i32
  }
  func.func @transform_1(%arg0: i32, %arg1: i32, %arg2: i32) -> (i32, i32, i32) {
    %c0_i32 = arith.constant 0 : i32
    %c0_i32_0 = arith.constant 0 : i32
    return %arg0, %arg1, %c0_i32 : i32, i32, i32
  }
  func.func @transform_2(%arg0: i32, %arg1: i32, %arg2: i32) -> (i32, i32) {
    %c0_i32 = arith.constant 0 : i32
    %c0_i32_0 = arith.constant 0 : i32
    %c0_i32_1 = arith.constant 0 : i32
    return %c0_i32, %c0_i32_0 : i32, i32
  }
  func.func @transform_3(%arg0: i32, %arg1: i32, %arg2: i32) -> (i32, i32) {
    %c0_i32 = arith.constant 0 : i32
    %c0_i32_0 = arith.constant 0 : i32
    %c0_i32_1 = arith.constant 0 : i32
    return %c0_i32, %c0_i32_0 : i32, i32
  }
  func.func @transform_4(%arg0: i32, %arg1: i32, %arg2: i32) -> (i32, i32) {
    %c0_i32 = arith.constant 0 : i32
    %c0_i32_0 = arith.constant 0 : i32
    return %arg2, %c0_i32 : i32, i32
  }
  func.func @transform_5(%arg0: i32, %arg1: i32, %arg2: i32) -> (i32, i32) {
    %c0_i32 = arith.constant 0 : i32
    %c0_i32_0 = arith.constant 0 : i32
    return %arg2, %c0_i32 : i32, i32
  }
  func.func @transform_6(%arg0: i32, %arg1: i32, %arg2: i32) -> (i32, i32) {
    %c0_i32 = arith.constant 0 : i32
    %c0_i32_0 = arith.constant 0 : i32
    return %c0_i32, %arg2 : i32, i32
  }
  func.func @transform_7(%arg0: i32, %arg1: i32, %arg2: i32) -> (i32, i32, i32) {
    %c0_i32 = arith.constant 0 : i32
    %c0_i32_0 = arith.constant 0 : i32
    return %arg0, %arg1, %c0_i32 : i32, i32, i32
  }
}

</mosaic_0001>

<bundles_post_ra>
// kernel: transformer_block_forward.4
= control target key start
LH: loop header
LB: loop body
LE: loop exit
PB: predicated region body
PF: predicated region fallthrough
CT: control target
= control target key end

     0   :  { %s3419_s0 = inlined_call_operand.vmem [shape: bf16[2,256,256], index: 0, kind: input, shape index: {}]   ;;  %s3420_s1 = inlined_call_operand.vmem [shape: bf16[2,256,256], index: 1, kind: input, shape index: {}]   ;;  %s3421_s2 = inlined_call_operand.vmem [shape: bf16[2,256,256], index: 2, kind: input, shape index: {}]   ;;  %s3422_s3 = inlined_call_operand.vmem [shape: bf16[2,256,256], index: 3, kind: output, shape index: {}]  }
   0x1   :  { %3425 = sst [smem:[#allocation13_spill]] %s3422_s3 }
   0x2   :  { %s2663_s12 = smov 0   ;;  %s2665_s13 = smov 0  }
   0x3   :  { %s2667_s14 = smov 0   ;;  %s2669_s15 = smov 0  }
   0x4   :  { %s2671_s16 = smov 0   ;;  %s2673_s17 = smov 0  }
   0x5   :  { %s2675_s18 = smov 0   ;;  %s2677_s19 = smov 0  }
   0x6   :  { %s2679_s20 = smov 0   ;;  %s2681_s21 = smov 0  }
   0x7   :  { %s2683_s22 = smov 0   ;;  %s2685_s23 = smov 0  }
   0x8   :  { %s2687_s24 = smov 0  }
   0x9 LB: > { %3426 = sst [smem:[#allocation9_spill]] %s2605_s16  ;;  %s28_s25 = sadd.s32 1, %s2621_s20  ;;  %s2637_s24 = sphi %s2687_s24, %s13_s24   ;;  %s2633_s23 = sphi %s2685_s23, %s3455_s23   ;;  %s2629_s22 = sphi %s2683_s22, %s3454_s22   ;;  %s2625_s21 = sphi %s2681_s21, %s3453_s21   ;;  %s2621_s20 = sphi %s2679_s20, %s3452_s20   ;;  %s2617_s19 = sphi %s2677_s19, %s3451_s19   ;;  %s2613_s18 = sphi %s2675_s18, %s3450_s18   ;;  %s2609_s17 = sphi %s2673_s17, %s3449_s17   ;;  %s2605_s16 = sphi %s2671_s16, %s3448_s16   ;;  %s2601_s15 = sphi %s2669_s15, %s3447_s15   ;;  %s2597_s14 = sphi %s2667_s14, %s3446_s14   ;;  %s2593_s13 = sphi %s2665_s13, %s3445_s13   ;;  %s2589_s12 = sphi %s2663_s12, %s3444_s12  }
   0xa   : > { %3427 = sst [smem:[#allocation10_spill]] %s2609_s17  ;;  %p29_p0 = scmp.ge.s32.totalorder %s28_s25, 2 }
   0xb   : > { %3428 = sst [smem:[#allocation11_spill]] %s2613_s18  ;;  %s31_s26 = sadd.s32 1, %s2625_s21 }
   0xc   : > { %3429 = sst [smem:[#allocation12_spill]] %s2617_s19  ;;  %s2064_s27 = sadd.s32 4294967295, %s2637_s24  }
   0xd   : > { %s3457_s26 = smov (!%p29_p0, %s31_s26), %s2625_s21  ;;  %s35_s28 = sadd.s32 1, %s2629_s22 }
   0xe   : > { %p57_p1 = scmp.ne.s32.totalorder %s2601_s15, %s2597_s14  ;;  %p33_p2 = scmp.ge.s32.totalorder %s3457_s26, 2 }
   0xf   : > { %p58_p3 = scmp.eq.s32.totalorder %s2637_s24, 0  ;;  %s3459_s25 = smov (%p29_p0, %s28_s25), 0 }
  0x10   : > { %s3461_s26 = smov (%p33_p2, %s3457_s26), 0  ;;  %s3463_s28 = smov (!%p33_p2, %s35_s28), %s2629_s22 }
  0x11   : > { %s39_s29 = sadd.s32 1, %s2633_s23  ;;  %p2745_p4 = por %p58_p3, %p57_p1 }
  0x12   : > { %p37_p5 = scmp.ge.s32.totalorder %s3463_s28, 2  ;;  %p87_p6 = scmp.ne.s32.totalorder %s2593_s13, %s2589_s12 }
  0x13   : > { %p151_p7 = scmp.eq.s32.totalorder %s2064_s27, 15  ;;  %s44_s6 = ssub.s32 %s2625_s21, %s3461_s26 }
  0x14   : > { %s3465_s28 = smov (%p37_p5, %s3463_s28), 0  ;;  %s3467_s29 = smov (!%p37_p5, %s39_s29), %s2633_s23 }
  0x15   : > { %p2754_p8 = por %p87_p6, %p58_p3  ;;  %p41_p9 = scmp.ge.s32.totalorder %s3467_s29, 2 }
  0x16   : > { %p2761_p10 = por %p151_p7, %p57_p1  ;;  %s74_s7 = ssub.s32 %s2621_s20, %s3459_s25 }
  0x17   : > { %s3469_s29 = smov (%p41_p9, %s3467_s29), 0  ;;  %s46_s8 = ssub.s32 %s2629_s22, %s3465_s28 }
  0x18   : > { %s50_s9 = sadd.s32 1, %s2601_s15  ;;  %s43_s10 = ssub.s32 %s2633_s23, %s3469_s29 }
  0x19   : > { %s80_s11 = sadd.s32 1, %s2593_s13  ;;  %s45_s27 = sor.u32 %s44_s6, %s43_s10 }
  0x1a   : > { %s75_s3 = sor.u32 %s74_s7, %s43_s10  ;;  %s47_s18 = sor.u32 %s46_s8, %s45_s27 }
  0x1b   : > { %s77_s19 = sor.u32 %s75_s3, %s46_s8  ;;  %p48_p11 = scmp.eq.s32.totalorder %s47_s18, 0 }
  0x1c   : > { %p78_p12 = scmp.eq.s32.totalorder %s77_s19, 0  ;;  %p2067_p13 = scmp.ge.s32.totalorder %s2637_s24, 16 }
  0x1d   : > { %s2778_s17 = scalar_select %p48_p11, %s2601_s15, %s50_s9  }
  0x1e   : > { %s2781_s16 = scalar_select %p78_p12, %s2593_s13, %s80_s11  }
  0x1f   : > { %173 = sbr.rel (%p2067_p13) target bundleno = 89 (0x59), region = 16 }
  0x26   : > { %176 = sbr.rel (!%p2745_p4) target bundleno = 55 (0x37), region = 20  ;;  %s178_s6 = sand.u32 (%p2745_p4), 1, %s2601_s15  }
  0x27   : > { %s2140_s7 = sshll.u32 (%p2745_p4), %s2625_s21, 5  ;;  %s2068_s10 = sshll.u32 (%p2745_p4), %s178_s6, 6 }
  0x28   : > { %s183_s3 = sadd.s32 (%p2745_p4), %s2629_s22, %s2140_s7  ;;  %s2071_s18 = sshll.u32 (%p2745_p4), %s2633_s23, 6 }
  0x29   : > { %s185_s19 = sadd.s32 (%p2745_p4), %s2071_s18, %s183_s3  ;;  %s180_s30 = scalar_lea.vmem (%p2745_p4), [#allocation5], %s2068_s10 }
  0x2a   : > { %s2072_s8 = sshll.u32 (%p2745_p4), %s185_s19, 2 }
  0x2b   : > { %s2793_s27 = scalar_lea.vmem (%p2745_p4), %s3419_s0, %s2072_s8 }
  0x2c   : > { %v203_v0 = vld [vmem:[%s2793_s27] sm:$0xf] (%p2745_p4)  ;;  %v205_v1 = vld [vmem:[%s2793_s27 + $0x8] sm:$0xf] (%p2745_p4)  ;;  %v207_v2 = vld [vmem:[%s2793_s27 + $0x10] sm:$0xf] (%p2745_p4) }
  0x2d   : > { %204 = vst [vmem:[%s180_s30] sm:$0xf] %v203_v0  ;;  %206 = vst [vmem:[%s180_s30 + $0x4] sm:$0xf] %v205_v1  ;;  %v209_v3 = vld [vmem:[%s2793_s27 + $0x18] sm:$0xf] }
  0x2e   : > { %208 = vst [vmem:[%s180_s30 + $0x8] sm:$0xf] %v207_v2  ;;  %v211_v4 = vld [vmem:[%s2793_s27 + $0x20] sm:$0xf]  ;;  %v213_v5 = vld [vmem:[%s2793_s27 + $0x28] sm:$0xf] }
  0x2f   : > { %210 = vst [vmem:[%s180_s30 + $0xc] sm:$0xf] %v209_v3  ;;  %212 = vst [vmem:[%s180_s30 + $0x10] sm:$0xf] %v211_v4  ;;  %v215_v6 = vld [vmem:[%s2793_s27 + $0x30] sm:$0xf] }
  0x30   : > { %214 = vst [vmem:[%s180_s30 + $0x14] sm:$0xf] %v213_v5  ;;  %v217_v7 = vld [vmem:[%s2793_s27 + $0x38] sm:$0xf]  ;;  %v219_v8 = vld [vmem:[%s2793_s27 + $0x40] sm:$0xf] }
  0x31   : > { %216 = vst [vmem:[%s180_s30 + $0x18] sm:$0xf] %v215_v6  ;;  %218 = vst [vmem:[%s180_s30 + $0x1c] sm:$0xf] %v217_v7  ;;  %v221_v9 = vld [vmem:[%s2793_s27 + $0x48] sm:$0xf] }
  0x32   : > { %220 = vst [vmem:[%s180_s30 + $0x20] sm:$0xf] %v219_v8  ;;  %v223_v10 = vld [vmem:[%s2793_s27 + $0x50] sm:$0xf]  ;;  %v225_v11 = vld [vmem:[%s2793_s27 + $0x58] sm:$0xf] }
  0x33   : > { %222 = vst [vmem:[%s180_s30 + $0x24] sm:$0xf] %v221_v9  ;;  %224 = vst [vmem:[%s180_s30 + $0x28] sm:$0xf] %v223_v10  ;;  %v227_v12 = vld [vmem:[%s2793_s27 + $0x60] sm:$0xf] }
  0x34   : > { %226 = vst [vmem:[%s180_s30 + $0x2c] sm:$0xf] %v225_v11  ;;  %v229_v13 = vld [vmem:[%s2793_s27 + $0x68] sm:$0xf]  ;;  %v231_v14 = vld [vmem:[%s2793_s27 + $0x70] sm:$0xf] }
  0x35   : > { %228 = vst [vmem:[%s180_s30 + $0x30] sm:$0xf] %v227_v12  ;;  %230 = vst [vmem:[%s180_s30 + $0x34] sm:$0xf] %v229_v13  ;;  %v233_v15 = vld [vmem:[%s2793_s27 + $0x78] sm:$0xf] }
  0x36   : > { %232 = vst [vmem:[%s180_s30 + $0x38] sm:$0xf] %v231_v14  ;;  %234 = vst [vmem:[%s180_s30 + $0x3c] sm:$0xf] %v233_v15 }
  0x37 PF: > { %289 = sbr.rel (!%p2754_p8) target bundleno = 72 (0x48), region = 61  ;;  %s291_s6 = sand.u32 (%p2754_p8), 1, %s2593_s13  }
  0x38   : > { %s2141_s7 = sshll.u32 (%p2754_p8), %s2621_s20, 5  ;;  %s2073_s10 = sshll.u32 (%p2754_p8), %s291_s6, 6 }
  0x39   : > { %s296_s3 = sadd.s32 (%p2754_p8), %s2629_s22, %s2141_s7  ;;  %s2076_s18 = sshll.u32 (%p2754_p8), %s2633_s23, 6 }
  0x3a   : > { %s298_s19 = sadd.s32 (%p2754_p8), %s2076_s18, %s296_s3  ;;  %s293_s30 = scalar_lea.vmem (%p2754_p8), [#allocation6], %s2073_s10 }
  0x3b   : > { %s2077_s8 = sshll.u32 (%p2754_p8), %s298_s19, 2 }
  0x3c   : > { %s2820_s27 = scalar_lea.vmem (%p2754_p8), %s3420_s1, %s2077_s8 }
  0x3d   : > { %v316_v16 = vld [vmem:[%s2820_s27] sm:$0xf] (%p2754_p8)  ;;  %v318_v17 = vld [vmem:[%s2820_s27 + $0x8] sm:$0xf] (%p2754_p8)  ;;  %v320_v18 = vld [vmem:[%s2820_s27 + $0x10] sm:$0xf] (%p2754_p8) }
  0x3e   : > { %317 = vst [vmem:[%s293_s30] sm:$0xf] %v316_v16  ;;  %319 = vst [vmem:[%s293_s30 + $0x4] sm:$0xf] %v318_v17  ;;  %v322_v19 = vld [vmem:[%s2820_s27 + $0x18] sm:$0xf] }
  0x3f   : > { %321 = vst [vmem:[%s293_s30 + $0x8] sm:$0xf] %v320_v18  ;;  %v324_v20 = vld [vmem:[%s2820_s27 + $0x20] sm:$0xf]  ;;  %v326_v21 = vld [vmem:[%s2820_s27 + $0x28] sm:$0xf] }
  0x40   : > { %323 = vst [vmem:[%s293_s30 + $0xc] sm:$0xf] %v322_v19  ;;  %325 = vst [vmem:[%s293_s30 + $0x10] sm:$0xf] %v324_v20  ;;  %v328_v22 = vld [vmem:[%s2820_s27 + $0x30] sm:$0xf] }
  0x41   : > { %327 = vst [vmem:[%s293_s30 + $0x14] sm:$0xf] %v326_v21  ;;  %v330_v23 = vld [vmem:[%s2820_s27 + $0x38] sm:$0xf]  ;;  %v332_v24 = vld [vmem:[%s2820_s27 + $0x40] sm:$0xf] }
  0x42   : > { %329 = vst [vmem:[%s293_s30 + $0x18] sm:$0xf] %v328_v22  ;;  %331 = vst [vmem:[%s293_s30 + $0x1c] sm:$0xf] %v330_v23  ;;  %v334_v25 = vld [vmem:[%s2820_s27 + $0x48] sm:$0xf] }
  0x43   : > { %333 = vst [vmem:[%s293_s30 + $0x20] sm:$0xf] %v332_v24  ;;  %v336_v26 = vld [vmem:[%s2820_s27 + $0x50] sm:$0xf]  ;;  %v338_v27 = vld [vmem:[%s2820_s27 + $0x58] sm:$0xf] }
  0x44   : > { %335 = vst [vmem:[%s293_s30 + $0x24] sm:$0xf] %v334_v25  ;;  %337 = vst [vmem:[%s293_s30 + $0x28] sm:$0xf] %v336_v26  ;;  %v340_v28 = vld [vmem:[%s2820_s27 + $0x60] sm:$0xf] }
  0x45   : > { %339 = vst [vmem:[%s293_s30 + $0x2c] sm:$0xf] %v338_v27  ;;  %v342_v29 = vld [vmem:[%s2820_s27 + $0x68] sm:$0xf]  ;;  %v344_v30 = vld [vmem:[%s2820_s27 + $0x70] sm:$0xf] }
  0x46   : > { %341 = vst [vmem:[%s293_s30 + $0x30] sm:$0xf] %v340_v28  ;;  %343 = vst [vmem:[%s293_s30 + $0x34] sm:$0xf] %v342_v29  ;;  %v346_v31 = vld [vmem:[%s2820_s27 + $0x78] sm:$0xf] }
  0x47   : > { %345 = vst [vmem:[%s293_s30 + $0x38] sm:$0xf] %v344_v30  ;;  %347 = vst [vmem:[%s293_s30 + $0x3c] sm:$0xf] %v346_v31 }
  0x48 PF: > { %402 = sbr.rel (!%p2754_p8) target bundleno = 89 (0x59), region = 102  ;;  %s404_s6 = sand.u32 (%p2754_p8), 1, %s2593_s13  }
  0x49   : > { %s2142_s7 = sshll.u32 (%p2754_p8), %s2621_s20, 5  ;;  %s2078_s10 = sshll.u32 (%p2754_p8), %s404_s6, 6 }
  0x4a   : > { %s409_s3 = sadd.s32 (%p2754_p8), %s2629_s22, %s2142_s7  ;;  %s2081_s18 = sshll.u32 (%p2754_p8), %s2633_s23, 6 }
  0x4b   : > { %s411_s19 = sadd.s32 (%p2754_p8), %s2081_s18, %s409_s3  ;;  %s406_s4 = scalar_lea.vmem (%p2754_p8), [#allocation7], %s2078_s10 }
  0x4c   : > { %s2082_s8 = sshll.u32 (%p2754_p8), %s411_s19, 2 }
  0x4d   : > { %s2847_s27 = scalar_lea.vmem (%p2754_p8), %s3421_s2, %s2082_s8 }
  0x4e   : > { %v429_v32 = vld [vmem:[%s2847_s27] sm:$0xf] (%p2754_p8)  ;;  %v431_v33 = vld [vmem:[%s2847_s27 + $0x8] sm:$0xf] (%p2754_p8)  ;;  %v433_v34 = vld [vmem:[%s2847_s27 + $0x10] sm:$0xf] (%p2754_p8) }
  0x4f   : > { %430 = vst [vmem:[%s406_s4] sm:$0xf] %v429_v32  ;;  %432 = vst [vmem:[%s406_s4 + $0x4] sm:$0xf] %v431_v33  ;;  %v435_v35 = vld [vmem:[%s2847_s27 + $0x18] sm:$0xf] }
  0x50   : > { %434 = vst [vmem:[%s406_s4 + $0x8] sm:$0xf] %v433_v34  ;;  %v437_v36 = vld [vmem:[%s2847_s27 + $0x20] sm:$0xf]  ;;  %v439_v37 = vld [vmem:[%s2847_s27 + $0x28] sm:$0xf] }
  0x51   : > { %436 = vst [vmem:[%s406_s4 + $0xc] sm:$0xf] %v435_v35  ;;  %438 = vst [vmem:[%s406_s4 + $0x10] sm:$0xf] %v437_v36  ;;  %v441_v38 = vld [vmem:[%s2847_s27 + $0x30] sm:$0xf] }
  0x52   : > { %440 = vst [vmem:[%s406_s4 + $0x14] sm:$0xf] %v439_v37  ;;  %v443_v39 = vld [vmem:[%s2847_s27 + $0x38] sm:$0xf]  ;;  %v445_v40 = vld [vmem:[%s2847_s27 + $0x40] sm:$0xf] }
  0x53   : > { %442 = vst [vmem:[%s406_s4 + $0x18] sm:$0xf] %v441_v38  ;;  %444 = vst [vmem:[%s406_s4 + $0x1c] sm:$0xf] %v443_v39  ;;  %v447_v41 = vld [vmem:[%s2847_s27 + $0x48] sm:$0xf] }
  0x54   : > { %446 = vst [vmem:[%s406_s4 + $0x20] sm:$0xf] %v445_v40  ;;  %v449_v42 = vld [vmem:[%s2847_s27 + $0x50] sm:$0xf]  ;;  %v451_v43 = vld [vmem:[%s2847_s27 + $0x58] sm:$0xf] }
  0x55   : > { %448 = vst [vmem:[%s406_s4 + $0x24] sm:$0xf] %v447_v41  ;;  %450 = vst [vmem:[%s406_s4 + $0x28] sm:$0xf] %v449_v42  ;;  %v453_v44 = vld [vmem:[%s2847_s27 + $0x60] sm:$0xf] }
  0x56   : > { %452 = vst [vmem:[%s406_s4 + $0x2c] sm:$0xf] %v451_v43  ;;  %v455_v45 = vld [vmem:[%s2847_s27 + $0x68] sm:$0xf]  ;;  %v457_v46 = vld [vmem:[%s2847_s27 + $0x70] sm:$0xf] }
  0x57   : > { %454 = vst [vmem:[%s406_s4 + $0x30] sm:$0xf] %v453_v44  ;;  %456 = vst [vmem:[%s406_s4 + $0x34] sm:$0xf] %v455_v45  ;;  %v459_v47 = vld [vmem:[%s2847_s27 + $0x78] sm:$0xf] }
  0x58   : > { %458 = vst [vmem:[%s406_s4 + $0x38] sm:$0xf] %v457_v46  ;;  %460 = vst [vmem:[%s406_s4 + $0x3c] sm:$0xf] %v459_v47 }
  0x59 PF: > { %p2083_p0 = scmp.ge.s32.totalorder %s2637_s24, 1  ;;  %p514_p1 = scmp.lt.s32.totalorder %s2637_s24, 17 }
  0x5b   : > { %p515_p2 = pnand %p2083_p0, %p514_p1 }
  0x5c   : > { %s521_s30 = sand.u32 (!%p515_p2), 1, %s2597_s14   ;;  %s528_s6 = sand.u32 (!%p515_p2), 1, %s2589_s12  }
  0x5d   : > { %518 = sbr.rel (%p515_p2) target bundleno = 1163 (0x48b), region = 143  ;;  %s2084_s7 = sshll.u32 (!%p515_p2), %s521_s30, 6 }
  0x5e   : > { %s2085_s10 = sshll.u32 (!%p515_p2), %s528_s6, 6  ;;  %s2869_s3 = scalar_lea.vmem (!%p515_p2), [#allocation5], %s2084_s7 }
  0x5f   : > { %s2871_s18 = scalar_lea.vmem (!%p515_p2), [#allocation6], %s2085_s10  ;;  %s2873_s19 = scalar_lea.vmem (!%p515_p2), [#allocation7], %s2085_s10 }
  0x60   : > { %s2875_s8 = scalar_lea.vmem (!%p515_p2), [#allocation8], %s2084_s7  ;;  %s3433_s9 = sld [smem:[#allocation9_spill]] (!%p515_p2) }
  0x66   : > { %p2088_p3 = scmp.ne.s32.totalorder %s3433_s9, 0 }
  0x67   : > { %vm574_vm0 = vcmask (!%p2088_p3), 7168   ;;  %v2639_v48 = vmov (!%p2088_p3), -inf   ;;  %v2640_v49 = vmov (!%p2088_p3), 0.0  }
  0x68   : > { %573 = sbr.rel (%p2088_p3) target bundleno = 128 (0x80), region = 159  ;;  %575 = vst.msk [vmem:[#allocation2] sm:$0xff] (!%p2088_p3), %vm574_vm0, %v2639_v48  ;;  %576 = vst.msk [vmem:[#allocation2 + $0x8] sm:$0xff] (!%p2088_p3), %vm574_vm0, %v2639_v48 }
  0x69   : > { %577 = vst.msk [vmem:[#allocation2 + $0x10] sm:$0xff] (!%p2088_p3), %vm574_vm0, %v2639_v48  ;;  %578 = vst.msk [vmem:[#allocation2 + $0x18] sm:$0xff] (!%p2088_p3), %vm574_vm0, %v2639_v48 }
  0x6a   : > { %579 = vst.msk [vmem:[#allocation2 + $0x20] sm:$0xff] (!%p2088_p3), %vm574_vm0, %v2639_v48  ;;  %580 = vst.msk [vmem:[#allocation2 + $0x28] sm:$0xff] (!%p2088_p3), %vm574_vm0, %v2639_v48 }
  0x6b   : > { %581 = vst.msk [vmem:[#allocation2 + $0x30] sm:$0xff] (!%p2088_p3), %vm574_vm0, %v2639_v48  ;;  %582 = vst.msk [vmem:[#allocation2 + $0x38] sm:$0xff] (!%p2088_p3), %vm574_vm0, %v2639_v48 }
  0x6c   : > { %583 = vst.msk [vmem:[#allocation2 + $0x40] sm:$0xff] (!%p2088_p3), %vm574_vm0, %v2639_v48  ;;  %584 = vst.msk [vmem:[#allocation2 + $0x48] sm:$0xff] (!%p2088_p3), %vm574_vm0, %v2639_v48 }
  0x6d   : > { %585 = vst.msk [vmem:[#allocation2 + $0x50] sm:$0xff] (!%p2088_p3), %vm574_vm0, %v2639_v48  ;;  %586 = vst.msk [vmem:[#allocation2 + $0x58] sm:$0xff] (!%p2088_p3), %vm574_vm0, %v2639_v48 }
  0x6e   : > { %587 = vst.msk [vmem:[#allocation2 + $0x60] sm:$0xff] (!%p2088_p3), %vm574_vm0, %v2639_v48  ;;  %588 = vst.msk [vmem:[#allocation2 + $0x68] sm:$0xff] (!%p2088_p3), %vm574_vm0, %v2639_v48 }
  0x6f   : > { %589 = vst.msk [vmem:[#allocation2 + $0x70] sm:$0xff] %vm574_vm0, %v2639_v48  ;;  %590 = vst.msk [vmem:[#allocation2 + $0x78] sm:$0xff] %vm574_vm0, %v2639_v48 }
  0x70   : > { %591 = vst.msk [vmem:[#allocation3] sm:$0xff] %vm574_vm0, %v2640_v49  ;;  %592 = vst.msk [vmem:[#allocation3 + $0x8] sm:$0xff] %vm574_vm0, %v2640_v49 }
  0x71   : > { %593 = vst.msk [vmem:[#allocation3 + $0x10] sm:$0xff] %vm574_vm0, %v2640_v49  ;;  %594 = vst.msk [vmem:[#allocation3 + $0x18] sm:$0xff] %vm574_vm0, %v2640_v49 }
  0x72   : > { %595 = vst.msk [vmem:[#allocation3 + $0x20] sm:$0xff] %vm574_vm0, %v2640_v49  ;;  %596 = vst.msk [vmem:[#allocation3 + $0x28] sm:$0xff] %vm574_vm0, %v2640_v49 }
  0x73   : > { %597 = vst.msk [vmem:[#allocation3 + $0x30] sm:$0xff] %vm574_vm0, %v2640_v49  ;;  %598 = vst.msk [vmem:[#allocation3 + $0x38] sm:$0xff] %vm574_vm0, %v2640_v49 }
  0x74   : > { %599 = vst.msk [vmem:[#allocation3 + $0x40] sm:$0xff] %vm574_vm0, %v2640_v49  ;;  %600 = vst.msk [vmem:[#allocation3 + $0x48] sm:$0xff] %vm574_vm0, %v2640_v49 }
  0x75   : > { %601 = vst.msk [vmem:[#allocation3 + $0x50] sm:$0xff] %vm574_vm0, %v2640_v49  ;;  %602 = vst.msk [vmem:[#allocation3 + $0x58] sm:$0xff] %vm574_vm0, %v2640_v49 }
  0x76   : > { %603 = vst.msk [vmem:[#allocation3 + $0x60] sm:$0xff] %vm574_vm0, %v2640_v49  ;;  %604 = vst.msk [vmem:[#allocation3 + $0x68] sm:$0xff] %vm574_vm0, %v2640_v49 }
  0x77   : > { %605 = vst.msk [vmem:[#allocation3 + $0x70] sm:$0xff] %vm574_vm0, %v2640_v49  ;;  %606 = vst.msk [vmem:[#allocation3 + $0x78] sm:$0xff] %vm574_vm0, %v2640_v49 }
  0x78   : > { %607 = vst [vmem:[#allocation4] sm:$0xff] %v2640_v49  ;;  %608 = vst [vmem:[#allocation4 + $0x8] sm:$0xff] %v2640_v49 }
  0x79   : > { %609 = vst [vmem:[#allocation4 + $0x10] sm:$0xff] %v2640_v49  ;;  %610 = vst [vmem:[#allocation4 + $0x18] sm:$0xff] %v2640_v49 }
  0x7a   : > { %611 = vst [vmem:[#allocation4 + $0x20] sm:$0xff] %v2640_v49  ;;  %612 = vst [vmem:[#allocation4 + $0x28] sm:$0xff] %v2640_v49 }
  0x7b   : > { %613 = vst [vmem:[#allocation4 + $0x30] sm:$0xff] %v2640_v49  ;;  %614 = vst [vmem:[#allocation4 + $0x38] sm:$0xff] %v2640_v49 }
  0x7c   : > { %615 = vst [vmem:[#allocation4 + $0x40] sm:$0xff] %v2640_v49  ;;  %616 = vst [vmem:[#allocation4 + $0x48] sm:$0xff] %v2640_v49 }
  0x7d   : > { %617 = vst [vmem:[#allocation4 + $0x50] sm:$0xff] %v2640_v49  ;;  %618 = vst [vmem:[#allocation4 + $0x58] sm:$0xff] %v2640_v49 }
  0x7e   : > { %619 = vst [vmem:[#allocation4 + $0x60] sm:$0xff] %v2640_v49  ;;  %620 = vst [vmem:[#allocation4 + $0x68] sm:$0xff] %v2640_v49 }
  0x7f   : > { %621 = vst [vmem:[#allocation4 + $0x70] sm:$0xff] %v2640_v49  ;;  %622 = vst [vmem:[#allocation4 + $0x78] sm:$0xff] %v2640_v49 }
  0x80 PF: > { %s3434_s12 = sld [smem:[#allocation9_spill]]  ;;  %s3435_s14 = sld [smem:[#allocation10_spill]] }
  0x86   : > { %s2089_s11 = sshll.u32 %s3434_s12, 7  ;;  %s2090_s27 = sshll.u32 %s3435_s14, 7 }
  0x87   : > { %s625_s4 = sadd.s32 127, %s2090_s27 }
  0x88   : > { %p2091_p4 = scmp.gt.s32.totalorder %s2089_s11, %s625_s4 }
  0x89   : > { %v2413_v50 = vld [vmem:[%s2871_s18] sm:$0xff] (!%p2091_p4)   ;;  %v2414_v51 = vld [vmem:[%s2871_s18 + $0x8] sm:$0xff] (!%p2091_p4)   ;;  %v2415_v52 = vld [vmem:[%s2871_s18 + $0x10] sm:$0xff] (!%p2091_p4)   ;;  %v871_v2 = vlaneseq (!%p2091_p4)  ;;  %v2937_v6 = vstv (!%p2091_p4), %s2090_s27 }
  0x8a   : > { %629 = sbr.rel (%p2091_p4) target bundleno = 963 (0x3c3), region = 163  ;;  %2239 = vmatprep.subr.bf16.mxu0 (!%p2091_p4), %v2413_v50  ;;  %v2421_v53 = vld [vmem:[%s2869_s3] sm:$0xff] (!%p2091_p4)   ;;  %v2416_v54 = vld [vmem:[%s2871_s18 + $0x18] sm:$0xff] (!%p2091_p4)   ;;  %v2418_v56 = vld [vmem:[%s2871_s18 + $0x28] sm:$0xff] (!%p2091_p4)   ;;  %v907_v7 = vstv (!%p2091_p4), %s2089_s11 }
  0x8b   : > { %2240 = vmatpush3.bf16.xpose.msra.mxu0 (!%p2091_p4), %v2413_v50  ;;  %2255 = vmatprep.mubr.bf16.mxu0 (!%p2091_p4), %v2421_v53  ;;  %v2417_v55 = vld [vmem:[%s2871_s18 + $0x20] sm:$0xff] (!%p2091_p4)   ;;  %v2419_v57 = vld [vmem:[%s2871_s18 + $0x30] sm:$0xff] (!%p2091_p4)   ;;  %v2420_v58 = vld [vmem:[%s2871_s18 + $0x38] sm:$0xff] (!%p2091_p4)   ;;  %v2932_v3 = vshrl.u32 (!%p2091_p4), %v871_v2, 7  ;;  %v906_v5 = vand.u32 (!%p2091_p4), 127, %v871_v2 }
  0x8c   : > { %2241 = vmatprep.subr.bf16.mxu0 (!%p2091_p4), %v2414_v51  ;;  %v2422_v59 = vld [vmem:[%s2869_s3 + $0x8] sm:$0xff] (!%p2091_p4)   ;;  %v2423_v60 = vld [vmem:[%s2869_s3 + $0x10] sm:$0xff] (!%p2091_p4)   ;;  %v2424_v61 = vld [vmem:[%s2869_s3 + $0x18] sm:$0xff] (!%p2091_p4)  }
  0x8d   : > { %v2425_v62 = vld [vmem:[%s2869_s3 + $0x20] sm:$0xff] (!%p2091_p4)   ;;  %v2426_v63 = vld [vmem:[%s2869_s3 + $0x28] sm:$0xff] (!%p2091_p4)   ;;  %v2427_v0 = vld [vmem:[%s2869_s3 + $0x30] sm:$0xff] (!%p2091_p4)   ;;  %v874_v4 = vadd.s32 (!%p2091_p4), 16, %v2932_v3  ;;  %v2942_v9 = vadd.s32 (!%p2091_p4), %v907_v7, %v906_v5  ;;  %v875_v10 = vadd.s32 (!%p2091_p4), 24, %v2932_v3  ;;  %v889_v11 = vadd.s32 (!%p2091_p4), %v2937_v6, %v2932_v3 }
  0x8e   : > { %v2428_v1 = vld [vmem:[%s2869_s3 + $0x38] sm:$0xff] (!%p2091_p4)   ;;  %v873_v12 = vadd.s32 (!%p2091_p4), 8, %v2932_v3  ;;  %v876_v15 = vadd.s32 (!%p2091_p4), 32, %v2932_v3  ;;  %v879_v17 = vadd.s32 (!%p2091_p4), 56, %v2932_v3  ;;  %v878_v24 = vadd.s32 (!%p2091_p4), 48, %v2932_v3 }
  0x8f   : > { %v891_v8 = vadd.s32 (!%p2091_p4), %v2937_v6, %v874_v4  ;;  %v892_v13 = vadd.s32 (!%p2091_p4), %v2937_v6, %v875_v10  ;;  %vm909_vm2 = vcmp.le.s32.totalorder (!%p2091_p4), %v2942_v9, %v889_v11  ;;  %v877_v26 = vadd.s32 (!%p2091_p4), 40, %v2932_v3  ;;  %v2430_v10 = vld [vmem:[%s2873_s19 + $0x8] sm:$0xff] (!%p2091_p4)   ;;  %v3042_v11 = vld [vmem:[#allocation2] sm:$0xff] (!%p2091_p4) }
  0x90   : > { %v890_v14 = vadd.s32 (!%p2091_p4), %v2937_v6, %v873_v12  ;;  %v893_v23 = vadd.s32 (!%p2091_p4), %v2937_v6, %v876_v15  ;;  %v896_v25 = vadd.s32 (!%p2091_p4), %v2937_v6, %v879_v17  ;;  %v895_v29 = vadd.s32 (!%p2091_p4), %v2937_v6, %v878_v24  ;;  %v3055_v17 = vld [vmem:[#allocation2 + $0x8] sm:$0xff] (!%p2091_p4) }
  0x91   : > { %vm911_vm1 = vcmp.le.s32.totalorder %v2942_v9, %v891_v8  ;;  %vm912_vm3 = vcmp.le.s32.totalorder %v2942_v9, %v892_v13  ;;  %v880_v30 = vadd.s32 64, %v2932_v3  ;;  %v894_v32 = vadd.s32 %v2937_v6, %v877_v26  ;;  %v2429_v8 = vld [vmem:[%s2873_s19] sm:$0xff]   ;;  %v2432_v26 = vld [vmem:[%s2873_s19 + $0x18] sm:$0xff]  }
  0x92   : > { %vm910_vm4 = vcmp.le.s32.totalorder %v2942_v9, %v890_v14  ;;  %vm913_vm5 = vcmp.le.s32.totalorder %v2942_v9, %v893_v23  ;;  %vm916_vm6 = vcmp.le.s32.totalorder %v2942_v9, %v896_v25  ;;  %v883_v33 = vadd.s32 88, %v2932_v3  ;;  %2271 = vmatprep.subr.bf16.mxu1 %v2429_v8  ;;  %v3070_v25 = vld [vmem:[#allocation2 + $0x20] sm:$0xff] }
  0x93   : > { %2242 = vmatpush3.bf16.xpose.msra.mxu0 %v2414_v51  ;;  %v882_v35 = vadd.s32 80, %v2932_v3  ;;  %v881_v38 = vadd.s32 72, %v2932_v3  ;;  %vm915_vm7 = vcmp.le.s32.totalorder %v2942_v9, %v895_v29  ;;  %v897_v41 = vadd.s32 %v2937_v6, %v880_v30  ;;  %2272 = vmatpush3.bf16.msra.mxu1 %v2429_v8  ;;  %v3075_v29 = vld [vmem:[#allocation2 + $0x38] sm:$0xff] }
  0x94   : > { %2243 = vmatprep.subr.bf16.mxu0 %v2415_v52  ;;  %vm914_vm8 = vcmp.le.s32.totalorder %v2942_v9, %v894_v32  ;;  %v900_v42 = vadd.s32 %v2937_v6, %v883_v33  ;;  %v884_v47 = vadd.s32 96, %v2932_v3  ;;  %v887_v49 = vadd.s32 120, %v2932_v3  ;;  %2273 = vmatprep.subr.bf16.mxu1 %v2430_v10 }
  0x95   : > { %v899_v43 = vadd.s32 %v2937_v6, %v882_v35  ;;  %v898_v45 = vadd.s32 %v2937_v6, %v881_v38  ;;  %vm917_vm9 = vcmp.le.s32.totalorder %v2942_v9, %v897_v41  ;;  %v886_v51 = vadd.s32 112, %v2932_v3  ;;  %v2433_v35 = vld [vmem:[%s2873_s19 + $0x20] sm:$0xff]  }
  0x96   : > { %vm920_vm10 = vcmp.le.s32.totalorder %v2942_v9, %v900_v42 }
  0x97   : > { %vm919_vm11 = vcmp.le.s32.totalorder %v2942_v9, %v899_v43  ;;  %vm918_vm12 = vcmp.le.s32.totalorder %v2942_v9, %v898_v45  ;;  %2274 = vmatpush3.bf16.msra.mxu1 %v2430_v10  ;;  %v3099_v43 = vld [vmem:[#allocation2 + $0x40] sm:$0xff]  ;;  %v2434_v45 = vld [vmem:[%s2873_s19 + $0x28] sm:$0xff]  }
  0x9b   : > { %2244 = vmatpush3.bf16.xpose.msra.mxu0 %v2415_v52  ;;  %v2641_v52 = vmov 0  }
  0x9c   : > { %2245 = vmatprep.subr.bf16.mxu0 %v2416_v54  ;;  %2412 = vset.pattern.permute.xlu1 %v2641_v52 }
  0x9d   : > { %2411 = vset.pattern.permute.xlu0 %v2641_v52  ;;  %v3115_v52 = vld [vmem:[#allocation2 + $0x50] sm:$0xff] }
  0xa3   : > { %2246 = vmatpush3.bf16.xpose.msra.mxu0 %v2416_v54 }
  0xa4   : > { %2247 = vmatprep.subr.bf16.mxu0 %v2417_v55 }
  0xab   : > { %2248 = vmatpush3.bf16.xpose.msra.mxu0 %v2417_v55  ;;  %v885_v55 = vadd.s32 104, %v2932_v3 }
  0xac   : > { %2249 = vmatprep.subr.bf16.mxu0 %v2418_v56 }
  0xb3   : > { %2250 = vmatpush3.bf16.xpose.msra.mxu0 %v2418_v56 }
  0xb4   : > { %2251 = vmatprep.subr.bf16.mxu0 %v2419_v57 }
  0xbb   : > { %2252 = vmatpush3.bf16.xpose.msra.mxu0 %v2419_v57 }
  0xbc   : > { %2253 = vmatprep.subr.bf16.mxu0 %v2420_v58 }
  0xc3   : > { %2254 = vmatpush3.bf16.xpose.msra.mxu0 %v2420_v58  ;;  %v901_v58 = vadd.s32 %v2937_v6, %v884_v47  ;;  %v3105_v47 = vld [vmem:[#allocation2 + $0x58] sm:$0xff] }
  0xc5   : > { %vm921_vm13 = vcmp.le.s32.totalorder %v2942_v9, %v901_v58 }
  0xca   : > { %2256 = vmatmul.mubr.bf16.vlgmr.msra.gmra.mrb[0].mxu0 %v2422_v59 }
  0xcb   : > { %2259 = vmatprep.mubr.bf16.mxu0 %v2423_v60  ;;  %v904_v60 = vadd.s32 %v2937_v6, %v887_v49 }
  0xcd   : > { %vm924_vm14 = vcmp.le.s32.totalorder %v2942_v9, %v904_v60 }
  0xd2   : > { %2260 = vmatmul.mubr.bf16.gmra.mrb[4].mxu0 %v2424_v61 }
  0xd3   : > { %2263 = vmatprep.mubr.bf16.mxu0 %v2425_v62  ;;  %v903_v62 = vadd.s32 %v2937_v6, %v886_v51 }
  0xd5   : > { %vm923_vm15 = vcmp.le.s32.totalorder %v2942_v9, %v903_v62 }
  0xda   : > { %2264 = vmatmul.mubr.bf16.gmra.mrb[8].mxu0 %v2426_v63  ;;  %v902_v63 = vadd.s32 %v2937_v6, %v885_v55  ;;  %v3121_v55 = vld [vmem:[#allocation2 + $0x48] sm:$0xff] }
  0xdb   : > { %2267 = vmatprep.mubr.bf16.mxu0 %v2427_v0 }
  0xdc   : > { %vm922_vm0 = vcmp.le.s32.totalorder %v2942_v9, %v902_v63  ;;  %v3040_v9 = vld [vmem:[#allocation2 + $0x10] sm:$0xff] }
  0xe2   : > { %2268 = vmatmul.mubr.bf16.gmra.mrb[12].mxu0 %v2428_v1 }
 0x19d   : > { %v2257_v16 = vpop.f32.mrb[0].mxu0 }
 0x19e   : > { %v808_v18 = vpop.f32.mrb[1].mxu0  ;;  %v2954_v19 = vsel %vm911_vm1, %v2257_v16, -1e+30  ;;  %vm1261_vm1 = vcmask 7168   ;;  %v3050_v16 = vld [vmem:[#allocation2 + $0x18] sm:$0xff] }
 0x19f   : > { %961 = vmax.xlane.f32.xlu1 %v2954_v19  ;;  %v2258_v20 = vpop.f32.mrb[2].mxu0  ;;  %v2957_v21 = vsel %vm909_vm2, %v808_v18, -1e+30  ;;  %v2431_v18 = vld [vmem:[%s2873_s19 + $0x10] sm:$0xff]  }
 0x1a0   : > { %957 = vmax.xlane.f32.xlu0 %v2957_v21  ;;  %v811_v22 = vpop.f32.mrb[3].mxu0  ;;  %v2966_v27 = vsel %vm912_vm3, %v2258_v20, -1e+30  ;;  %2275 = vmatprep.subr.bf16.mxu1 %v2431_v18 }
 0x1a1   : > { %v2969_v28 = vsel %vm910_vm4, %v811_v22, -1e+30  ;;  %2276 = vmatpush3.bf16.msra.mxu1 %v2431_v18  ;;  %v954_v18 = vld [vmem:[#allocation2 + $0x68] sm:$0xff] }
 0x1a2   : > { %2277 = vmatprep.subr.bf16.mxu1 %v2432_v26 }
 0x1a3   : > { %963 = vmax.xlane.f32.xlu1 %v2966_v27 }
 0x1a4   : > { %959 = vmax.xlane.f32.xlu0 %v2969_v28 }
 0x1a5   : > { %v2261_v31 = vpop.f32.mrb[4].mxu0  ;;  %2278 = vmatpush3.bf16.msra.mxu1 %v2432_v26 }
 0x1a6   : > { %v824_v34 = vpop.f32.mrb[5].mxu0  ;;  %v2991_v44 = vsel %vm915_vm7, %v2261_v31, -1e+30  ;;  %2279 = vmatprep.subr.bf16.mxu1 %v2433_v35 }
 0x1a7   : > { %v2262_v36 = vpop.f32.mrb[6].mxu0  ;;  %v2979_v37 = vsel %vm913_vm5, %v824_v34, -1e+30  ;;  %v3084_v34 = vld [vmem:[#allocation2 + $0x30] sm:$0xff] }
 0x1a8   : > { %965 = vmax.xlane.f32.xlu0 %v2979_v37  ;;  %v827_v39 = vpop.f32.mrb[7].mxu0  ;;  %v2983_v40 = vsel %vm916_vm6, %v2262_v36, -1e+30  ;;  %v3089_v36 = vld [vmem:[#allocation2 + $0x28] sm:$0xff] }
 0x1a9   : > { %971 = vmax.xlane.f32.xlu1 %v2983_v40  ;;  %v2995_v46 = vsel %vm914_vm8, %v827_v39, -1e+30  ;;  %2280 = vmatpush3.bf16.msra.mxu1 %v2433_v35 }
 0x1aa   : > { %2281 = vmatprep.subr.bf16.mxu1 %v2434_v45 }
 0x1ac   : > { %969 = vmax.xlane.f32.xlu0 %v2991_v44 }
 0x1ad   : > { %967 = vmax.xlane.f32.xlu1 %v2995_v46  ;;  %v2265_v48 = vpop.f32.mrb[8].mxu0  ;;  %2282 = vmatpush3.bf16.msra.mxu1 %v2434_v45 }
 0x1ae   : > { %v840_v50 = vpop.f32.mrb[9].mxu0  ;;  %v3013_v59 = vsel %vm919_vm11, %v2265_v48, -1e+30 }
 0x1af   : > { %v2266_v53 = vpop.f32.mrb[10].mxu0  ;;  %v3004_v54 = vsel %vm917_vm9, %v840_v50, -1e+30 }
 0x1b0   : > { %v3008_v56 = vsel %vm920_vm10, %v2266_v53, -1e+30  ;;  %973 = vmax.xlane.f32.xlu0 %v3004_v54  ;;  %v843_v57 = vpop.f32.mrb[11].mxu0  ;;  %v2435_v53 = vld [vmem:[%s2873_s19 + $0x30] sm:$0xff]  }
 0x1b1   : > { %979 = vmax.xlane.f32.xlu1 %v3008_v56  ;;  %v3016_v61 = vsel %vm918_vm12, %v843_v57, -1e+30  ;;  %2283 = vmatprep.subr.bf16.mxu1 %v2435_v53 }
 0x1b2   : > { %2284 = vmatpush3.bf16.msra.mxu1 %v2435_v53 }
 0x1b4   : > { %977 = vmax.xlane.f32.xlu0 %v3013_v59 }
 0x1b5   : > { %975 = vmax.xlane.f32.xlu1 %v3016_v61  ;;  %v2269_v0 = vpop.f32.mrb[12].mxu0 }
 0x1b6   : > { %v856_v1 = vpop.f32.mrb[13].mxu0  ;;  %v3032_v6 = vsel %vm923_vm15, %v2269_v0, -1e+30  ;;  %v3133_v0 = vld [vmem:[#allocation2 + $0x60] sm:$0xff] }
 0x1b7   : > { %v2270_v2 = vpop.f32.mrb[14].mxu0  ;;  %v3025_v3 = vsel %vm921_vm13, %v856_v1, -1e+30  ;;  %v2436_v1 = vld [vmem:[%s2873_s19 + $0x38] sm:$0xff]  }
 0x1b8   : > { %v3028_v4 = vsel %vm924_vm14, %v2270_v2, -1e+30  ;;  %981 = vmax.xlane.f32.xlu0 %v3025_v3  ;;  %v859_v5 = vpop.f32.mrb[15].mxu0  ;;  %v3139_v2 = vld [vmem:[#allocation2 + $0x78] sm:$0xff]  ;;  %2285 = vmatprep.subr.bf16.mxu1 %v2436_v1 }
 0x1b9   : > { %987 = vmax.xlane.f32.xlu1 %v3028_v4  ;;  %v3034_v7 = vsel %vm922_vm0, %v859_v5, -1e+30  ;;  %2286 = vmatpush3.bf16.msra.mxu1 %v2436_v1 }
 0x1bc   : > { %985 = vmax.xlane.f32.xlu0 %v3032_v6 }
 0x1bd   : > { %983 = vmax.xlane.f32.xlu1 %v3034_v7 }
 0x22c   : > { %v962_v12 = vpop.xlane.xlu1 %961 }
 0x22d   : > { %v3045_v13 = vmax.f32 %v3040_v9, %v962_v12  ;;  %v958_v14 = vpop.xlane.xlu0 %957 }
 0x22e   : > { %v3048_v15 = vmax.f32 %v3042_v11, %v958_v14 }
 0x22f   : > { %1577 = vst.msk [vmem:[#allocation2 + $0x10] sm:$0xff] %vm1261_vm1, %v3045_v13  ;;  %1065 = vperm.xlu1 %2412, %v3045_v13  }
 0x230   : > { %1575 = vst.msk [vmem:[#allocation2] sm:$0xff] %vm1261_vm1, %v3048_v15  ;;  %v964_v20 = vpop.xlane.xlu1 %963  ;;  %1055 = vperm.xlu0 %2411, %v3048_v15   ;;  %v1005_v58 = vsub.f32 %v3042_v11, %v3048_v15  ;;  %v3152_v15 = vld [vmem:[#allocation2 + $0x70] sm:$0xff] }
 0x231   : > { %v3062_v22 = vmax.f32 %v3050_v16, %v964_v20  ;;  %v960_v23 = vpop.xlane.xlu0 %959 }
 0x232   : > { %v3065_v24 = vmax.f32 %v3055_v17, %v960_v23  ;;  %v1021_v8 = vmul.f32 1.442695, %v1005_v58 }
 0x233   : > { %1578 = vst.msk [vmem:[#allocation2 + $0x18] sm:$0xff] %vm1261_vm1, %v3062_v22  ;;  %1070 = vperm.xlu1 %2412, %v3062_v22   ;;  %v1008_v10 = vsub.f32 %v3050_v16, %v3062_v22 }
 0x234   : > { %1576 = vst.msk [vmem:[#allocation2 + $0x8] sm:$0xff] %vm1261_vm1, %v3065_v24  ;;  %v1006_v20 = vsub.f32 %v3055_v17, %v3065_v24  ;;  %2437 = vpow2.f32 %v1021_v8 }
 0x235   : > { %v966_v30 = vpop.xlane.xlu0 %965  ;;  %v1027_v23 = vmul.f32 1.442695, %v1008_v10 }
 0x236   : > { %v3078_v31 = vmax.f32 %v3070_v25, %v966_v30  ;;  %v972_v32 = vpop.xlane.xlu1 %971 }
 0x237   : > { %v3081_v33 = vmax.f32 %v3075_v29, %v972_v32  ;;  %1060 = vperm.xlu1 %2412, %v3065_v24   ;;  %v1007_v24 = vsub.f32 %v3040_v9, %v3045_v13  ;;  %2439 = vpow2.f32 %v1027_v23 }
 0x238   : > { %1579 = vst.msk [vmem:[#allocation2 + $0x20] sm:$0xff] %vm1261_vm1, %v3078_v31  ;;  %v1009_v45 = vsub.f32 %v3070_v25, %v3078_v31 }
 0x239   : > { %1582 = vst.msk [vmem:[#allocation2 + $0x38] sm:$0xff] %vm1261_vm1, %v3081_v33  ;;  %v970_v38 = vpop.xlane.xlu0 %969 }
 0x23a   : > { %v3094_v39 = vmax.f32 %v3084_v34, %v970_v38  ;;  %v968_v41 = vpop.xlane.xlu1 %967  ;;  %v1023_v38 = vmul.f32 1.442695, %v1006_v20 }
 0x23b   : > { %v3097_v42 = vmax.f32 %v3089_v36, %v968_v41 }
 0x23c   : > { %1581 = vst.msk [vmem:[#allocation2 + $0x30] sm:$0xff] %vm1261_vm1, %v3094_v39  ;;  %1085 = vperm.xlu1 %2412, %v3094_v39   ;;  %2441 = vpow2.f32 %v1023_v38 }
 0x23d   : > { %1580 = vst.msk [vmem:[#allocation2 + $0x28] sm:$0xff] %vm1261_vm1, %v3097_v42  ;;  %v974_v48 = vpop.xlane.xlu0 %973  ;;  %v1010_v26 = vsub.f32 %v3089_v36, %v3097_v42  ;;  %v1012_v36 = vsub.f32 %v3075_v29, %v3081_v33  ;;  %v1029_v29 = vmul.f32 1.442695, %v1009_v45 }
 0x23e   : > { %v980_v49 = vpop.xlane.xlu1 %979  ;;  %v3110_v50 = vmax.f32 %v3099_v43, %v974_v48  ;;  %v3185_v13 = vpop.eup %2437 }
 0x23f   : > { %v3113_v51 = vmax.f32 %v3105_v47, %v980_v49  ;;  %v1031_v41 = vmul.f32 1.442695, %v1010_v26  ;;  %v1035_v48 = vmul.f32 1.442695, %v1012_v36 }
 0x240   : > { %1583 = vst.msk [vmem:[#allocation2 + $0x40] sm:$0xff] %vm1261_vm1, %v3110_v50  ;;  %1075 = vperm.xlu1 %2412, %v3078_v31  }
 0x241   : > { %1586 = vst.msk [vmem:[#allocation2 + $0x58] sm:$0xff] %vm1261_vm1, %v3113_v51  ;;  %v978_v57 = vpop.xlane.xlu0 %977  ;;  %2443 = vpow2.f32 %v1031_v41  ;;  %v1016_v9 = vsub.f32 %v3105_v47, %v3113_v51  ;;  %v3193_v49 = vpop.eup %2439 }
 0x242   : > { %v976_v60 = vpop.xlane.xlu1 %975  ;;  %v3128_v62 = vmax.f32 %v3115_v52, %v978_v57 }
 0x243   : > { %v3131_v63 = vmax.f32 %v3121_v55, %v976_v60  ;;  %v1043_v25 = vmul.f32 1.442695, %v1016_v9 }
 0x244   : > { %1585 = vst.msk [vmem:[#allocation2 + $0x50] sm:$0xff] %vm1261_vm1, %v3128_v62  ;;  %1080 = vperm.xlu1 %2412, %v3097_v42   ;;  %v1025_v42 = vmul.f32 1.442695, %v1007_v24 }
 0x245   : > { %1584 = vst.msk [vmem:[#allocation2 + $0x48] sm:$0xff] %vm1261_vm1, %v3131_v63  ;;  %1100 = vperm.xlu0 %2411, %v3131_v63   ;;  %v982_v5 = vpop.xlane.xlu0 %981  ;;  %v1014_v31 = vsub.f32 %v3121_v55, %v3131_v63  ;;  %v1013_v55 = vsub.f32 %v3099_v43, %v3110_v50 }
 0x246   : > { %v988_v11 = vpop.xlane.xlu1 %987  ;;  %v3147_v12 = vmax.f32 %v3133_v0, %v982_v5  ;;  %2445 = vpow2.f32 %v1025_v42  ;;  %v3199_v53 = vpop.eup %2441 }
 0x247   : > { %v3150_v14 = vmax.f32 %v3139_v2, %v988_v11  ;;  %2447 = vpow2.f32 %v1035_v48  ;;  %v1037_v63 = vmul.f32 1.442695, %v1013_v55 }
 0x248   : > { %1587 = vst.msk [vmem:[#allocation2 + $0x60] sm:$0xff] %vm1261_vm1, %v3147_v12  ;;  %1090 = vperm.xlu1 %2412, %v3081_v33   ;;  %v1011_v33 = vsub.f32 %v3084_v34, %v3094_v39  ;;  %2449 = vpow2.f32 %v1029_v29  ;;  %v1039_v34 = vmul.f32 1.442695, %v1014_v31  ;;  %v1017_v1 = vsub.f32 %v3133_v0, %v3147_v12 }
 0x249   : > { %v1020_v16 = vsub.f32 %v3139_v2, %v3150_v14  ;;  %1590 = vst.msk [vmem:[#allocation2 + $0x78] sm:$0xff] %vm1261_vm1, %v3150_v14  ;;  %1110 = vperm.xlu0 %2411, %v3113_v51   ;;  %v986_v22 = vpop.xlane.xlu0 %985  ;;  %v1015_v51 = vsub.f32 %v3115_v52, %v3128_v62  ;;  %2451 = vpow2.f32 %v1043_v25 }
 0x24a   : > { %v984_v30 = vpop.xlane.xlu1 %983  ;;  %v3167_v32 = vmax.f32 %v3152_v15, %v986_v22  ;;  %v1033_v47 = vmul.f32 1.442695, %v1011_v33  ;;  %v1045_v5 = vmul.f32 1.442695, %v1017_v1 }
 0x24b   : > { %v1002_v35 = vmax.f32 %v954_v18, %v984_v30  ;;  %v3201_v57 = vpop.eup %2443  ;;  %v1041_v58 = vmul.f32 1.442695, %v1015_v51 }
 0x24c   : > { %v1019_v17 = vsub.f32 %v3152_v15, %v3167_v32  ;;  %1589 = vst.msk [vmem:[#allocation2 + $0x70] sm:$0xff] %vm1261_vm1, %v3167_v32  ;;  %1095 = vperm.xlu1 %2412, %v3110_v50   ;;  %2453 = vpow2.f32 %v1033_v47 }
 0x24d   : > { %1588 = vst.msk [vmem:[#allocation2 + $0x68] sm:$0xff] %vm1261_vm1, %v1002_v35  ;;  %1120 = vperm.xlu0 %2411, %v1002_v35   ;;  %v1018_v39 = vsub.f32 %v954_v18, %v1002_v35  ;;  %2455 = vpow2.f32 %v1039_v34 }
 0x24e   : > { %2457 = vpow2.f32 %v1041_v58 }
 0x24f   : > { %v1047_v52 = vmul.f32 1.442695, %v1018_v39 }
 0x250   : > { %1105 = vperm.xlu1 %2412, %v3128_v62   ;;  %v3207_v60 = vpop.eup %2445 }
 0x251   : > { %1130 = vperm.xlu0 %2411, %v3150_v14   ;;  %v3209_v62 = vpop.eup %2447  ;;  %2459 = vpow2.f32 %v1047_v52 }
 0x252   : > { %v3215_v43 = vpop.eup %2449  ;;  %2461 = vpow2.f32 %v1037_v63 }
 0x253   : > { %v3217_v50 = vpop.eup %2451  ;;  %2463 = vpow2.f32 %v1045_v5 }
 0x254   : > { %1115 = vperm.xlu1 %2412, %v3147_v12  }
 0x255   : > { %1296 = vperm.xlu0 %2411, %v3185_v13  }
 0x256   : > { %v3221_v8 = vpop.eup %2453 }
 0x257   : > { %v3223_v10 = vpop.eup %2455 }
 0x258   : > { %1125 = vperm.xlu1 %2412, %v3167_v32   ;;  %v3227_v0 = vpop.eup %2457 }
 0x259   : > { %1311 = vperm.xlu0 %2411, %v3193_v49  }
 0x25b   : > { %v3229_v11 = vpop.eup %2459 }
 0x25c   : > { %1301 = vperm.xlu1 %2412, %v3199_v53   ;;  %v3233_v12 = vpop.eup %2461 }
 0x25d   : > { %1321 = vperm.xlu0 %2411, %v3201_v57   ;;  %v3236_v18 = vpop.eup %2463 }
 0x260   : > { %1306 = vperm.xlu1 %2412, %v3207_v60  }
 0x261   : > { %1331 = vperm.xlu0 %2411, %v3209_v62  }
 0x264   : > { %1316 = vperm.xlu1 %2412, %v3215_v43  }
 0x265   : > { %1351 = vperm.xlu0 %2411, %v3217_v50  }
 0x268   : > { %1326 = vperm.xlu1 %2412, %v3221_v8  }
 0x269   : > { %1341 = vperm.xlu0 %2411, %v3223_v10  }
 0x26c   : > { %1346 = vperm.xlu1 %2412, %v3227_v0  }
 0x26d   : > { %1361 = vperm.xlu0 %2411, %v3229_v11  }
 0x270   : > { %1336 = vperm.xlu1 %2412, %v3233_v12  }
 0x274   : > { %1356 = vperm.xlu1 %2412, %v3236_v18  }
 0x2ae   : > { %v1066_v20 = vpop.permute.xlu1 %1065 }
 0x2af   : > { %v1135_v22 = vsub.f32 %v2954_v19, %v1066_v20  ;;  %v1056_v23 = vpop.permute.xlu0 %1055 }
 0x2b0   : > { %v1133_v26 = vsub.f32 %v2957_v21, %v1056_v23 }
 0x2b1   : > { %v1153_v30 = vmul.f32 1.442695, %v1135_v22 }
 0x2b2   : > { %v1149_v35 = vmul.f32 1.442695, %v1133_v26  ;;  %v1071_v24 = vpop.permute.xlu1 %1070 }
 0x2b3   : > { %2465 = vpow2.f32 %v1153_v30  ;;  %v1136_v38 = vsub.f32 %v2966_v27, %v1071_v24 }
 0x2b4   : > { %2467 = vpow2.f32 %v1149_v35 }
 0x2b5   : > { %v1155_v36 = vmul.f32 1.442695, %v1136_v38 }
 0x2b6   : > { %v1061_v41 = vpop.permute.xlu1 %1060 }
 0x2b7   : > { %2469 = vpow2.f32 %v1155_v36  ;;  %v1134_v42 = vsub.f32 %v2969_v28, %v1061_v41 }
 0x2b9   : > { %v1151_v45 = vmul.f32 1.442695, %v1134_v42 }
 0x2bb   : > { %2471 = vpow2.f32 %v1151_v45  ;;  %v1086_v48 = vpop.permute.xlu1 %1085 }
 0x2bc   : > { %v1139_v19 = vsub.f32 %v2991_v44, %v1086_v48 }
 0x2bd   : > { %v2466_v9 = vpop.eup %2465 }
 0x2be   : > { %v2468_v29 = vpop.eup %2467  ;;  %v1161_v21 = vmul.f32 1.442695, %v1139_v19  ;;  %1217 = vadd.xlane.f32.xlu0 %v2466_v9 }
 0x2bf   : > { %1213 = vadd.xlane.f32.xlu1 %v2468_v29  ;;  %v1076_v33 = vpop.permute.xlu1 %1075 }
 0x2c0   : > { %2473 = vpow2.f32 %v1161_v21  ;;  %v1137_v27 = vsub.f32 %v2979_v37, %v1076_v33 }
 0x2c1   : > { %v2470_v25 = vpop.eup %2469 }
 0x2c2   : > { %v1157_v31 = vmul.f32 1.442695, %v1137_v27  ;;  %v1391_v52 = vpack.c.bf16 %v2470_v25, %v2466_v9 }
 0x2c3   : > { %1219 = vadd.xlane.f32.xlu1 %v2470_v25  ;;  %v1081_v47 = vpop.permute.xlu1 %1080 }
 0x2c4   : > { %2475 = vpow2.f32 %v1157_v31  ;;  %v1138_v28 = vsub.f32 %v2995_v46, %v1081_v47  ;;  %v1101_v51 = vpop.permute.xlu0 %1100 }
 0x2c5   : > { %v2472_v34 = vpop.eup %2471  ;;  %v1142_v55 = vsub.f32 %v3016_v61, %v1101_v51 }
 0x2c6   : > { %v1159_v39 = vmul.f32 1.442695, %v1138_v28  ;;  %1215 = vadd.xlane.f32.xlu0 %v2472_v34  ;;  %v1390_v44 = vpack.c.bf16 %v2472_v34, %v2468_v29 }
 0x2c7   : > { %v1091_v58 = vpop.permute.xlu1 %1090  ;;  %v1167_v20 = vmul.f32 1.442695, %v1142_v55 }
 0x2c8   : > { %2477 = vpow2.f32 %v1159_v39  ;;  %v1140_v63 = vsub.f32 %v2983_v40, %v1091_v58  ;;  %v1111_v37 = vpop.permute.xlu0 %1110  ;;  %2287 = vmatprep.mubr.bf16.mxu1 %v1390_v44  ;;  %v1049_v58 = vmul.f32 1.442695, %v1019_v17 }
 0x2c9   : > { %2288 = vmatmul.mubr.bf16.vlgmr.msra.gmra.mrb[0].mxu1 %v1391_v52  ;;  %v1144_v46 = vsub.f32 %v3008_v56, %v1111_v37  ;;  %v1051_v52 = vmul.f32 1.442695, %v1020_v16 }
 0x2ca   : > { %v2474_v1 = vpop.eup %2473  ;;  %v1163_v5 = vmul.f32 1.442695, %v1140_v63 }
 0x2cb   : > { %1225 = vadd.xlane.f32.xlu0 %v2474_v1  ;;  %v1096_v22 = vpop.permute.xlu1 %1095  ;;  %v1171_v35 = vmul.f32 1.442695, %v1144_v46 }
 0x2cc   : > { %2479 = vpow2.f32 %v1163_v5  ;;  %v1141_v23 = vsub.f32 %v3004_v54, %v1096_v22  ;;  %v1121_v26 = vpop.permute.xlu0 %1120 }
 0x2cd   : > { %2481 = vpow2.f32 %v1167_v20  ;;  %v1146_v40 = vsub.f32 %v3034_v7, %v1121_v26 }
 0x2ce   : > { %v2476_v61 = vpop.eup %2475  ;;  %v1165_v30 = vmul.f32 1.442695, %v1141_v23 }
 0x2cf   : > { %1221 = vadd.xlane.f32.xlu0 %v2476_v61  ;;  %v1106_v24 = vpop.permute.xlu1 %1105  ;;  %v1175_v42 = vmul.f32 1.442695, %v1146_v40 }
 0x2d0   : > { %2483 = vpow2.f32 %v1165_v30  ;;  %v1143_v38 = vsub.f32 %v3013_v59, %v1106_v24  ;;  %v1131_v36 = vpop.permute.xlu0 %1130 }
 0x2d1   : > { %2485 = vpow2.f32 %v1171_v35  ;;  %v1148_v45 = vsub.f32 %v3028_v4, %v1131_v36  ;;  %v1181_v35 = vld [vmem:[#allocation3] sm:$0xff] }
 0x2d2   : > { %v2478_v41 = vpop.eup %2477  ;;  %v1169_v56 = vmul.f32 1.442695, %v1143_v38  ;;  %v1197_v38 = vmul.f32 %v3185_v13, %v1181_v35  ;;  %v1187_v13 = vld [vmem:[#allocation3 + $0x30] sm:$0xff] }
 0x2d3   : > { %v1116_v54 = vpop.permute.xlu1 %1115  ;;  %v1392_v48 = vpack.c.bf16 %v2478_v41, %v2476_v61  ;;  %v1179_v29 = vmul.f32 1.442695, %v1148_v45  ;;  %v1183_v61 = vld [vmem:[#allocation3 + $0x10] sm:$0xff] }
 0x2d4   : > { %2487 = vpow2.f32 %v1169_v56  ;;  %v1145_v19 = vsub.f32 %v3025_v3, %v1116_v54  ;;  %v1199_v40 = vmul.f32 %v3207_v60, %v1183_v61  ;;  %v1184_v56 = vld [vmem:[#allocation3 + $0x18] sm:$0xff]  ;;  %v1182_v54 = vld [vmem:[#allocation3 + $0x8] sm:$0xff] }
 0x2d5   : > { %2291 = vmatprep.mubr.bf16.mxu1 %v1392_v48  ;;  %2489 = vpow2.f32 %v1175_v42  ;;  %v1200_v45 = vmul.f32 %v3193_v49, %v1184_v56 }
 0x2d6   : > { %v2480_v9 = vpop.eup %2479  ;;  %v1173_v7 = vmul.f32 1.442695, %v1145_v19 }
 0x2d7   : > { %1227 = vadd.xlane.f32.xlu1 %v2480_v9  ;;  %v1126_v21 = vpop.permute.xlu1 %1125  ;;  %v1393_v59 = vpack.c.bf16 %v2480_v9, %v2474_v1  ;;  %v2482_v27 = vpop.eup %2481  ;;  %v1198_v9 = vmul.f32 %v3199_v53, %v1182_v54  ;;  %v1188_v53 = vld [vmem:[#allocation3 + $0x38] sm:$0xff]  ;;  %v1193_v54 = vld [vmem:[#allocation3 + $0x60] sm:$0xff] }
 0x2d8   : > { %2491 = vpow2.f32 %v1173_v7  ;;  %v1147_v33 = vsub.f32 %v3032_v6, %v1126_v21  ;;  %v3267_v1 = vpop.permute.xlu0 %1296 }
 0x2d9   : > { %2292 = vmatmul.mubr.bf16.gmra.mrb[4].mxu1 %v1393_v59  ;;  %2493 = vpow2.f32 %v1179_v29  ;;  %v1203_v29 = vmul.f32 %v3221_v8, %v1187_v13  ;;  %v1185_v59 = vld [vmem:[#allocation3 + $0x20] sm:$0xff] }
 0x2da   : > { %v2484_v25 = vpop.eup %2483  ;;  %v1177_v4 = vmul.f32 1.442695, %v1147_v33  ;;  %v1201_v49 = vmul.f32 %v3215_v43, %v1185_v59  ;;  %v1279_v59 = vld [vmem:[#allocation4 + $0x8] sm:$0xff] }
 0x2db   : > { %1223 = vadd.xlane.f32.xlu1 %v2478_v41  ;;  %v1394_v31 = vpack.c.bf16 %v2482_v27, %v2484_v25  ;;  %v2486_v3 = vpop.eup %2485  ;;  %v3269_v5 = vpop.permute.xlu1 %1301 }
 0x2dc   : > { %2495 = vpow2.f32 %v1177_v4  ;;  %v3271_v15 = vpop.permute.xlu0 %1311  ;;  %v1204_v4 = vmul.f32 %v3209_v62, %v1188_v53  ;;  %v1189_v62 = vld [vmem:[#allocation3 + $0x40] sm:$0xff]  ;;  %v1375_v53 = vmul.f32 %v3269_v5, %v1279_v59 }
 0x2dd   : > { %2295 = vmatprep.mubr.bf16.mxu1 %v1394_v31  ;;  %2497 = vpow2.f32 %v1049_v58  ;;  %v1190_v58 = vld [vmem:[#allocation3 + $0x48] sm:$0xff] }
 0x2de   : > { %v2488_v47 = vpop.eup %2487  ;;  %2499 = vpow2.f32 %v1051_v52  ;;  %v1206_v35 = vmul.f32 %v3223_v10, %v1190_v58 }
 0x2df   : > { %1235 = vadd.xlane.f32.xlu1 %v2486_v3  ;;  %1233 = vadd.xlane.f32.xlu0 %v2488_v47  ;;  %v1395_v28 = vpack.c.bf16 %v2486_v3, %v2488_v47  ;;  %v2490_v51 = vpop.eup %2489  ;;  %v3273_v32 = vpop.permute.xlu1 %1306  ;;  %v1186_v3 = vld [vmem:[#allocation3 + $0x28] sm:$0xff] }
 0x2e0   : > { %v3275_v17 = vpop.permute.xlu0 %1321  ;;  %v1202_v8 = vmul.f32 %v3201_v57, %v1186_v3  ;;  %v1205_v57 = vmul.f32 %v3233_v12, %v1189_v62  ;;  %v1194_v12 = vld [vmem:[#allocation3 + $0x68] sm:$0xff] }
 0x2e1   : > { %2296 = vmatmul.mubr.bf16.gmra.mrb[8].mxu1 %v1395_v28 }
 0x2e2   : > { %v2492_v34 = vpop.eup %2491 }
 0x2e3   : > { %1231 = vadd.xlane.f32.xlu1 %v2482_v27  ;;  %1229 = vadd.xlane.f32.xlu0 %v2484_v25  ;;  %v1396_v6 = vpack.c.bf16 %v2490_v51, %v2492_v34  ;;  %v2494_v39 = vpop.eup %2493  ;;  %v3277_v2 = vpop.permute.xlu1 %1316 }
 0x2e4   : > { %v3279_v14 = vpop.permute.xlu0 %1331 }
 0x2e5   : > { %2299 = vmatprep.mubr.bf16.mxu1 %v1396_v6 }
 0x2e6   : > { %v2496_v44 = vpop.eup %2495 }
 0x2e7   : > { %1243 = vadd.xlane.f32.xlu1 %v2494_v39  ;;  %1241 = vadd.xlane.f32.xlu0 %v2496_v44  ;;  %v1397_v55 = vpack.c.bf16 %v2494_v39, %v2496_v44  ;;  %v3261_v63 = vpop.eup %2497  ;;  %v3281_v16 = vpop.permute.xlu1 %1326 }
 0x2e8   : > { %v3264_v37 = vpop.eup %2499  ;;  %v3283_v20 = vpop.permute.xlu0 %1351 }
 0x2e9   : > { %2300 = vmatmul.mubr.bf16.gmra.mrb[12].mxu1 %v1397_v55 }
 0x2eb   : > { %1239 = vadd.xlane.f32.xlu1 %v2490_v51  ;;  %1237 = vadd.xlane.f32.xlu0 %v2492_v34  ;;  %v3285_v46 = vpop.permute.xlu1 %1346  ;;  %v1191_v51 = vld [vmem:[#allocation3 + $0x50] sm:$0xff]  ;;  %v1192_v34 = vld [vmem:[#allocation3 + $0x58] sm:$0xff] }
 0x2ec   : > { %v3287_v22 = vpop.permute.xlu0 %1341  ;;  %v1207_v43 = vmul.f32 %v3227_v0, %v1191_v51  ;;  %v1208_v39 = vmul.f32 %v3217_v50, %v1192_v34  ;;  %v1196_v0 = vld [vmem:[#allocation3 + $0x78] sm:$0xff] }
 0x2ed   : > { %v1212_v56 = vmul.f32 %v3264_v37, %v1196_v0  ;;  %v1285_v51 = vld [vmem:[#allocation4 + $0x38] sm:$0xff] }
 0x2ee   : > { %v1381_v5 = vmul.f32 %v3279_v14, %v1285_v51 }
 0x2ef   : > { %v3289_v23 = vpop.permute.xlu1 %1336 }
 0x2f0   : > { %v3291_v26 = vpop.permute.xlu0 %1361 }
 0x2f3   : > { %v3293_v30 = vpop.permute.xlu1 %1356 }
 0x2fc   : > { %1366 = vperm.xlu1 %2412, %v3261_v63  }
 0x301   : > { %1371 = vperm.xlu0 %2411, %v3264_v37   ;;  %v1280_v37 = vld [vmem:[#allocation4 + $0x10] sm:$0xff] }
 0x34b   : > { %v1218_v24 = vpop.xlane.xlu0 %1217 }
 0x34c   : > { %v1247_v36 = vadd.f32 %v1218_v24, %v1199_v40  ;;  %v1214_v41 = vpop.xlane.xlu1 %1213 }
 0x34d   : > { %v1245_v42 = vadd.f32 %v1214_v41, %v1197_v38  ;;  %v1195_v38 = vld [vmem:[#allocation3 + $0x70] sm:$0xff] }
 0x34e   : > { %1264 = vst.msk [vmem:[#allocation3 + $0x10] sm:$0xff] %vm1261_vm1, %v1247_v36  ;;  %v1211_v41 = vmul.f32 %v3261_v63, %v1195_v38 }
 0x34f   : > { %1262 = vst.msk [vmem:[#allocation3] sm:$0xff] %vm1261_vm1, %v1245_v42 }
 0x350   : > { %v1220_v48 = vpop.xlane.xlu1 %1219 }
 0x351   : > { %v1248_v19 = vadd.f32 %v1220_v48, %v1200_v45 }
 0x353   : > { %1265 = vst.msk [vmem:[#allocation3 + $0x18] sm:$0xff] %vm1261_vm1, %v1248_v19  ;;  %v1216_v60 = vpop.xlane.xlu0 %1215  ;;  %v1209_v19 = vmul.f32 %v3236_v18, %v1193_v54 }
 0x354   : > { %v1246_v7 = vadd.f32 %v1216_v60, %v1198_v9  ;;  %v1210_v9 = vmul.f32 %v3229_v11, %v1194_v12 }
 0x356   : > { %1263 = vst.msk [vmem:[#allocation3 + $0x8] sm:$0xff] %vm1261_vm1, %v1246_v7 }
 0x358   : > { %v1226_v21 = vpop.xlane.xlu0 %1225 }
 0x359   : > { %v1251_v33 = vadd.f32 %v1226_v21, %v1203_v29  ;;  %v1278_v29 = vld [vmem:[#allocation4] sm:$0xff]  ;;  %v1281_v21 = vld [vmem:[#allocation4 + $0x18] sm:$0xff] }
 0x35a   : > { %v1377_v18 = vmul.f32 %v3271_v15, %v1281_v21 }
 0x35b   : > { %1268 = vst.msk [vmem:[#allocation3 + $0x30] sm:$0xff] %vm1261_vm1, %v1251_v33  ;;  %v1376_v33 = vmul.f32 %v3273_v32, %v1280_v37  ;;  %v1282_v32 = vld [vmem:[#allocation4 + $0x20] sm:$0xff] }
 0x35c   : > { %v1222_v27 = vpop.xlane.xlu0 %1221  ;;  %v1378_v15 = vmul.f32 %v3277_v2, %v1282_v32  ;;  %v1287_v2 = vld [vmem:[#allocation4 + $0x48] sm:$0xff] }
 0x35d   : > { %v1249_v25 = vadd.f32 %v1222_v27, %v1201_v49  ;;  %v1374_v49 = vmul.f32 %v3267_v1, %v1278_v29  ;;  %v1283_v1 = vld [vmem:[#allocation4 + $0x28] sm:$0xff] }
 0x35f   : > { %1266 = vst.msk [vmem:[#allocation3 + $0x20] sm:$0xff] %vm1261_vm1, %v1249_v25 }
 0x364   : > { %v1228_v31 = vpop.xlane.xlu1 %1227 }
 0x365   : > { %v1252_v47 = vadd.f32 %v1228_v31, %v1204_v4 }
 0x367   : > { %1269 = vst.msk [vmem:[#allocation3 + $0x38] sm:$0xff] %vm1261_vm1, %v1252_v47 }
 0x368   : > { %v1224_v28 = vpop.xlane.xlu1 %1223 }
 0x369   : > { %v1250_v6 = vadd.f32 %v1224_v28, %v1202_v8  ;;  %v1284_v28 = vld [vmem:[#allocation4 + $0x30] sm:$0xff] }
 0x36a   : > { %v1380_v34 = vmul.f32 %v3281_v16, %v1284_v28  ;;  %v1289_v16 = vld [vmem:[#allocation4 + $0x58] sm:$0xff] }
 0x36b   : > { %1267 = vst.msk [vmem:[#allocation3 + $0x28] sm:$0xff] %vm1261_vm1, %v1250_v6 }
 0x36c   : > { %v1234_v44 = vpop.xlane.xlu0 %1233  ;;  %v1236_v55 = vpop.xlane.xlu1 %1235 }
 0x36d   : > { %v1255_v52 = vadd.f32 %v1234_v44, %v1207_v43  ;;  %v1256_v61 = vadd.f32 %v1236_v55, %v1208_v39  ;;  %v1379_v44 = vmul.f32 %v3275_v17, %v1283_v1  ;;  %v1385_v17 = vmul.f32 %v3283_v20, %v1289_v16 }
 0x36f   : > { %1272 = vst.msk [vmem:[#allocation3 + $0x50] sm:$0xff] %vm1261_vm1, %v1255_v52  ;;  %1273 = vst.msk [vmem:[#allocation3 + $0x58] sm:$0xff] %vm1261_vm1, %v1256_v61  ;;  %v1288_v61 = vld [vmem:[#allocation4 + $0x50] sm:$0xff] }
 0x370   : > { %v1230_v40 = vpop.xlane.xlu0 %1229  ;;  %v1232_v24 = vpop.xlane.xlu1 %1231 }
 0x371   : > { %v1253_v36 = vadd.f32 %v1230_v40, %v1205_v57  ;;  %v1254_v50 = vadd.f32 %v1232_v24, %v1206_v35  ;;  %v1286_v35 = vld [vmem:[#allocation4 + $0x40] sm:$0xff]  ;;  %v1384_v40 = vmul.f32 %v3285_v46, %v1288_v61  ;;  %v1293_v46 = vld [vmem:[#allocation4 + $0x78] sm:$0xff] }
 0x372   : > { %v1382_v14 = vmul.f32 %v3289_v23, %v1286_v35 }
 0x373   : > { %1270 = vst.msk [vmem:[#allocation3 + $0x40] sm:$0xff] %vm1261_vm1, %v1253_v36  ;;  %1271 = vst.msk [vmem:[#allocation3 + $0x48] sm:$0xff] %vm1261_vm1, %v1254_v50  ;;  %v1383_v36 = vmul.f32 %v3287_v22, %v1287_v2 }
 0x374   : > { %v1242_v42 = vpop.xlane.xlu0 %1241  ;;  %v1244_v45 = vpop.xlane.xlu1 %1243 }
 0x375   : > { %v1259_v48 = vadd.f32 %v1242_v42, %v1211_v41  ;;  %v1260_v10 = vadd.f32 %v1244_v45, %v1212_v56  ;;  %v1292_v45 = vld [vmem:[#allocation4 + $0x70] sm:$0xff] }
 0x377   : > { %1276 = vst.msk [vmem:[#allocation3 + $0x70] sm:$0xff] %vm1261_vm1, %v1259_v48  ;;  %1277 = vst.msk [vmem:[#allocation3 + $0x78] sm:$0xff] %vm1261_vm1, %v1260_v10  ;;  %v1290_v48 = vld [vmem:[#allocation4 + $0x60] sm:$0xff]  ;;  %v1291_v10 = vld [vmem:[#allocation4 + $0x68] sm:$0xff] }
 0x378   : > { %v1238_v60 = vpop.xlane.xlu0 %1237  ;;  %v1240_v7 = vpop.xlane.xlu1 %1239 }
 0x379   : > { %v1257_v13 = vadd.f32 %v1238_v60, %v1209_v19  ;;  %v1258_v63 = vadd.f32 %v1240_v7, %v1210_v9  ;;  %v1386_v19 = vmul.f32 %v3293_v30, %v1290_v48 }
 0x37b   : > { %1274 = vst.msk [vmem:[#allocation3 + $0x60] sm:$0xff] %vm1261_vm1, %v1257_v13  ;;  %1275 = vst.msk [vmem:[#allocation3 + $0x68] sm:$0xff] %vm1261_vm1, %v1258_v63  ;;  %v1387_v13 = vmul.f32 %v3291_v26, %v1291_v10 }
 0x37c   : > { %v1367_v54 = vpop.permute.xlu1 %1366 }
 0x37d   : > { %v1388_v20 = vmul.f32 %v1367_v54, %v1292_v45 }
 0x380   : > { %v1372_v23 = vpop.permute.xlu0 %1371 }
 0x381   : > { %v1389_v22 = vmul.f32 %v1372_v23, %v1293_v46 }
 0x39c   : > { %v2289_v27 = vpop.f32.mrb[0].mxu1 }
 0x39d   : > { %v1545_v11 = vadd.f32 %v2289_v27, %v1376_v33  ;;  %v1480_v25 = vpop.f32.mrb[1].mxu1 }
 0x39e   : > { %v1543_v4 = vadd.f32 %v1480_v25, %v1374_v49  ;;  %v2290_v31 = vpop.f32.mrb[2].mxu1 }
 0x39f   : > { %1561 = vst [vmem:[#allocation4 + $0x10] sm:$0xff] %v1545_v11  ;;  %v1546_v3 = vadd.f32 %v2290_v31, %v1377_v18  ;;  %v1483_v47 = vpop.f32.mrb[3].mxu1 }
 0x3a0   : > { %1559 = vst [vmem:[#allocation4] sm:$0xff] %v1543_v4  ;;  %v1544_v8 = vadd.f32 %v1483_v47, %v1375_v53 }
 0x3a1   : > { %1562 = vst [vmem:[#allocation4 + $0x18] sm:$0xff] %v1546_v3 }
 0x3a2   : > { %1560 = vst [vmem:[#allocation4 + $0x8] sm:$0xff] %v1544_v8 }
 0x3ac   : > { %v2293_v6 = vpop.f32.mrb[4].mxu1 }
 0x3ad   : > { %v1549_v43 = vadd.f32 %v2293_v6, %v1380_v34  ;;  %v1496_v39 = vpop.f32.mrb[5].mxu1 }
 0x3ae   : > { %v1547_v55 = vadd.f32 %v1496_v39, %v1378_v15  ;;  %v2294_v62 = vpop.f32.mrb[6].mxu1 }
 0x3af   : > { %1565 = vst [vmem:[#allocation4 + $0x30] sm:$0xff] %v1549_v43  ;;  %v1550_v58 = vadd.f32 %v2294_v62, %v1381_v5  ;;  %v1499_v52 = vpop.f32.mrb[7].mxu1 }
 0x3b0   : > { %1563 = vst [vmem:[#allocation4 + $0x20] sm:$0xff] %v1547_v55  ;;  %v1548_v57 = vadd.f32 %v1499_v52, %v1379_v44 }
 0x3b1   : > { %1566 = vst [vmem:[#allocation4 + $0x38] sm:$0xff] %v1550_v58 }
 0x3b2   : > { %1564 = vst [vmem:[#allocation4 + $0x28] sm:$0xff] %v1548_v57 }
 0x3b4   : > { %v2297_v24 = vpop.f32.mrb[8].mxu1 }
 0x3b5   : > { %v1553_v38 = vadd.f32 %v2297_v24, %v1384_v40  ;;  %v1512_v0 = vpop.f32.mrb[9].mxu1 }
 0x3b6   : > { %v1551_v50 = vadd.f32 %v1512_v0, %v1382_v14  ;;  %v2298_v41 = vpop.f32.mrb[10].mxu1 }
 0x3b7   : > { %1569 = vst [vmem:[#allocation4 + $0x50] sm:$0xff] %v1553_v38  ;;  %v1554_v56 = vadd.f32 %v2298_v41, %v1385_v17  ;;  %v1515_v42 = vpop.f32.mrb[11].mxu1 }
 0x3b8   : > { %1567 = vst [vmem:[#allocation4 + $0x40] sm:$0xff] %v1551_v50  ;;  %v1552_v12 = vadd.f32 %v1515_v42, %v1383_v36 }
 0x3b9   : > { %1570 = vst [vmem:[#allocation4 + $0x58] sm:$0xff] %v1554_v56 }
 0x3ba   : > { %1568 = vst [vmem:[#allocation4 + $0x48] sm:$0xff] %v1552_v12 }
 0x3bc   : > { %v2301_v9 = vpop.f32.mrb[12].mxu1 }
 0x3bd   : > { %v1557_v60 = vadd.f32 %v2301_v9, %v1388_v20  ;;  %v1528_v7 = vpop.f32.mrb[13].mxu1 }
 0x3be   : > { %v1555_v63 = vadd.f32 %v1528_v7, %v1386_v19  ;;  %v2302_v37 = vpop.f32.mrb[14].mxu1 }
 0x3bf   : > { %1573 = vst [vmem:[#allocation4 + $0x70] sm:$0xff] %v1557_v60  ;;  %v1558_v29 = vadd.f32 %v2302_v37, %v1389_v22  ;;  %v1531_v21 = vpop.f32.mrb[15].mxu1 }
 0x3c0   : > { %1571 = vst [vmem:[#allocation4 + $0x60] sm:$0xff] %v1555_v63  ;;  %v1556_v59 = vadd.f32 %v1531_v21, %v1387_v13 }
 0x3c1   : > { %1574 = vst [vmem:[#allocation4 + $0x78] sm:$0xff] %v1558_v29 }
 0x3c2   : > { %1572 = vst [vmem:[#allocation4 + $0x68] sm:$0xff] %v1556_v59 }
 0x3c3 PF: > { %s3438_s7 = sld [smem:[#allocation9_spill]] }
 0x3c9   : > { %p2116_p5 = scmp.ne.s32.totalorder %s3438_s7, 1 }
 0x3ca   : > { %v1597_v30 = vld [vmem:[#allocation3 + $0x10] sm:$0xff] (!%p2116_p5)  ;;  %v1595_v33 = vld [vmem:[#allocation3] sm:$0xff] (!%p2116_p5)  ;;  %v1598_v49 = vld [vmem:[#allocation3 + $0x18] sm:$0xff] (!%p2116_p5)  ;;  %v2642_v27 = vmov (!%p2116_p5), 0  }
 0x3cb   : > { %1594 = sbr.rel (%p2116_p5) target bundleno = 1144 (0x478), region = 167  ;;  %2502 = vset.pattern.permute.xlu1 (!%p2116_p5), %v2642_v27  ;;  %2501 = vset.pattern.permute.xlu0 (!%p2116_p5), %v2642_v27  ;;  %2503 = vrcp.f32 (!%p2116_p5), %v1597_v30  ;;  %v1596_v26 = vld [vmem:[#allocation3 + $0x8] sm:$0xff] (!%p2116_p5)  ;;  %v1599_v11 = vld [vmem:[#allocation3 + $0x20] sm:$0xff] (!%p2116_p5)  ;;  %v1602_v25 = vld [vmem:[#allocation3 + $0x38] sm:$0xff] (!%p2116_p5) }
 0x3cc   : > { %2505 = vrcp.f32 (!%p2116_p5), %v1595_v33  ;;  %v1600_v18 = vld [vmem:[#allocation3 + $0x28] sm:$0xff] (!%p2116_p5)  ;;  %v1601_v53 = vld [vmem:[#allocation3 + $0x30] sm:$0xff] (!%p2116_p5)  ;;  %v1603_v8 = vld [vmem:[#allocation3 + $0x40] sm:$0xff] (!%p2116_p5) }
 0x3cd   : > { %2507 = vrcp.f32 (!%p2116_p5), %v1598_v49  ;;  %v1604_v3 = vld [vmem:[#allocation3 + $0x48] sm:$0xff] (!%p2116_p5)  ;;  %v1606_v32 = vld [vmem:[#allocation3 + $0x58] sm:$0xff] (!%p2116_p5)  ;;  %v1605_v1 = vld [vmem:[#allocation3 + $0x50] sm:$0xff] (!%p2116_p5) }
 0x3ce   : > { %2509 = vrcp.f32 (!%p2116_p5), %v1596_v26  ;;  %v1608_v15 = vld [vmem:[#allocation3 + $0x68] sm:$0xff] (!%p2116_p5)  ;;  %v1607_v5 = vld [vmem:[#allocation3 + $0x60] sm:$0xff] (!%p2116_p5)  ;;  %v1610_v39 = vld [vmem:[#allocation3 + $0x78] sm:$0xff] (!%p2116_p5) }
 0x3cf   : > { %2511 = vrcp.f32 (!%p2116_p5), %v1600_v18  ;;  %v1609_v55 = vld [vmem:[#allocation3 + $0x70] sm:$0xff] (!%p2116_p5)  ;;  %v1630_v24 = vld [vmem:[#allocation4 + $0x18] sm:$0xff] (!%p2116_p5)  ;;  %v1627_v17 = vld [vmem:[#allocation4] sm:$0xff] (!%p2116_p5) }
 0x3d0   : > { %2513 = vrcp.f32 (!%p2116_p5), %v1599_v11  ;;  %v1629_v14 = vld [vmem:[#allocation4 + $0x10] sm:$0xff] (!%p2116_p5)  ;;  %v1628_v38 = vld [vmem:[#allocation4 + $0x8] sm:$0xff] (!%p2116_p5)  ;;  %v1631_v12 = vld [vmem:[#allocation4 + $0x20] sm:$0xff] (!%p2116_p5) }
 0x3d1   : > { %2515 = vrcp.f32 (!%p2116_p5), %v1602_v25  ;;  %v1632_v45 = vld [vmem:[#allocation4 + $0x28] sm:$0xff] (!%p2116_p5)  ;;  %v1634_v19 = vld [vmem:[#allocation4 + $0x38] sm:$0xff] (!%p2116_p5)  ;;  %v1633_v9 = vld [vmem:[#allocation4 + $0x30] sm:$0xff] (!%p2116_p5) }
 0x3d2   : > { %2517 = vrcp.f32 %v1601_v53  ;;  %v1636_v37 = vld [vmem:[#allocation4 + $0x48] sm:$0xff]  ;;  %v1635_v29 = vld [vmem:[#allocation4 + $0x40] sm:$0xff]  ;;  %v1638_v27 = vld [vmem:[#allocation4 + $0x58] sm:$0xff] }
 0x3d3   : > { %2519 = vrcp.f32 %v1604_v3  ;;  %v1637_v26 = vld [vmem:[#allocation4 + $0x50] sm:$0xff]  ;;  %v1639_v3 = vld [vmem:[#allocation4 + $0x60] sm:$0xff] }
 0x3d4   : > { %2521 = vrcp.f32 %v1603_v8 }
 0x3d5   : > { %v2504_v4 = vpop.eup %2503  ;;  %2523 = vrcp.f32 %v1606_v32 }
 0x3d6   : > { %v2506_v31 = vpop.eup %2505  ;;  %1655 = vperm.xlu1 %2502, %v2504_v4   ;;  %2525 = vrcp.f32 %v1605_v1  ;;  %v1642_v1 = vld [vmem:[#allocation4 + $0x78] sm:$0xff] }
 0x3d7   : > { %v2508_v47 = vpop.eup %2507  ;;  %1645 = vperm.xlu0 %2501, %v2506_v31   ;;  %2527 = vrcp.f32 %v1608_v15  ;;  %v1640_v31 = vld [vmem:[#allocation4 + $0x68] sm:$0xff] }
 0x3d8   : > { %v2510_v28 = vpop.eup %2509  ;;  %2529 = vrcp.f32 %v1607_v5 }
 0x3d9   : > { %v2512_v51 = vpop.eup %2511  ;;  %2531 = vrcp.f32 %v1610_v39 }
 0x3da   : > { %1660 = vperm.xlu1 %2502, %v2508_v47   ;;  %v2514_v34 = vpop.eup %2513  ;;  %2533 = vrcp.f32 %v1609_v55 }
 0x3db   : > { %1650 = vperm.xlu0 %2501, %v2510_v28   ;;  %v2516_v6 = vpop.eup %2515 }
 0x3dc   : > { %v2518_v43 = vpop.eup %2517 }
 0x3dd   : > { %v2520_v44 = vpop.eup %2519 }
 0x3de   : > { %1670 = vperm.xlu1 %2502, %v2512_v51   ;;  %v2522_v62 = vpop.eup %2521 }
 0x3df   : > { %1665 = vperm.xlu0 %2501, %v2514_v34   ;;  %v2524_v58 = vpop.eup %2523  ;;  %v1641_v34 = vld [vmem:[#allocation4 + $0x70] sm:$0xff] }
 0x3e0   : > { %v2526_v52 = vpop.eup %2525 }
 0x3e1   : > { %v2528_v61 = vpop.eup %2527 }
 0x3e2   : > { %1680 = vperm.xlu1 %2502, %v2516_v6   ;;  %v2530_v57 = vpop.eup %2529 }
 0x3e3   : > { %1675 = vperm.xlu0 %2501, %v2518_v43   ;;  %v2532_v35 = vpop.eup %2531 }
 0x3e4   : > { %v2534_v16 = vpop.eup %2533 }
 0x3e6   : > { %1690 = vperm.xlu1 %2502, %v2520_v44  }
 0x3e7   : > { %1685 = vperm.xlu0 %2501, %v2522_v62  }
 0x3ea   : > { %1700 = vperm.xlu1 %2502, %v2524_v58  }
 0x3eb   : > { %1695 = vperm.xlu0 %2501, %v2526_v52  }
 0x3ee   : > { %1710 = vperm.xlu1 %2502, %v2528_v61  }
 0x3ef   : > { %1705 = vperm.xlu0 %2501, %v2530_v57  }
 0x3f2   : > { %1720 = vperm.xlu1 %2502, %v2532_v35  }
 0x3f3   : > { %1715 = vperm.xlu0 %2501, %v2534_v16  }
 0x455   : > { %v1656_v2 = vpop.permute.xlu1 %1655 }
 0x456   : > { %v1646_v40 = vpop.permute.xlu0 %1645  ;;  %v1725_v36 = vmul.f32 %v1656_v2, %v1629_v14 }
 0x457   : > { %v1723_v56 = vmul.f32 %v1646_v40, %v1627_v17 }
 0x459   : > { %v1661_v0 = vpop.permute.xlu1 %1660 }
 0x45a   : > { %v1726_v50 = vmul.f32 %v1661_v0, %v1630_v24  ;;  %v1651_v41 = vpop.permute.xlu0 %1650 }
 0x45b   : > { %v1724_v42 = vmul.f32 %v1651_v41, %v1628_v38 }
 0x45c   : > { %v2168_v54 = vpack.c.bf16 %v1726_v50, %v1725_v36 }
 0x45d   : > { %v2163_v48 = vpack.c.bf16 %v1724_v42, %v1723_v56  ;;  %v1671_v46 = vpop.permute.xlu1 %1670 }
 0x45e   : > { %2200 = vst [vmem:[%s2875_s8 + $0x8] sm:$0xff] %v2168_v54   ;;  %v1728_v23 = vmul.f32 %v1671_v46, %v1632_v45  ;;  %v1666_v10 = vpop.permute.xlu0 %1665 }
 0x45f   : > { %2164 = vst [vmem:[%s2875_s8] sm:$0xff] %v2163_v48   ;;  %v1727_v20 = vmul.f32 %v1666_v10, %v1631_v12 }
 0x461   : > { %v2173_v22 = vpack.c.bf16 %v1728_v23, %v1727_v20  ;;  %v1681_v60 = vpop.permute.xlu1 %1680 }
 0x462   : > { %v1730_v7 = vmul.f32 %v1681_v60, %v1634_v19  ;;  %v1676_v13 = vpop.permute.xlu0 %1675 }
 0x463   : > { %2201 = vst [vmem:[%s2875_s8 + $0x10] sm:$0xff] %v2173_v22   ;;  %v1729_v63 = vmul.f32 %v1676_v13, %v1633_v9 }
 0x465   : > { %v2178_v21 = vpack.c.bf16 %v1730_v7, %v1729_v63  ;;  %v1691_v59 = vpop.permute.xlu1 %1690 }
 0x466   : > { %v1732_v30 = vmul.f32 %v1691_v59, %v1636_v37  ;;  %v1686_v33 = vpop.permute.xlu0 %1685 }
 0x467   : > { %2202 = vst [vmem:[%s2875_s8 + $0x18] sm:$0xff] %v2178_v21   ;;  %v1731_v49 = vmul.f32 %v1686_v33, %v1635_v29 }
 0x469   : > { %v2183_v18 = vpack.c.bf16 %v1732_v30, %v1731_v49  ;;  %v1701_v11 = vpop.permute.xlu1 %1700 }
 0x46a   : > { %v1734_v25 = vmul.f32 %v1701_v11, %v1638_v27  ;;  %v1696_v53 = vpop.permute.xlu0 %1695 }
 0x46b   : > { %2203 = vst [vmem:[%s2875_s8 + $0x20] sm:$0xff] %v2183_v18   ;;  %v1733_v4 = vmul.f32 %v1696_v53, %v1637_v26 }
 0x46d   : > { %v2188_v47 = vpack.c.bf16 %v1734_v25, %v1733_v4  ;;  %v1711_v8 = vpop.permute.xlu1 %1710 }
 0x46e   : > { %v1736_v28 = vmul.f32 %v1711_v8, %v1640_v31  ;;  %v1706_v32 = vpop.permute.xlu0 %1705 }
 0x46f   : > { %2204 = vst [vmem:[%s2875_s8 + $0x28] sm:$0xff] %v2188_v47   ;;  %v1735_v51 = vmul.f32 %v1706_v32, %v1639_v3 }
 0x471   : > { %v2193_v15 = vpack.c.bf16 %v1736_v28, %v1735_v51  ;;  %v1721_v6 = vpop.permute.xlu1 %1720 }
 0x472   : > { %v1738_v5 = vmul.f32 %v1721_v6, %v1642_v1  ;;  %v1716_v43 = vpop.permute.xlu0 %1715 }
 0x473   : > { %2205 = vst [vmem:[%s2875_s8 + $0x30] sm:$0xff] %v2193_v15   ;;  %v1737_v39 = vmul.f32 %v1716_v43, %v1641_v34 }
 0x475   : > { %v2198_v44 = vpack.c.bf16 %v1738_v5, %v1737_v39 }
 0x477   : > { %2206 = vst [vmem:[%s2875_s8 + $0x38] sm:$0xff] %v2198_v44  }
 0x478 PF: > { %1825 = sbr.rel (!%p2761_p10) target bundleno = 1163 (0x48b), region = 171  ;;  %s3439_s10 = sld [smem:[#allocation10_spill]] (%p2761_p10)  ;;  %v1848_v55 = vld [vmem:[%s2875_s8] sm:$0xf] (%p2761_p10)  ;;  %v1850_v62 = vld [vmem:[%s2875_s8 + $0x4] sm:$0xf] (%p2761_p10) }
 0x479   : > { %s3440_s3 = sld [smem:[#allocation12_spill]] (%p2761_p10)  ;;  %s3441_s18 = sld [smem:[#allocation11_spill]] (%p2761_p10)  ;;  %v1852_v58 = vld [vmem:[%s2875_s8 + $0x8] sm:$0xf] (%p2761_p10)  ;;  %v1854_v52 = vld [vmem:[%s2875_s8 + $0xc] sm:$0xf] (%p2761_p10) }
 0x47a   : > { %v1856_v61 = vld [vmem:[%s2875_s8 + $0x10] sm:$0xf] (%p2761_p10)  ;;  %v1858_v57 = vld [vmem:[%s2875_s8 + $0x14] sm:$0xf] (%p2761_p10)  ;;  %v1860_v35 = vld [vmem:[%s2875_s8 + $0x18] sm:$0xf] (%p2761_p10) }
 0x47b   : > { %v1862_v16 = vld [vmem:[%s2875_s8 + $0x1c] sm:$0xf] (%p2761_p10)  ;;  %v1864_v2 = vld [vmem:[%s2875_s8 + $0x20] sm:$0xf] (%p2761_p10)  ;;  %v1866_v40 = vld [vmem:[%s2875_s8 + $0x24] sm:$0xf] (%p2761_p10) }
 0x47c   : > { %s3442_s4 = sld [smem:[#allocation13_spill]] (%p2761_p10)  ;;  %v1868_v14 = vld [vmem:[%s2875_s8 + $0x28] sm:$0xf] (%p2761_p10)  ;;  %v1870_v24 = vld [vmem:[%s2875_s8 + $0x2c] sm:$0xf] (%p2761_p10) }
 0x47d   : > { %v1872_v17 = vld [vmem:[%s2875_s8 + $0x30] sm:$0xf] (%p2761_p10)  ;;  %v1874_v38 = vld [vmem:[%s2875_s8 + $0x34] sm:$0xf] (%p2761_p10) }
 0x47e   : > { %s2159_s19 = sshll.u32 (%p2761_p10), %s3439_s10, 5  ;;  %v1876_v0 = vld [vmem:[%s2875_s8 + $0x38] sm:$0xf] (%p2761_p10)  ;;  %v1878_v36 = vld [vmem:[%s2875_s8 + $0x3c] sm:$0xf] (%p2761_p10) }
 0x47f   : > { %s2136_s9 = sshll.u32 %s3440_s3, 6  ;;  %s1828_s5 = sadd.s32 %s3441_s18, %s2159_s19 }
 0x480   : > { %s1830_s12 = sadd.s32 %s2136_s9, %s1828_s5 }
 0x481   : > { %s2137_s14 = sshll.u32 %s1830_s12, 2 }
 0x482   : > { %s1832_s30 = scalar_lea.vmem %s3442_s4, %s2137_s14 }
 0x483   : > { %1849 = vst [vmem:[%s1832_s30] sm:$0xf] %v1848_v55  ;;  %1851 = vst [vmem:[%s1832_s30 + $0x8] sm:$0xf] %v1850_v62 }
 0x484   : > { %1853 = vst [vmem:[%s1832_s30 + $0x10] sm:$0xf] %v1852_v58  ;;  %1855 = vst [vmem:[%s1832_s30 + $0x18] sm:$0xf] %v1854_v52 }
 0x485   : > { %1857 = vst [vmem:[%s1832_s30 + $0x20] sm:$0xf] %v1856_v61  ;;  %1859 = vst [vmem:[%s1832_s30 + $0x28] sm:$0xf] %v1858_v57 }
 0x486   : > { %1861 = vst [vmem:[%s1832_s30 + $0x30] sm:$0xf] %v1860_v35  ;;  %1863 = vst [vmem:[%s1832_s30 + $0x38] sm:$0xf] %v1862_v16 }
 0x487   : > { %1865 = vst [vmem:[%s1832_s30 + $0x40] sm:$0xf] %v1864_v2  ;;  %1867 = vst [vmem:[%s1832_s30 + $0x48] sm:$0xf] %v1866_v40 }
 0x488   : > { %1869 = vst [vmem:[%s1832_s30 + $0x50] sm:$0xf] %v1868_v14  ;;  %1871 = vst [vmem:[%s1832_s30 + $0x58] sm:$0xf] %v1870_v24 }
 0x489   : > { %1873 = vst [vmem:[%s1832_s30 + $0x60] sm:$0xf] %v1872_v17  ;;  %1875 = vst [vmem:[%s1832_s30 + $0x68] sm:$0xf] %v1874_v38 }
 0x48a   : > { %1877 = vst [vmem:[%s1832_s30 + $0x70] sm:$0xf] %v1876_v0  ;;  %1879 = vst [vmem:[%s1832_s30 + $0x78] sm:$0xf] %v1878_v36 }
 0x48b PF: > { %s13_s24 = sadd.s32 1, %s2637_s24   ;;  %s3444_s12 = smov %s2593_s13 }
 0x48c   : > { %p3375_p6 = scmp.ge.s32.totalorder %s13_s24, 18   ;;  %s3445_s13 = smov %s2781_s16 }
 0x48d   : > { %s3446_s14 = smov %s2601_s15  ;;  %s3447_s15 = smov %s2778_s17 }
 0x48e   : > { %s3448_s16 = smov %s2621_s20  ;;  %s3449_s17 = smov %s2625_s21 }
 0x48f   : > { %s3450_s18 = smov %s2629_s22  ;;  %s3451_s19 = smov %s2633_s23 }
 0x490   : > { %s3452_s20 = smov %s3459_s25  ;;  %s3453_s21 = smov %s3461_s26 }
 0x491   : > { %s3454_s22 = smov %s3465_s28  ;;  %s3455_s23 = smov %s3469_s29 }
 0x492   :  { %12 = sbr.rel (!%p3375_p6) target bundleno = 9 (0x9), region = 259 }

// kernel: transformer_block_forward.3
= control target key start
LH: loop header
LB: loop body
LE: loop exit
PB: predicated region body
PF: predicated region fallthrough
CT: control target
= control target key end

     0   :  { %s3596_s13 = smov 0   ;;  %s3598_s14 = smov 0   ;;  %s5239_s0 = inlined_call_operand.vmem [shape: f32[2,256,256], index: 0, kind: input, shape index: {}]   ;;  %s5240_s1 = inlined_call_operand.vmem [shape: f32[1,256], index: 1, kind: input, shape index: {}]   ;;  %s5241_s2 = inlined_call_operand.vmem [shape: bf16[256,256], index: 2, kind: input, shape index: {}]   ;;  %s5242_s3 = inlined_call_operand.vmem [shape: bf16[256,256], index: 3, kind: input, shape index: {}]   ;;  %s5243_s4 = inlined_call_operand.vmem [shape: bf16[256,256], index: 4, kind: input, shape index: {}]   ;;  %s5244_s5 = inlined_call_operand.vmem [shape: f32[256,256], index: 5, kind: input, shape index: {}]   ;;  %s5245_s6 = inlined_call_operand.vmem [shape: f32[256,256], index: 6, kind: input, shape index: {}]   ;;  %s5246_s7 = inlined_call_operand.vmem [shape: bf16[256,256], index: 7, kind: input, shape index: {}]   ;;  %s5247_s8 = inlined_call_operand.vmem [shape: bf16[2,256,256], index: 8, kind: output, shape index: {0}]   ;;  %s5248_s9 = inlined_call_operand.vmem [shape: bf16[2,256,256], index: 9, kind: output, shape index: {1}]   ;;  %s5249_s10 = inlined_call_operand.vmem [shape: bf16[2,256,256], index: 10, kind: output, shape index: {2}]  }
   0x1   :  { %s3600_s15 = smov 0   ;;  %s3602_s16 = smov 0  }
   0x2   :  { %s3604_s17 = smov 0  }
   0x3 LB: > { %s30_s18 = sadd.s32 1, %s3531_s15  ;;  %s33_s19 = sadd.s32 1, %s3535_s16  ;;  %s3539_s17 = sphi %s3604_s17, %s21_s17   ;;  %s3535_s16 = sphi %s3602_s16, %s5448_s16   ;;  %s3531_s15 = sphi %s3600_s15, %s5447_s15   ;;  %s3527_s14 = sphi %s3598_s14, %s5446_s14   ;;  %s3523_s13 = sphi %s3596_s13, %s5445_s13  }
   0x4   : > { %p31_p0 = scmp.ge.s32.totalorder %s30_s18, 2  ;;  %p2986_p1 = scmp.ge.s32.totalorder %s3539_s17, 1 }
   0x5   : > { %p367_p2 = scmp.lt.s32.totalorder %s3539_s17, 5 }
   0x6   : > { %s5450_s18 = smov (%p31_p0, %s30_s18), 0  ;;  %s5452_s19 = smov (!%p31_p0, %s33_s19), %s3535_s16 }
   0x7   : > { %p368_p3 = pnand %p2986_p1, %p367_p2  ;;  %p35_p4 = scmp.ge.s32.totalorder %s5452_s19, 2 }
   0x9   : > { %s5454_s19 = smov (%p35_p4, %s5452_s19), 0  ;;  %371 = sbr.rel (%p368_p3) target bundleno = 757 (0x2f5), region = 52 }
  0x10   : > { %s2987_s20 = sshll.u32 %s3523_s13, 4  ;;  %p448_p5 = scmp.lt.s32.totalorder %s3527_s14, 1  ;;  %v3277_v0 = vld [vmem:[%s5241_s2 + $0x4] ss:$8 sps:$4 sm:$0xff]   ;;  %v3279_v1 = vld [vmem:[%s5241_s2] ss:$8 sps:$4 sm:$0xff]  }
  0x11   : > { %p450_p6 = scmp.lt.s32.totalorder %s2987_s20, 31  ;;  %950 = vmatprep.subr.bf16.mxu0 %v3277_v0  ;;  %v3280_v2 = vld [vmem:[%s5242_s3 + $0x4] ss:$8 sps:$4 sm:$0xff]   ;;  %v3282_v3 = vld [vmem:[%s5242_s3] ss:$8 sps:$4 sm:$0xff]  }
  0x12   : > { %s5456_s14 = smov (!%p448_p5, %s3527_s14), 1  ;;  %951 = vmatpush1.bf16.xpose.msra.mxu0 %v3279_v1  ;;  %v3283_v4 = vld [vmem:[%s5241_s2 + $0x14] ss:$8 sps:$4 sm:$0xff]   ;;  %1255 = vmatprep.subr.bf16.mxu1 %v3280_v2  ;;  %v3285_v6 = vld [vmem:[%s5241_s2 + $0x10] ss:$8 sps:$4 sm:$0xff]  }
  0x13   : > { %s5458_s20 = smov (!%p450_p6, %s2987_s20), 31  ;;  %s2989_s11 = sshll.u32 %s5456_s14, 6  ;;  %v3286_v5 = vld [vmem:[%s5242_s3 + $0x14] ss:$8 sps:$4 sm:$0xff]   ;;  %1256 = vmatpush1.bf16.xpose.msra.mxu1 %v3282_v3  ;;  %952 = vmatprep.subr.bf16.mxu0 %v3283_v4  ;;  %v3288_v7 = vld [vmem:[%s5242_s3 + $0x10] ss:$8 sps:$4 sm:$0xff]  }
  0x14   : > { %s2988_s21 = sshll.u32 %s5458_s20, 1  ;;  %1257 = vmatprep.subr.bf16.mxu1 %v3286_v5  ;;  %v3289_v8 = vld [vmem:[%s5241_s2 + $0x24] ss:$8 sps:$4 sm:$0xff]   ;;  %v3291_v42 = vld [vmem:[%s5241_s2 + $0x20] ss:$8 sps:$4 sm:$0xff]   ;;  %s3187_s27 = sshll.u32 %s5458_s20, 4 }
  0x15   : > { %s3647_s22 = sadd.s32 %s2989_s11, %s2988_s21  ;;  %v3292_v18 = vld [vmem:[%s5242_s3 + $0x24] ss:$8 sps:$4 sm:$0xff]   ;;  %v3294_v43 = vld [vmem:[%s5242_s3 + $0x20] ss:$8 sps:$4 sm:$0xff]   ;;  %v3295_v44 = vld [vmem:[%s5241_s2 + $0x34] ss:$8 sps:$4 sm:$0xff]   ;;  %s4435_s30 = scalar_lea.vmem %s5244_s5, %s3187_s27 }
  0x16   : > { %s2990_s23 = sshll.u32 %s3647_s22, 3  ;;  %v3298_v55 = vld [vmem:[%s5242_s3 + $0x34] ss:$8 sps:$4 sm:$0xff]   ;;  %v3297_v2 = vld [vmem:[%s5241_s2 + $0x30] ss:$8 sps:$4 sm:$0xff]   ;;  %s4893_s12 = sshll.u32 %s3647_s22, 2 }
  0x17   : > { %s3659_s29 = scalar_lea.vmem %s5239_s0, %s2990_s23  ;;  %v3300_v3 = vld [vmem:[%s5242_s3 + $0x30] ss:$8 sps:$4 sm:$0xff]   ;;  %v3301_v4 = vld [vmem:[%s5241_s2 + $0x44] ss:$8 sps:$4 sm:$0xff]   ;;  %s4899_s13 = scalar_lea.vmem %s5249_s10, %s4893_s12 }
  0x18   : > { %v3665_v9 = vld [vmem:[%s3659_s29] sm:$0xff]  ;;  %v3668_v10 = vld [vmem:[%s3659_s29 + $0x8] sm:$0xff]  ;;  %v3683_v16 = vld [vmem:[%s3659_s29 + $0x10] sm:$0xff]  ;;  %s4922_s23 = scalar_lea.vmem %s5245_s6, %s3187_s27  ;;  %s4955_s25 = scalar_lea.vmem %s5247_s8, %s4893_s12 }
  0x19   : > { %v3671_v11 = vld [vmem:[%s3659_s29 + $0x20] sm:$0xff]  ;;  %v538_v12 = vmul.f32 %v3665_v9, %v3665_v9  ;;  %v539_v13 = vmul.f32 %v3668_v10, %v3668_v10  ;;  %v3678_v14 = vld [vmem:[%s3659_s29 + $0x28] sm:$0xff]  ;;  %v3686_v17 = vld [vmem:[%s3659_s29 + $0x18] sm:$0xff]  ;;  %v540_v20 = vmul.f32 %v3683_v16, %v3683_v16  ;;  %s5148_s14 = scalar_lea.vmem %s5248_s9, %s4893_s12 }
  0x1a   : > { %v542_v15 = vmul.f32 %v3671_v11, %v3671_v11  ;;  %v543_v19 = vmul.f32 %v3678_v14, %v3678_v14  ;;  %v541_v21 = vmul.f32 %v3686_v17, %v3686_v17  ;;  %v3698_v22 = vld [vmem:[%s3659_s29 + $0x30] sm:$0xff]  ;;  %v3701_v23 = vld [vmem:[%s3659_s29 + $0x38] sm:$0xff]  ;;  %953 = vmatpush1.bf16.xpose.msra.mxu0 %v3285_v6  ;;  %v3714_v29 = vld [vmem:[%s3659_s29 + $0x40] sm:$0xff] }
  0x1b   : > { %v3704_v24 = vld [vmem:[%s3659_s29 + $0x50] sm:$0xff]  ;;  %v570_v25 = vadd.f32 %v539_v13, %v538_v12  ;;  %v544_v26 = vmul.f32 %v3698_v22, %v3698_v22  ;;  %v545_v27 = vmul.f32 %v3701_v23, %v3701_v23  ;;  %v3711_v28 = vld [vmem:[%s3659_s29 + $0x58] sm:$0xff]  ;;  %v3717_v30 = vld [vmem:[%s3659_s29 + $0x48] sm:$0xff]  ;;  %954 = vmatprep.subr.bf16.mxu0 %v3289_v8  ;;  %1258 = vmatpush1.bf16.xpose.msra.mxu1 %v3288_v7 }
  0x1c   : > { %v576_v31 = vadd.f32 %v543_v19, %v542_v15  ;;  %v573_v32 = vadd.f32 %v541_v21, %v540_v20  ;;  %v546_v33 = vmul.f32 %v3714_v29, %v3714_v29  ;;  %v547_v34 = vmul.f32 %v3717_v30, %v3717_v30  ;;  %v3728_v38 = vld [vmem:[%s3659_s29 + $0x60] sm:$0xff]  ;;  %v3731_v39 = vld [vmem:[%s3659_s29 + $0x68] sm:$0xff]  ;;  %v3734_v40 = vld [vmem:[%s3659_s29 + $0x70] sm:$0xff]  ;;  %1259 = vmatprep.subr.bf16.mxu1 %v3292_v18 }
  0x1d   : > { %571 = vadd.xlane.f32.xlu0 %v570_v25  ;;  %v579_v35 = vadd.f32 %v545_v27, %v544_v26  ;;  %v548_v36 = vmul.f32 %v3704_v24, %v3704_v24  ;;  %v549_v37 = vmul.f32 %v3711_v28, %v3711_v28  ;;  %v3737_v41 = vld [vmem:[%s3659_s29 + $0x78] sm:$0xff]  ;;  %v550_v46 = vmul.f32 %v3728_v38, %v3728_v38  ;;  %v3753_v48 = vld [vmem:[%s3659_s29 + $0x90] sm:$0xff]  ;;  %v3763_v53 = vld [vmem:[%s3659_s29 + $0x80] sm:$0xff] }
  0x1e   : > { %577 = vadd.xlane.f32.xlu1 %v576_v31  ;;  %v582_v45 = vadd.f32 %v547_v34, %v546_v33  ;;  %v551_v47 = vmul.f32 %v3731_v39, %v3731_v39  ;;  %v552_v50 = vmul.f32 %v3734_v40, %v3734_v40  ;;  %v553_v51 = vmul.f32 %v3737_v41, %v3737_v41  ;;  %v3760_v52 = vld [vmem:[%s3659_s29 + $0x98] sm:$0xff]  ;;  %v3766_v54 = vld [vmem:[%s3659_s29 + $0x88] sm:$0xff]  ;;  %v3776_v59 = vld [vmem:[%s3659_s29 + $0xb0] sm:$0xff] }
  0x1f   : > { %v585_v49 = vadd.f32 %v549_v37, %v548_v36  ;;  %v554_v57 = vmul.f32 %v3763_v53, %v3763_v53  ;;  %v555_v58 = vmul.f32 %v3766_v54, %v3766_v54  ;;  %v3779_v60 = vld [vmem:[%s3659_s29 + $0xb8] sm:$0xff]  ;;  %v3782_v61 = vld [vmem:[%s3659_s29 + $0xa0] sm:$0xff]  ;;  %v556_v63 = vmul.f32 %v3753_v48, %v3753_v48  ;;  %v3789_v1 = vld [vmem:[%s3659_s29 + $0xa8] sm:$0xff] }
  0x20   : > { %v588_v56 = vadd.f32 %v551_v47, %v550_v46  ;;  %v591_v62 = vadd.f32 %v553_v51, %v552_v50  ;;  %v557_v0 = vmul.f32 %v3760_v52, %v3760_v52  ;;  %v558_v6 = vmul.f32 %v3782_v61, %v3782_v61  ;;  %v3805_v8 = vld [vmem:[%s3659_s29 + $0xd0] sm:$0xff]  ;;  %v3304_v12 = vld [vmem:[%s5242_s3 + $0x44] ss:$8 sps:$4 sm:$0xff]   ;;  %v3821_v21 = vld [vmem:[%s3659_s29 + $0xd8] sm:$0xff] }
  0x21   : > { %574 = vadd.xlane.f32.xlu0 %v573_v32  ;;  %v594_v5 = vadd.f32 %v555_v58, %v554_v57  ;;  %v559_v7 = vmul.f32 %v3789_v1, %v3789_v1  ;;  %v560_v15 = vmul.f32 %v3776_v59, %v3776_v59  ;;  %v561_v18 = vmul.f32 %v3779_v60, %v3779_v60  ;;  %v3815_v19 = vld [vmem:[%s3659_s29 + $0xc0] sm:$0xff]  ;;  %v3818_v20 = vld [vmem:[%s3659_s29 + $0xc8] sm:$0xff]  ;;  %v3828_v31 = vld [vmem:[%s3659_s29 + $0xf0] sm:$0xff] }
  0x22   : > { %580 = vadd.xlane.f32.xlu1 %v579_v35  ;;  %955 = vmatpush1.bf16.xpose.msra.mxu0 %v3291_v42  ;;  %v597_v13 = vadd.f32 %v557_v0, %v556_v63  ;;  %v562_v26 = vmul.f32 %v3815_v19, %v3815_v19  ;;  %v563_v27 = vmul.f32 %v3818_v20, %v3818_v20  ;;  %v3831_v32 = vld [vmem:[%s3659_s29 + $0xf8] sm:$0xff]  ;;  %v3834_v33 = vld [vmem:[%s3659_s29 + $0xe0] sm:$0xff]  ;;  %v3841_v37 = vld [vmem:[%s3659_s29 + $0xe8] sm:$0xff] }
  0x23   : > { %1260 = vmatpush1.bf16.xpose.msra.mxu1 %v3294_v43  ;;  %956 = vmatprep.subr.bf16.mxu0 %v3295_v44  ;;  %v600_v25 = vadd.f32 %v559_v7, %v558_v6  ;;  %v603_v34 = vadd.f32 %v561_v18, %v560_v15  ;;  %v564_v35 = vmul.f32 %v3805_v8, %v3805_v8  ;;  %v3303_v42 = vld [vmem:[%s5241_s2 + $0x40] ss:$8 sps:$4 sm:$0xff]   ;;  %v3307_v44 = vld [vmem:[%s5241_s2 + $0x54] ss:$8 sps:$4 sm:$0xff]   ;;  %v3309_v58 = vld [vmem:[%s5241_s2 + $0x50] ss:$8 sps:$4 sm:$0xff]  }
  0x24   : > { %1261 = vmatprep.subr.bf16.mxu1 %v3298_v55  ;;  %v565_v36 = vmul.f32 %v3821_v21, %v3821_v21  ;;  %v3306_v43 = vld [vmem:[%s5242_s3 + $0x40] ss:$8 sps:$4 sm:$0xff]   ;;  %v566_v46 = vmul.f32 %v3834_v33, %v3834_v33  ;;  %v567_v47 = vmul.f32 %v3841_v37, %v3841_v37  ;;  %v568_v51 = vmul.f32 %v3828_v31, %v3828_v31  ;;  %v3313_v63 = vld [vmem:[%s5241_s2 + $0x64] ss:$8 sps:$4 sm:$0xff]   ;;  %v3321_v6 = vld [vmem:[%s5241_s2 + $0x70] ss:$8 sps:$4 sm:$0xff]  }
  0x25   : > { %583 = vadd.xlane.f32.xlu0 %v582_v45  ;;  %v606_v45 = vadd.f32 %v563_v27, %v562_v26  ;;  %v569_v55 = vmul.f32 %v3831_v32, %v3831_v32  ;;  %v3316_v0 = vld [vmem:[%s5242_s3 + $0x64] ss:$8 sps:$4 sm:$0xff]   ;;  %v3324_v7 = vld [vmem:[%s5242_s3 + $0x70] ss:$8 sps:$4 sm:$0xff]   ;;  %v3327_v15 = vld [vmem:[%s5241_s2 + $0x80] ss:$8 sps:$4 sm:$0xff]  }
  0x26   : > { %586 = vadd.xlane.f32.xlu1 %v585_v49  ;;  %v3310_v49 = vld [vmem:[%s5242_s3 + $0x54] ss:$8 sps:$4 sm:$0xff]   ;;  %v609_v50 = vadd.f32 %v565_v36, %v564_v35  ;;  %v3330_v18 = vld [vmem:[%s5242_s3 + $0x80] ss:$8 sps:$4 sm:$0xff]   ;;  %v3333_v27 = vld [vmem:[%s5241_s2 + $0x90] ss:$8 sps:$4 sm:$0xff]  }
  0x27   : > { %v615_v57 = vadd.f32 %v569_v55, %v568_v51  ;;  %v3334_v26 = vld [vmem:[%s5242_s3 + $0x94] ss:$8 sps:$4 sm:$0xff]   ;;  %v3337_v35 = vld [vmem:[%s5241_s2 + $0xa4] ss:$8 sps:$4 sm:$0xff]   ;;  %v3351_v51 = vld [vmem:[%s5241_s2 + $0xc0] ss:$8 sps:$4 sm:$0xff]  }
  0x28   : > { %v3340_v36 = vld [vmem:[%s5242_s3 + $0xa4] ss:$8 sps:$4 sm:$0xff]   ;;  %v3354_v55 = vld [vmem:[%s5242_s3 + $0xc0] ss:$8 sps:$4 sm:$0xff]  }
  0x29   : > { %589 = vadd.xlane.f32.xlu0 %v588_v56  ;;  %v612_v56 = vadd.f32 %v567_v47, %v566_v46  ;;  %v3345_v46 = vld [vmem:[%s5241_s2 + $0xb0] ss:$8 sps:$4 sm:$0xff]  }
  0x2a   : > { %592 = vadd.xlane.f32.xlu1 %v591_v62  ;;  %957 = vmatpush1.bf16.xpose.msra.mxu0 %v3297_v2  ;;  %v3312_v62 = vld [vmem:[%s5242_s3 + $0x50] ss:$8 sps:$4 sm:$0xff]   ;;  %v3315_v2 = vld [vmem:[%s5241_s2 + $0x60] ss:$8 sps:$4 sm:$0xff]  }
  0x2b   : > { %1262 = vmatpush1.bf16.xpose.msra.mxu1 %v3300_v3  ;;  %958 = vmatprep.subr.bf16.mxu0 %v3301_v4  ;;  %v3318_v3 = vld [vmem:[%s5242_s3 + $0x60] ss:$8 sps:$4 sm:$0xff]   ;;  %v3319_v4 = vld [vmem:[%s5241_s2 + $0x74] ss:$8 sps:$4 sm:$0xff]   ;;  %v3348_v47 = vld [vmem:[%s5242_s3 + $0xb0] ss:$8 sps:$4 sm:$0xff]  }
  0x2c   : > { %1263 = vmatprep.subr.bf16.mxu1 %v3304_v12  ;;  %v3325_v12 = vld [vmem:[%s5241_s2 + $0x84] ss:$8 sps:$4 sm:$0xff]  }
  0x2d   : > { %595 = vadd.xlane.f32.xlu0 %v594_v5  ;;  %v3322_v5 = vld [vmem:[%s5242_s3 + $0x74] ss:$8 sps:$4 sm:$0xff]  }
  0x2e   : > { %598 = vadd.xlane.f32.xlu1 %v597_v13  ;;  %v3328_v13 = vld [vmem:[%s5242_s3 + $0x84] ss:$8 sps:$4 sm:$0xff]  }
  0x31   : > { %601 = vadd.xlane.f32.xlu0 %v600_v25  ;;  %v3331_v25 = vld [vmem:[%s5241_s2 + $0x94] ss:$8 sps:$4 sm:$0xff]  }
  0x32   : > { %604 = vadd.xlane.f32.xlu1 %v603_v34  ;;  %959 = vmatpush1.bf16.xpose.msra.mxu0 %v3303_v42  ;;  %v3336_v34 = vld [vmem:[%s5242_s3 + $0x90] ss:$8 sps:$4 sm:$0xff]   ;;  %v3339_v42 = vld [vmem:[%s5241_s2 + $0xa0] ss:$8 sps:$4 sm:$0xff]  }
  0x33   : > { %1264 = vmatpush1.bf16.xpose.msra.mxu1 %v3306_v43  ;;  %960 = vmatprep.subr.bf16.mxu0 %v3307_v44  ;;  %v3342_v43 = vld [vmem:[%s5242_s3 + $0xa0] ss:$8 sps:$4 sm:$0xff]   ;;  %v3343_v44 = vld [vmem:[%s5241_s2 + $0xb4] ss:$8 sps:$4 sm:$0xff]  }
  0x34   : > { %1265 = vmatprep.subr.bf16.mxu1 %v3310_v49  ;;  %v3349_v49 = vld [vmem:[%s5241_s2 + $0xc4] ss:$8 sps:$4 sm:$0xff]  }
  0x35   : > { %607 = vadd.xlane.f32.xlu0 %v606_v45  ;;  %v3346_v45 = vld [vmem:[%s5242_s3 + $0xb4] ss:$8 sps:$4 sm:$0xff]  }
  0x36   : > { %610 = vadd.xlane.f32.xlu1 %v609_v50  ;;  %v3352_v50 = vld [vmem:[%s5242_s3 + $0xc4] ss:$8 sps:$4 sm:$0xff]  }
  0x39   : > { %613 = vadd.xlane.f32.xlu0 %v612_v56  ;;  %v3355_v56 = vld [vmem:[%s5241_s2 + $0xd4] ss:$8 sps:$4 sm:$0xff]  }
  0x3a   : > { %616 = vadd.xlane.f32.xlu1 %v615_v57  ;;  %961 = vmatpush1.bf16.xpose.msra.mxu0 %v3309_v58  ;;  %v3358_v57 = vld [vmem:[%s5242_s3 + $0xd4] ss:$8 sps:$4 sm:$0xff]   ;;  %v3357_v58 = vld [vmem:[%s5241_s2 + $0xd0] ss:$8 sps:$4 sm:$0xff]  }
  0x3b   : > { %1266 = vmatpush1.bf16.xpose.msra.mxu1 %v3312_v62  ;;  %962 = vmatprep.subr.bf16.mxu0 %v3313_v63  ;;  %v3360_v62 = vld [vmem:[%s5242_s3 + $0xd0] ss:$8 sps:$4 sm:$0xff]   ;;  %v3361_v63 = vld [vmem:[%s5241_s2 + $0xe4] ss:$8 sps:$4 sm:$0xff]  }
  0x3c   : > { %1267 = vmatprep.subr.bf16.mxu1 %v3316_v0  ;;  %v3364_v0 = vld [vmem:[%s5242_s3 + $0xe4] ss:$8 sps:$4 sm:$0xff]  }
  0x42   : > { %963 = vmatpush1.bf16.xpose.msra.mxu0 %v3315_v2  ;;  %v3363_v2 = vld [vmem:[%s5241_s2 + $0xe0] ss:$8 sps:$4 sm:$0xff]  }
  0x43   : > { %1268 = vmatpush1.bf16.xpose.msra.mxu1 %v3318_v3  ;;  %964 = vmatprep.subr.bf16.mxu0 %v3319_v4  ;;  %v3366_v3 = vld [vmem:[%s5242_s3 + $0xe0] ss:$8 sps:$4 sm:$0xff]   ;;  %v3367_v4 = vld [vmem:[%s5241_s2 + $0xf4] ss:$8 sps:$4 sm:$0xff]  }
  0x44   : > { %1269 = vmatprep.subr.bf16.mxu1 %v3322_v5  ;;  %v3370_v5 = vld [vmem:[%s5242_s3 + $0xf4] ss:$8 sps:$4 sm:$0xff]  }
  0x4a   : > { %965 = vmatpush1.bf16.xpose.msra.mxu0 %v3321_v6  ;;  %v3369_v6 = vld [vmem:[%s5241_s2 + $0xf0] ss:$8 sps:$4 sm:$0xff]  }
  0x4b   : > { %1270 = vmatpush1.bf16.xpose.msra.mxu1 %v3324_v7  ;;  %966 = vmatprep.subr.bf16.mxu0 %v3325_v12  ;;  %v3372_v7 = vld [vmem:[%s5242_s3 + $0xf0] ss:$8 sps:$4 sm:$0xff]   ;;  %v3375_v12 = vld [vmem:[%s5243_s4 + $0x4] ss:$8 sps:$4 sm:$0xff]  }
  0x4c   : > { %1271 = vmatprep.subr.bf16.mxu1 %v3328_v13 }
  0x52   : > { %967 = vmatpush1.bf16.xpose.msra.mxu0 %v3327_v15 }
  0x53   : > { %1272 = vmatpush1.bf16.xpose.msra.mxu1 %v3330_v18  ;;  %968 = vmatprep.subr.bf16.mxu0 %v3331_v25 }
  0x54   : > { %1273 = vmatprep.subr.bf16.mxu1 %v3334_v26 }
  0x5a   : > { %969 = vmatpush1.bf16.xpose.msra.mxu0 %v3333_v27 }
  0x5b   : > { %1274 = vmatpush1.bf16.xpose.msra.mxu1 %v3336_v34  ;;  %970 = vmatprep.subr.bf16.mxu0 %v3337_v35 }
  0x5c   : > { %1275 = vmatprep.subr.bf16.mxu1 %v3340_v36 }
  0x62   : > { %971 = vmatpush1.bf16.xpose.msra.mxu0 %v3339_v42  ;;  %v700_v42 = vlaneseq }
  0x63   : > { %1276 = vmatpush1.bf16.xpose.msra.mxu1 %v3342_v43  ;;  %972 = vmatprep.subr.bf16.mxu0 %v3343_v44 }
  0x64   : > { %1277 = vmatprep.subr.bf16.mxu1 %v3346_v45 }
  0x6a   : > { %973 = vmatpush1.bf16.xpose.msra.mxu0 %v3345_v46 }
  0x6b   : > { %1278 = vmatpush1.bf16.xpose.msra.mxu1 %v3348_v47  ;;  %974 = vmatprep.subr.bf16.mxu0 %v3349_v49 }
  0x6c   : > { %1279 = vmatprep.subr.bf16.mxu1 %v3352_v50  ;;  %v701_v50 = vshrl.u32 %v700_v42, 7 }
  0x72   : > { %975 = vmatpush1.bf16.xpose.msra.mxu0 %v3351_v51 }
  0x73   : > { %1280 = vmatpush1.bf16.xpose.msra.mxu1 %v3354_v55  ;;  %976 = vmatprep.subr.bf16.mxu0 %v3355_v56 }
  0x74   : > { %1281 = vmatprep.subr.bf16.mxu1 %v3358_v57 }
  0x7a   : > { %977 = vmatpush1.bf16.xpose.msra.mxu0 %v3357_v58  ;;  %v706_v58 = vsub.s32 1, %v701_v50 }
  0x7b   : > { %1282 = vmatpush1.bf16.xpose.msra.mxu1 %v3360_v62  ;;  %978 = vmatprep.subr.bf16.mxu0 %v3361_v63 }
  0x7c   : > { %1283 = vmatprep.subr.bf16.mxu1 %v3364_v0  ;;  %v537_v0 = vld [vmem:[%s5240_s1] sm:$0x3] }
  0x82   : > { %979 = vmatpush1.bf16.xpose.msra.mxu0 %v3363_v2  ;;  %v702_v2 = vsub.s32 0, %v701_v50 }
  0x83   : > { %1284 = vmatpush1.bf16.xpose.msra.mxu1 %v3366_v3  ;;  %980 = vmatprep.subr.bf16.mxu0 %v3367_v4 }
  0x84   : > { %1285 = vmatprep.subr.bf16.mxu1 %v3370_v5 }
  0x8a   : > { %981 = vmatpush1.bf16.xpose.msra.mxu0 %v3369_v6 }
  0x8b   : > { %1286 = vmatpush1.bf16.xpose.msra.mxu1 %v3372_v7  ;;  %1560 = vmatprep.subr.bf16.mxu0 %v3375_v12 }
  0xaa   : > { %v572_v13 = vpop.xlane.xlu0 %571 }
  0xab   : > { %v619_v15 = vmul.f32 0.00390625, %v572_v13  ;;  %v578_v18 = vpop.xlane.xlu1 %577 }
  0xac   : > { %v621_v25 = vmul.f32 0.00390625, %v578_v18 }
  0xad   : > { %v635_v26 = vadd.f32 1e-05, %v619_v15  ;;  %v3996_v15 = vrot.slane %v537_v0, %v706_v58 }
  0xae   : > { %v637_v27 = vadd.f32 1e-05, %v621_v25  ;;  %v575_v34 = vpop.xlane.xlu0 %574 }
  0xaf   : > { %3469 = vrsqrt.f32 %v635_v26  ;;  %v620_v35 = vmul.f32 0.00390625, %v575_v34  ;;  %v581_v36 = vpop.xlane.xlu1 %580 }
  0xb0   : > { %3471 = vrsqrt.f32 %v637_v27  ;;  %v622_v43 = vmul.f32 0.00390625, %v581_v36  ;;  %v4000_v27 = vrot.slane %v537_v0, %v702_v2  ;;  %v3378_v0 = vld [vmem:[%s5243_s4 + $0x14] ss:$8 sps:$4 sm:$0xff]  }
  0xb1   : > { %v636_v44 = vadd.f32 1e-05, %v620_v35 }
  0xb2   : > { %v638_v45 = vadd.f32 1e-05, %v622_v43  ;;  %v584_v46 = vpop.xlane.xlu0 %583 }
  0xb3   : > { %3473 = vrsqrt.f32 %v636_v44  ;;  %v587_v47 = vpop.xlane.xlu1 %586  ;;  %v623_v49 = vmul.f32 0.00390625, %v584_v46 }
  0xb4   : > { %3475 = vrsqrt.f32 %v638_v45  ;;  %v624_v51 = vmul.f32 0.00390625, %v587_v47 }
  0xb5   : > { %v639_v55 = vadd.f32 1e-05, %v623_v49 }
  0xb6   : > { %v640_v56 = vadd.f32 1e-05, %v624_v51  ;;  %v590_v57 = vpop.xlane.xlu0 %589 }
  0xb7   : > { %3477 = vrsqrt.f32 %v639_v55  ;;  %v593_v62 = vpop.xlane.xlu1 %592  ;;  %v625_v63 = vmul.f32 0.00390625, %v590_v57 }
  0xb8   : > { %3479 = vrsqrt.f32 %v640_v56  ;;  %v626_v3 = vmul.f32 0.00390625, %v593_v62 }
  0xb9   : > { %v3470_v4 = vpop.eup %3469  ;;  %v641_v5 = vadd.f32 1e-05, %v625_v63 }
  0xba   : > { %v3472_v6 = vpop.eup %3471  ;;  %v642_v7 = vadd.f32 1e-05, %v626_v3  ;;  %v596_v12 = vpop.xlane.xlu0 %595  ;;  %v668_v13 = vmul.f32 %v3470_v4, %v3668_v10  ;;  %v667_v26 = vmul.f32 %v3470_v4, %v3665_v9 }
  0xbb   : > { %v672_v18 = vmul.f32 %v3472_v6, %v3678_v14  ;;  %v599_v25 = vpop.xlane.xlu1 %598  ;;  %3481 = vrsqrt.f32 %v641_v5  ;;  %v627_v34 = vmul.f32 0.00390625, %v596_v12  ;;  %v671_v2 = vmul.f32 %v3472_v6, %v3671_v11 }
  0xbc   : > { %3483 = vrsqrt.f32 %v642_v7  ;;  %v628_v36 = vmul.f32 0.00390625, %v599_v25  ;;  %v711_v10 = vmul.f32 %v3996_v15, %v668_v13  ;;  %v710_v46 = vmul.f32 %v4000_v27, %v667_v26 }
  0xbd   : > { %v3474_v35 = vpop.eup %3473  ;;  %v715_v14 = vmul.f32 %v3996_v15, %v672_v18  ;;  %v643_v49 = vadd.f32 1e-05, %v627_v34  ;;  %v714_v6 = vmul.f32 %v4000_v27, %v671_v2 }
  0xbe   : > { %v3476_v42 = vpop.eup %3475  ;;  %v670_v43 = vmul.f32 %v3474_v35, %v3686_v17  ;;  %v669_v44 = vmul.f32 %v3474_v35, %v3683_v16  ;;  %v644_v55 = vadd.f32 1e-05, %v628_v36  ;;  %v602_v17 = vpop.xlane.xlu0 %601  ;;  %v3376_v35 = vld [vmem:[%s5243_s4 + $0x10] ss:$8 sps:$4 sm:$0xff]  }
  0xbf   : > { %v674_v45 = vmul.f32 %v3476_v42, %v3701_v23  ;;  %v3373_v23 = vld [vmem:[%s5243_s4] ss:$8 sps:$4 sm:$0xff]   ;;  %v605_v62 = vpop.xlane.xlu1 %604  ;;  %v673_v3 = vmul.f32 %v3476_v42, %v3698_v22  ;;  %3485 = vrsqrt.f32 %v643_v49  ;;  %v629_v5 = vmul.f32 0.00390625, %v602_v17 }
  0xc0   : > { %v713_v9 = vmul.f32 %v3996_v15, %v670_v43  ;;  %v712_v47 = vmul.f32 %v4000_v27, %v669_v44  ;;  %3487 = vrsqrt.f32 %v644_v55 }
  0xc1   : > { %v3478_v50 = vpop.eup %3477  ;;  %v717_v51 = vmul.f32 %v3996_v15, %v674_v45  ;;  %v716_v12 = vmul.f32 %v4000_v27, %v673_v3  ;;  %v645_v13 = vadd.f32 1e-05, %v629_v5  ;;  %v3384_v3 = vld [vmem:[%s5243_s4 + $0x34] ss:$8 sps:$4 sm:$0xff]  }
  0xc2   : > { %v3480_v56 = vpop.eup %3479  ;;  %v4011_v16 = vpack.c.bf16 %v713_v9, %v711_v10  ;;  %v4016_v57 = vpack.c.bf16 %v712_v47, %v710_v46  ;;  %v676_v58 = vmul.f32 %v3478_v50, %v3717_v30  ;;  %v630_v30 = vmul.f32 0.00390625, %v605_v62  ;;  %v608_v44 = vpop.xlane.xlu0 %607 }
  0xc3   : > { %v4019_v63 = vpack.c.bf16 %v717_v51, %v715_v14  ;;  %v678_v4 = vmul.f32 %v3480_v56, %v3711_v28  ;;  %v675_v18 = vmul.f32 %v3478_v50, %v3714_v29  ;;  %v677_v25 = vmul.f32 %v3480_v56, %v3704_v24  ;;  %v611_v34 = vpop.xlane.xlu1 %610  ;;  %v3381_v29 = vld [vmem:[%s5243_s4 + $0x24] ss:$8 sps:$4 sm:$0xff]  }
  0xc4   : > { %982 = vmatprep.mubr.bf16.mxu0 %v4011_v16  ;;  %1287 = vmatprep.mubr.bf16.mxu1 %v4011_v16  ;;  %v719_v11 = vmul.f32 %v3996_v15, %v676_v58  ;;  %v646_v26 = vadd.f32 1e-05, %v630_v30  ;;  %v4046_v10 = vpack.c.bf16 %v716_v12, %v714_v6  ;;  %3489 = vrsqrt.f32 %v645_v13  ;;  %v3382_v13 = vld [vmem:[%s5243_s4 + $0x30] ss:$8 sps:$4 sm:$0xff]  }
  0xc5   : > { %983 = vmatmul.mubr.bf16.vlgmr.msra.gmra.mrb[0].mxu0 %v4016_v57  ;;  %1288 = vmatmul.mubr.bf16.vlgmr.msra.gmra.mrb[0].mxu1 %v4016_v57  ;;  %v3482_v7 = vpop.eup %3481  ;;  %v721_v22 = vmul.f32 %v3996_v15, %v678_v4  ;;  %v632_v24 = vmul.f32 0.00390625, %v611_v34  ;;  %v718_v45 = vmul.f32 %v4000_v27, %v675_v18  ;;  %v720_v14 = vmul.f32 %v4000_v27, %v677_v25  ;;  %v3387_v34 = vld [vmem:[%s5243_s4 + $0x44] ss:$8 sps:$4 sm:$0xff]  }
  0xc6   : > { %1561 = vmatpush1.bf16.xpose.msra.mxu0 %v3373_v23  ;;  %992 = vmatprep.mubr.bf16.mxu0 %v4019_v63  ;;  %v3484_v28 = vpop.eup %3483  ;;  %v680_v42 = vmul.f32 %v3482_v7, %v3731_v39  ;;  %3491 = vrsqrt.f32 %v646_v26  ;;  %v631_v39 = vmul.f32 0.00390625, %v608_v44  ;;  %v679_v51 = vmul.f32 %v3482_v7, %v3728_v38  ;;  %v3379_v23 = vld [vmem:[%s5243_s4 + $0x20] ss:$8 sps:$4 sm:$0xff]   ;;  %v614_v2 = vpop.xlane.xlu0 %613 }
  0xc7   : > { %1297 = vmatprep.mubr.bf16.mxu1 %v4019_v63  ;;  %1562 = vmatprep.subr.bf16.mxu0 %v3378_v0  ;;  %v4042_v36 = vpack.c.bf16 %v721_v22, %v719_v11  ;;  %v682_v43 = vmul.f32 %v3484_v28, %v3737_v41  ;;  %v648_v49 = vadd.f32 1e-05, %v632_v24  ;;  %v4059_v50 = vpack.c.bf16 %v720_v14, %v718_v45  ;;  %v617_v56 = vpop.xlane.xlu1 %616 }
  0xc8   : > { %v723_v9 = vmul.f32 %v3996_v15, %v680_v42  ;;  %v681_v55 = vmul.f32 %v3484_v28, %v3734_v40  ;;  %v647_v17 = vadd.f32 1e-05, %v631_v39  ;;  %v634_v38 = vmul.f32 0.00390625, %v617_v56  ;;  %v4105_v42 = vld [vmem:[%s5246_s7] ss:$8 sps:$4 sm:$0xff]  }
  0xc9   : > { %v3486_v41 = vpop.eup %3485  ;;  %v725_v46 = vmul.f32 %v3996_v15, %v682_v43  ;;  %3493 = vrsqrt.f32 %v648_v49  ;;  %v722_v40 = vmul.f32 %v4000_v27, %v679_v51  ;;  %v633_v5 = vmul.f32 0.00390625, %v614_v2  ;;  %v4110_v43 = vld [vmem:[%s5246_s7 + $0x4] ss:$8 sps:$4 sm:$0xff]   ;;  %v3385_v39 = vld [vmem:[%s5243_s4 + $0x40] ss:$8 sps:$4 sm:$0xff]  }
  0xca   : > { %v3488_v47 = vpop.eup %3487  ;;  %v684_v62 = vmul.f32 %v3486_v41, %v3766_v54  ;;  %v724_v4 = vmul.f32 %v4000_v27, %v681_v55  ;;  %3495 = vrsqrt.f32 %v647_v17  ;;  %v650_v11 = vadd.f32 1e-05, %v634_v38  ;;  %1977 = vmatprep.subr.bf16.mxu1 %v4110_v43  ;;  %v4150_v55 = vld [vmem:[%s5246_s7 + $0x24] ss:$8 sps:$4 sm:$0xff]   ;;  %v4157_v56 = vld [vmem:[%s5246_s7 + $0x20] ss:$8 sps:$4 sm:$0xff]  }
  0xcb   : > { %v4066_v58 = vpack.c.bf16 %v725_v46, %v723_v9  ;;  %v686_v0 = vmul.f32 %v3488_v47, %v3760_v52  ;;  %v683_v28 = vmul.f32 %v3486_v41, %v3763_v53  ;;  %v685_v6 = vmul.f32 %v3488_v47, %v3753_v48  ;;  %1978 = vmatpush1.bf16.msra.mxu1 %v4105_v42  ;;  %v3388_v2 = vld [vmem:[%s5243_s4 + $0x50] ss:$8 sps:$4 sm:$0xff]  }
  0xcc   : > { %v727_v52 = vmul.f32 %v3996_v15, %v684_v62  ;;  %v4081_v22 = vpack.c.bf16 %v724_v4, %v722_v40  ;;  %v649_v12 = vadd.f32 1e-05, %v633_v5  ;;  %3497 = vrsqrt.f32 %v650_v11  ;;  %v3393_v4 = vld [vmem:[%s5243_s4 + $0x64] ss:$8 sps:$4 sm:$0xff]  }
  0xcd   : > { %993 = vmatmul.mubr.bf16.gmra.mrb[4].mxu0 %v4046_v10  ;;  %1298 = vmatmul.mubr.bf16.gmra.mrb[4].mxu1 %v4046_v10  ;;  %v729_v30 = vmul.f32 %v3996_v15, %v686_v0  ;;  %v726_v48 = vmul.f32 %v4000_v27, %v683_v28  ;;  %v728_v53 = vmul.f32 %v4000_v27, %v685_v6  ;;  %v3396_v6 = vld [vmem:[%s5243_s4 + $0x74] ss:$8 sps:$4 sm:$0xff]  }
  0xce   : > { %1563 = vmatpush1.bf16.xpose.msra.mxu0 %v3376_v35  ;;  %1002 = vmatprep.mubr.bf16.mxu0 %v4042_v36  ;;  %v3490_v54 = vpop.eup %3489  ;;  %3499 = vrsqrt.f32 %v649_v12 }
  0xcf   : > { %1307 = vmatprep.mubr.bf16.mxu1 %v4042_v36  ;;  %1564 = vmatprep.subr.bf16.mxu0 %v3381_v29  ;;  %v4088_v18 = vpack.c.bf16 %v729_v30, %v727_v52  ;;  %v688_v25 = vmul.f32 %v3490_v54, %v3789_v1  ;;  %v4116_v29 = vld [vmem:[%s5246_s7 + $0x14] ss:$8 sps:$4 sm:$0xff]   ;;  %v4119_v24 = vpack.c.bf16 %v728_v53, %v726_v48  ;;  %v4195_v52 = vld [vmem:[%s5246_s7 + $0x44] ss:$8 sps:$4 sm:$0xff]   ;;  %v4253_v53 = vld [vmem:[%s5246_s7 + $0x60] ss:$8 sps:$4 sm:$0xff]  }
  0xd0   : > { %v3492_v7 = vpop.eup %3491  ;;  %v687_v45 = vmul.f32 %v3490_v54, %v3782_v61  ;;  %1979 = vmatprep.subr.bf16.mxu1 %v4116_v29  ;;  %v3390_v61 = vld [vmem:[%s5243_s4 + $0x54] ss:$8 sps:$4 sm:$0xff]   ;;  %v4247_v48 = vld [vmem:[%s5246_s7 + $0x64] ss:$8 sps:$4 sm:$0xff]  }
  0xd1   : > { %v690_v26 = vmul.f32 %v3492_v7, %v3779_v60  ;;  %v731_v60 = vmul.f32 %v3996_v15, %v688_v25  ;;  %v689_v14 = vmul.f32 %v3492_v7, %v3776_v59  ;;  %v4138_v59 = vld [vmem:[%s5246_s7 + $0x10] ss:$8 sps:$4 sm:$0xff]  }
  0xd2   : > { %v730_v47 = vmul.f32 %v4000_v27, %v687_v45  ;;  %1980 = vmatpush1.bf16.msra.mxu1 %v4138_v59  ;;  %v4233_v25 = vld [vmem:[%s5246_s7 + $0x50] ss:$8 sps:$4 sm:$0xff]   ;;  %v4286_v45 = vld [vmem:[%s5246_s7 + $0x80] ss:$8 sps:$4 sm:$0xff]  }
  0xd3   : > { %v3494_v35 = vpop.eup %3493  ;;  %v733_v1 = vmul.f32 %v3996_v15, %v690_v26  ;;  %1981 = vmatprep.subr.bf16.mxu1 %v4150_v55 }
  0xd4   : > { %v3496_v44 = vpop.eup %3495  ;;  %v694_v46 = vmul.f32 %v3494_v35, %v3821_v21  ;;  %v693_v0 = vmul.f32 %v3494_v35, %v3805_v8  ;;  %v4178_v8 = vld [vmem:[%s5246_s7 + $0x34] ss:$8 sps:$4 sm:$0xff]  }
  0xd5   : > { %1003 = vmatmul.mubr.bf16.gmra.mrb[8].mxu0 %v4059_v50  ;;  %1308 = vmatmul.mubr.bf16.gmra.mrb[8].mxu1 %v4059_v50  ;;  %v4127_v41 = vpack.c.bf16 %v733_v1, %v731_v60  ;;  %v692_v9 = vmul.f32 %v3496_v44, %v3818_v20  ;;  %v732_v20 = vmul.f32 %v4000_v27, %v689_v14  ;;  %v4260_v35 = vld [vmem:[%s5246_s7 + $0x74] ss:$8 sps:$4 sm:$0xff]   ;;  %v4268_v60 = vld [vmem:[%s5246_s7 + $0x70] ss:$8 sps:$4 sm:$0xff]   ;;  %v4274_v1 = vld [vmem:[%s5246_s7 + $0x84] ss:$8 sps:$4 sm:$0xff]  }
  0xd6   : > { %1565 = vmatpush1.bf16.xpose.msra.mxu0 %v3379_v23  ;;  %1012 = vmatprep.mubr.bf16.mxu0 %v4066_v58  ;;  %v3498_v21 = vpop.eup %3497  ;;  %v737_v51 = vmul.f32 %v3996_v15, %v694_v46  ;;  %v691_v62 = vmul.f32 %v3496_v44, %v3815_v19  ;;  %v3402_v44 = vld [vmem:[%s5243_s4 + $0x94] ss:$8 sps:$4 sm:$0xff]   ;;  %v3400_v46 = vld [vmem:[%s5243_s4 + $0x90] ss:$8 sps:$4 sm:$0xff]  }
  0xd7   : > { %1317 = vmatprep.mubr.bf16.mxu1 %v4066_v58  ;;  %1566 = vmatprep.subr.bf16.mxu0 %v3384_v3  ;;  %v735_v49 = vmul.f32 %v3996_v15, %v692_v9  ;;  %v4159_v23 = vpack.c.bf16 %v732_v20, %v730_v47  ;;  %v698_v40 = vmul.f32 %v3498_v21, %v3831_v32  ;;  %v4187_v32 = vld [vmem:[%s5246_s7 + $0x30] ss:$8 sps:$4 sm:$0xff]   ;;  %v4292_v14 = vld [vmem:[%s5246_s7 + $0x94] ss:$8 sps:$4 sm:$0xff]   ;;  %v4304_v9 = vld [vmem:[%s5246_s7 + $0xa4] ss:$8 sps:$4 sm:$0xff]  }
  0xd8   : > { %v3500_v17 = vpop.eup %3499  ;;  %1982 = vmatpush1.bf16.msra.mxu1 %v4157_v56  ;;  %v734_v19 = vmul.f32 %v4000_v27, %v691_v62  ;;  %v697_v11 = vmul.f32 %v3498_v21, %v3828_v31  ;;  %v4316_v47 = vld [vmem:[%s5246_s7 + $0xa0] ss:$8 sps:$4 sm:$0xff]   ;;  %v4322_v20 = vld [vmem:[%s5246_s7 + $0xb4] ss:$8 sps:$4 sm:$0xff]   ;;  %v4328_v21 = vld [vmem:[%s5246_s7 + $0xb0] ss:$8 sps:$4 sm:$0xff]  }
  0xd9   : > { %v4167_v3 = vpack.c.bf16 %v737_v51, %v735_v49  ;;  %v696_v38 = vmul.f32 %v3500_v17, %v3841_v37  ;;  %v736_v37 = vmul.f32 %v4000_v27, %v693_v0  ;;  %v741_v54 = vmul.f32 %v3996_v15, %v698_v40  ;;  %1983 = vmatprep.subr.bf16.mxu1 %v4178_v8  ;;  %v4334_v49 = vld [vmem:[%s5246_s7 + $0xc4] ss:$8 sps:$4 sm:$0xff]   ;;  %v3403_v51 = vld [vmem:[%s5243_s4 + $0xa0] ss:$8 sps:$4 sm:$0xff]   ;;  %v4352_v0 = vld [vmem:[%s5246_s7 + $0xd4] ss:$8 sps:$4 sm:$0xff]  }
  0xda   : > { %v695_v7 = vmul.f32 %v3500_v17, %v3834_v33  ;;  %v4216_v33 = vld [vmem:[%s5246_s7 + $0x40] ss:$8 sps:$4 sm:$0xff]   ;;  %v740_v12 = vmul.f32 %v4000_v27, %v697_v11  ;;  %v3408_v17 = vld [vmem:[%s5243_s4 + $0xb4] ss:$8 sps:$4 sm:$0xff]   ;;  %v3406_v40 = vld [vmem:[%s5243_s4 + $0xb0] ss:$8 sps:$4 sm:$0xff]  }
  0xdb   : > { %v739_v5 = vmul.f32 %v3996_v15, %v696_v38  ;;  %v4199_v30 = vpack.c.bf16 %v736_v37, %v734_v19  ;;  %v3391_v15 = vld [vmem:[%s5243_s4 + $0x60] ss:$8 sps:$4 sm:$0xff]   ;;  %v4364_v38 = vld [vmem:[%s5246_s7 + $0xe4] ss:$8 sps:$4 sm:$0xff]   ;;  %v4382_v37 = vld [vmem:[%s5246_s7 + $0xf4] ss:$8 sps:$4 sm:$0xff]  }
  0xdc   : > { %1984 = vmatpush1.bf16.msra.mxu1 %v4187_v32  ;;  %v738_v31 = vmul.f32 %v4000_v27, %v695_v7  ;;  %v3394_v27 = vld [vmem:[%s5243_s4 + $0x70] ss:$8 sps:$4 sm:$0xff]   ;;  %v4346_v62 = vld [vmem:[%s5246_s7 + $0xc0] ss:$8 sps:$4 sm:$0xff]   ;;  %v3414_v7 = vld [vmem:[%s5243_s4 + $0xd4] ss:$8 sps:$4 sm:$0xff]  }
  0xdd   : > { %1013 = vmatmul.mubr.bf16.gmra.mrb[12].mxu0 %v4081_v22  ;;  %1318 = vmatmul.mubr.bf16.gmra.mrb[12].mxu1 %v4081_v22  ;;  %v4207_v28 = vpack.c.bf16 %v741_v54, %v739_v5  ;;  %v4376_v19 = vld [vmem:[%s5246_s7 + $0xe0] ss:$8 sps:$4 sm:$0xff]   ;;  %v4388_v5 = vld [vmem:[%s5246_s7 + $0xf0] ss:$8 sps:$4 sm:$0xff]  }
  0xde   : > { %1567 = vmatpush1.bf16.xpose.msra.mxu0 %v3382_v13  ;;  %1022 = vmatprep.mubr.bf16.mxu0 %v4088_v18  ;;  %v4225_v13 = vld [vmem:[%s5246_s7 + $0x54] ss:$8 sps:$4 sm:$0xff]   ;;  %v4235_v26 = vpack.c.bf16 %v740_v12, %v738_v31  ;;  %v3409_v54 = vld [vmem:[%s5243_s4 + $0xc0] ss:$8 sps:$4 sm:$0xff]   ;;  %v3412_v11 = vld [vmem:[%s5243_s4 + $0xd0] ss:$8 sps:$4 sm:$0xff]  }
  0xdf   : > { %1327 = vmatprep.mubr.bf16.mxu1 %v4088_v18  ;;  %1568 = vmatprep.subr.bf16.mxu0 %v3387_v34  ;;  %v3399_v34 = vld [vmem:[%s5243_s4 + $0x84] ss:$8 sps:$4 sm:$0xff]   ;;  %v3418_v31 = vld [vmem:[%s5243_s4 + $0xf0] ss:$8 sps:$4 sm:$0xff]  }
  0xe0   : > { %1985 = vmatprep.subr.bf16.mxu1 %v4195_v52 }
  0xe1   : > { %1986 = vmatpush1.bf16.msra.mxu1 %v4216_v33 }
  0xe2   : > { %1987 = vmatprep.subr.bf16.mxu1 %v4225_v13 }
  0xe5   : > { %1023 = vmatmul.mubr.bf16.gmra.mrb[16].mxu0 %v4119_v24  ;;  %1328 = vmatmul.mubr.bf16.gmra.mrb[16].mxu1 %v4119_v24 }
  0xe6   : > { %1569 = vmatpush1.bf16.xpose.msra.mxu0 %v3385_v39  ;;  %1032 = vmatprep.mubr.bf16.mxu0 %v4127_v41  ;;  %v4298_v39 = vld [vmem:[%s5246_s7 + $0x90] ss:$8 sps:$4 sm:$0xff]  }
  0xe7   : > { %1337 = vmatprep.mubr.bf16.mxu1 %v4127_v41  ;;  %1570 = vmatprep.subr.bf16.mxu0 %v3390_v61  ;;  %v3405_v61 = vld [vmem:[%s5243_s4 + $0xa4] ss:$8 sps:$4 sm:$0xff]  }
  0xe8   : > { %1988 = vmatpush1.bf16.msra.mxu1 %v4233_v25 }
  0xe9   : > { %1989 = vmatprep.subr.bf16.mxu1 %v4247_v48 }
  0xec   : > { %1990 = vmatpush1.bf16.msra.mxu1 %v4253_v53 }
  0xed   : > { %1033 = vmatmul.mubr.bf16.gmra.mrb[20].mxu0 %v4159_v23  ;;  %1338 = vmatmul.mubr.bf16.gmra.mrb[20].mxu1 %v4159_v23 }
  0xee   : > { %1571 = vmatpush1.bf16.xpose.msra.mxu0 %v3388_v2  ;;  %1042 = vmatprep.mubr.bf16.mxu0 %v4167_v3  ;;  %v4358_v2 = vld [vmem:[%s5246_s7 + $0xd0] ss:$8 sps:$4 sm:$0xff]  }
  0xef   : > { %1347 = vmatprep.mubr.bf16.mxu1 %v4167_v3  ;;  %1572 = vmatprep.subr.bf16.mxu0 %v3393_v4  ;;  %v3411_v4 = vld [vmem:[%s5243_s4 + $0xc4] ss:$8 sps:$4 sm:$0xff]  }
  0xf0   : > { %1991 = vmatprep.subr.bf16.mxu1 %v4260_v35 }
  0xf1   : > { %1992 = vmatpush1.bf16.msra.mxu1 %v4268_v60 }
  0xf2   : > { %1993 = vmatprep.subr.bf16.mxu1 %v4274_v1 }
  0xf5   : > { %1043 = vmatmul.mubr.bf16.gmra.mrb[24].mxu0 %v4199_v30  ;;  %1348 = vmatmul.mubr.bf16.gmra.mrb[24].mxu1 %v4199_v30 }
  0xf6   : > { %1573 = vmatpush1.bf16.xpose.msra.mxu0 %v3391_v15  ;;  %1052 = vmatprep.mubr.bf16.mxu0 %v4207_v28  ;;  %v3417_v15 = vld [vmem:[%s5243_s4 + $0xe4] ss:$8 sps:$4 sm:$0xff]  }
  0xf7   : > { %1357 = vmatprep.mubr.bf16.mxu1 %v4207_v28  ;;  %1574 = vmatprep.subr.bf16.mxu0 %v3396_v6  ;;  %v3415_v6 = vld [vmem:[%s5243_s4 + $0xe0] ss:$8 sps:$4 sm:$0xff]  }
  0xf8   : > { %1994 = vmatpush1.bf16.msra.mxu1 %v4286_v45 }
  0xf9   : > { %1995 = vmatprep.subr.bf16.mxu1 %v4292_v14 }
  0xfc   : > { %1996 = vmatpush1.bf16.msra.mxu1 %v4298_v39 }
  0xfd   : > { %1053 = vmatmul.mubr.bf16.gmra.mrb[28].mxu0 %v4235_v26  ;;  %1358 = vmatmul.mubr.bf16.gmra.mrb[28].mxu1 %v4235_v26 }
  0xfe   : > { %1575 = vmatpush1.bf16.xpose.msra.mxu0 %v3394_v27  ;;  %1592 = vmatprep.mubr.bf16.mxu0 %v4011_v16  ;;  %v3397_v16 = vld [vmem:[%s5243_s4 + $0x80] ss:$8 sps:$4 sm:$0xff]  }
  0xff   : > { %1576 = vmatprep.subr.bf16.mxu0 %v3399_v34  ;;  %1997 = vmatprep.subr.bf16.mxu1 %v4304_v9 }
 0x100   : > { %1998 = vmatpush1.bf16.msra.mxu1 %v4316_v47 }
 0x101   : > { %1999 = vmatprep.subr.bf16.mxu1 %v4322_v20 }
 0x104   : > { %2000 = vmatpush1.bf16.msra.mxu1 %v4328_v21 }
 0x105   : > { %2001 = vmatprep.subr.bf16.mxu1 %v4334_v49 }
 0x106   : > { %1577 = vmatpush1.bf16.xpose.msra.mxu0 %v3397_v16 }
 0x107   : > { %1578 = vmatprep.subr.bf16.mxu0 %v3402_v44 }
 0x108   : > { %2002 = vmatpush1.bf16.msra.mxu1 %v4346_v62 }
 0x109   : > { %2003 = vmatprep.subr.bf16.mxu1 %v4352_v0 }
 0x10c   : > { %2004 = vmatpush1.bf16.msra.mxu1 %v4358_v2 }
 0x10d   : > { %2005 = vmatprep.subr.bf16.mxu1 %v4364_v38 }
 0x10e   : > { %1579 = vmatpush1.bf16.xpose.msra.mxu0 %v3400_v46  ;;  %v4490_v46 = vld [vmem:[%s4435_s30 + $0x20] sm:$0xff] }
 0x10f   : > { %1580 = vmatprep.subr.bf16.mxu0 %v3405_v61  ;;  %v4493_v61 = vld [vmem:[%s4435_s30 + $0x28] sm:$0xff] }
 0x110   : > { %2006 = vmatpush1.bf16.msra.mxu1 %v4376_v19 }
 0x111   : > { %2007 = vmatprep.subr.bf16.mxu1 %v4382_v37 }
 0x114   : > { %2008 = vmatpush1.bf16.msra.mxu1 %v4388_v5 }
 0x115   : > { %2202 = vmatprep.subr.bf16.mxu1 %v4110_v43  ;;  %v3420_v43 = vld [vmem:[%s5243_s4 + $0xf4] ss:$8 sps:$4 sm:$0xff]  }
 0x116   : > { %1581 = vmatpush1.bf16.xpose.msra.mxu0 %v3403_v51 }
 0x117   : > { %1582 = vmatprep.subr.bf16.mxu0 %v3408_v17 }
 0x11e   : > { %1583 = vmatpush1.bf16.xpose.msra.mxu0 %v3406_v40  ;;  %v4501_v40 = vld [vmem:[%s4435_s30 + $0x30] sm:$0xff] }
 0x11f   : > { %1584 = vmatprep.subr.bf16.mxu0 %v3411_v4 }
 0x126   : > { %1585 = vmatpush1.bf16.xpose.msra.mxu0 %v3409_v54 }
 0x127   : > { %1586 = vmatprep.subr.bf16.mxu0 %v3414_v7 }
 0x12e   : > { %1587 = vmatpush1.bf16.xpose.msra.mxu0 %v3412_v11  ;;  %v4513_v11 = vld [vmem:[%s4435_s30 + $0x38] sm:$0xff] }
 0x12f   : > { %1588 = vmatprep.subr.bf16.mxu0 %v3417_v15  ;;  %5296 = vst [vmem:[#allocation7_spill] sm:$0xff] %v4513_v11 }
 0x136   : > { %1589 = vmatpush1.bf16.xpose.msra.mxu0 %v3415_v6 }
 0x137   : > { %1590 = vmatprep.subr.bf16.mxu0 %v3420_v43 }
 0x13e   : > { %1591 = vmatpush1.bf16.xpose.msra.mxu0 %v3418_v31 }
 0x145   : > { %1593 = vmatmul.mubr.bf16.vlgmr.msra.gmra.mrb[32].mxu0 %v4016_v57  ;;  %v4438_v57 = vld [vmem:[%s4435_s30] sm:$0xff] }
 0x146   : > { %1602 = vmatprep.mubr.bf16.mxu0 %v4019_v63  ;;  %v4441_v63 = vld [vmem:[%s4435_s30 + $0x8] sm:$0xff] }
 0x14d   : > { %1603 = vmatmul.mubr.bf16.gmra.mrb[36].mxu0 %v4046_v10 }
 0x14e   : > { %1612 = vmatprep.mubr.bf16.mxu0 %v4042_v36 }
 0x155   : > { %1613 = vmatmul.mubr.bf16.gmra.mrb[40].mxu0 %v4059_v50  ;;  %v4448_v50 = vld [vmem:[%s4435_s30 + $0x10] sm:$0xff] }
 0x156   : > { %1622 = vmatprep.mubr.bf16.mxu0 %v4066_v58 }
 0x15d   : > { %1623 = vmatmul.mubr.bf16.gmra.mrb[44].mxu0 %v4081_v22 }
 0x15e   : > { %1632 = vmatprep.mubr.bf16.mxu0 %v4088_v18 }
 0x165   : > { %1633 = vmatmul.mubr.bf16.gmra.mrb[48].mxu0 %v4119_v24  ;;  %v4459_v24 = vld [vmem:[%s4435_s30 + $0x18] sm:$0xff] }
 0x166   : > { %1642 = vmatprep.mubr.bf16.mxu0 %v4127_v41 }
 0x16d   : > { %1643 = vmatmul.mubr.bf16.gmra.mrb[52].mxu0 %v4159_v23 }
 0x16e   : > { %1652 = vmatprep.mubr.bf16.mxu0 %v4167_v3 }
 0x175   : > { %1653 = vmatmul.mubr.bf16.gmra.mrb[56].mxu0 %v4199_v30 }
 0x176   : > { %1662 = vmatprep.mubr.bf16.mxu0 %v4207_v28 }
 0x17d   : > { %1663 = vmatmul.mubr.bf16.gmra.mrb[60].mxu0 %v4235_v26 }
 0x198   : > { %v4443_v36 = vpop.f32.mrb[0].mxu0  ;;  %v4445_v10 = vpop.f32.mrb[0].mxu1 }
 0x199   : > { %v4452_v58 = vmul.f32 %v4438_v57, %v4445_v10  ;;  %v4454_v22 = vpop.f32.mrb[1].mxu0  ;;  %v4456_v18 = vpop.f32.mrb[1].mxu1 }
 0x19a   : > { %v4463_v41 = vmul.f32 %v4441_v63, %v4456_v18  ;;  %v4465_v23 = vpop.f32.mrb[2].mxu0  ;;  %v4467_v3 = vpop.f32.mrb[2].mxu1 }
 0x19b   : > { %5291 = vst [vmem:[#allocation2_spill] sm:$0xff] %v4452_v58  ;;  %v1801_v30 = vpack.c.bf16 %v4465_v23, %v4443_v36  ;;  %v4473_v28 = vmul.f32 %v4448_v50, %v4467_v3  ;;  %v4477_v26 = vpop.f32.mrb[3].mxu0  ;;  %v4479_v27 = vpop.f32.mrb[3].mxu1 }
 0x19c   : > { %5292 = vst [vmem:[#allocation3_spill] sm:$0xff] %v4463_v41  ;;  %v1802_v34 = vpack.c.bf16 %v4477_v26, %v4454_v22  ;;  %v4485_v16 = vmul.f32 %v4459_v24, %v4479_v27 }
 0x19d   : > { %5293 = vst [vmem:[#allocation4_spill] sm:$0xff] %v4473_v28 }
 0x19e   : > { %5294 = vst [vmem:[#allocation5_spill] sm:$0xff] %v4485_v16  ;;  %2009 = vmatprep.mubr.bf16.mxu1 %v1802_v34 }
 0x19f   : > { %2010 = vmatmul.mubr.bf16.vlgmr.msra.gmra.mrb[32].mxu1 %v1801_v30 }
 0x1a0   : > { %2203 = vmatpush1.bf16.msra.mxu1 %v4105_v42  ;;  %v4496_v51 = vpop.f32.mrb[4].mxu0  ;;  %v4498_v17 = vpop.f32.mrb[4].mxu1 }
 0x1a1   : > { %v4505_v4 = vmul.f32 %v4490_v46, %v4498_v17  ;;  %v4507_v54 = vpop.f32.mrb[5].mxu0  ;;  %v4509_v7 = vpop.f32.mrb[5].mxu1  ;;  %2204 = vmatprep.subr.bf16.mxu1 %v4116_v29  ;;  %v4546_v29 = vld [vmem:[%s4435_s30 + $0x40] sm:$0xff] }
 0x1a2   : > { %v4517_v42 = vmul.f32 %v4493_v61, %v4509_v7  ;;  %v4519_v15 = vpop.f32.mrb[6].mxu0  ;;  %v4521_v6 = vpop.f32.mrb[6].mxu1  ;;  %5300 = vst [vmem:[#allocation11_spill] sm:$0xff] %v4546_v29 }
 0x1a3   : > { %5295 = vst [vmem:[#allocation6_spill] sm:$0xff] %v4505_v4  ;;  %v1803_v43 = vpack.c.bf16 %v4519_v15, %v4496_v51  ;;  %v4527_v31 = vmul.f32 %v4501_v40, %v4521_v6  ;;  %v4531_v30 = vpop.f32.mrb[7].mxu0  ;;  %v4533_v34 = vpop.f32.mrb[7].mxu1 }
 0x1a4   : > { %5297 = vst [vmem:[#allocation8_spill] sm:$0xff] %v4517_v42  ;;  %v1804_v12 = vpack.c.bf16 %v4531_v30, %v4507_v54  ;;  %v4539_v44 = vmul.f32 %v4513_v11, %v4533_v34  ;;  %2205 = vmatpush1.bf16.msra.mxu1 %v4138_v59 }
 0x1a5   : > { %5298 = vst [vmem:[#allocation9_spill] sm:$0xff] %v4527_v31  ;;  %2206 = vmatprep.subr.bf16.mxu1 %v4150_v55  ;;  %v4549_v31 = vld [vmem:[%s4435_s30 + $0x48] sm:$0xff] }
 0x1a6   : > { %5299 = vst [vmem:[#allocation10_spill] sm:$0xff] %v4539_v44  ;;  %2019 = vmatprep.mubr.bf16.mxu1 %v1804_v12  ;;  %5301 = vst [vmem:[#allocation12_spill] sm:$0xff] %v4549_v31  ;;  %v4557_v44 = vld [vmem:[%s4435_s30 + $0x50] sm:$0xff]  ;;  %v4569_v12 = vld [vmem:[%s4435_s30 + $0x58] sm:$0xff] }
 0x1a7   : > { %2020 = vmatmul.mubr.bf16.gmra.mrb[36].mxu1 %v1803_v43  ;;  %5303 = vst [vmem:[#allocation14_spill] sm:$0xff] %v4557_v44  ;;  %5306 = vst [vmem:[#allocation17_spill] sm:$0xff] %v4569_v12 }
 0x1a8   : > { %2207 = vmatpush1.bf16.msra.mxu1 %v4157_v56  ;;  %v4552_v4 = vpop.f32.mrb[8].mxu0  ;;  %v4554_v16 = vpop.f32.mrb[8].mxu1 }
 0x1a9   : > { %5302 = vst [vmem:[#allocation13_spill] sm:$0xff] %v4552_v4  ;;  %v4561_v42 = vmul.f32 %v4546_v29, %v4554_v16  ;;  %v4563_v59 = vpop.f32.mrb[9].mxu0  ;;  %v4565_v55 = vpop.f32.mrb[9].mxu1  ;;  %2208 = vmatprep.subr.bf16.mxu1 %v4178_v8  ;;  %v4602_v8 = vld [vmem:[%s4435_s30 + $0x60] sm:$0xff] }
 0x1aa   : > { %5305 = vst [vmem:[#allocation16_spill] sm:$0xff] %v4563_v59  ;;  %v4573_v56 = vmul.f32 %v4549_v31, %v4565_v55  ;;  %v4575_v43 = vpop.f32.mrb[10].mxu0  ;;  %v4577_v28 = vpop.f32.mrb[10].mxu1  ;;  %5312 = vst [vmem:[#allocation23_spill] sm:$0xff] %v4602_v8 }
 0x1ab   : > { %5304 = vst [vmem:[#allocation15_spill] sm:$0xff] %v4561_v42  ;;  %5308 = vst [vmem:[#allocation19_spill] sm:$0xff] %v4575_v43  ;;  %v1805_v42 = vpack.c.bf16 %v4575_v43, %v4552_v4  ;;  %v4583_v41 = vmul.f32 %v4557_v44, %v4577_v28  ;;  %v4587_v58 = vpop.f32.mrb[11].mxu0  ;;  %v4589_v31 = vpop.f32.mrb[11].mxu1 }
 0x1ac   : > { %5307 = vst [vmem:[#allocation18_spill] sm:$0xff] %v4573_v56  ;;  %5310 = vst [vmem:[#allocation21_spill] sm:$0xff] %v4587_v58  ;;  %v1806_v56 = vpack.c.bf16 %v4587_v58, %v4563_v59  ;;  %v4595_v29 = vmul.f32 %v4569_v12, %v4589_v31  ;;  %2209 = vmatpush1.bf16.msra.mxu1 %v4187_v32 }
 0x1ad   : > { %5309 = vst [vmem:[#allocation20_spill] sm:$0xff] %v4583_v41  ;;  %2210 = vmatprep.subr.bf16.mxu1 %v4195_v52  ;;  %v4605_v41 = vld [vmem:[%s4435_s30 + $0x68] sm:$0xff] }
 0x1ae   : > { %5311 = vst [vmem:[#allocation22_spill] sm:$0xff] %v4595_v29  ;;  %2029 = vmatprep.mubr.bf16.mxu1 %v1806_v56  ;;  %5313 = vst [vmem:[#allocation24_spill] sm:$0xff] %v4605_v41  ;;  %v4613_v29 = vld [vmem:[%s4435_s30 + $0x70] sm:$0xff] }
 0x1af   : > { %2030 = vmatmul.mubr.bf16.gmra.mrb[40].mxu1 %v1805_v42  ;;  %5315 = vst [vmem:[#allocation26_spill] sm:$0xff] %v4613_v29  ;;  %v4625_v42 = vld [vmem:[%s4435_s30 + $0x78] sm:$0xff] }
 0x1b0   : > { %2211 = vmatpush1.bf16.msra.mxu1 %v4216_v33  ;;  %v4608_v58 = vpop.f32.mrb[12].mxu0  ;;  %v4610_v12 = vpop.f32.mrb[12].mxu1  ;;  %5318 = vst [vmem:[#allocation29_spill] sm:$0xff] %v4625_v42 }
 0x1b1   : > { %5314 = vst [vmem:[#allocation25_spill] sm:$0xff] %v4608_v58  ;;  %v4617_v44 = vmul.f32 %v4602_v8, %v4610_v12  ;;  %v4619_v32 = vpop.f32.mrb[13].mxu0  ;;  %v4621_v52 = vpop.f32.mrb[13].mxu1  ;;  %2212 = vmatprep.subr.bf16.mxu1 %v4225_v13  ;;  %v4658_v13 = vld [vmem:[%s4435_s30 + $0x80] sm:$0xff] }
 0x1b2   : > { %5317 = vst [vmem:[#allocation28_spill] sm:$0xff] %v4619_v32  ;;  %v4629_v33 = vmul.f32 %v4605_v41, %v4621_v52  ;;  %v4631_v56 = vpop.f32.mrb[14].mxu0  ;;  %v4633_v43 = vpop.f32.mrb[14].mxu1  ;;  %5324 = vst [vmem:[#allocation35_spill] sm:$0xff] %v4658_v13 }
 0x1b3   : > { %5316 = vst [vmem:[#allocation27_spill] sm:$0xff] %v4617_v44  ;;  %5320 = vst [vmem:[#allocation31_spill] sm:$0xff] %v4631_v56  ;;  %v1807_v44 = vpack.c.bf16 %v4631_v56, %v4608_v58  ;;  %v4639_v8 = vmul.f32 %v4613_v29, %v4633_v43  ;;  %v4643_v59 = vpop.f32.mrb[15].mxu0  ;;  %v4645_v41 = vpop.f32.mrb[15].mxu1 }
 0x1b4   : > { %5319 = vst [vmem:[#allocation30_spill] sm:$0xff] %v4629_v33  ;;  %5322 = vst [vmem:[#allocation33_spill] sm:$0xff] %v4643_v59  ;;  %v1808_v33 = vpack.c.bf16 %v4643_v59, %v4619_v32  ;;  %v4651_v4 = vmul.f32 %v4625_v42, %v4645_v41  ;;  %2213 = vmatpush1.bf16.msra.mxu1 %v4233_v25 }
 0x1b5   : > { %5321 = vst [vmem:[#allocation32_spill] sm:$0xff] %v4639_v8  ;;  %2214 = vmatprep.subr.bf16.mxu1 %v4247_v48  ;;  %v4661_v8 = vld [vmem:[%s4435_s30 + $0x88] sm:$0xff] }
 0x1b6   : > { %5323 = vst [vmem:[#allocation34_spill] sm:$0xff] %v4651_v4  ;;  %2039 = vmatprep.mubr.bf16.mxu1 %v1808_v33  ;;  %5325 = vst [vmem:[#allocation36_spill] sm:$0xff] %v4661_v8  ;;  %v4669_v4 = vld [vmem:[%s4435_s30 + $0x90] sm:$0xff] }
 0x1b7   : > { %2040 = vmatmul.mubr.bf16.gmra.mrb[44].mxu1 %v1807_v44  ;;  %5327 = vst [vmem:[#allocation38_spill] sm:$0xff] %v4669_v4  ;;  %v4681_v44 = vld [vmem:[%s4435_s30 + $0x98] sm:$0xff] }
 0x1b8   : > { %2215 = vmatpush1.bf16.msra.mxu1 %v4253_v53  ;;  %v4664_v59 = vpop.f32.mrb[16].mxu0  ;;  %v4666_v42 = vpop.f32.mrb[16].mxu1  ;;  %5330 = vst [vmem:[#allocation41_spill] sm:$0xff] %v4681_v44 }
 0x1b9   : > { %5326 = vst [vmem:[#allocation37_spill] sm:$0xff] %v4664_v59  ;;  %v4673_v29 = vmul.f32 %v4658_v13, %v4666_v42  ;;  %v4675_v25 = vpop.f32.mrb[17].mxu0  ;;  %v4677_v48 = vpop.f32.mrb[17].mxu1  ;;  %2216 = vmatprep.subr.bf16.mxu1 %v4260_v35  ;;  %v4714_v35 = vld [vmem:[%s4435_s30 + $0xa0] sm:$0xff] }
 0x1ba   : > { %5329 = vst [vmem:[#allocation40_spill] sm:$0xff] %v4675_v25  ;;  %v4685_v53 = vmul.f32 %v4661_v8, %v4677_v48  ;;  %v4687_v33 = vpop.f32.mrb[18].mxu0  ;;  %v4689_v56 = vpop.f32.mrb[18].mxu1  ;;  %5336 = vst [vmem:[#allocation47_spill] sm:$0xff] %v4714_v35 }
 0x1bb   : > { %5328 = vst [vmem:[#allocation39_spill] sm:$0xff] %v4673_v29  ;;  %5332 = vst [vmem:[#allocation43_spill] sm:$0xff] %v4687_v33  ;;  %v1809_v29 = vpack.c.bf16 %v4687_v33, %v4664_v59  ;;  %v4695_v13 = vmul.f32 %v4669_v4, %v4689_v56  ;;  %v4699_v32 = vpop.f32.mrb[19].mxu0  ;;  %v4701_v8 = vpop.f32.mrb[19].mxu1 }
 0x1bc   : > { %5331 = vst [vmem:[#allocation42_spill] sm:$0xff] %v4685_v53  ;;  %5334 = vst [vmem:[#allocation45_spill] sm:$0xff] %v4699_v32  ;;  %v1810_v53 = vpack.c.bf16 %v4699_v32, %v4675_v25  ;;  %v4707_v58 = vmul.f32 %v4681_v44, %v4701_v8  ;;  %2217 = vmatpush1.bf16.msra.mxu1 %v4268_v60 }
 0x1bd   : > { %5333 = vst [vmem:[#allocation44_spill] sm:$0xff] %v4695_v13  ;;  %2218 = vmatprep.subr.bf16.mxu1 %v4274_v1  ;;  %v4717_v13 = vld [vmem:[%s4435_s30 + $0xa8] sm:$0xff] }
 0x1be   : > { %5335 = vst [vmem:[#allocation46_spill] sm:$0xff] %v4707_v58  ;;  %2049 = vmatprep.mubr.bf16.mxu1 %v1810_v53  ;;  %5337 = vst [vmem:[#allocation48_spill] sm:$0xff] %v4717_v13  ;;  %v4725_v58 = vld [vmem:[%s4435_s30 + $0xb0] sm:$0xff] }
 0x1bf   : > { %2050 = vmatmul.mubr.bf16.gmra.mrb[48].mxu1 %v1809_v29  ;;  %5339 = vst [vmem:[#allocation50_spill] sm:$0xff] %v4725_v58  ;;  %v4737_v29 = vld [vmem:[%s4435_s30 + $0xb8] sm:$0xff] }
 0x1c0   : > { %2219 = vmatpush1.bf16.msra.mxu1 %v4286_v45  ;;  %v4720_v32 = vpop.f32.mrb[20].mxu0  ;;  %v4722_v44 = vpop.f32.mrb[20].mxu1  ;;  %5342 = vst [vmem:[#allocation53_spill] sm:$0xff] %v4737_v29 }
 0x1c1   : > { %5338 = vst [vmem:[#allocation49_spill] sm:$0xff] %v4720_v32  ;;  %v4729_v4 = vmul.f32 %v4714_v35, %v4722_v44  ;;  %v4731_v60 = vpop.f32.mrb[21].mxu0  ;;  %v4733_v1 = vpop.f32.mrb[21].mxu1  ;;  %2220 = vmatprep.subr.bf16.mxu1 %v4292_v14  ;;  %v4770_v14 = vld [vmem:[%s4435_s30 + $0xc0] sm:$0xff] }
 0x1c2   : > { %5341 = vst [vmem:[#allocation52_spill] sm:$0xff] %v4731_v60  ;;  %v4741_v45 = vmul.f32 %v4717_v13, %v4733_v1  ;;  %v4743_v53 = vpop.f32.mrb[22].mxu0  ;;  %v4745_v33 = vpop.f32.mrb[22].mxu1  ;;  %5348 = vst [vmem:[#allocation59_spill] sm:$0xff] %v4770_v14 }
 0x1c3   : > { %5340 = vst [vmem:[#allocation51_spill] sm:$0xff] %v4729_v4  ;;  %5344 = vst [vmem:[#allocation55_spill] sm:$0xff] %v4743_v53  ;;  %v1811_v4 = vpack.c.bf16 %v4743_v53, %v4720_v32  ;;  %v4751_v35 = vmul.f32 %v4725_v58, %v4745_v33  ;;  %v4755_v25 = vpop.f32.mrb[23].mxu0  ;;  %v4757_v13 = vpop.f32.mrb[23].mxu1 }
 0x1c4   : > { %5343 = vst [vmem:[#allocation54_spill] sm:$0xff] %v4741_v45  ;;  %5346 = vst [vmem:[#allocation57_spill] sm:$0xff] %v4755_v25  ;;  %v1812_v45 = vpack.c.bf16 %v4755_v25, %v4731_v60  ;;  %v4763_v59 = vmul.f32 %v4737_v29, %v4757_v13  ;;  %2221 = vmatpush1.bf16.msra.mxu1 %v4298_v39 }
 0x1c5   : > { %5345 = vst [vmem:[#allocation56_spill] sm:$0xff] %v4751_v35  ;;  %2222 = vmatprep.subr.bf16.mxu1 %v4304_v9  ;;  %v4773_v35 = vld [vmem:[%s4435_s30 + $0xc8] sm:$0xff] }
 0x1c6   : > { %5347 = vst [vmem:[#allocation58_spill] sm:$0xff] %v4763_v59  ;;  %2059 = vmatprep.mubr.bf16.mxu1 %v1812_v45  ;;  %5349 = vst [vmem:[#allocation60_spill] sm:$0xff] %v4773_v35  ;;  %v4781_v59 = vld [vmem:[%s4435_s30 + $0xd0] sm:$0xff] }
 0x1c7   : > { %2060 = vmatmul.mubr.bf16.gmra.mrb[52].mxu1 %v1811_v4  ;;  %5350 = vst [vmem:[#allocation61_spill] sm:$0xff] %v4781_v59  ;;  %v4791_v4 = vld [vmem:[%s4435_s30 + $0xd8] sm:$0xff] }
 0x1c8   : > { %2223 = vmatpush1.bf16.msra.mxu1 %v4316_v47  ;;  %v4776_v25 = vpop.f32.mrb[24].mxu0  ;;  %v4778_v29 = vpop.f32.mrb[24].mxu1  ;;  %5353 = vst [vmem:[#allocation64_spill] sm:$0xff] %v4791_v4 }
 0x1c9   : > { %v4785_v58 = vmul.f32 %v4770_v14, %v4778_v29  ;;  %v4787_v39 = vpop.f32.mrb[25].mxu0  ;;  %v1351_v9 = vpop.f32.mrb[25].mxu1  ;;  %2224 = vmatprep.subr.bf16.mxu1 %v4322_v20 }
 0x1ca   : > { %5352 = vst [vmem:[#allocation63_spill] sm:$0xff] %v4787_v39  ;;  %v4794_v47 = vmul.f32 %v4773_v35, %v1351_v9  ;;  %v4796_v45 = vpop.f32.mrb[26].mxu0  ;;  %v1353_v53 = vpop.f32.mrb[26].mxu1 }
 0x1cb   : > { %5351 = vst [vmem:[#allocation62_spill] sm:$0xff] %v4785_v58  ;;  %5355 = vst [vmem:[#allocation66_spill] sm:$0xff] %v4796_v45  ;;  %v1813_v60 = vpack.c.bf16 %v4796_v45, %v4776_v25  ;;  %v4801_v58 = vmul.f32 %v4781_v59, %v1353_v53  ;;  %v2198_v14 = vpack.c.bf16 %v1353_v53, %v4778_v29  ;;  %v4804_v20 = vpop.f32.mrb[27].mxu0  ;;  %v1355_v32 = vpop.f32.mrb[27].mxu1  ;;  %v4817_v29 = vld [vmem:[%s4435_s30 + $0xe8] sm:$0xff]  ;;  %v4823_v59 = vld [vmem:[%s4435_s30 + $0xf0] sm:$0xff] }
 0x1cc   : > { %5354 = vst [vmem:[#allocation65_spill] sm:$0xff] %v4794_v47  ;;  %5357 = vst [vmem:[#allocation68_spill] sm:$0xff] %v4804_v20  ;;  %v1814_v35 = vpack.c.bf16 %v4804_v20, %v4787_v39  ;;  %v4809_v47 = vmul.f32 %v4791_v4, %v1355_v32  ;;  %v2199_v11 = vpack.c.bf16 %v1355_v32, %v1351_v9  ;;  %2225 = vmatpush1.bf16.msra.mxu1 %v4328_v21 }
 0x1cd   : > { %5356 = vst [vmem:[#allocation67_spill] sm:$0xff] %v4801_v58  ;;  %2226 = vmatprep.subr.bf16.mxu1 %v4334_v49  ;;  %v4814_v58 = vld [vmem:[%s4435_s30 + $0xe0] sm:$0xff]  ;;  %v4832_v49 = vld [vmem:[%s4435_s30 + $0xf8] sm:$0xff] }
 0x1ce   : > { %5358 = vst [vmem:[#allocation69_spill] sm:$0xff] %v4809_v47  ;;  %2069 = vmatprep.mubr.bf16.mxu1 %v1814_v35  ;;  %5359 = vst [vmem:[#allocation70_spill] sm:$0xff] %v4814_v58 }
 0x1cf   : > { %2070 = vmatmul.mubr.bf16.gmra.mrb[56].mxu1 %v1813_v60 }
 0x1d0   : > { %2227 = vmatpush1.bf16.msra.mxu1 %v4346_v62  ;;  %v4820_v53 = vpop.f32.mrb[28].mxu0  ;;  %v1359_v20 = vpop.f32.mrb[28].mxu1 }
 0x1d1   : > { %v4826_v47 = vmul.f32 %v4814_v58, %v1359_v20  ;;  %v4828_v32 = vpop.f32.mrb[29].mxu0  ;;  %v1361_v21 = vpop.f32.mrb[29].mxu1  ;;  %2228 = vmatprep.subr.bf16.mxu1 %v4352_v0 }
 0x1d2   : > { %v4835_v35 = vmul.f32 %v4817_v29, %v1361_v21  ;;  %v4837_v60 = vpop.f32.mrb[30].mxu0  ;;  %v1363_v62 = vpop.f32.mrb[30].mxu1 }
 0x1d3   : > { %5360 = vst [vmem:[#allocation71_spill] sm:$0xff] %v4826_v47  ;;  %v1815_v9 = vpack.c.bf16 %v4837_v60, %v4820_v53  ;;  %v4842_v4 = vmul.f32 %v4823_v59, %v1363_v62  ;;  %v2200_v47 = vpack.c.bf16 %v1363_v62, %v1359_v20  ;;  %v4844_v58 = vpop.f32.mrb[31].mxu0  ;;  %v1365_v45 = vpop.f32.mrb[31].mxu1  ;;  %v5362_v20 = vpack.c.bf16 %v4479_v27, %v4456_v18 }
 0x1d4   : > { %5361 = vst [vmem:[#allocation72_spill] sm:$0xff] %v4835_v35  ;;  %v1816_v0 = vpack.c.bf16 %v4844_v58, %v4828_v32  ;;  %v4849_v39 = vmul.f32 %v4832_v49, %v1365_v45  ;;  %v2201_v35 = vpack.c.bf16 %v1365_v45, %v1361_v21  ;;  %2229 = vmatpush1.bf16.msra.mxu1 %v4358_v2 }
 0x1d5   : > { %2230 = vmatprep.subr.bf16.mxu1 %v4364_v38  ;;  %v5363_v45 = vpack.c.bf16 %v4467_v3, %v4445_v10  ;;  %v5364_v2 = vpack.c.bf16 %v4533_v34, %v4509_v7  ;;  %v5365_v38 = vpack.c.bf16 %v4521_v6, %v4498_v17  ;;  %v5369_v10 = vpack.c.bf16 %v4633_v43, %v4610_v12 }
 0x1d6   : > { %2079 = vmatprep.mubr.bf16.mxu1 %v1816_v0  ;;  %v5370_v18 = vpack.c.bf16 %v4701_v8, %v4677_v48  ;;  %v5371_v3 = vpack.c.bf16 %v4689_v56, %v4666_v42 }
 0x1d7   : > { %2080 = vmatmul.mubr.bf16.gmra.mrb[60].mxu1 %v1815_v9 }
 0x1d8   : > { %2231 = vmatpush1.bf16.msra.mxu1 %v4376_v19  ;;  %2234 = vmatprep.mubr.bf16.mxu1 %v5362_v20  ;;  %v5366_v19 = vpack.c.bf16 %v4589_v31, %v4565_v55 }
 0x1d9   : > { %2232 = vmatprep.subr.bf16.mxu1 %v4382_v37  ;;  %v5367_v37 = vpack.c.bf16 %v4577_v28, %v4554_v16  ;;  %v5372_v28 = vpack.c.bf16 %v4757_v13, %v4733_v1 }
 0x1dc   : > { %2233 = vmatpush1.bf16.msra.mxu1 %v4388_v5  ;;  %v5368_v5 = vpack.c.bf16 %v4645_v41, %v4621_v52  ;;  %v5373_v41 = vpack.c.bf16 %v4745_v33, %v4722_v44 }
 0x1df   : > { %2235 = vmatmul.mubr.bf16.vlgmr.msra.gmra.mrb[64].mxu1 %v5363_v45 }
 0x1e0   : > { %2244 = vmatprep.mubr.bf16.mxu1 %v5364_v2 }
 0x1e7   : > { %2245 = vmatmul.mubr.bf16.gmra.mrb[68].mxu1 %v5365_v38 }
 0x1e8   : > { %2254 = vmatprep.mubr.bf16.mxu1 %v5366_v19 }
 0x1ef   : > { %2255 = vmatmul.mubr.bf16.gmra.mrb[72].mxu1 %v5367_v37 }
 0x1f0   : > { %2264 = vmatprep.mubr.bf16.mxu1 %v5368_v5 }
 0x1f7   : > { %2265 = vmatmul.mubr.bf16.gmra.mrb[76].mxu1 %v5369_v10 }
 0x1f8   : > { %2274 = vmatprep.mubr.bf16.mxu1 %v5370_v18 }
 0x1ff   : > { %2275 = vmatmul.mubr.bf16.gmra.mrb[80].mxu1 %v5371_v3 }
 0x200   : > { %2284 = vmatprep.mubr.bf16.mxu1 %v5372_v28 }
 0x207   : > { %2285 = vmatmul.mubr.bf16.gmra.mrb[84].mxu1 %v5373_v41 }
 0x208   : > { %2294 = vmatprep.mubr.bf16.mxu1 %v2199_v11 }
 0x20f   : > { %2295 = vmatmul.mubr.bf16.gmra.mrb[88].mxu1 %v2198_v14 }
 0x210   : > { %2304 = vmatprep.mubr.bf16.mxu1 %v2201_v35 }
 0x217   : > { %2305 = vmatmul.mubr.bf16.gmra.mrb[92].mxu1 %v2200_v47 }
 0x218   : > { %v1594_v27 = vpop.f32.mrb[32].mxu0 }
 0x219   : > { %v1596_v16 = vpop.f32.mrb[33].mxu0 }
 0x21a   : > { %v3221_v17 = vpack.c.bf16 %v1596_v16, %v1594_v27  ;;  %v1598_v7 = vpop.f32.mrb[34].mxu0 }
 0x21b   : > { %v1600_v11 = vpop.f32.mrb[35].mxu0 }
 0x21c   : > { %2731 = vst [vmem:[%s4899_s13] sm:$0xff] %v3221_v17  ;;  %v3222_v6 = vpack.c.bf16 %v1600_v11, %v1598_v7 }
 0x21e   : > { %2732 = vst [vmem:[%s4899_s13 + $0x8] sm:$0xff] %v3222_v6 }
 0x220   : > { %v1604_v31 = vpop.f32.mrb[36].mxu0 }
 0x221   : > { %v1606_v34 = vpop.f32.mrb[37].mxu0 }
 0x222   : > { %v3223_v55 = vpack.c.bf16 %v1606_v34, %v1604_v31  ;;  %v1608_v12 = vpop.f32.mrb[38].mxu0 }
 0x223   : > { %v1610_v43 = vpop.f32.mrb[39].mxu0 }
 0x224   : > { %2733 = vst [vmem:[%s4899_s13 + $0x10] sm:$0xff] %v3223_v55  ;;  %v3224_v8 = vpack.c.bf16 %v1610_v43, %v1608_v12  ;;  %v4925_v12 = vld [vmem:[%s4922_s23] sm:$0xff]  ;;  %v4928_v43 = vld [vmem:[%s4922_s23 + $0x8] sm:$0xff] }
 0x226   : > { %2734 = vst [vmem:[%s4899_s13 + $0x18] sm:$0xff] %v3224_v8 }
 0x228   : > { %v1614_v52 = vpop.f32.mrb[40].mxu0 }
 0x229   : > { %v1616_v42 = vpop.f32.mrb[41].mxu0 }
 0x22a   : > { %v3225_v56 = vpack.c.bf16 %v1616_v42, %v1614_v52  ;;  %v1618_v13 = vpop.f32.mrb[42].mxu0  ;;  %v4931_v52 = vld [vmem:[%s4922_s23 + $0x10] sm:$0xff]  ;;  %v1769_v42 = vmul.f32 %v4438_v57, %v4443_v36 }
 0x22b   : > { %v1620_v48 = vpop.f32.mrb[43].mxu0 }
 0x22c   : > { %2735 = vst [vmem:[%s4899_s13 + $0x20] sm:$0xff] %v3225_v56  ;;  %v3226_v44 = vpack.c.bf16 %v1620_v48, %v1618_v13  ;;  %v4937_v48 = vld [vmem:[%s4922_s23 + $0x18] sm:$0xff] }
 0x22e   : > { %2736 = vst [vmem:[%s4899_s13 + $0x28] sm:$0xff] %v3226_v44  ;;  %v1770_v44 = vmul.f32 %v4441_v63, %v4454_v22 }
 0x230   : > { %v1624_v33 = vpop.f32.mrb[44].mxu0 }
 0x231   : > { %v1626_v1 = vpop.f32.mrb[45].mxu0 }
 0x232   : > { %v3227_v14 = vpack.c.bf16 %v1626_v1, %v1624_v33  ;;  %v1628_v47 = vpop.f32.mrb[46].mxu0 }
 0x233   : > { %v1630_v21 = vpop.f32.mrb[47].mxu0 }
 0x234   : > { %2737 = vst [vmem:[%s4899_s13 + $0x30] sm:$0xff] %v3227_v14  ;;  %v3228_v35 = vpack.c.bf16 %v1630_v21, %v1628_v47  ;;  %v1771_v14 = vmul.f32 %v4448_v50, %v4465_v23  ;;  %v1772_v21 = vmul.f32 %v4459_v24, %v4477_v26  ;;  %v4958_v23 = vld [vmem:[%s4922_s23 + $0x28] sm:$0xff] }
 0x236   : > { %2738 = vst [vmem:[%s4899_s13 + $0x38] sm:$0xff] %v3228_v35 }
 0x238   : > { %v1634_v62 = vpop.f32.mrb[48].mxu0 }
 0x239   : > { %v1636_v9 = vpop.f32.mrb[49].mxu0 }
 0x23a   : > { %v3229_v0 = vpack.c.bf16 %v1636_v9, %v1634_v62  ;;  %v1638_v20 = vpop.f32.mrb[50].mxu0 }
 0x23b   : > { %v1640_v45 = vpop.f32.mrb[51].mxu0 }
 0x23c   : > { %2739 = vst [vmem:[%s4899_s13 + $0x40] sm:$0xff] %v3229_v0  ;;  %v3230_v2 = vpack.c.bf16 %v1640_v45, %v1638_v20  ;;  %v4949_v20 = vld [vmem:[%s4922_s23 + $0x20] sm:$0xff] }
 0x23e   : > { %2740 = vst [vmem:[%s4899_s13 + $0x48] sm:$0xff] %v3230_v2  ;;  %v4961_v2 = vld [vmem:[%s4922_s23 + $0x30] sm:$0xff] }
 0x240   : > { %v1644_v38 = vpop.f32.mrb[52].mxu0 }
 0x241   : > { %v1646_v19 = vpop.f32.mrb[53].mxu0 }
 0x242   : > { %v3231_v37 = vpack.c.bf16 %v1646_v19, %v1644_v38  ;;  %v1648_v5 = vpop.f32.mrb[54].mxu0  ;;  %v1773_v38 = vmul.f32 %v4490_v46, %v4496_v51 }
 0x243   : > { %v1650_v10 = vpop.f32.mrb[55].mxu0 }
 0x244   : > { %2741 = vst [vmem:[%s4899_s13 + $0x50] sm:$0xff] %v3231_v37  ;;  %v3232_v18 = vpack.c.bf16 %v1650_v10, %v1648_v5  ;;  %v4967_v5 = vld [vmem:[%s4922_s23 + $0x38] sm:$0xff]  ;;  %v1774_v10 = vmul.f32 %v4493_v61, %v4507_v54 }
 0x246   : > { %2742 = vst [vmem:[%s4899_s13 + $0x58] sm:$0xff] %v3232_v18 }
 0x248   : > { %v1654_v3 = vpop.f32.mrb[56].mxu0 }
 0x249   : > { %v1656_v28 = vpop.f32.mrb[57].mxu0 }
 0x24a   : > { %v3233_v41 = vpack.c.bf16 %v1656_v28, %v1654_v3  ;;  %v1658_v27 = vpop.f32.mrb[58].mxu0 }
 0x24b   : > { %v1660_v16 = vpop.f32.mrb[59].mxu0 }
 0x24c   : > { %2743 = vst [vmem:[%s4899_s13 + $0x60] sm:$0xff] %v3233_v41  ;;  %v3234_v17 = vpack.c.bf16 %v1660_v16, %v1658_v27  ;;  %v1775_v41 = vmul.f32 %v4501_v40, %v4519_v15  ;;  %v5374_v16 = vld [vmem:[#allocation7_spill] sm:$0xff] }
 0x24d   : > { %v4984_v15 = vld [vmem:[%s4922_s23 + $0x48] sm:$0xff] }
 0x24e   : > { %2744 = vst [vmem:[%s4899_s13 + $0x68] sm:$0xff] %v3234_v17  ;;  %v1776_v17 = vmul.f32 %v5374_v16, %v4531_v30  ;;  %v4987_v30 = vld [vmem:[%s4922_s23 + $0x50] sm:$0xff] }
 0x250   : > { %v1664_v7 = vpop.f32.mrb[60].mxu0 }
 0x251   : > { %v1666_v11 = vpop.f32.mrb[61].mxu0 }
 0x252   : > { %v3235_v6 = vpack.c.bf16 %v1666_v11, %v1664_v7  ;;  %v1668_v31 = vpop.f32.mrb[62].mxu0 }
 0x253   : > { %v1670_v34 = vpop.f32.mrb[63].mxu0 }
 0x254   : > { %2745 = vst [vmem:[%s4899_s13 + $0x70] sm:$0xff] %v3235_v6  ;;  %v3236_v55 = vpack.c.bf16 %v1670_v34, %v1668_v31  ;;  %v4981_v34 = vld [vmem:[%s4922_s23 + $0x40] sm:$0xff] }
 0x256   : > { %2746 = vst [vmem:[%s4899_s13 + $0x78] sm:$0xff] %v3236_v55 }
 0x272   : > { %v2011_v8 = vpop.f32.mrb[32].mxu1 }
 0x273   : > { %v2090_v56 = vmul.f32 %v2011_v8, %v4925_v12  ;;  %v2013_v13 = vpop.f32.mrb[33].mxu1 }
 0x274   : > { %v2091_v33 = vmul.f32 %v2013_v13, %v4928_v43  ;;  %v2015_v1 = vpop.f32.mrb[34].mxu1  ;;  %v5376_v13 = vld [vmem:[#allocation11_spill] sm:$0xff] }
 0x275   : > { %v2122_v47 = vadd.f32 %v2090_v56, %v1769_v42  ;;  %v2092_v57 = vmul.f32 %v2015_v1, %v4931_v52  ;;  %v2017_v36 = vpop.f32.mrb[35].mxu1  ;;  %v5375_v56 = vld [vmem:[#allocation13_spill] sm:$0xff] }
 0x276   : > { %v2123_v35 = vadd.f32 %v2091_v33, %v1770_v44  ;;  %v2093_v62 = vmul.f32 %v2017_v36, %v4937_v48  ;;  %v1777_v44 = vmul.f32 %v5376_v13, %v5375_v56 }
 0x277   : > { %v2379_v63 = vmul.f32 0.088388346, %v2122_v47  ;;  %v2124_v22 = vadd.f32 %v2092_v57, %v1771_v14  ;;  %v4993_v14 = vld [vmem:[%s4922_s23 + $0x58] sm:$0xff]  ;;  %v5377_v47 = vld [vmem:[#allocation16_spill] sm:$0xff] }
 0x278   : > { %v2380_v9 = vmul.f32 0.088388346, %v2123_v35  ;;  %v2125_v0 = vadd.f32 %v2093_v62, %v1772_v21  ;;  %v5378_v57 = vld [vmem:[#allocation12_spill] sm:$0xff] }
 0x279   : > { %v2381_v50 = vmul.f32 0.088388346, %v2124_v22  ;;  %v1778_v36 = vmul.f32 %v5378_v57, %v5377_v47  ;;  %v5380_v22 = vld [vmem:[#allocation14_spill] sm:$0xff] }
 0x27a   : > { %v3189_v24 = vpack.c.bf16 %v2380_v9, %v2379_v63  ;;  %v2382_v26 = vmul.f32 0.088388346, %v2125_v0  ;;  %v2021_v45 = vpop.f32.mrb[36].mxu1  ;;  %v5379_v63 = vld [vmem:[#allocation19_spill] sm:$0xff] }
 0x27b   : > { %v2094_v19 = vmul.f32 %v2021_v45, %v4949_v20  ;;  %v2023_v37 = vpop.f32.mrb[37].mxu1  ;;  %v1779_v9 = vmul.f32 %v5380_v22, %v5379_v63  ;;  %v5382_v45 = vld [vmem:[#allocation17_spill] sm:$0xff] }
 0x27c   : > { %2507 = vst [vmem:[%s4955_s25] sm:$0xff] %v3189_v24  ;;  %v3190_v18 = vpack.c.bf16 %v2382_v26, %v2381_v50  ;;  %v2095_v3 = vmul.f32 %v2023_v37, %v4958_v23  ;;  %v2025_v28 = vpop.f32.mrb[38].mxu1  ;;  %v5381_v26 = vld [vmem:[#allocation21_spill] sm:$0xff] }
 0x27d   : > { %v2126_v27 = vadd.f32 %v2094_v19, %v1773_v38  ;;  %v2096_v46 = vmul.f32 %v2025_v28, %v4961_v2  ;;  %v2027_v51 = vpop.f32.mrb[39].mxu1  ;;  %v1780_v38 = vmul.f32 %v5382_v45, %v5381_v26  ;;  %v5033_v45 = vld [vmem:[%s4922_s23 + $0x80] sm:$0xff] }
 0x27e   : > { %2508 = vst [vmem:[%s4955_s25 + $0x8] sm:$0xff] %v3190_v18  ;;  %v2127_v61 = vadd.f32 %v2095_v3, %v1774_v10  ;;  %v2097_v54 = vmul.f32 %v2027_v51, %v4967_v5 }
 0x27f   : > { %v2383_v7 = vmul.f32 0.088388346, %v2126_v27  ;;  %v2128_v11 = vadd.f32 %v2096_v46, %v1775_v41  ;;  %v5007_v41 = vld [vmem:[%s4922_s23 + $0x60] sm:$0xff]  ;;  %v5010_v46 = vld [vmem:[%s4922_s23 + $0x68] sm:$0xff] }
 0x280   : > { %v2384_v6 = vmul.f32 0.088388346, %v2127_v61  ;;  %v2129_v31 = vadd.f32 %v2097_v54, %v1776_v17  ;;  %v5013_v61 = vld [vmem:[%s4922_s23 + $0x70] sm:$0xff]  ;;  %v5383_v54 = vld [vmem:[#allocation25_spill] sm:$0xff] }
 0x281   : > { %v2385_v40 = vmul.f32 0.088388346, %v2128_v11 }
 0x282   : > { %v3191_v55 = vpack.c.bf16 %v2384_v6, %v2383_v7  ;;  %v2386_v8 = vmul.f32 0.088388346, %v2129_v31  ;;  %v2031_v42 = vpop.f32.mrb[40].mxu1  ;;  %v5384_v7 = vld [vmem:[#allocation23_spill] sm:$0xff] }
 0x283   : > { %v2098_v33 = vmul.f32 %v2031_v42, %v4981_v34  ;;  %v2033_v1 = vpop.f32.mrb[41].mxu1  ;;  %v1781_v11 = vmul.f32 %v5384_v7, %v5383_v54  ;;  %v5045_v54 = vld [vmem:[%s4922_s23 + $0x98] sm:$0xff]  ;;  %v5393_v7 = vld [vmem:[#allocation40_spill] sm:$0xff] }
 0x284   : > { %2509 = vst [vmem:[%s4955_s25 + $0x10] sm:$0xff] %v3191_v55  ;;  %v3192_v21 = vpack.c.bf16 %v2386_v8, %v2385_v40  ;;  %v2099_v35 = vmul.f32 %v2033_v1, %v4984_v15  ;;  %v2035_v62 = vpop.f32.mrb[42].mxu1  ;;  %v5019_v40 = vld [vmem:[%s4922_s23 + $0x78] sm:$0xff]  ;;  %v5385_v55 = vld [vmem:[#allocation28_spill] sm:$0xff]  ;;  %v5388_v1 = vld [vmem:[#allocation26_spill] sm:$0xff] }
 0x285   : > { %v2130_v0 = vadd.f32 %v2098_v33, %v1777_v44  ;;  %v2100_v50 = vmul.f32 %v2035_v62, %v4987_v30  ;;  %v2037_v24 = vpop.f32.mrb[43].mxu1  ;;  %v5386_v8 = vld [vmem:[#allocation24_spill] sm:$0xff]  ;;  %v5387_v33 = vld [vmem:[#allocation31_spill] sm:$0xff]  ;;  %v5390_v62 = vld [vmem:[#allocation29_spill] sm:$0xff] }
 0x286   : > { %2510 = vst [vmem:[%s4955_s25 + $0x18] sm:$0xff] %v3192_v21  ;;  %v2131_v19 = vadd.f32 %v2099_v35, %v1778_v36  ;;  %v2101_v37 = vmul.f32 %v2037_v24, %v4993_v14  ;;  %v1782_v42 = vmul.f32 %v5386_v8, %v5385_v55  ;;  %v1783_v47 = vmul.f32 %v5388_v1, %v5387_v33  ;;  %v5389_v35 = vld [vmem:[#allocation33_spill] sm:$0xff] }
 0x287   : > { %v2387_v10 = vmul.f32 0.088388346, %v2130_v0  ;;  %v2132_v18 = vadd.f32 %v2100_v50, %v1779_v9  ;;  %v1784_v63 = vmul.f32 %v5390_v62, %v5389_v35 }
 0x288   : > { %v2388_v3 = vmul.f32 0.088388346, %v2131_v19  ;;  %v2133_v28 = vadd.f32 %v2101_v37, %v1780_v38  ;;  %v5036_v19 = vld [vmem:[%s4922_s23 + $0x88] sm:$0xff] }
 0x289   : > { %v2389_v27 = vmul.f32 0.088388346, %v2132_v18 }
 0x28a   : > { %v3193_v51 = vpack.c.bf16 %v2388_v3, %v2387_v10  ;;  %v2390_v16 = vmul.f32 0.088388346, %v2133_v28  ;;  %v2041_v17 = vpop.f32.mrb[44].mxu1  ;;  %v5039_v3 = vld [vmem:[%s4922_s23 + $0x90] sm:$0xff]  ;;  %v5391_v28 = vld [vmem:[#allocation37_spill] sm:$0xff] }
 0x28b   : > { %v2102_v6 = vmul.f32 %v2041_v17, %v5007_v41  ;;  %v2043_v31 = vpop.f32.mrb[45].mxu1 }
 0x28c   : > { %2511 = vst [vmem:[%s4955_s25 + $0x20] sm:$0xff] %v3193_v51  ;;  %v3194_v56 = vpack.c.bf16 %v2390_v16, %v2389_v27  ;;  %v2103_v13 = vmul.f32 %v2043_v31, %v5010_v46  ;;  %v2045_v44 = vpop.f32.mrb[46].mxu1  ;;  %v5392_v27 = vld [vmem:[#allocation35_spill] sm:$0xff] }
 0x28d   : > { %v2134_v57 = vadd.f32 %v2102_v6, %v1781_v11  ;;  %v2104_v36 = vmul.f32 %v2045_v44, %v5013_v61  ;;  %v2047_v21 = vpop.f32.mrb[47].mxu1  ;;  %v1785_v51 = vmul.f32 %v5392_v27, %v5391_v28  ;;  %v5394_v11 = vld [vmem:[#allocation36_spill] sm:$0xff]  ;;  %v5400_v28 = vld [vmem:[#allocation47_spill] sm:$0xff] }
 0x28e   : > { %2512 = vst [vmem:[%s4955_s25 + $0x28] sm:$0xff] %v3194_v56  ;;  %v2135_v22 = vadd.f32 %v2103_v13, %v1782_v42  ;;  %v2105_v9 = vmul.f32 %v2047_v21, %v5019_v40  ;;  %v1786_v6 = vmul.f32 %v5394_v11, %v5393_v7  ;;  %v5395_v42 = vld [vmem:[#allocation43_spill] sm:$0xff]  ;;  %v5396_v56 = vld [vmem:[#allocation38_spill] sm:$0xff]  ;;  %v5401_v7 = vld [vmem:[#allocation52_spill] sm:$0xff] }
 0x28f   : > { %v2391_v0 = vmul.f32 0.088388346, %v2134_v57  ;;  %v2136_v50 = vadd.f32 %v2104_v36, %v1783_v47  ;;  %v1787_v13 = vmul.f32 %v5396_v56, %v5395_v42  ;;  %v5397_v47 = vld [vmem:[#allocation45_spill] sm:$0xff]  ;;  %v5402_v11 = vld [vmem:[#allocation48_spill] sm:$0xff]  ;;  %v5403_v42 = vld [vmem:[#allocation55_spill] sm:$0xff] }
 0x290   : > { %v2392_v24 = vmul.f32 0.088388346, %v2135_v22  ;;  %v2137_v26 = vadd.f32 %v2105_v9, %v1784_v63  ;;  %v5398_v57 = vld [vmem:[#allocation41_spill] sm:$0xff]  ;;  %v5404_v56 = vld [vmem:[#allocation50_spill] sm:$0xff] }
 0x291   : > { %v2393_v38 = vmul.f32 0.088388346, %v2136_v50  ;;  %v1788_v36 = vmul.f32 %v5398_v57, %v5397_v47  ;;  %v5405_v47 = vld [vmem:[#allocation57_spill] sm:$0xff] }
 0x292   : > { %v3195_v37 = vpack.c.bf16 %v2392_v24, %v2391_v0  ;;  %v2394_v10 = vmul.f32 0.088388346, %v2137_v26  ;;  %v2051_v18 = vpop.f32.mrb[48].mxu1  ;;  %v5059_v0 = vld [vmem:[%s4922_s23 + $0xa0] sm:$0xff]  ;;  %v5062_v24 = vld [vmem:[%s4922_s23 + $0xa8] sm:$0xff]  ;;  %v5406_v57 = vld [vmem:[#allocation53_spill] sm:$0xff] }
 0x293   : > { %v2106_v16 = vmul.f32 %v2051_v18, %v5033_v45  ;;  %v2053_v17 = vpop.f32.mrb[49].mxu1  ;;  %v5399_v18 = vld [vmem:[#allocation49_spill] sm:$0xff] }
 0x294   : > { %2513 = vst [vmem:[%s4955_s25 + $0x30] sm:$0xff] %v3195_v37  ;;  %v3196_v31 = vpack.c.bf16 %v2394_v10, %v2393_v38  ;;  %v2107_v55 = vmul.f32 %v2053_v17, %v5036_v19  ;;  %v2055_v8 = vpop.f32.mrb[50].mxu1  ;;  %v5065_v10 = vld [vmem:[%s4922_s23 + $0xb0] sm:$0xff]  ;;  %v1789_v27 = vmul.f32 %v5400_v28, %v5399_v18  ;;  %v5071_v17 = vld [vmem:[%s4922_s23 + $0xb8] sm:$0xff] }
 0x295   : > { %v2138_v44 = vadd.f32 %v2106_v16, %v1785_v51  ;;  %v2108_v33 = vmul.f32 %v2055_v8, %v5039_v3  ;;  %v2057_v1 = vpop.f32.mrb[51].mxu1 }
 0x296   : > { %2514 = vst [vmem:[%s4955_s25 + $0x38] sm:$0xff] %v3196_v31  ;;  %v2139_v21 = vadd.f32 %v2107_v55, %v1786_v6  ;;  %v2109_v35 = vmul.f32 %v2057_v1, %v5045_v54  ;;  %v1790_v6 = vmul.f32 %v5402_v11, %v5401_v7 }
 0x297   : > { %v2395_v62 = vmul.f32 0.088388346, %v2138_v44  ;;  %v2140_v63 = vadd.f32 %v2108_v33, %v1787_v13  ;;  %v1791_v13 = vmul.f32 %v5404_v56, %v5403_v42 }
 0x298   : > { %v2396_v22 = vmul.f32 0.088388346, %v2139_v21  ;;  %v2141_v9 = vadd.f32 %v2109_v35, %v1788_v36  ;;  %v1792_v36 = vmul.f32 %v5406_v57, %v5405_v47 }
 0x299   : > { %v2397_v50 = vmul.f32 0.088388346, %v2140_v63 }
 0x29a   : > { %v3197_v26 = vpack.c.bf16 %v2396_v22, %v2395_v62  ;;  %v2398_v38 = vmul.f32 0.088388346, %v2141_v9  ;;  %v2061_v37 = vpop.f32.mrb[52].mxu1 }
 0x29b   : > { %v2110_v51 = vmul.f32 %v2061_v37, %v5059_v0  ;;  %v2063_v16 = vpop.f32.mrb[53].mxu1 }
 0x29c   : > { %2515 = vst [vmem:[%s4955_s25 + $0x40] sm:$0xff] %v3197_v26  ;;  %v3198_v31 = vpack.c.bf16 %v2398_v38, %v2397_v50  ;;  %v2111_v55 = vmul.f32 %v2063_v16, %v5062_v24  ;;  %v2065_v8 = vpop.f32.mrb[54].mxu1  ;;  %v5085_v50 = vld [vmem:[%s4922_s23 + $0xc0] sm:$0xff]  ;;  %v5088_v38 = vld [vmem:[%s4922_s23 + $0xc8] sm:$0xff] }
 0x29d   : > { %v2142_v44 = vadd.f32 %v2110_v51, %v1789_v27  ;;  %v2112_v33 = vmul.f32 %v2065_v8, %v5065_v10  ;;  %v2067_v1 = vpop.f32.mrb[55].mxu1  ;;  %v5091_v27 = vld [vmem:[%s4922_s23 + $0xd0] sm:$0xff]  ;;  %v5407_v51 = vld [vmem:[#allocation59_spill] sm:$0xff] }
 0x29e   : > { %2516 = vst [vmem:[%s4955_s25 + $0x48] sm:$0xff] %v3198_v31  ;;  %v2143_v21 = vadd.f32 %v2111_v55, %v1790_v6  ;;  %v2113_v35 = vmul.f32 %v2067_v1, %v5071_v17  ;;  %v1793_v16 = vmul.f32 %v5407_v51, %v4776_v25  ;;  %v5097_v6 = vld [vmem:[%s4922_s23 + $0xd8] sm:$0xff]  ;;  %v5408_v31 = vld [vmem:[#allocation63_spill] sm:$0xff]  ;;  %v5409_v55 = vld [vmem:[#allocation60_spill] sm:$0xff] }
 0x29f   : > { %v2399_v62 = vmul.f32 0.088388346, %v2142_v44  ;;  %v2144_v63 = vadd.f32 %v2112_v33, %v1791_v13  ;;  %v1794_v8 = vmul.f32 %v5409_v55, %v5408_v31  ;;  %v5410_v44 = vld [vmem:[#allocation66_spill] sm:$0xff]  ;;  %v5411_v33 = vld [vmem:[#allocation61_spill] sm:$0xff]  ;;  %v5114_v51 = vld [vmem:[%s4922_s23 + $0xe8] sm:$0xff] }
 0x2a0   : > { %v2400_v22 = vmul.f32 0.088388346, %v2143_v21  ;;  %v2145_v9 = vadd.f32 %v2113_v35, %v1792_v36  ;;  %v1795_v1 = vmul.f32 %v5411_v33, %v5410_v44  ;;  %v5412_v36 = vld [vmem:[#allocation68_spill] sm:$0xff]  ;;  %v5414_v55 = vld [vmem:[#allocation70_spill] sm:$0xff]  ;;  %v1798_v44 = vmul.f32 %v4817_v29, %v4828_v32 }
 0x2a1   : > { %v2401_v26 = vmul.f32 0.088388346, %v2144_v63  ;;  %v5413_v21 = vld [vmem:[#allocation64_spill] sm:$0xff] }
 0x2a2   : > { %v3199_v37 = vpack.c.bf16 %v2400_v22, %v2399_v62  ;;  %v2402_v18 = vmul.f32 0.088388346, %v2145_v9  ;;  %v2071_v28 = vpop.f32.mrb[56].mxu1  ;;  %v1796_v35 = vmul.f32 %v5413_v21, %v5412_v36  ;;  %v5117_v31 = vld [vmem:[%s4922_s23 + $0xf0] sm:$0xff]  ;;  %v1800_v21 = vmul.f32 %v4832_v49, %v4844_v58 }
 0x2a3   : > { %v2114_v7 = vmul.f32 %v2071_v28, %v5085_v50  ;;  %v2073_v11 = vpop.f32.mrb[57].mxu1 }
 0x2a4   : > { %2517 = vst [vmem:[%s4955_s25 + $0x50] sm:$0xff] %v3199_v37  ;;  %v3200_v42 = vpack.c.bf16 %v2402_v18, %v2401_v26  ;;  %v2115_v56 = vmul.f32 %v2073_v11, %v5088_v38  ;;  %v2075_v13 = vpop.f32.mrb[58].mxu1  ;;  %v5111_v18 = vld [vmem:[%s4922_s23 + $0xe0] sm:$0xff] }
 0x2a5   : > { %v2146_v47 = vadd.f32 %v2114_v7, %v1793_v16  ;;  %v2116_v25 = vmul.f32 %v2075_v13, %v5091_v27  ;;  %v2077_v57 = vpop.f32.mrb[59].mxu1  ;;  %v5123_v13 = vld [vmem:[%s4922_s23 + $0xf8] sm:$0xff] }
 0x2a6   : > { %2518 = vst [vmem:[%s4955_s25 + $0x58] sm:$0xff] %v3200_v42  ;;  %v2147_v62 = vadd.f32 %v2115_v56, %v1794_v8  ;;  %v2117_v63 = vmul.f32 %v2077_v57, %v5097_v6  ;;  %v1797_v8 = vmul.f32 %v5414_v55, %v4820_v53 }
 0x2a7   : > { %v2403_v22 = vmul.f32 0.088388346, %v2146_v47  ;;  %v2148_v9 = vadd.f32 %v2116_v25, %v1795_v1  ;;  %v1799_v25 = vmul.f32 %v4823_v59, %v4837_v60 }
 0x2a8   : > { %v2404_v26 = vmul.f32 0.088388346, %v2147_v62  ;;  %v2149_v37 = vadd.f32 %v2117_v63, %v1796_v35 }
 0x2a9   : > { %v2405_v28 = vmul.f32 0.088388346, %v2148_v9 }
 0x2aa   : > { %v3201_v16 = vpack.c.bf16 %v2404_v26, %v2403_v22  ;;  %v2406_v7 = vmul.f32 0.088388346, %v2149_v37  ;;  %v2081_v11 = vpop.f32.mrb[60].mxu1 }
 0x2ab   : > { %v2118_v42 = vmul.f32 %v2081_v11, %v5111_v18  ;;  %v2083_v56 = vpop.f32.mrb[61].mxu1 }
 0x2ac   : > { %2519 = vst [vmem:[%s4955_s25 + $0x60] sm:$0xff] %v3201_v16  ;;  %v3202_v33 = vpack.c.bf16 %v2406_v7, %v2405_v28  ;;  %v2119_v1 = vmul.f32 %v2083_v56, %v5114_v51  ;;  %v2085_v47 = vpop.f32.mrb[62].mxu1  ;;  %v5415_v7 = vld [vmem:[#allocation2_spill] sm:$0xff] }
 0x2ad   : > { %v2150_v57 = vadd.f32 %v2118_v42, %v1797_v8  ;;  %v2120_v36 = vmul.f32 %v2085_v47, %v5117_v31  ;;  %v2087_v53 = vpop.f32.mrb[63].mxu1  ;;  %v5416_v42 = vld [vmem:[#allocation3_spill] sm:$0xff] }
 0x2ae   : > { %2520 = vst [vmem:[%s4955_s25 + $0x68] sm:$0xff] %v3202_v33  ;;  %v2151_v35 = vadd.f32 %v2119_v1, %v1798_v44  ;;  %v2121_v29 = vmul.f32 %v2087_v53, %v5123_v13  ;;  %v5418_v1 = vld [vmem:[#allocation5_spill] sm:$0xff] }
 0x2af   : > { %v2407_v32 = vmul.f32 0.088388346, %v2150_v57  ;;  %v2152_v62 = vadd.f32 %v2120_v36, %v1799_v25 }
 0x2b0   : > { %v2408_v63 = vmul.f32 0.088388346, %v2151_v35  ;;  %v2153_v22 = vadd.f32 %v2121_v29, %v1800_v21  ;;  %v5419_v21 = vld [vmem:[#allocation6_spill] sm:$0xff] }
 0x2b1   : > { %v2409_v9 = vmul.f32 0.088388346, %v2152_v62  ;;  %v5420_v62 = vld [vmem:[#allocation8_spill] sm:$0xff] }
 0x2b2   : > { %v3203_v59 = vpack.c.bf16 %v2408_v63, %v2407_v32  ;;  %v2410_v60 = vmul.f32 0.088388346, %v2153_v22  ;;  %v2236_v26 = vpop.f32.mrb[64].mxu1 }
 0x2b3   : > { %v2315_v37 = vmul.f32 %v2236_v26, %v4925_v12  ;;  %v2238_v28 = vpop.f32.mrb[65].mxu1  ;;  %v5417_v12 = vld [vmem:[#allocation4_spill] sm:$0xff]  ;;  %v5422_v26 = vld [vmem:[#allocation10_spill] sm:$0xff] }
 0x2b4   : > { %2521 = vst [vmem:[%s4955_s25 + $0x70] sm:$0xff] %v3203_v59  ;;  %v3204_v16 = vpack.c.bf16 %v2410_v60, %v2409_v9  ;;  %v2316_v58 = vmul.f32 %v2238_v28, %v4928_v43  ;;  %v2240_v49 = vpop.f32.mrb[66].mxu1  ;;  %v5421_v9 = vld [vmem:[#allocation9_spill] sm:$0xff] }
 0x2b5   : > { %v2347_v11 = vadd.f32 %v2315_v37, %v5415_v7  ;;  %v2317_v55 = vmul.f32 %v2240_v49, %v4931_v52  ;;  %v2242_v8 = vpop.f32.mrb[67].mxu1  ;;  %v5423_v49 = vld [vmem:[#allocation15_spill] sm:$0xff] }
 0x2b6   : > { %2522 = vst [vmem:[%s4955_s25 + $0x78] sm:$0xff] %v3204_v16  ;;  %v2348_v56 = vadd.f32 %v2316_v58, %v5416_v42  ;;  %v2318_v44 = vmul.f32 %v2242_v8, %v4937_v48 }
 0x2b7   : > { %v2349_v43 = vadd.f32 %v2317_v55, %v5417_v12  ;;  %v5424_v55 = vld [vmem:[#allocation18_spill] sm:$0xff] }
 0x2b8   : > { %v3205_v33 = vpack.c.bf16 %v2348_v56, %v2347_v11  ;;  %v2350_v47 = vadd.f32 %v2318_v44, %v5418_v1  ;;  %v5425_v56 = vld [vmem:[#allocation20_spill] sm:$0xff] }
 0x2ba   : > { %2619 = vst [vmem:[%s5148_s14] sm:$0xff] %v3205_v33  ;;  %v3206_v52 = vpack.c.bf16 %v2350_v47, %v2349_v43  ;;  %v2246_v25 = vpop.f32.mrb[68].mxu1  ;;  %v5426_v43 = vld [vmem:[#allocation22_spill] sm:$0xff] }
 0x2bb   : > { %v2319_v57 = vmul.f32 %v2246_v25, %v4949_v20  ;;  %v2248_v36 = vpop.f32.mrb[69].mxu1  ;;  %v5427_v25 = vld [vmem:[#allocation27_spill] sm:$0xff] }
 0x2bc   : > { %2620 = vst [vmem:[%s5148_s14 + $0x8] sm:$0xff] %v3206_v52  ;;  %v2320_v48 = vmul.f32 %v2248_v36, %v4958_v23  ;;  %v2250_v53 = vpop.f32.mrb[70].mxu1 }
 0x2bd   : > { %v2351_v35 = vadd.f32 %v2319_v57, %v5419_v21  ;;  %v2321_v29 = vmul.f32 %v2250_v53, %v4961_v2  ;;  %v2252_v32 = vpop.f32.mrb[71].mxu1 }
 0x2be   : > { %v2352_v63 = vadd.f32 %v2320_v48, %v5420_v62  ;;  %v2322_v22 = vmul.f32 %v2252_v32, %v4967_v5  ;;  %v5428_v48 = vld [vmem:[#allocation30_spill] sm:$0xff] }
 0x2bf   : > { %v2353_v59 = vadd.f32 %v2321_v29, %v5421_v9  ;;  %v5430_v62 = vld [vmem:[#allocation34_spill] sm:$0xff] }
 0x2c0   : > { %v3207_v60 = vpack.c.bf16 %v2352_v63, %v2351_v35  ;;  %v2354_v20 = vadd.f32 %v2322_v22, %v5422_v26  ;;  %v5429_v35 = vld [vmem:[#allocation32_spill] sm:$0xff] }
 0x2c2   : > { %2621 = vst [vmem:[%s5148_s14 + $0x10] sm:$0xff] %v3207_v60  ;;  %v3208_v37 = vpack.c.bf16 %v2354_v20, %v2353_v59  ;;  %v2256_v28 = vpop.f32.mrb[72].mxu1  ;;  %v5431_v60 = vld [vmem:[#allocation39_spill] sm:$0xff] }
 0x2c3   : > { %v2323_v23 = vmul.f32 %v2256_v28, %v4981_v34  ;;  %v2258_v16 = vpop.f32.mrb[73].mxu1 }
 0x2c4   : > { %2622 = vst [vmem:[%s5148_s14 + $0x18] sm:$0xff] %v3208_v37  ;;  %v2324_v2 = vmul.f32 %v2258_v16, %v4984_v15  ;;  %v2260_v58 = vpop.f32.mrb[74].mxu1  ;;  %v5432_v37 = vld [vmem:[#allocation42_spill] sm:$0xff]  ;;  %v5433_v16 = vld [vmem:[#allocation44_spill] sm:$0xff] }
 0x2c5   : > { %v2355_v7 = vadd.f32 %v2323_v23, %v5423_v49  ;;  %v2325_v5 = vmul.f32 %v2260_v58, %v4987_v30  ;;  %v2262_v11 = vpop.f32.mrb[75].mxu1  ;;  %v5434_v49 = vld [vmem:[#allocation46_spill] sm:$0xff] }
 0x2c6   : > { %v2356_v8 = vadd.f32 %v2324_v2, %v5424_v55  ;;  %v2326_v42 = vmul.f32 %v2262_v11, %v4993_v14 }
 0x2c7   : > { %v2357_v44 = vadd.f32 %v2325_v5, %v5425_v56 }
 0x2c8   : > { %v3209_v12 = vpack.c.bf16 %v2356_v8, %v2355_v7  ;;  %v2358_v34 = vadd.f32 %v2326_v42, %v5426_v43  ;;  %v5435_v8 = vld [vmem:[#allocation51_spill] sm:$0xff] }
 0x2ca   : > { %2623 = vst [vmem:[%s5148_s14 + $0x20] sm:$0xff] %v3209_v12  ;;  %v3210_v33 = vpack.c.bf16 %v2358_v34, %v2357_v44  ;;  %v2266_v1 = vpop.f32.mrb[76].mxu1  ;;  %v5436_v44 = vld [vmem:[#allocation54_spill] sm:$0xff]  ;;  %v5437_v34 = vld [vmem:[#allocation56_spill] sm:$0xff] }
 0x2cb   : > { %v2327_v15 = vmul.f32 %v2266_v1, %v5007_v41  ;;  %v2268_v47 = vpop.f32.mrb[77].mxu1 }
 0x2cc   : > { %2624 = vst [vmem:[%s5148_s14 + $0x28] sm:$0xff] %v3210_v33  ;;  %v2328_v30 = vmul.f32 %v2268_v47, %v5010_v46  ;;  %v2270_v52 = vpop.f32.mrb[78].mxu1 }
 0x2cd   : > { %v2359_v57 = vadd.f32 %v2327_v15, %v5427_v25  ;;  %v2329_v14 = vmul.f32 %v2270_v52, %v5013_v61  ;;  %v2272_v36 = vpop.f32.mrb[79].mxu1  ;;  %v5438_v15 = vld [vmem:[#allocation58_spill] sm:$0xff] }
 0x2ce   : > { %v2360_v53 = vadd.f32 %v2328_v30, %v5428_v48  ;;  %v2330_v21 = vmul.f32 %v2272_v36, %v5019_v40  ;;  %v5440_v48 = vld [vmem:[#allocation65_spill] sm:$0xff] }
 0x2cf   : > { %v2361_v29 = vadd.f32 %v2329_v14, %v5429_v35  ;;  %v5441_v35 = vld [vmem:[#allocation67_spill] sm:$0xff] }
 0x2d0   : > { %v3211_v32 = vpack.c.bf16 %v2360_v53, %v2359_v57  ;;  %v2362_v41 = vadd.f32 %v2330_v21, %v5430_v62  ;;  %v5439_v57 = vld [vmem:[#allocation62_spill] sm:$0xff]  ;;  %v5442_v62 = vld [vmem:[#allocation69_spill] sm:$0xff] }
 0x2d2   : > { %2625 = vst [vmem:[%s5148_s14 + $0x30] sm:$0xff] %v3211_v32  ;;  %v3212_v63 = vpack.c.bf16 %v2362_v41, %v2361_v29  ;;  %v2276_v22 = vpop.f32.mrb[80].mxu1 }
 0x2d3   : > { %v2331_v46 = vmul.f32 %v2276_v22, %v5033_v45  ;;  %v2278_v9 = vpop.f32.mrb[81].mxu1 }
 0x2d4   : > { %2626 = vst [vmem:[%s5148_s14 + $0x38] sm:$0xff] %v3212_v63  ;;  %v2332_v61 = vmul.f32 %v2278_v9, %v5036_v19  ;;  %v2280_v59 = vpop.f32.mrb[82].mxu1  ;;  %v5443_v9 = vld [vmem:[#allocation71_spill] sm:$0xff] }
 0x2d5   : > { %v2363_v26 = vadd.f32 %v2331_v46, %v5431_v60  ;;  %v2333_v40 = vmul.f32 %v2280_v59, %v5039_v3  ;;  %v2282_v20 = vpop.f32.mrb[83].mxu1  ;;  %v5444_v60 = vld [vmem:[#allocation72_spill] sm:$0xff] }
 0x2d6   : > { %v2364_v28 = vadd.f32 %v2332_v61, %v5432_v37  ;;  %v2334_v23 = vmul.f32 %v2282_v20, %v5045_v54 }
 0x2d7   : > { %v2365_v2 = vadd.f32 %v2333_v40, %v5433_v16 }
 0x2d8   : > { %v3213_v58 = vpack.c.bf16 %v2364_v28, %v2363_v26  ;;  %v2366_v45 = vadd.f32 %v2334_v23, %v5434_v49 }
 0x2da   : > { %2627 = vst [vmem:[%s5148_s14 + $0x40] sm:$0xff] %v3213_v58  ;;  %v3214_v7 = vpack.c.bf16 %v2366_v45, %v2365_v2  ;;  %v2286_v5 = vpop.f32.mrb[84].mxu1 }
 0x2db   : > { %v2335_v19 = vmul.f32 %v2286_v5, %v5059_v0  ;;  %v2288_v11 = vpop.f32.mrb[85].mxu1 }
 0x2dc   : > { %2628 = vst [vmem:[%s5148_s14 + $0x48] sm:$0xff] %v3214_v7  ;;  %v2336_v3 = vmul.f32 %v2288_v11, %v5062_v24  ;;  %v2290_v55 = vpop.f32.mrb[86].mxu1 }
 0x2dd   : > { %v2367_v42 = vadd.f32 %v2335_v19, %v5435_v8  ;;  %v2337_v54 = vmul.f32 %v2290_v55, %v5065_v10  ;;  %v2292_v56 = vpop.f32.mrb[87].mxu1 }
 0x2de   : > { %v2368_v12 = vadd.f32 %v2336_v3, %v5436_v44  ;;  %v2338_v43 = vmul.f32 %v2292_v56, %v5071_v17 }
 0x2df   : > { %v2369_v33 = vadd.f32 %v2337_v54, %v5437_v34 }
 0x2e0   : > { %v3215_v1 = vpack.c.bf16 %v2368_v12, %v2367_v42  ;;  %v2370_v0 = vadd.f32 %v2338_v43, %v5438_v15 }
 0x2e2   : > { %2629 = vst [vmem:[%s5148_s14 + $0x50] sm:$0xff] %v3215_v1  ;;  %v3216_v47 = vpack.c.bf16 %v2370_v0, %v2369_v33  ;;  %v2296_v30 = vpop.f32.mrb[88].mxu1 }
 0x2e3   : > { %v2339_v24 = vmul.f32 %v2296_v30, %v5085_v50  ;;  %v2298_v52 = vpop.f32.mrb[89].mxu1 }
 0x2e4   : > { %2630 = vst [vmem:[%s5148_s14 + $0x58] sm:$0xff] %v3216_v47  ;;  %v2340_v10 = vmul.f32 %v2298_v52, %v5088_v38  ;;  %v2300_v25 = vpop.f32.mrb[90].mxu1 }
 0x2e5   : > { %v2371_v14 = vadd.f32 %v2339_v24, %v5439_v57  ;;  %v2341_v17 = vmul.f32 %v2300_v25, %v5091_v27  ;;  %v2302_v36 = vpop.f32.mrb[91].mxu1 }
 0x2e6   : > { %v2372_v53 = vadd.f32 %v2340_v10, %v5440_v48  ;;  %v2342_v21 = vmul.f32 %v2302_v36, %v5097_v6 }
 0x2e7   : > { %v2373_v29 = vadd.f32 %v2341_v17, %v5441_v35 }
 0x2e8   : > { %v3217_v32 = vpack.c.bf16 %v2372_v53, %v2371_v14  ;;  %v2374_v50 = vadd.f32 %v2342_v21, %v5442_v62 }
 0x2ea   : > { %2631 = vst [vmem:[%s5148_s14 + $0x60] sm:$0xff] %v3217_v32  ;;  %v3218_v41 = vpack.c.bf16 %v2374_v50, %v2373_v29  ;;  %v2306_v63 = vpop.f32.mrb[92].mxu1 }
 0x2eb   : > { %v2343_v38 = vmul.f32 %v2306_v63, %v5111_v18  ;;  %v2308_v22 = vpop.f32.mrb[93].mxu1 }
 0x2ec   : > { %2632 = vst [vmem:[%s5148_s14 + $0x68] sm:$0xff] %v3218_v41  ;;  %v2344_v27 = vmul.f32 %v2308_v22, %v5114_v51  ;;  %v2310_v46 = vpop.f32.mrb[94].mxu1 }
 0x2ed   : > { %v2375_v61 = vadd.f32 %v2343_v38, %v5443_v9  ;;  %v2345_v6 = vmul.f32 %v2310_v46, %v5117_v31  ;;  %v2312_v59 = vpop.f32.mrb[95].mxu1 }
 0x2ee   : > { %v2376_v26 = vadd.f32 %v2344_v27, %v5444_v60  ;;  %v2346_v40 = vmul.f32 %v2312_v59, %v5123_v13 }
 0x2ef   : > { %v2377_v20 = vadd.f32 %v2345_v6, %v4842_v4 }
 0x2f0   : > { %v3219_v37 = vpack.c.bf16 %v2376_v26, %v2375_v61  ;;  %v2378_v28 = vadd.f32 %v2346_v40, %v4849_v39 }
 0x2f2   : > { %2633 = vst [vmem:[%s5148_s14 + $0x70] sm:$0xff] %v3219_v37  ;;  %v3220_v18 = vpack.c.bf16 %v2378_v28, %v2377_v20 }
 0x2f4   : > { %2634 = vst [vmem:[%s5148_s14 + $0x78] sm:$0xff] %v3220_v18 }
 0x2f5 PF: > { %s21_s17 = sadd.s32 1, %s3539_s17   ;;  %s5445_s13 = smov %s3531_s15 }
 0x2f6   : > { %p18_p7 = scmp.ge.s32.totalorder %s21_s17, 6   ;;  %s5446_s14 = smov %s3535_s16 }
 0x2f7   : > { %s5447_s15 = smov %s5450_s18  ;;  %s5448_s16 = smov %s5454_s19 }
 0x2f8   :  { %20 = sbr.rel (!%p18_p7) target bundleno = 3 (0x3), region = 112 }

// kernel: transformer_block_forward.5
= control target key start
LH: loop header
LB: loop body
LE: loop exit
PB: predicated region body
PF: predicated region fallthrough
CT: control target
= control target key end

     0   :  { %s4847_s0 = inlined_call_operand.vmem [shape: f32[2,256,256], index: 0, kind: input, shape index: {}]   ;;  %s4848_s1 = inlined_call_operand.vmem [shape: bf16[2,256,256], index: 1, kind: input, shape index: {}]   ;;  %s4849_s2 = inlined_call_operand.vmem [shape: bf16[256,256], index: 2, kind: input, shape index: {}]   ;;  %s4850_s3 = inlined_call_operand.vmem [shape: f32[1,256], index: 3, kind: input, shape index: {}]   ;;  %s4851_s4 = inlined_call_operand.vmem [shape: bf16[512,256], index: 4, kind: input, shape index: {}]   ;;  %s4852_s5 = inlined_call_operand.vmem [shape: bf16[512,256], index: 5, kind: input, shape index: {}]   ;;  %s4853_s6 = inlined_call_operand.vmem [shape: bf16[256,512], index: 6, kind: input, shape index: {}]   ;;  %s4854_s7 = inlined_call_operand.hbm [shape: f32[2,256,256], index: 7, kind: output, shape index: {}]  }
   0x1   :  { %4867 = sst [smem:[#allocation21_spill]] %s4853_s6 }
   0x2   :  { %4868 = sst [smem:[#allocation22_spill]] %s4854_s7 }
   0x3   :  { %12 = vsyncpa [#allocation7], 0 }
   0x4   :  { %14 = vsyncpa [#allocation7 + $0x1], 0  ;;  %s3826_s24 = smov 0   ;;  %s3828_s25 = smov 0  }
   0x5   :  { %s3830_s26 = smov 0   ;;  %s3832_s27 = smov 0  }
   0x6   :  { %s3834_s28 = smov 0   ;;  %s3836_s29 = smov 0  }
   0x7   :  { %s3838_s30 = smov 0   ;;  %s3840_s8 = smov 0  }
   0x8   :  { %s3842_s9 = smov 0   ;;  %s3844_s10 = smov 0  }
   0x9   :  { %s3846_s11 = smov 0   ;;  %s3848_s12 = smov 0  }
   0xa LB: > { %4869 = sst [smem:[#allocation9_spill]] %s3736_s24  ;;  %s2927_s13 = sadd.s32 4294967295, %s3780_s12   ;;  %s3780_s12 = sphi %s3848_s12, %s20_s12   ;;  %s3776_s11 = sphi %s3846_s11, %s4898_s11   ;;  %s3772_s10 = sphi %s3844_s10, %s4897_s10   ;;  %s3768_s9 = sphi %s3842_s9, %s4896_s9   ;;  %s3764_s8 = sphi %s3840_s8, %s4895_s8   ;;  %s3760_s30 = sphi %s3838_s30, %s4894_s30   ;;  %s3756_s29 = sphi %s3836_s29, %s4893_s29   ;;  %s3752_s28 = sphi %s3834_s28, %s4892_s28   ;;  %s3748_s27 = sphi %s3832_s27, %s4891_s27   ;;  %s3744_s26 = sphi %s3830_s26, %s4890_s26   ;;  %s3740_s25 = sphi %s3828_s25, %s4900_s25   ;;  %s3736_s24 = sphi %s3826_s24, %s4899_s24  }
   0xb   : > { %4870 = sst [smem:[#allocation10_spill]] %s3744_s26  ;;  %s2928_s14 = sadd.s32 4294967294, %s3780_s12  }
   0xc   : > { %4871 = sst [smem:[#allocation11_spill]] %s3752_s28  ;;  %s32_s15 = sadd.s32 1, %s3768_s9 }
   0xd   : > { %4872 = sst [smem:[#allocation12_spill]] %s3768_s9  ;;  %p33_p0 = scmp.ge.s32.totalorder %s32_s15, 2 }
   0xe   : > { %4873 = sst [smem:[#allocation13_spill]] %s3772_s10  ;;  %s35_s16 = sadd.s32 1, %s3772_s10 }
   0xf   : > { %4874 = sst [smem:[#allocation14_spill]] %s3776_s11  ;;  %s39_s17 = sadd.s32 1, %s3776_s11 }
  0x10   : > { %p203_p1 = scmp.ne.s32.totalorder %s3752_s28, %s3748_s27  ;;  %s4902_s15 = smov (%p33_p0, %s32_s15), 0 }
  0x11   : > { %4875 = sst [smem:[#allocation15_spill]] %s4902_s15  ;;  %s4904_s16 = smov (!%p33_p0, %s35_s16), %s3772_s10 }
  0x12   : > { %s193_s18 = ssub.s32 %s3768_s9, %s4902_s15  ;;  %p204_p2 = scmp.eq.s32.totalorder %s3780_s12, 0 }
  0x13   : > { %p37_p3 = scmp.ge.s32.totalorder %s4904_s16, 2  ;;  %p194_p4 = scmp.eq.s32.totalorder %s193_s18, 0 }
  0x14   : > { %s196_s19 = sadd.s32 1, %s3752_s28  ;;  %p3900_p5 = por %p204_p2, %p203_p1 }
  0x15   : > { %s4906_s16 = smov (%p37_p3, %s4904_s16), 0  ;;  %s4908_s17 = smov (!%p37_p3, %s39_s17), %s3776_s11 }
  0x16   : > { %4877 = sst [smem:[#allocation16_spill]] %s4906_s16  ;;  %p41_p6 = scmp.ge.s32.totalorder %s4908_s17, 2 }
  0x17   : > { %s3908_s21 = scalar_select %p194_p4, %s3752_s28, %s196_s19  }
  0x18   : > { %s220_s22 = ssub.s32 %s3772_s10, %s4906_s16  ;;  %p234_p7 = scmp.ne.s32.totalorder %s3744_s26, %s3740_s25 }
  0x19   : > { %4878 = sst [smem:[#allocation17_spill]] %s3908_s21  ;;  %p235_p8 = scmp.eq.s32.totalorder %s2927_s13, 7 }
  0x1a   : > { %s4910_s17 = smov (%p41_p6, %s4908_s17), 0  ;;  %p240_p10 = scmp.ne.s32.totalorder %s3740_s25, %s3736_s24 }
  0x1b   : > { %4879 = sst [smem:[#allocation18_spill]] %s4910_s17  ;;  %p3916_p9 = por %p235_p8, %p234_p7 }
  0x1c   : > { %s219_s18 = ssub.s32 %s3776_s11, %s4910_s17  ;;  %p241_p11 = scmp.eq.s32.totalorder %s2928_s14, 7 }
  0x1d   : > { %s221_s15 = sor.u32 %s220_s22, %s219_s18  ;;  %s224_s7 = sadd.s32 1, %s3744_s26 }
  0x1e   : > { %p222_p12 = scmp.eq.s32.totalorder %s221_s15, 0  ;;  %p3925_p13 = por %p241_p11, %p240_p10 }
  0x1f   : > { %p2930_p0 = scmp.ge.s32.totalorder %s3780_s12, 8 }
  0x20   : > { %s4881_s19 = scalar_select %p3925_p13, 1, 0 }
  0x21   : > { %s3930_s16 = scalar_select %p222_p12, %s3744_s26, %s224_s7  }
  0x22   : > { %4882 = sst [smem:[#allocation19_spill]] %s4881_s19  ;;  %263 = sbr.rel (%p2930_p0) target bundleno = 67 (0x43), region = 24 }
  0x23   : > { %4883 = sst [smem:[#allocation20_spill]] %s3930_s16 }
  0x29   : > { %314 = sbr.rel (!%p3900_p5) target bundleno = 67 (0x43), region = 44  ;;  %s316_s13 = sand.u32 (%p3900_p5), 1, %s3752_s28  }
  0x2a   : > { %s3104_s17 = sshll.u32 (%p3900_p5), %s3768_s9, 3  ;;  %s2931_s14 = sshll.u32 (%p3900_p5), %s316_s13, 8 }
  0x2b   : > { %s4884_s6 = sld [smem:[#allocation21_spill]] (%p3900_p5)  ;;  %s3945_s7 = scalar_lea.vmem (%p3900_p5), [#allocation5], %s2931_s14 }
  0x31   : > { %s3940_s15 = scalar_lea.vmem %s4884_s6, %s3104_s17 }
  0x32   : > { %v411_v0 = vld [vmem:[%s3940_s15] sm:$0xff]  ;;  %v413_v1 = vld [vmem:[%s3940_s15 + $0x10] sm:$0xff] }
  0x33   : > { %v415_v2 = vld [vmem:[%s3940_s15 + $0x20] sm:$0xff]  ;;  %412 = vst [vmem:[%s3945_s7] sm:$0xff] %v411_v0  ;;  %414 = vst [vmem:[%s3945_s7 + $0x8] sm:$0xff] %v413_v1  ;;  %v417_v3 = vld [vmem:[%s3940_s15 + $0x30] sm:$0xff] }
  0x34   : > { %416 = vst [vmem:[%s3945_s7 + $0x10] sm:$0xff] %v415_v2  ;;  %v419_v4 = vld [vmem:[%s3940_s15 + $0x40] sm:$0xff]  ;;  %v421_v5 = vld [vmem:[%s3940_s15 + $0x50] sm:$0xff]  ;;  %418 = vst [vmem:[%s3945_s7 + $0x18] sm:$0xff] %v417_v3 }
  0x35   : > { %420 = vst [vmem:[%s3945_s7 + $0x20] sm:$0xff] %v419_v4  ;;  %422 = vst [vmem:[%s3945_s7 + $0x28] sm:$0xff] %v421_v5  ;;  %v423_v6 = vld [vmem:[%s3940_s15 + $0x60] sm:$0xff]  ;;  %v425_v7 = vld [vmem:[%s3940_s15 + $0x70] sm:$0xff] }
  0x36   : > { %v427_v8 = vld [vmem:[%s3940_s15 + $0x80] sm:$0xff]  ;;  %424 = vst [vmem:[%s3945_s7 + $0x30] sm:$0xff] %v423_v6  ;;  %426 = vst [vmem:[%s3945_s7 + $0x38] sm:$0xff] %v425_v7  ;;  %v429_v9 = vld [vmem:[%s3940_s15 + $0x90] sm:$0xff] }
  0x37   : > { %428 = vst [vmem:[%s3945_s7 + $0x40] sm:$0xff] %v427_v8  ;;  %v431_v10 = vld [vmem:[%s3940_s15 + $0xa0] sm:$0xff]  ;;  %v433_v11 = vld [vmem:[%s3940_s15 + $0xb0] sm:$0xff]  ;;  %430 = vst [vmem:[%s3945_s7 + $0x48] sm:$0xff] %v429_v9 }
  0x38   : > { %432 = vst [vmem:[%s3945_s7 + $0x50] sm:$0xff] %v431_v10  ;;  %434 = vst [vmem:[%s3945_s7 + $0x58] sm:$0xff] %v433_v11  ;;  %v435_v12 = vld [vmem:[%s3940_s15 + $0xc0] sm:$0xff]  ;;  %v437_v13 = vld [vmem:[%s3940_s15 + $0xd0] sm:$0xff] }
  0x39   : > { %v439_v14 = vld [vmem:[%s3940_s15 + $0xe0] sm:$0xff]  ;;  %436 = vst [vmem:[%s3945_s7 + $0x60] sm:$0xff] %v435_v12  ;;  %438 = vst [vmem:[%s3945_s7 + $0x68] sm:$0xff] %v437_v13  ;;  %v441_v15 = vld [vmem:[%s3940_s15 + $0xf0] sm:$0xff] }
  0x3a   : > { %440 = vst [vmem:[%s3945_s7 + $0x70] sm:$0xff] %v439_v14  ;;  %v443_v16 = vld [vmem:[%s3940_s15 + $0x100] sm:$0xff]  ;;  %v445_v17 = vld [vmem:[%s3940_s15 + $0x110] sm:$0xff]  ;;  %442 = vst [vmem:[%s3945_s7 + $0x78] sm:$0xff] %v441_v15 }
  0x3b   : > { %444 = vst [vmem:[%s3945_s7 + $0x80] sm:$0xff] %v443_v16  ;;  %446 = vst [vmem:[%s3945_s7 + $0x88] sm:$0xff] %v445_v17  ;;  %v447_v18 = vld [vmem:[%s3940_s15 + $0x120] sm:$0xff]  ;;  %v449_v19 = vld [vmem:[%s3940_s15 + $0x130] sm:$0xff] }
  0x3c   : > { %v451_v20 = vld [vmem:[%s3940_s15 + $0x140] sm:$0xff]  ;;  %448 = vst [vmem:[%s3945_s7 + $0x90] sm:$0xff] %v447_v18  ;;  %450 = vst [vmem:[%s3945_s7 + $0x98] sm:$0xff] %v449_v19  ;;  %v453_v21 = vld [vmem:[%s3940_s15 + $0x150] sm:$0xff] }
  0x3d   : > { %452 = vst [vmem:[%s3945_s7 + $0xa0] sm:$0xff] %v451_v20  ;;  %v455_v22 = vld [vmem:[%s3940_s15 + $0x160] sm:$0xff]  ;;  %v457_v23 = vld [vmem:[%s3940_s15 + $0x170] sm:$0xff]  ;;  %454 = vst [vmem:[%s3945_s7 + $0xa8] sm:$0xff] %v453_v21 }
  0x3e   : > { %456 = vst [vmem:[%s3945_s7 + $0xb0] sm:$0xff] %v455_v22  ;;  %458 = vst [vmem:[%s3945_s7 + $0xb8] sm:$0xff] %v457_v23  ;;  %v459_v24 = vld [vmem:[%s3940_s15 + $0x180] sm:$0xff]  ;;  %v461_v25 = vld [vmem:[%s3940_s15 + $0x190] sm:$0xff] }
  0x3f   : > { %v463_v26 = vld [vmem:[%s3940_s15 + $0x1a0] sm:$0xff]  ;;  %460 = vst [vmem:[%s3945_s7 + $0xc0] sm:$0xff] %v459_v24  ;;  %462 = vst [vmem:[%s3945_s7 + $0xc8] sm:$0xff] %v461_v25  ;;  %v465_v27 = vld [vmem:[%s3940_s15 + $0x1b0] sm:$0xff] }
  0x40   : > { %464 = vst [vmem:[%s3945_s7 + $0xd0] sm:$0xff] %v463_v26  ;;  %v467_v28 = vld [vmem:[%s3940_s15 + $0x1c0] sm:$0xff]  ;;  %v469_v29 = vld [vmem:[%s3940_s15 + $0x1d0] sm:$0xff]  ;;  %466 = vst [vmem:[%s3945_s7 + $0xd8] sm:$0xff] %v465_v27 }
  0x41   : > { %468 = vst [vmem:[%s3945_s7 + $0xe0] sm:$0xff] %v467_v28  ;;  %470 = vst [vmem:[%s3945_s7 + $0xe8] sm:$0xff] %v469_v29  ;;  %v471_v30 = vld [vmem:[%s3940_s15 + $0x1e0] sm:$0xff]  ;;  %v473_v31 = vld [vmem:[%s3940_s15 + $0x1f0] sm:$0xff] }
  0x42   : > { %472 = vst [vmem:[%s3945_s7 + $0xf0] sm:$0xff] %v471_v30  ;;  %474 = vst [vmem:[%s3945_s7 + $0xf8] sm:$0xff] %v473_v31 }
  0x43 PF: > { %p2934_p1 = scmp.ge.s32.totalorder %s3780_s12, 1  ;;  %p479_p2 = scmp.lt.s32.totalorder %s3780_s12, 9 }
  0x45   : > { %p480_p3 = pnand %p2934_p1, %p479_p2 }
  0x46   : > { %s486_s17 = sand.u32 (!%p480_p3), 1, %s3748_s27   ;;  %s4863_s20 = sand.u32 (!%p480_p3), 1, %s3740_s25  }
  0x47   : > { %483 = sbr.rel (%p480_p3) target bundleno = 1321 (0x529), region = 82  ;;  %s2935_s13 = sshll.u32 (!%p480_p3), %s486_s17, 8 }
  0x48   : > { %s2936_s14 = sshll.u32 (!%p480_p3), %s4863_s20, 8  ;;  %s2937_s22 = sshll.u32 (!%p480_p3), %s3760_s30, 4 }
  0x49   : > { %p550_p4 = scmp.lt.s32.totalorder (!%p480_p3), %s3764_s8, 1  ;;  %p552_p5 = scmp.lt.s32.totalorder (!%p480_p3), %s2937_s22, 31 }
  0x4a   : > { %s2945_s18 = sshll.u32 (!%p480_p3), %s3756_s29, 5  ;;  %s4038_s28 = scalar_lea.vmem (!%p480_p3), [#allocation5], %s2935_s13 }
  0x4b   : > { %p572_p6 = scmp.lt.s32.totalorder (!%p480_p3), %s2945_s18, 63  ;;  %p2951_p7 = scmp.ne.s32.totalorder (!%p480_p3), %s3756_s29, 0 }
  0x4e   : > { %s551_s15 = scalar_select %p550_p4, %s3764_s8, 1 }
  0x4f   : > { %s4912_s22 = smov (!%p552_p5, %s2937_s22), 31  ;;  %s4914_s18 = smov (!%p572_p6, %s2945_s18), 63 }
  0x50   : > { %s2939_s7 = sshll.u32 %s551_s15, 6  ;;  %s2938_s6 = sshll.u32 %s4912_s22, 1  ;;  %v3278_v32 = vld [vmem:[%s4849_s2 + $0x4] ss:$8 sps:$4 sm:$0xff] (!%p2951_p7)   ;;  %v3280_v33 = vld [vmem:[%s4849_s2] ss:$8 sps:$4 sm:$0xff] (!%p2951_p7)  }
  0x51   : > { %s556_s11 = sadd.s32 %s2939_s7, %s2938_s6  ;;  %s3105_s26 = sshll.u32 %s4914_s18, 3  ;;  %911 = vmatprep.subr.bf16.mxu0 (!%p2951_p7), %v3278_v32  ;;  %3108 = vmatprep.subr.bf16.mxu1 (!%p2951_p7), %v3278_v32  ;;  %v3281_v34 = vld [vmem:[%s4849_s2 + $0x14] ss:$8 sps:$4 sm:$0xff] (!%p2951_p7)   ;;  %v3283_v35 = vld [vmem:[%s4849_s2 + $0x10] ss:$8 sps:$4 sm:$0xff] (!%p2951_p7)  }
  0x52   : > { %s2940_s10 = sshll.u32 %s556_s11, 3  ;;  %s2944_s9 = sshll.u32 %s556_s11, 2  ;;  %912 = vmatpush1.bf16.xpose.msra.mxu0 (!%p2951_p7), %v3280_v33  ;;  %3124 = vmatpush1.bf16.xpose.msra.mxu1 (!%p2951_p7), %v3280_v33  ;;  %v3284_v36 = vld [vmem:[%s4849_s2 + $0x24] ss:$8 sps:$4 sm:$0xff] (!%p2951_p7)   ;;  %v3286_v37 = vld [vmem:[%s4849_s2 + $0x20] ss:$8 sps:$4 sm:$0xff] (!%p2951_p7)  }
  0x53   : > { %s4021_s27 = scalar_lea.vmem %s4847_s0, %s2940_s10  ;;  %s4026_s20 = scalar_lea.vmem %s4848_s1, %s2944_s9  ;;  %913 = vmatprep.subr.bf16.mxu0 (!%p2951_p7), %v3281_v34  ;;  %3109 = vmatprep.subr.bf16.mxu1 (!%p2951_p7), %v3281_v34  ;;  %v3287_v38 = vld [vmem:[%s4849_s2 + $0x34] ss:$8 sps:$4 sm:$0xff] (!%p2951_p7)   ;;  %v3289_v40 = vld [vmem:[%s4849_s2 + $0x30] ss:$8 sps:$4 sm:$0xff] (!%p2951_p7)   ;;  %v3290_v42 = vld [vmem:[%s4849_s2 + $0x44] ss:$8 sps:$4 sm:$0xff] (!%p2951_p7)  }
  0x54   : > { %s4031_s22 = scalar_lea.vmem %s4851_s4, %s3105_s26  ;;  %s4036_s11 = scalar_lea.vmem %s4852_s5, %s3105_s26  ;;  %v3328_v39 = vld [vmem:[%s4026_s20 + $0x4] ss:$8 sps:$4 sm:$0xff] (!%p2951_p7)   ;;  %v3292_v43 = vld [vmem:[%s4849_s2 + $0x40] ss:$8 sps:$4 sm:$0xff] (!%p2951_p7)   ;;  %v3293_v44 = vld [vmem:[%s4849_s2 + $0x54] ss:$8 sps:$4 sm:$0xff] (!%p2951_p7)  }
  0x55   : > { %s4040_s10 = scalar_lea.vmem [#allocation6], %s2936_s14  ;;  %590 = sbr.rel (%p2951_p7) target bundleno = 626 (0x272), region = 90  ;;  %v3331_v41 = vld [vmem:[%s4026_s20 + $0x44] ss:$8 sps:$4 sm:$0xff] (!%p2951_p7)   ;;  %943 = vmatprep.mubr.bf16.mxu0 (!%p2951_p7), %v3328_v39  ;;  %v3295_v45 = vld [vmem:[%s4849_s2 + $0x50] ss:$8 sps:$4 sm:$0xff] (!%p2951_p7)  }
  0x56   : > { %983 = vmatprep.mubr.bf16.mxu1 (!%p2951_p7), %v3331_v41  ;;  %v3296_v46 = vld [vmem:[%s4849_s2 + $0x64] ss:$8 sps:$4 sm:$0xff] (!%p2951_p7)   ;;  %v3298_v47 = vld [vmem:[%s4849_s2 + $0x60] ss:$8 sps:$4 sm:$0xff] (!%p2951_p7)   ;;  %v3299_v48 = vld [vmem:[%s4849_s2 + $0x74] ss:$8 sps:$4 sm:$0xff] (!%p2951_p7)  }
  0x57   : > { %v3301_v49 = vld [vmem:[%s4849_s2 + $0x70] ss:$8 sps:$4 sm:$0xff] (!%p2951_p7)   ;;  %v3302_v50 = vld [vmem:[%s4849_s2 + $0x84] ss:$8 sps:$4 sm:$0xff] (!%p2951_p7)   ;;  %v3304_v51 = vld [vmem:[%s4849_s2 + $0x80] ss:$8 sps:$4 sm:$0xff] (!%p2951_p7)  }
  0x58   : > { %v3305_v52 = vld [vmem:[%s4849_s2 + $0x94] ss:$8 sps:$4 sm:$0xff] (!%p2951_p7)   ;;  %v3307_v53 = vld [vmem:[%s4849_s2 + $0x90] ss:$8 sps:$4 sm:$0xff] (!%p2951_p7)   ;;  %v3308_v54 = vld [vmem:[%s4849_s2 + $0xa4] ss:$8 sps:$4 sm:$0xff] (!%p2951_p7)  }
  0x59   : > { %v3310_v55 = vld [vmem:[%s4849_s2 + $0xa0] ss:$8 sps:$4 sm:$0xff] (!%p2951_p7)   ;;  %v3311_v56 = vld [vmem:[%s4849_s2 + $0xb4] ss:$8 sps:$4 sm:$0xff] (!%p2951_p7)   ;;  %v3313_v57 = vld [vmem:[%s4849_s2 + $0xb0] ss:$8 sps:$4 sm:$0xff] (!%p2951_p7)  }
  0x5a   : > { %914 = vmatpush1.bf16.xpose.msra.mxu0 (!%p2951_p7), %v3283_v35  ;;  %3125 = vmatpush1.bf16.xpose.msra.mxu1 (!%p2951_p7), %v3283_v35  ;;  %v3314_v58 = vld [vmem:[%s4849_s2 + $0xc4] ss:$8 sps:$4 sm:$0xff] (!%p2951_p7)   ;;  %v3316_v59 = vld [vmem:[%s4849_s2 + $0xc0] ss:$8 sps:$4 sm:$0xff] (!%p2951_p7)   ;;  %v3317_v60 = vld [vmem:[%s4849_s2 + $0xd4] ss:$8 sps:$4 sm:$0xff] (!%p2951_p7)  }
  0x5b   : > { %915 = vmatprep.subr.bf16.mxu0 (!%p2951_p7), %v3284_v36  ;;  %3110 = vmatprep.subr.bf16.mxu1 (!%p2951_p7), %v3284_v36  ;;  %v3319_v61 = vld [vmem:[%s4849_s2 + $0xd0] ss:$8 sps:$4 sm:$0xff] (!%p2951_p7)   ;;  %v3320_v62 = vld [vmem:[%s4849_s2 + $0xe4] ss:$8 sps:$4 sm:$0xff] (!%p2951_p7)   ;;  %v3322_v63 = vld [vmem:[%s4849_s2 + $0xe0] ss:$8 sps:$4 sm:$0xff] (!%p2951_p7)  }
  0x5c   : > { %v3323_v0 = vld [vmem:[%s4849_s2 + $0xf4] ss:$8 sps:$4 sm:$0xff]   ;;  %v3325_v1 = vld [vmem:[%s4849_s2 + $0xf0] ss:$8 sps:$4 sm:$0xff]   ;;  %v3326_v2 = vld [vmem:[%s4026_s20] ss:$8 sps:$4 sm:$0xff]  }
  0x5d   : > { %v3329_v3 = vld [vmem:[%s4026_s20 + $0x40] ss:$8 sps:$4 sm:$0xff]   ;;  %v3332_v4 = vld [vmem:[%s4026_s20 + $0x14] ss:$8 sps:$4 sm:$0xff]   ;;  %v3334_v6 = vld [vmem:[%s4026_s20 + $0x10] ss:$8 sps:$4 sm:$0xff]  }
  0x5e   : > { %v3335_v5 = vld [vmem:[%s4026_s20 + $0x54] ss:$8 sps:$4 sm:$0xff]   ;;  %v3337_v7 = vld [vmem:[%s4026_s20 + $0x50] ss:$8 sps:$4 sm:$0xff]   ;;  %v3338_v8 = vld [vmem:[%s4026_s20 + $0x24] ss:$8 sps:$4 sm:$0xff]  }
  0x5f   : > { %v3341_v9 = vld [vmem:[%s4026_s20 + $0x64] ss:$8 sps:$4 sm:$0xff]   ;;  %v3340_v10 = vld [vmem:[%s4026_s20 + $0x20] ss:$8 sps:$4 sm:$0xff]   ;;  %v3344_v12 = vld [vmem:[%s4026_s20 + $0x34] ss:$8 sps:$4 sm:$0xff]  }
  0x60   : > { %v3343_v11 = vld [vmem:[%s4026_s20 + $0x60] ss:$8 sps:$4 sm:$0xff]   ;;  %v3347_v13 = vld [vmem:[%s4026_s20 + $0x74] ss:$8 sps:$4 sm:$0xff]   ;;  %v3346_v14 = vld [vmem:[%s4026_s20 + $0x30] ss:$8 sps:$4 sm:$0xff]  }
  0x61   : > { %v3349_v15 = vld [vmem:[%s4026_s20 + $0x70] ss:$8 sps:$4 sm:$0xff]   ;;  %v591_v16 = vld [vmem:[%s4021_s27] sm:$0xff]  ;;  %v592_v18 = vld [vmem:[%s4021_s27 + $0x8] sm:$0xff] }
  0x62   : > { %916 = vmatpush1.bf16.xpose.msra.mxu0 %v3286_v37  ;;  %3126 = vmatpush1.bf16.xpose.msra.mxu1 %v3286_v37  ;;  %v607_v17 = vld [vmem:[%s4021_s27 + $0x80] sm:$0xff]  ;;  %v608_v19 = vld [vmem:[%s4021_s27 + $0x88] sm:$0xff]  ;;  %v593_v22 = vld [vmem:[%s4021_s27 + $0x10] sm:$0xff] }
  0x63   : > { %917 = vmatprep.subr.bf16.mxu0 %v3287_v38  ;;  %3111 = vmatprep.subr.bf16.mxu1 %v3287_v38  ;;  %v609_v23 = vld [vmem:[%s4021_s27 + $0x90] sm:$0xff]  ;;  %v594_v28 = vld [vmem:[%s4021_s27 + $0x18] sm:$0xff] }
  0x64   : > { %v610_v29 = vld [vmem:[%s4021_s27 + $0x98] sm:$0xff] }
  0x6a   : > { %918 = vmatpush1.bf16.xpose.msra.mxu0 %v3289_v40  ;;  %3127 = vmatpush1.bf16.xpose.msra.mxu1 %v3289_v40 }
  0x6b   : > { %919 = vmatprep.subr.bf16.mxu0 %v3290_v42  ;;  %3112 = vmatprep.subr.bf16.mxu1 %v3290_v42 }
  0x72   : > { %920 = vmatpush1.bf16.xpose.msra.mxu0 %v3292_v43  ;;  %3128 = vmatpush1.bf16.xpose.msra.mxu1 %v3292_v43  ;;  %v595_v43 = vld [vmem:[%s4021_s27 + $0x20] sm:$0xff] }
  0x73   : > { %921 = vmatprep.subr.bf16.mxu0 %v3293_v44  ;;  %3113 = vmatprep.subr.bf16.mxu1 %v3293_v44 }
  0x7a   : > { %922 = vmatpush1.bf16.xpose.msra.mxu0 %v3295_v45  ;;  %3129 = vmatpush1.bf16.xpose.msra.mxu1 %v3295_v45 }
  0x7b   : > { %923 = vmatprep.subr.bf16.mxu0 %v3296_v46  ;;  %3114 = vmatprep.subr.bf16.mxu1 %v3296_v46  ;;  %v611_v46 = vld [vmem:[%s4021_s27 + $0xa0] sm:$0xff] }
  0x82   : > { %924 = vmatpush1.bf16.xpose.msra.mxu0 %v3298_v47  ;;  %3130 = vmatpush1.bf16.xpose.msra.mxu1 %v3298_v47 }
  0x83   : > { %925 = vmatprep.subr.bf16.mxu0 %v3299_v48  ;;  %3115 = vmatprep.subr.bf16.mxu1 %v3299_v48 }
  0x8a   : > { %926 = vmatpush1.bf16.xpose.msra.mxu0 %v3301_v49  ;;  %3131 = vmatpush1.bf16.xpose.msra.mxu1 %v3301_v49  ;;  %v596_v49 = vld [vmem:[%s4021_s27 + $0x28] sm:$0xff] }
  0x8b   : > { %927 = vmatprep.subr.bf16.mxu0 %v3302_v50  ;;  %3116 = vmatprep.subr.bf16.mxu1 %v3302_v50  ;;  %v612_v50 = vld [vmem:[%s4021_s27 + $0xa8] sm:$0xff] }
  0x92   : > { %928 = vmatpush1.bf16.xpose.msra.mxu0 %v3304_v51  ;;  %3132 = vmatpush1.bf16.xpose.msra.mxu1 %v3304_v51 }
  0x93   : > { %929 = vmatprep.subr.bf16.mxu0 %v3305_v52  ;;  %3117 = vmatprep.subr.bf16.mxu1 %v3305_v52  ;;  %v597_v52 = vld [vmem:[%s4021_s27 + $0x30] sm:$0xff] }
  0x9a   : > { %930 = vmatpush1.bf16.xpose.msra.mxu0 %v3307_v53  ;;  %3133 = vmatpush1.bf16.xpose.msra.mxu1 %v3307_v53 }
  0x9b   : > { %931 = vmatprep.subr.bf16.mxu0 %v3308_v54  ;;  %3118 = vmatprep.subr.bf16.mxu1 %v3308_v54 }
  0xa2   : > { %932 = vmatpush1.bf16.xpose.msra.mxu0 %v3310_v55  ;;  %3134 = vmatpush1.bf16.xpose.msra.mxu1 %v3310_v55  ;;  %v613_v55 = vld [vmem:[%s4021_s27 + $0xb0] sm:$0xff] }
  0xa3   : > { %933 = vmatprep.subr.bf16.mxu0 %v3311_v56  ;;  %3119 = vmatprep.subr.bf16.mxu1 %v3311_v56 }
  0xaa   : > { %934 = vmatpush1.bf16.xpose.msra.mxu0 %v3313_v57  ;;  %3135 = vmatpush1.bf16.xpose.msra.mxu1 %v3313_v57 }
  0xab   : > { %935 = vmatprep.subr.bf16.mxu0 %v3314_v58  ;;  %3120 = vmatprep.subr.bf16.mxu1 %v3314_v58  ;;  %v598_v58 = vld [vmem:[%s4021_s27 + $0x38] sm:$0xff] }
  0xb2   : > { %936 = vmatpush1.bf16.xpose.msra.mxu0 %v3316_v59  ;;  %3136 = vmatpush1.bf16.xpose.msra.mxu1 %v3316_v59 }
  0xb3   : > { %937 = vmatprep.subr.bf16.mxu0 %v3317_v60  ;;  %3121 = vmatprep.subr.bf16.mxu1 %v3317_v60 }
  0xba   : > { %938 = vmatpush1.bf16.xpose.msra.mxu0 %v3319_v61  ;;  %3137 = vmatpush1.bf16.xpose.msra.mxu1 %v3319_v61  ;;  %v614_v61 = vld [vmem:[%s4021_s27 + $0xb8] sm:$0xff] }
  0xbb   : > { %939 = vmatprep.subr.bf16.mxu0 %v3320_v62  ;;  %3122 = vmatprep.subr.bf16.mxu1 %v3320_v62 }
  0xc2   : > { %940 = vmatpush1.bf16.xpose.msra.mxu0 %v3322_v63  ;;  %3138 = vmatpush1.bf16.xpose.msra.mxu1 %v3322_v63 }
  0xc3   : > { %941 = vmatprep.subr.bf16.mxu0 %v3323_v0  ;;  %3123 = vmatprep.subr.bf16.mxu1 %v3323_v0 }
  0xca   : > { %942 = vmatpush1.bf16.xpose.msra.mxu0 %v3325_v1  ;;  %3139 = vmatpush1.bf16.xpose.msra.mxu1 %v3325_v1 }
  0xd1   : > { %944 = vmatmul.mubr.bf16.vlgmr.msra.gmra.mrb[0].mxu0 %v3326_v2  ;;  %984 = vmatmul.mubr.bf16.vlgmr.msra.gmra.mrb[0].mxu1 %v3329_v3 }
  0xd2   : > { %953 = vmatprep.mubr.bf16.mxu0 %v3332_v4  ;;  %993 = vmatprep.mubr.bf16.mxu1 %v3335_v5 }
  0xd9   : > { %954 = vmatmul.mubr.bf16.gmra.mrb[4].mxu0 %v3334_v6  ;;  %994 = vmatmul.mubr.bf16.gmra.mrb[4].mxu1 %v3337_v7 }
  0xda   : > { %963 = vmatprep.mubr.bf16.mxu0 %v3338_v8  ;;  %1003 = vmatprep.mubr.bf16.mxu1 %v3341_v9 }
  0xe1   : > { %964 = vmatmul.mubr.bf16.gmra.mrb[8].mxu0 %v3340_v10  ;;  %1004 = vmatmul.mubr.bf16.gmra.mrb[8].mxu1 %v3343_v11 }
  0xe2   : > { %973 = vmatprep.mubr.bf16.mxu0 %v3344_v12  ;;  %1013 = vmatprep.mubr.bf16.mxu1 %v3347_v13 }
  0xe9   : > { %974 = vmatmul.mubr.bf16.gmra.mrb[12].mxu0 %v3346_v14  ;;  %1014 = vmatmul.mubr.bf16.gmra.mrb[12].mxu1 %v3349_v15  ;;  %v599_v15 = vld [vmem:[%s4021_s27 + $0x40] sm:$0xff] }
 0x1a4   : > { %v945_v20 = vpop.f32.mrb[0].mxu0  ;;  %v985_v21 = vpop.f32.mrb[0].mxu1 }
 0x1a5   : > { %v4161_v24 = vadd.f32 %v945_v20, %v591_v16  ;;  %v4163_v25 = vadd.f32 %v985_v21, %v607_v17  ;;  %v947_v26 = vpop.f32.mrb[1].mxu0  ;;  %v987_v27 = vpop.f32.mrb[1].mxu1  ;;  %v600_v21 = vld [vmem:[%s4021_s27 + $0x48] sm:$0xff] }
 0x1a6   : > { %v4167_v30 = vadd.f32 %v947_v26, %v592_v18  ;;  %v4169_v31 = vadd.f32 %v987_v27, %v608_v19  ;;  %v949_v32 = vpop.f32.mrb[2].mxu0  ;;  %v989_v33 = vpop.f32.mrb[2].mxu1  ;;  %v615_v18 = vld [vmem:[%s4021_s27 + $0xc0] sm:$0xff]  ;;  %v601_v26 = vld [vmem:[%s4021_s27 + $0x50] sm:$0xff] }
 0x1a7   : > { %1056 = vst [vmem:[#allocation2] sm:$0xff] %v4161_v24  ;;  %1072 = vst [vmem:[#allocation2 + $0x80] sm:$0xff] %v4163_v25  ;;  %v4173_v34 = vadd.f32 %v949_v32, %v593_v22  ;;  %v4175_v35 = vadd.f32 %v989_v33, %v609_v23  ;;  %v951_v36 = vpop.f32.mrb[3].mxu0  ;;  %v991_v37 = vpop.f32.mrb[3].mxu1  ;;  %v1089_v38 = vmul.f32 %v4161_v24, %v4161_v24  ;;  %v616_v22 = vld [vmem:[%s4021_s27 + $0xc8] sm:$0xff] }
 0x1a8   : > { %1057 = vst [vmem:[#allocation2 + $0x8] sm:$0xff] %v4167_v30  ;;  %1073 = vst [vmem:[#allocation2 + $0x88] sm:$0xff] %v4169_v31  ;;  %v4181_v39 = vadd.f32 %v951_v36, %v594_v28  ;;  %v4183_v40 = vadd.f32 %v991_v37, %v610_v29  ;;  %v1090_v41 = vmul.f32 %v4167_v30, %v4167_v30  ;;  %v617_v29 = vld [vmem:[%s4021_s27 + $0xd0] sm:$0xff]  ;;  %v602_v36 = vld [vmem:[%s4021_s27 + $0x58] sm:$0xff] }
 0x1a9   : > { %1058 = vst [vmem:[#allocation2 + $0x10] sm:$0xff] %v4173_v34  ;;  %1074 = vst [vmem:[#allocation2 + $0x90] sm:$0xff] %v4175_v35  ;;  %v1107_v42 = vmul.f32 %v4175_v35, %v4175_v35  ;;  %v1105_v47 = vmul.f32 %v4163_v25, %v4163_v25  ;;  %v1106_v48 = vmul.f32 %v4169_v31, %v4169_v31 }
 0x1aa   : > { %1059 = vst [vmem:[#allocation2 + $0x18] sm:$0xff] %v4181_v39  ;;  %1075 = vst [vmem:[#allocation2 + $0x98] sm:$0xff] %v4183_v40  ;;  %v1121_v44 = vadd.f32 %v1090_v41, %v1089_v38  ;;  %v1108_v45 = vmul.f32 %v4183_v40, %v4183_v40  ;;  %v1091_v62 = vmul.f32 %v4173_v34, %v4173_v34  ;;  %v618_v41 = vld [vmem:[%s4021_s27 + $0xd8] sm:$0xff] }
 0x1ab   : > { %v1145_v2 = vadd.f32 %v1106_v48, %v1105_v47  ;;  %v1092_v4 = vmul.f32 %v4181_v39, %v4181_v39 }
 0x1ac   : > { %v955_v51 = vpop.f32.mrb[4].mxu0  ;;  %1122 = vadd.xlane.f32.xlu0 %v1121_v44  ;;  %v1148_v53 = vadd.f32 %v1108_v45, %v1107_v42  ;;  %v995_v54 = vpop.f32.mrb[4].mxu1 }
 0x1ad   : > { %v4205_v56 = vadd.f32 %v955_v51, %v595_v43  ;;  %v957_v57 = vpop.f32.mrb[5].mxu0  ;;  %v4208_v59 = vadd.f32 %v995_v54, %v611_v46  ;;  %v997_v60 = vpop.f32.mrb[5].mxu1  ;;  %v1124_v17 = vadd.f32 %v1092_v4, %v1091_v62 }
 0x1ae   : > { %v4213_v63 = vadd.f32 %v957_v57, %v596_v49  ;;  %v959_v0 = vpop.f32.mrb[6].mxu0  ;;  %1149 = vadd.xlane.f32.xlu1 %v1148_v53  ;;  %v4215_v1 = vadd.f32 %v997_v60, %v612_v50  ;;  %v999_v3 = vpop.f32.mrb[6].mxu1 }
 0x1af   : > { %1060 = vst [vmem:[#allocation2 + $0x20] sm:$0xff] %v4205_v56  ;;  %v4220_v5 = vadd.f32 %v959_v0, %v597_v52  ;;  %v961_v6 = vpop.f32.mrb[7].mxu0  ;;  %1076 = vst [vmem:[#allocation2 + $0xa0] sm:$0xff] %v4208_v59  ;;  %v4223_v7 = vadd.f32 %v999_v3, %v613_v55  ;;  %v1001_v8 = vpop.f32.mrb[7].mxu1  ;;  %v1093_v9 = vmul.f32 %v4205_v56, %v4205_v56 }
 0x1b0   : > { %v1109_v10 = vmul.f32 %v4208_v59, %v4208_v59  ;;  %1061 = vst [vmem:[#allocation2 + $0x28] sm:$0xff] %v4213_v63  ;;  %v4230_v11 = vadd.f32 %v961_v6, %v598_v58  ;;  %1077 = vst [vmem:[#allocation2 + $0xa8] sm:$0xff] %v4215_v1  ;;  %1146 = vadd.xlane.f32.xlu0 %v1145_v2  ;;  %v4233_v12 = vadd.f32 %v1001_v8, %v614_v61  ;;  %v603_v61 = vld [vmem:[%s4021_s27 + $0x60] sm:$0xff]  ;;  %v604_v6 = vld [vmem:[%s4021_s27 + $0x68] sm:$0xff] }
 0x1b1   : > { %v1094_v13 = vmul.f32 %v4213_v63, %v4213_v63  ;;  %v1110_v14 = vmul.f32 %v4215_v1, %v4215_v1  ;;  %1062 = vst [vmem:[#allocation2 + $0x30] sm:$0xff] %v4220_v5  ;;  %1078 = vst [vmem:[#allocation2 + $0xb0] sm:$0xff] %v4223_v7  ;;  %v1095_v19 = vmul.f32 %v4220_v5, %v4220_v5  ;;  %v619_v2 = vld [vmem:[%s4021_s27 + $0xe0] sm:$0xff]  ;;  %v620_v8 = vld [vmem:[%s4021_s27 + $0xe8] sm:$0xff] }
 0x1b2   : > { %1063 = vst [vmem:[#allocation2 + $0x38] sm:$0xff] %v4230_v11  ;;  %1079 = vst [vmem:[#allocation2 + $0xb8] sm:$0xff] %v4233_v12  ;;  %v1096_v20 = vmul.f32 %v4230_v11, %v4230_v11  ;;  %v1111_v42 = vmul.f32 %v4223_v7, %v4223_v7  ;;  %v1112_v48 = vmul.f32 %v4233_v12, %v4233_v12 }
 0x1b3   : > { %v1127_v16 = vadd.f32 %v1094_v13, %v1093_v9  ;;  %v1151_v28 = vadd.f32 %v1110_v14, %v1109_v10  ;;  %v605_v10 = vld [vmem:[%s4021_s27 + $0x70] sm:$0xff] }
 0x1b4   : > { %v965_v23 = vpop.f32.mrb[8].mxu0  ;;  %1125 = vadd.xlane.f32.xlu0 %v1124_v17  ;;  %v1005_v27 = vpop.f32.mrb[8].mxu1  ;;  %v1130_v46 = vadd.f32 %v1096_v20, %v1095_v19  ;;  %v1154_v62 = vadd.f32 %v1112_v48, %v1111_v42 }
 0x1b5   : > { %1128 = vadd.xlane.f32.xlu1 %v1127_v16  ;;  %v4253_v32 = vadd.f32 %v965_v23, %v599_v15  ;;  %v967_v33 = vpop.f32.mrb[9].mxu0  ;;  %v4256_v37 = vadd.f32 %v1005_v27, %v615_v18  ;;  %v1007_v38 = vpop.f32.mrb[9].mxu1  ;;  %v621_v15 = vld [vmem:[%s4021_s27 + $0xf0] sm:$0xff]  ;;  %v606_v18 = vld [vmem:[%s4021_s27 + $0x78] sm:$0xff] }
 0x1b6   : > { %v4261_v43 = vadd.f32 %v967_v33, %v600_v21  ;;  %v969_v44 = vpop.f32.mrb[10].mxu0  ;;  %v4263_v45 = vadd.f32 %v1007_v38, %v616_v22  ;;  %v1009_v47 = vpop.f32.mrb[10].mxu1  ;;  %v622_v21 = vld [vmem:[%s4021_s27 + $0xf8] sm:$0xff] }
 0x1b7   : > { %1064 = vst [vmem:[#allocation2 + $0x40] sm:$0xff] %v4253_v32  ;;  %v4268_v49 = vadd.f32 %v969_v44, %v601_v26  ;;  %v971_v50 = vpop.f32.mrb[11].mxu0  ;;  %1080 = vst [vmem:[#allocation2 + $0xc0] sm:$0xff] %v4256_v37  ;;  %v4271_v51 = vadd.f32 %v1009_v47, %v617_v29  ;;  %v1011_v52 = vpop.f32.mrb[11].mxu1  ;;  %v1097_v53 = vmul.f32 %v4253_v32, %v4253_v32 }
 0x1b8   : > { %v1113_v54 = vmul.f32 %v4256_v37, %v4256_v37  ;;  %1065 = vst [vmem:[#allocation2 + $0x48] sm:$0xff] %v4261_v43  ;;  %v4278_v55 = vadd.f32 %v971_v50, %v602_v36  ;;  %1081 = vst [vmem:[#allocation2 + $0xc8] sm:$0xff] %v4263_v45  ;;  %1152 = vadd.xlane.f32.xlu0 %v1151_v28  ;;  %v4281_v57 = vadd.f32 %v1011_v52, %v618_v41 }
 0x1b9   : > { %1131 = vadd.xlane.f32.xlu1 %v1130_v46  ;;  %v1098_v58 = vmul.f32 %v4261_v43, %v4261_v43  ;;  %1066 = vst [vmem:[#allocation2 + $0x50] sm:$0xff] %v4268_v49  ;;  %1082 = vst [vmem:[#allocation2 + $0xd0] sm:$0xff] %v4271_v51  ;;  %v1114_v60 = vmul.f32 %v4263_v45, %v4263_v45  ;;  %v1099_v3 = vmul.f32 %v4268_v49, %v4268_v49 }
 0x1ba   : > { %1067 = vst [vmem:[#allocation2 + $0x58] sm:$0xff] %v4278_v55  ;;  %1083 = vst [vmem:[#allocation2 + $0xd8] sm:$0xff] %v4281_v57  ;;  %v1100_v4 = vmul.f32 %v4278_v55, %v4278_v55  ;;  %v1115_v22 = vmul.f32 %v4271_v51, %v4271_v51  ;;  %v1116_v33 = vmul.f32 %v4281_v57, %v4281_v57 }
 0x1bb   : > { %v1133_v0 = vadd.f32 %v1098_v58, %v1097_v53  ;;  %v1157_v14 = vadd.f32 %v1114_v60, %v1113_v54 }
 0x1bc   : > { %v975_v9 = vpop.f32.mrb[12].mxu0  ;;  %v1015_v13 = vpop.f32.mrb[12].mxu1  ;;  %v1136_v28 = vadd.f32 %v1100_v4, %v1099_v3  ;;  %v1160_v53 = vadd.f32 %v1116_v33, %v1115_v22  ;;  %v3782_v4 = vmov 0.0  }
 0x1bd   : > { %1155 = vadd.xlane.f32.xlu1 %v1154_v62  ;;  %1134 = vadd.xlane.f32.xlu0 %v1133_v0  ;;  %v4301_v16 = vadd.f32 %v975_v9, %v603_v61  ;;  %v977_v17 = vpop.f32.mrb[13].mxu0  ;;  %v4304_v19 = vadd.f32 %v1015_v13, %v619_v2  ;;  %v1017_v20 = vpop.f32.mrb[13].mxu1  ;;  %1325 = vst [vmem:[#allocation4] sm:$0xff] %v3782_v4  ;;  %1326 = vst [vmem:[#allocation4 + $0x8] sm:$0xff] %v3782_v4 }
 0x1be   : > { %v4309_v23 = vadd.f32 %v977_v17, %v604_v6  ;;  %v979_v26 = vpop.f32.mrb[14].mxu0  ;;  %v4311_v27 = vadd.f32 %v1017_v20, %v620_v8  ;;  %v1019_v29 = vpop.f32.mrb[14].mxu1  ;;  %1327 = vst [vmem:[#allocation4 + $0x10] sm:$0xff] %v3782_v4  ;;  %1328 = vst [vmem:[#allocation4 + $0x18] sm:$0xff] %v3782_v4 }
 0x1bf   : > { %1068 = vst [vmem:[#allocation2 + $0x60] sm:$0xff] %v4301_v16  ;;  %v4316_v36 = vadd.f32 %v979_v26, %v605_v10  ;;  %v981_v38 = vpop.f32.mrb[15].mxu0  ;;  %1084 = vst [vmem:[#allocation2 + $0xe0] sm:$0xff] %v4304_v19  ;;  %v4319_v41 = vadd.f32 %v1019_v29, %v621_v15  ;;  %v1021_v42 = vpop.f32.mrb[15].mxu1  ;;  %v1101_v44 = vmul.f32 %v4301_v16, %v4301_v16 }
 0x1c0   : > { %v1117_v46 = vmul.f32 %v4304_v19, %v4304_v19  ;;  %1069 = vst [vmem:[#allocation2 + $0x68] sm:$0xff] %v4309_v23  ;;  %v4326_v47 = vadd.f32 %v981_v38, %v606_v18  ;;  %1085 = vst [vmem:[#allocation2 + $0xe8] sm:$0xff] %v4311_v27  ;;  %v4329_v48 = vadd.f32 %v1021_v42, %v622_v21  ;;  %v1251_v18 = vlaneseq }
 0x1c1   : > { %1137 = vadd.xlane.f32.xlu1 %v1136_v28  ;;  %1158 = vadd.xlane.f32.xlu0 %v1157_v14  ;;  %v1102_v50 = vmul.f32 %v4309_v23, %v4309_v23  ;;  %1070 = vst [vmem:[#allocation2 + $0x70] sm:$0xff] %v4316_v36  ;;  %1086 = vst [vmem:[#allocation2 + $0xf0] sm:$0xff] %v4319_v41  ;;  %v1118_v52 = vmul.f32 %v4311_v27, %v4311_v27 }
 0x1c2   : > { %1071 = vst [vmem:[#allocation2 + $0x78] sm:$0xff] %v4326_v47  ;;  %1087 = vst [vmem:[#allocation2 + $0xf8] sm:$0xff] %v4329_v48  ;;  %v1103_v58 = vmul.f32 %v4316_v36, %v4316_v36  ;;  %v1104_v60 = vmul.f32 %v4326_v47, %v4326_v47  ;;  %v1119_v0 = vmul.f32 %v4319_v41, %v4319_v41  ;;  %v1252_v29 = vshrl.u32 %v1251_v18, 7 }
 0x1c3   : > { %v1139_v54 = vadd.f32 %v1102_v50, %v1101_v44  ;;  %v1163_v61 = vadd.f32 %v1118_v52, %v1117_v46  ;;  %v1120_v2 = vmul.f32 %v4329_v48, %v4329_v48  ;;  %1329 = vst [vmem:[#allocation4 + $0x20] sm:$0xff] %v3782_v4  ;;  %1330 = vst [vmem:[#allocation4 + $0x28] sm:$0xff] %v3782_v4 }
 0x1c4   : > { %v1142_v62 = vadd.f32 %v1104_v60, %v1103_v58  ;;  %1331 = vst [vmem:[#allocation4 + $0x30] sm:$0xff] %v3782_v4  ;;  %1332 = vst [vmem:[#allocation4 + $0x38] sm:$0xff] %v3782_v4  ;;  %v1253_v52 = vsub.s32 0, %v1252_v29  ;;  %v1088_v60 = vld [vmem:[%s4850_s3] sm:$0x3] }
 0x1c5   : > { %1161 = vadd.xlane.f32.xlu1 %v1160_v53  ;;  %1140 = vadd.xlane.f32.xlu0 %v1139_v54  ;;  %v1166_v3 = vadd.f32 %v1120_v2, %v1119_v0  ;;  %1333 = vst [vmem:[#allocation4 + $0x40] sm:$0xff] %v3782_v4  ;;  %1334 = vst [vmem:[#allocation4 + $0x48] sm:$0xff] %v3782_v4 }
 0x1c6   : > { %1335 = vst [vmem:[#allocation4 + $0x50] sm:$0xff] %v3782_v4  ;;  %1336 = vst [vmem:[#allocation4 + $0x58] sm:$0xff] %v3782_v4 }
 0x1c7   : > { %1337 = vst [vmem:[#allocation4 + $0x60] sm:$0xff] %v3782_v4  ;;  %1338 = vst [vmem:[#allocation4 + $0x68] sm:$0xff] %v3782_v4 }
 0x1c8   : > { %1339 = vst [vmem:[#allocation4 + $0x70] sm:$0xff] %v3782_v4  ;;  %1340 = vst [vmem:[#allocation4 + $0x78] sm:$0xff] %v3782_v4 }
 0x1c9   : > { %1143 = vadd.xlane.f32.xlu1 %v1142_v62  ;;  %1164 = vadd.xlane.f32.xlu0 %v1163_v61  ;;  %1341 = vst [vmem:[#allocation4 + $0x80] sm:$0xff] %v3782_v4  ;;  %1342 = vst [vmem:[#allocation4 + $0x88] sm:$0xff] %v3782_v4  ;;  %v1257_v61 = vsub.s32 1, %v1252_v29 }
 0x1ca   : > { %1343 = vst [vmem:[#allocation4 + $0x90] sm:$0xff] %v3782_v4  ;;  %1344 = vst [vmem:[#allocation4 + $0x98] sm:$0xff] %v3782_v4 }
 0x1cb   : > { %1345 = vst [vmem:[#allocation4 + $0xa0] sm:$0xff] %v3782_v4  ;;  %1346 = vst [vmem:[#allocation4 + $0xa8] sm:$0xff] %v3782_v4 }
 0x1cc   : > { %1347 = vst [vmem:[#allocation4 + $0xb0] sm:$0xff] %v3782_v4  ;;  %1348 = vst [vmem:[#allocation4 + $0xb8] sm:$0xff] %v3782_v4 }
 0x1cd   : > { %1167 = vadd.xlane.f32.xlu1 %v1166_v3  ;;  %1349 = vst [vmem:[#allocation4 + $0xc0] sm:$0xff] %v3782_v4  ;;  %1350 = vst [vmem:[#allocation4 + $0xc8] sm:$0xff] %v3782_v4 }
 0x1ce   : > { %1351 = vst [vmem:[#allocation4 + $0xd0] sm:$0xff] %v3782_v4  ;;  %1352 = vst [vmem:[#allocation4 + $0xd8] sm:$0xff] %v3782_v4 }
 0x1cf   : > { %1353 = vst [vmem:[#allocation4 + $0xe0] sm:$0xff] %v3782_v4  ;;  %1354 = vst [vmem:[#allocation4 + $0xe8] sm:$0xff] %v3782_v4 }
 0x1d0   : > { %1355 = vst [vmem:[#allocation4 + $0xf0] sm:$0xff] %v3782_v4  ;;  %1356 = vst [vmem:[#allocation4 + $0xf8] sm:$0xff] %v3782_v4 }
 0x239   : > { %v1123_v6 = vpop.xlane.xlu0 %1122 }
 0x23a   : > { %v1170_v8 = vmul.f32 0.00390625, %v1123_v6 }
 0x23b   : > { %v1150_v9 = vpop.xlane.xlu1 %1149 }
 0x23c   : > { %v1186_v10 = vadd.f32 1e-05, %v1170_v8  ;;  %v1179_v13 = vmul.f32 0.00390625, %v1150_v9 }
 0x23d   : > { %v1147_v14 = vpop.xlane.xlu0 %1146 }
 0x23e   : > { %v1195_v15 = vadd.f32 1e-05, %v1179_v13  ;;  %v1178_v17 = vmul.f32 0.00390625, %v1147_v14  ;;  %3350 = vrsqrt.f32 %v1186_v10  ;;  %v4352_v10 = vrot.slane %v1088_v60, %v1253_v52 }
 0x240   : > { %3352 = vrsqrt.f32 %v1195_v15  ;;  %v1194_v20 = vadd.f32 1e-05, %v1178_v17  ;;  %v4354_v15 = vrot.slane %v1088_v60, %v1257_v61 }
 0x241   : > { %v1126_v22 = vpop.xlane.xlu0 %1125 }
 0x242   : > { %v1129_v21 = vpop.xlane.xlu1 %1128  ;;  %3354 = vrsqrt.f32 %v1194_v20  ;;  %v1171_v28 = vmul.f32 0.00390625, %v1126_v22 }
 0x243   : > { %v1172_v26 = vmul.f32 0.00390625, %v1129_v21 }
 0x244   : > { %v1187_v38 = vadd.f32 1e-05, %v1171_v28 }
 0x245   : > { %v1188_v33 = vadd.f32 1e-05, %v1172_v26  ;;  %v1153_v44 = vpop.xlane.xlu0 %1152 }
 0x246   : > { %v1132_v42 = vpop.xlane.xlu1 %1131  ;;  %v1180_v50 = vmul.f32 0.00390625, %v1153_v44 }
 0x247   : > { %3356 = vrsqrt.f32 %v1188_v33  ;;  %v1173_v46 = vmul.f32 0.00390625, %v1132_v42 }
 0x248   : > { %3358 = vrsqrt.f32 %v1187_v38  ;;  %v1196_v54 = vadd.f32 1e-05, %v1180_v50  ;;  %v3351_v58 = vpop.eup %3350 }
 0x249   : > { %v1189_v53 = vadd.f32 1e-05, %v1173_v46  ;;  %v1218_v17 = vmul.f32 %v3351_v58, %v4161_v24  ;;  %v1219_v24 = vmul.f32 %v3351_v58, %v4167_v30 }
 0x24a   : > { %v1156_v62 = vpop.xlane.xlu1 %1155  ;;  %v1135_v0 = vpop.xlane.xlu0 %1134 }
 0x24b   : > { %v3353_v2 = vpop.eup %3352  ;;  %3360 = vrsqrt.f32 %v1189_v53  ;;  %v1181_v3 = vmul.f32 0.00390625, %v1156_v62  ;;  %v1174_v4 = vmul.f32 0.00390625, %v1135_v0  ;;  %v1261_v62 = vmul.f32 %v4352_v10, %v1218_v17 }
 0x24c   : > { %v1236_v6 = vmul.f32 %v3353_v2, %v4175_v35  ;;  %v1237_v8 = vmul.f32 %v3353_v2, %v4183_v40  ;;  %v3355_v9 = vpop.eup %3354  ;;  %3362 = vrsqrt.f32 %v1196_v54  ;;  %v1262_v2 = vmul.f32 %v4354_v15, %v1219_v24 }
 0x24d   : > { %v1197_v13 = vadd.f32 1e-05, %v1181_v3  ;;  %v1190_v14 = vadd.f32 1e-05, %v1174_v4  ;;  %v1234_v18 = vmul.f32 %v3355_v9, %v4163_v25  ;;  %v1235_v20 = vmul.f32 %v3355_v9, %v4169_v31 }
 0x24e   : > { %v1138_v21 = vpop.xlane.xlu1 %1137  ;;  %v1159_v22 = vpop.xlane.xlu0 %1158  ;;  %v1279_v35 = vmul.f32 %v4352_v10, %v1236_v6  ;;  %v1280_v28 = vmul.f32 %v4354_v15, %v1237_v8 }
 0x24f   : > { %3364 = vrsqrt.f32 %v1197_v13  ;;  %v1175_v40 = vmul.f32 0.00390625, %v1138_v21  ;;  %v1182_v26 = vmul.f32 0.00390625, %v1159_v22  ;;  %v1277_v29 = vmul.f32 %v4352_v10, %v1234_v18 }
 0x250   : > { %v1278_v33 = vmul.f32 %v4354_v15, %v1235_v20  ;;  %3366 = vrsqrt.f32 %v1190_v14 }
 0x251   : > { %v3357_v38 = vpop.eup %3356  ;;  %v1191_v25 = vadd.f32 1e-05, %v1175_v40  ;;  %v1198_v42 = vadd.f32 1e-05, %v1182_v26  ;;  %v1301_v44 = vpack.c.bf16 %v1279_v35, %v1277_v29 }
 0x252   : > { %v3359_v31 = vpop.eup %3358  ;;  %v1302_v46 = vpack.c.bf16 %v1280_v28, %v1278_v33  ;;  %v1222_v50 = vmul.f32 %v3357_v38, %v4205_v56  ;;  %v1162_v52 = vpop.xlane.xlu1 %1161  ;;  %v1223_v30 = vmul.f32 %v3357_v38, %v4213_v63 }
 0x253   : > { %v1141_v53 = vpop.xlane.xlu0 %1140  ;;  %v1220_v54 = vmul.f32 %v3359_v31, %v4173_v34  ;;  %v1221_v60 = vmul.f32 %v3359_v31, %v4181_v39  ;;  %3368 = vrsqrt.f32 %v1191_v25  ;;  %v1183_v61 = vmul.f32 0.00390625, %v1162_v52  ;;  %1317 = vst [vmem:[#allocation3 + $0x40] sm:$0xff] %v1301_v44 }
 0x254   : > { %1318 = vst [vmem:[#allocation3 + $0x48] sm:$0xff] %v1302_v46  ;;  %3370 = vrsqrt.f32 %v1198_v42  ;;  %v1176_v58 = vmul.f32 0.00390625, %v1141_v53  ;;  %v1265_v39 = vmul.f32 %v4352_v10, %v1222_v50  ;;  %v1266_v20 = vmul.f32 %v4354_v15, %v1223_v30 }
 0x255   : > { %v3361_v0 = vpop.eup %3360  ;;  %v1263_v56 = vmul.f32 %v4352_v10, %v1220_v54  ;;  %v1264_v3 = vmul.f32 %v4354_v15, %v1221_v60  ;;  %v1199_v34 = vadd.f32 1e-05, %v1183_v61 }
 0x256   : > { %v1224_v4 = vmul.f32 %v3361_v0, %v4220_v5  ;;  %v1225_v6 = vmul.f32 %v3361_v0, %v4230_v11  ;;  %v1192_v8 = vadd.f32 1e-05, %v1176_v58  ;;  %v1144_v9 = vpop.xlane.xlu1 %1143  ;;  %v3363_v63 = vpop.eup %3362 }
 0x257   : > { %v1165_v13 = vpop.xlane.xlu0 %1164  ;;  %v1293_v14 = vpack.c.bf16 %v1263_v56, %v1261_v62  ;;  %v1294_v17 = vpack.c.bf16 %v1264_v3, %v1262_v2  ;;  %3372 = vrsqrt.f32 %v1199_v34  ;;  %v1177_v18 = vmul.f32 0.00390625, %v1144_v9 }
 0x258   : > { %v1267_v21 = vmul.f32 %v4352_v10, %v1224_v4  ;;  %v1268_v22 = vmul.f32 %v4354_v15, %v1225_v6  ;;  %v1238_v35 = vmul.f32 %v3363_v63, %v4208_v59  ;;  %v1239_v5 = vmul.f32 %v3363_v63, %v4215_v1 }
 0x259   : > { %v3365_v40 = vpop.eup %3364  ;;  %1309 = vst [vmem:[#allocation3] sm:$0xff] %v1293_v14  ;;  %1310 = vst [vmem:[#allocation3 + $0x8] sm:$0xff] %v1294_v17  ;;  %3374 = vrsqrt.f32 %v1192_v8  ;;  %v1193_v11 = vadd.f32 1e-05, %v1177_v18  ;;  %v1184_v26 = vmul.f32 0.00390625, %v1165_v13 }
 0x25a   : > { %v3367_v28 = vpop.eup %3366  ;;  %v1295_v29 = vpack.c.bf16 %v1267_v21, %v1265_v39  ;;  %v1296_v33 = vpack.c.bf16 %v1268_v22, %v1266_v20  ;;  %v1168_v38 = vpop.xlane.xlu1 %1167  ;;  %v1240_v24 = vmul.f32 %v3365_v40, %v4223_v7  ;;  %v1241_v25 = vmul.f32 %v3365_v40, %v4233_v12 }
 0x25b   : > { %v1226_v42 = vmul.f32 %v3367_v28, %v4253_v32  ;;  %v1227_v59 = vmul.f32 %v3367_v28, %v4261_v43  ;;  %v1281_v31 = vmul.f32 %v4352_v10, %v1238_v35  ;;  %3376 = vrsqrt.f32 %v1193_v11 }
 0x25c   : > { %1311 = vst [vmem:[#allocation3 + $0x10] sm:$0xff] %v1295_v29  ;;  %1312 = vst [vmem:[#allocation3 + $0x18] sm:$0xff] %v1296_v33  ;;  %v1200_v1 = vadd.f32 1e-05, %v1184_v26  ;;  %v1185_v44 = vmul.f32 0.00390625, %v1168_v38  ;;  %v1282_v50 = vmul.f32 %v4354_v15, %v1239_v5  ;;  %v1283_v52 = vmul.f32 %v4352_v10, %v1240_v24 }
 0x25d   : > { %v3369_v46 = vpop.eup %3368  ;;  %v1284_v7 = vmul.f32 %v4354_v15, %v1241_v25  ;;  %v1269_v12 = vmul.f32 %v4352_v10, %v1226_v42  ;;  %v1270_v62 = vmul.f32 %v4354_v15, %v1227_v59 }
 0x25e   : > { %v3371_v53 = vpop.eup %3370  ;;  %v1228_v32 = vmul.f32 %v3369_v46, %v4268_v49  ;;  %v1229_v43 = vmul.f32 %v3369_v46, %v4278_v55  ;;  %3378 = vrsqrt.f32 %v1200_v1  ;;  %v1201_v54 = vadd.f32 1e-05, %v1185_v44 }
 0x25f   : > { %v1303_v60 = vpack.c.bf16 %v1283_v52, %v1281_v31  ;;  %v1304_v61 = vpack.c.bf16 %v1284_v7, %v1282_v50  ;;  %v1242_v30 = vmul.f32 %v3371_v53, %v4256_v37  ;;  %v1243_v2 = vmul.f32 %v3371_v53, %v4263_v45 }
 0x260   : > { %v1271_v58 = vmul.f32 %v4352_v10, %v1228_v32  ;;  %v1272_v0 = vmul.f32 %v4354_v15, %v1229_v43  ;;  %3380 = vrsqrt.f32 %v1201_v54 }
 0x261   : > { %v3373_v56 = vpop.eup %3372  ;;  %1319 = vst [vmem:[#allocation3 + $0x50] sm:$0xff] %v1303_v60  ;;  %1320 = vst [vmem:[#allocation3 + $0x58] sm:$0xff] %v1304_v61  ;;  %v1285_v37 = vmul.f32 %v4352_v10, %v1242_v30  ;;  %v1286_v4 = vmul.f32 %v4354_v15, %v1243_v2 }
 0x262   : > { %v1297_v49 = vpack.c.bf16 %v1271_v58, %v1269_v12  ;;  %v1298_v55 = vpack.c.bf16 %v1272_v0, %v1270_v62  ;;  %v1244_v3 = vmul.f32 %v3373_v56, %v4271_v51  ;;  %v1245_v34 = vmul.f32 %v3373_v56, %v4281_v57 }
 0x263   : > { %v3375_v39 = vpop.eup %3374 }
 0x264   : > { %1313 = vst [vmem:[#allocation3 + $0x20] sm:$0xff] %v1297_v49  ;;  %1314 = vst [vmem:[#allocation3 + $0x28] sm:$0xff] %v1298_v55  ;;  %v1287_v6 = vmul.f32 %v4352_v10, %v1244_v3  ;;  %v1288_v45 = vmul.f32 %v4354_v15, %v1245_v34  ;;  %v1230_v8 = vmul.f32 %v3375_v39, %v4301_v16 }
 0x265   : > { %v1231_v9 = vmul.f32 %v3375_v39, %v4309_v23  ;;  %v3377_v13 = vpop.eup %3376 }
 0x266   : > { %v1305_v63 = vpack.c.bf16 %v1287_v6, %v1285_v37  ;;  %v1306_v51 = vpack.c.bf16 %v1288_v45, %v1286_v4  ;;  %v1232_v57 = vmul.f32 %v3377_v13, %v4316_v36  ;;  %v1233_v14 = vmul.f32 %v3377_v13, %v4326_v47 }
 0x267   : > { %v1273_v18 = vmul.f32 %v4352_v10, %v1230_v8  ;;  %v1274_v20 = vmul.f32 %v4354_v15, %v1231_v9 }
 0x268   : > { %v3379_v17 = vpop.eup %3378  ;;  %1321 = vst [vmem:[#allocation3 + $0x60] sm:$0xff] %v1305_v63  ;;  %1322 = vst [vmem:[#allocation3 + $0x68] sm:$0xff] %v1306_v51  ;;  %v1275_v21 = vmul.f32 %v4352_v10, %v1232_v57  ;;  %v1276_v16 = vmul.f32 %v4354_v15, %v1233_v14 }
 0x269   : > { %v1246_v23 = vmul.f32 %v3379_v17, %v4304_v19  ;;  %v1247_v35 = vmul.f32 %v3379_v17, %v4311_v27 }
 0x26a   : > { %v3381_v22 = vpop.eup %3380  ;;  %v1299_v40 = vpack.c.bf16 %v1275_v21, %v1273_v18  ;;  %v1300_v36 = vpack.c.bf16 %v1276_v16, %v1274_v20 }
 0x26b   : > { %v1248_v47 = vmul.f32 %v3381_v22, %v4319_v41  ;;  %v1249_v5 = vmul.f32 %v3381_v22, %v4329_v48  ;;  %v1289_v11 = vmul.f32 %v4352_v10, %v1246_v23  ;;  %v1290_v26 = vmul.f32 %v4354_v15, %v1247_v35 }
 0x26c   : > { %1315 = vst [vmem:[#allocation3 + $0x30] sm:$0xff] %v1299_v40  ;;  %1316 = vst [vmem:[#allocation3 + $0x38] sm:$0xff] %v1300_v36 }
 0x26d   : > { %v1291_v28 = vmul.f32 %v4352_v10, %v1248_v47  ;;  %v1292_v29 = vmul.f32 %v4354_v15, %v1249_v5 }
 0x26f   : > { %v1307_v33 = vpack.c.bf16 %v1291_v28, %v1289_v11  ;;  %v1308_v19 = vpack.c.bf16 %v1292_v29, %v1290_v26 }
 0x271   : > { %1323 = vst [vmem:[#allocation3 + $0x70] sm:$0xff] %v1307_v33  ;;  %1324 = vst [vmem:[#allocation3 + $0x78] sm:$0xff] %v1308_v19 }
 0x272 PF: > { %v3382_v27 = vld [vmem:[%s4031_s22 + $0x4] ss:$8 sps:$4 sm:$0xff]   ;;  %v3384_v41 = vld [vmem:[%s4031_s22] ss:$8 sps:$4 sm:$0xff]   ;;  %v3385_v48 = vld [vmem:[%s4031_s22 + $0x14] ss:$8 sps:$4 sm:$0xff]  }
 0x273   : > { %1565 = vmatprep.subr.bf16.mxu0 %v3382_v27  ;;  %v3394_v10 = vld [vmem:[%s4036_s11 + $0x4] ss:$8 sps:$4 sm:$0xff]   ;;  %v3396_v15 = vld [vmem:[%s4036_s11] ss:$8 sps:$4 sm:$0xff]   ;;  %v3387_v38 = vld [vmem:[%s4031_s22 + $0x10] ss:$8 sps:$4 sm:$0xff]  }
 0x274   : > { %1566 = vmatpush1.bf16.xpose.msra.mxu0 %v3384_v41  ;;  %v3388_v24 = vld [vmem:[%s4031_s22 + $0x24] ss:$8 sps:$4 sm:$0xff]   ;;  %1870 = vmatprep.subr.bf16.mxu1 %v3394_v10  ;;  %v3400_v25 = vld [vmem:[%s4036_s11 + $0x14] ss:$8 sps:$4 sm:$0xff]   ;;  %v3402_v42 = vld [vmem:[%s4036_s11 + $0x10] ss:$8 sps:$4 sm:$0xff]  }
 0x275   : > { %1567 = vmatprep.subr.bf16.mxu0 %v3385_v48  ;;  %1871 = vmatpush1.bf16.xpose.msra.mxu1 %v3396_v15  ;;  %v3406_v59 = vld [vmem:[%s4036_s11 + $0x24] ss:$8 sps:$4 sm:$0xff]   ;;  %v3390_v31 = vld [vmem:[%s4031_s22 + $0x20] ss:$8 sps:$4 sm:$0xff]   ;;  %v3391_v1 = vld [vmem:[%s4031_s22 + $0x34] ss:$8 sps:$4 sm:$0xff]  }
 0x276   : > { %1872 = vmatprep.subr.bf16.mxu1 %v3400_v25  ;;  %v3408_v44 = vld [vmem:[%s4036_s11 + $0x20] ss:$8 sps:$4 sm:$0xff]   ;;  %v3412_v46 = vld [vmem:[%s4036_s11 + $0x34] ss:$8 sps:$4 sm:$0xff]   ;;  %v3393_v50 = vld [vmem:[%s4031_s22 + $0x30] ss:$8 sps:$4 sm:$0xff]  }
 0x277   : > { %v3397_v52 = vld [vmem:[%s4031_s22 + $0x44] ss:$8 sps:$4 sm:$0xff]   ;;  %v3414_v7 = vld [vmem:[%s4036_s11 + $0x30] ss:$8 sps:$4 sm:$0xff]   ;;  %v3399_v53 = vld [vmem:[%s4031_s22 + $0x40] ss:$8 sps:$4 sm:$0xff]  }
 0x278   : > { %v3418_v12 = vld [vmem:[%s4036_s11 + $0x44] ss:$8 sps:$4 sm:$0xff]   ;;  %v3403_v32 = vld [vmem:[%s4031_s22 + $0x54] ss:$8 sps:$4 sm:$0xff]   ;;  %v3420_v43 = vld [vmem:[%s4036_s11 + $0x40] ss:$8 sps:$4 sm:$0xff]  }
 0x279   : > { %v3424_v54 = vld [vmem:[%s4036_s11 + $0x54] ss:$8 sps:$4 sm:$0xff]   ;;  %v1358_v60 = vld [vmem:[#allocation3 + $0x8] sm:$0xff]  ;;  %v3405_v61 = vld [vmem:[%s4031_s22 + $0x50] ss:$8 sps:$4 sm:$0xff]   ;;  %p3096_p8 = scmp.ne.s32.totalorder %s3756_s29, 1 }
 0x27a   : > { %1597 = vmatprep.mubr.bf16.mxu0 %v1358_v60  ;;  %1902 = vmatprep.mubr.bf16.mxu1 %v1358_v60  ;;  %v3409_v62 = vld [vmem:[%s4031_s22 + $0x64] ss:$8 sps:$4 sm:$0xff]   ;;  %v3426_v30 = vld [vmem:[%s4036_s11 + $0x50] ss:$8 sps:$4 sm:$0xff]   ;;  %v3411_v58 = vld [vmem:[%s4031_s22 + $0x60] ss:$8 sps:$4 sm:$0xff]  }
 0x27b   : > { %v3430_v0 = vld [vmem:[%s4036_s11 + $0x64] ss:$8 sps:$4 sm:$0xff]   ;;  %v3415_v2 = vld [vmem:[%s4031_s22 + $0x74] ss:$8 sps:$4 sm:$0xff]   ;;  %v3432_v56 = vld [vmem:[%s4036_s11 + $0x60] ss:$8 sps:$4 sm:$0xff]  }
 0x27c   : > { %1568 = vmatpush1.bf16.xpose.msra.mxu0 %v3387_v38  ;;  %v3436_v49 = vld [vmem:[%s4036_s11 + $0x74] ss:$8 sps:$4 sm:$0xff]   ;;  %v3417_v55 = vld [vmem:[%s4031_s22 + $0x70] ss:$8 sps:$4 sm:$0xff]   ;;  %v3421_v3 = vld [vmem:[%s4031_s22 + $0x84] ss:$8 sps:$4 sm:$0xff]  }
 0x27d   : > { %1569 = vmatprep.subr.bf16.mxu0 %v3388_v24  ;;  %1873 = vmatpush1.bf16.xpose.msra.mxu1 %v3402_v42  ;;  %v3438_v34 = vld [vmem:[%s4036_s11 + $0x70] ss:$8 sps:$4 sm:$0xff]   ;;  %v3442_v39 = vld [vmem:[%s4036_s11 + $0x84] ss:$8 sps:$4 sm:$0xff]   ;;  %v3423_v37 = vld [vmem:[%s4031_s22 + $0x80] ss:$8 sps:$4 sm:$0xff]  }
 0x27e   : > { %1874 = vmatprep.subr.bf16.mxu1 %v3406_v59  ;;  %v3427_v4 = vld [vmem:[%s4031_s22 + $0x94] ss:$8 sps:$4 sm:$0xff]   ;;  %v3444_v6 = vld [vmem:[%s4036_s11 + $0x80] ss:$8 sps:$4 sm:$0xff]   ;;  %v3429_v8 = vld [vmem:[%s4031_s22 + $0x90] ss:$8 sps:$4 sm:$0xff]  }
 0x27f   : > { %v3448_v45 = vld [vmem:[%s4036_s11 + $0x94] ss:$8 sps:$4 sm:$0xff]   ;;  %v3433_v9 = vld [vmem:[%s4031_s22 + $0xa4] ss:$8 sps:$4 sm:$0xff]   ;;  %v3450_v13 = vld [vmem:[%s4036_s11 + $0x90] ss:$8 sps:$4 sm:$0xff]  }
 0x280   : > { %v3454_v63 = vld [vmem:[%s4036_s11 + $0xa4] ss:$8 sps:$4 sm:$0xff]   ;;  %v3435_v51 = vld [vmem:[%s4031_s22 + $0xa0] ss:$8 sps:$4 sm:$0xff]   ;;  %v3439_v57 = vld [vmem:[%s4031_s22 + $0xb4] ss:$8 sps:$4 sm:$0xff]  }
 0x281   : > { %v3456_v14 = vld [vmem:[%s4036_s11 + $0xa0] ss:$8 sps:$4 sm:$0xff]   ;;  %v3460_v17 = vld [vmem:[%s4036_s11 + $0xb4] ss:$8 sps:$4 sm:$0xff]   ;;  %v3441_v18 = vld [vmem:[%s4031_s22 + $0xb0] ss:$8 sps:$4 sm:$0xff]  }
 0x282   : > { %v3445_v20 = vld [vmem:[%s4031_s22 + $0xc4] ss:$8 sps:$4 sm:$0xff]   ;;  %v3462_v21 = vld [vmem:[%s4036_s11 + $0xb0] ss:$8 sps:$4 sm:$0xff]   ;;  %v3447_v22 = vld [vmem:[%s4031_s22 + $0xc0] ss:$8 sps:$4 sm:$0xff]  }
 0x283   : > { %v3466_v16 = vld [vmem:[%s4036_s11 + $0xc4] ss:$8 sps:$4 sm:$0xff]   ;;  %v3451_v23 = vld [vmem:[%s4031_s22 + $0xd4] ss:$8 sps:$4 sm:$0xff]   ;;  %v3468_v35 = vld [vmem:[%s4036_s11 + $0xc0] ss:$8 sps:$4 sm:$0xff]  }
 0x284   : > { %1570 = vmatpush1.bf16.xpose.msra.mxu0 %v3390_v31  ;;  %v3469_v40 = vld [vmem:[%s4036_s11 + $0xd4] ss:$8 sps:$4 sm:$0xff]   ;;  %v3453_v36 = vld [vmem:[%s4031_s22 + $0xd0] ss:$8 sps:$4 sm:$0xff]   ;;  %v3457_v47 = vld [vmem:[%s4031_s22 + $0xe4] ss:$8 sps:$4 sm:$0xff]  }
 0x285   : > { %1571 = vmatprep.subr.bf16.mxu0 %v3391_v1  ;;  %1875 = vmatpush1.bf16.xpose.msra.mxu1 %v3408_v44  ;;  %v3471_v5 = vld [vmem:[%s4036_s11 + $0xd0] ss:$8 sps:$4 sm:$0xff]   ;;  %v3472_v11 = vld [vmem:[%s4036_s11 + $0xe4] ss:$8 sps:$4 sm:$0xff]   ;;  %v3459_v26 = vld [vmem:[%s4031_s22 + $0xe0] ss:$8 sps:$4 sm:$0xff]  }
 0x286   : > { %1876 = vmatprep.subr.bf16.mxu1 %v3412_v46  ;;  %v3463_v28 = vld [vmem:[%s4031_s22 + $0xf4] ss:$8 sps:$4 sm:$0xff]   ;;  %v3474_v29 = vld [vmem:[%s4036_s11 + $0xe0] ss:$8 sps:$4 sm:$0xff]   ;;  %v3465_v19 = vld [vmem:[%s4031_s22 + $0xf0] ss:$8 sps:$4 sm:$0xff]  }
 0x287   : > { %v3475_v33 = vld [vmem:[%s4036_s11 + $0xf4] ss:$8 sps:$4 sm:$0xff]   ;;  %v3480_v27 = vld [vmem:[%s4038_s28 + $0x4] ss:$8 sps:$4 sm:$0xff]   ;;  %v3477_v41 = vld [vmem:[%s4036_s11 + $0xf0] ss:$8 sps:$4 sm:$0xff]  }
 0x288   : > { %v1357_v48 = vld [vmem:[#allocation3] sm:$0xff]  ;;  %v1360_v15 = vld [vmem:[#allocation3 + $0x18] sm:$0xff]  ;;  %v1359_v24 = vld [vmem:[#allocation3 + $0x10] sm:$0xff] }
 0x289   : > { %v3478_v10 = vld [vmem:[%s4038_s28] ss:$8 sps:$4 sm:$0xff]   ;;  %v3483_v38 = vld [vmem:[%s4038_s28 + $0x14] ss:$8 sps:$4 sm:$0xff]   ;;  %v3481_v25 = vld [vmem:[%s4038_s28 + $0x10] ss:$8 sps:$4 sm:$0xff]  }
 0x28a   : > { %v1362_v42 = vld [vmem:[#allocation3 + $0x28] sm:$0xff]  ;;  %v1361_v31 = vld [vmem:[#allocation3 + $0x20] sm:$0xff]  ;;  %v1364_v44 = vld [vmem:[#allocation3 + $0x38] sm:$0xff] }
 0x28b   : > { %v3486_v59 = vld [vmem:[%s4038_s28 + $0x24] ss:$8 sps:$4 sm:$0xff]   ;;  %v3484_v1 = vld [vmem:[%s4038_s28 + $0x20] ss:$8 sps:$4 sm:$0xff]   ;;  %v3489_v46 = vld [vmem:[%s4038_s28 + $0x34] ss:$8 sps:$4 sm:$0xff]  }
 0x28c   : > { %1572 = vmatpush1.bf16.xpose.msra.mxu0 %v3393_v50  ;;  %v1363_v50 = vld [vmem:[#allocation3 + $0x30] sm:$0xff] }
 0x28d   : > { %1573 = vmatprep.subr.bf16.mxu0 %v3397_v52  ;;  %1877 = vmatpush1.bf16.xpose.msra.mxu1 %v3414_v7  ;;  %v3487_v52 = vld [vmem:[%s4038_s28 + $0x30] ss:$8 sps:$4 sm:$0xff]   ;;  %v1366_v7 = vld [vmem:[#allocation3 + $0x48] sm:$0xff] }
 0x28e   : > { %1878 = vmatprep.subr.bf16.mxu1 %v3418_v12  ;;  %v3492_v12 = vld [vmem:[%s4038_s28 + $0x44] ss:$8 sps:$4 sm:$0xff]   ;;  %v1367_v60 = vld [vmem:[#allocation3 + $0x50] sm:$0xff] }
 0x294   : > { %1574 = vmatpush1.bf16.xpose.msra.mxu0 %v3399_v53  ;;  %v1365_v53 = vld [vmem:[#allocation3 + $0x40] sm:$0xff] }
 0x295   : > { %1575 = vmatprep.subr.bf16.mxu0 %v3403_v32  ;;  %1879 = vmatpush1.bf16.xpose.msra.mxu1 %v3420_v43  ;;  %v3490_v32 = vld [vmem:[%s4038_s28 + $0x40] ss:$8 sps:$4 sm:$0xff]   ;;  %v1368_v43 = vld [vmem:[#allocation3 + $0x58] sm:$0xff] }
 0x296   : > { %1880 = vmatprep.subr.bf16.mxu1 %v3424_v54  ;;  %v3495_v54 = vld [vmem:[%s4038_s28 + $0x54] ss:$8 sps:$4 sm:$0xff]  }
 0x29c   : > { %1576 = vmatpush1.bf16.xpose.msra.mxu0 %v3405_v61  ;;  %v3493_v61 = vld [vmem:[%s4038_s28 + $0x50] ss:$8 sps:$4 sm:$0xff]  }
 0x29d   : > { %1577 = vmatprep.subr.bf16.mxu0 %v3409_v62  ;;  %1881 = vmatpush1.bf16.xpose.msra.mxu1 %v3426_v30  ;;  %v1370_v62 = vld [vmem:[#allocation3 + $0x68] sm:$0xff] }
 0x29e   : > { %1882 = vmatprep.subr.bf16.mxu1 %v3430_v0  ;;  %v3498_v30 = vld [vmem:[%s4038_s28 + $0x64] ss:$8 sps:$4 sm:$0xff]   ;;  %v3496_v0 = vld [vmem:[%s4038_s28 + $0x60] ss:$8 sps:$4 sm:$0xff]  }
 0x2a4   : > { %1578 = vmatpush1.bf16.xpose.msra.mxu0 %v3411_v58  ;;  %v1369_v58 = vld [vmem:[#allocation3 + $0x60] sm:$0xff] }
 0x2a5   : > { %1579 = vmatprep.subr.bf16.mxu0 %v3415_v2  ;;  %1883 = vmatpush1.bf16.xpose.msra.mxu1 %v3432_v56  ;;  %v1372_v2 = vld [vmem:[#allocation3 + $0x78] sm:$0xff] }
 0x2a6   : > { %1884 = vmatprep.subr.bf16.mxu1 %v3436_v49  ;;  %v3501_v56 = vld [vmem:[%s4038_s28 + $0x74] ss:$8 sps:$4 sm:$0xff]  }
 0x2a7   : > { %v1371_v49 = vld [vmem:[#allocation3 + $0x70] sm:$0xff] }
 0x2ac   : > { %1580 = vmatpush1.bf16.xpose.msra.mxu0 %v3417_v55  ;;  %v3499_v55 = vld [vmem:[%s4038_s28 + $0x70] ss:$8 sps:$4 sm:$0xff]  }
 0x2ad   : > { %1581 = vmatprep.subr.bf16.mxu0 %v3421_v3  ;;  %1885 = vmatpush1.bf16.xpose.msra.mxu1 %v3438_v34  ;;  %v3504_v3 = vld [vmem:[%s4038_s28 + $0x84] ss:$8 sps:$4 sm:$0xff]   ;;  %v3502_v34 = vld [vmem:[%s4038_s28 + $0x80] ss:$8 sps:$4 sm:$0xff]  }
 0x2ae   : > { %1886 = vmatprep.subr.bf16.mxu1 %v3442_v39  ;;  %v3507_v39 = vld [vmem:[%s4038_s28 + $0x94] ss:$8 sps:$4 sm:$0xff]  }
 0x2b4   : > { %1582 = vmatpush1.bf16.xpose.msra.mxu0 %v3423_v37  ;;  %v3505_v37 = vld [vmem:[%s4038_s28 + $0x90] ss:$8 sps:$4 sm:$0xff]  }
 0x2b5   : > { %1583 = vmatprep.subr.bf16.mxu0 %v3427_v4  ;;  %1887 = vmatpush1.bf16.xpose.msra.mxu1 %v3444_v6  ;;  %v3510_v4 = vld [vmem:[%s4038_s28 + $0xa4] ss:$8 sps:$4 sm:$0xff]   ;;  %v3508_v6 = vld [vmem:[%s4038_s28 + $0xa0] ss:$8 sps:$4 sm:$0xff]  }
 0x2b6   : > { %1888 = vmatprep.subr.bf16.mxu1 %v3448_v45  ;;  %v3513_v45 = vld [vmem:[%s4038_s28 + $0xb4] ss:$8 sps:$4 sm:$0xff]  }
 0x2bc   : > { %1584 = vmatpush1.bf16.xpose.msra.mxu0 %v3429_v8  ;;  %v3511_v8 = vld [vmem:[%s4038_s28 + $0xb0] ss:$8 sps:$4 sm:$0xff]  }
 0x2bd   : > { %1585 = vmatprep.subr.bf16.mxu0 %v3433_v9  ;;  %1889 = vmatpush1.bf16.xpose.msra.mxu1 %v3450_v13  ;;  %v3516_v9 = vld [vmem:[%s4038_s28 + $0xc4] ss:$8 sps:$4 sm:$0xff]   ;;  %v3514_v13 = vld [vmem:[%s4038_s28 + $0xc0] ss:$8 sps:$4 sm:$0xff]  }
 0x2be   : > { %1890 = vmatprep.subr.bf16.mxu1 %v3454_v63  ;;  %v3519_v63 = vld [vmem:[%s4038_s28 + $0xd4] ss:$8 sps:$4 sm:$0xff]  }
 0x2c4   : > { %1586 = vmatpush1.bf16.xpose.msra.mxu0 %v3435_v51  ;;  %v3517_v51 = vld [vmem:[%s4038_s28 + $0xd0] ss:$8 sps:$4 sm:$0xff]  }
 0x2c5   : > { %1587 = vmatprep.subr.bf16.mxu0 %v3439_v57  ;;  %1891 = vmatpush1.bf16.xpose.msra.mxu1 %v3456_v14  ;;  %v3522_v57 = vld [vmem:[%s4038_s28 + $0xe4] ss:$8 sps:$4 sm:$0xff]   ;;  %v3520_v14 = vld [vmem:[%s4038_s28 + $0xe0] ss:$8 sps:$4 sm:$0xff]  }
 0x2c6   : > { %1892 = vmatprep.subr.bf16.mxu1 %v3460_v17  ;;  %v3525_v17 = vld [vmem:[%s4038_s28 + $0xf4] ss:$8 sps:$4 sm:$0xff]  }
 0x2cc   : > { %1588 = vmatpush1.bf16.xpose.msra.mxu0 %v3441_v18  ;;  %v3523_v18 = vld [vmem:[%s4038_s28 + $0xf0] ss:$8 sps:$4 sm:$0xff]  }
 0x2cd   : > { %1589 = vmatprep.subr.bf16.mxu0 %v3445_v20  ;;  %1893 = vmatpush1.bf16.xpose.msra.mxu1 %v3462_v21 }
 0x2ce   : > { %1894 = vmatprep.subr.bf16.mxu1 %v3466_v16 }
 0x2d4   : > { %1590 = vmatpush1.bf16.xpose.msra.mxu0 %v3447_v22 }
 0x2d5   : > { %1591 = vmatprep.subr.bf16.mxu0 %v3451_v23  ;;  %1895 = vmatpush1.bf16.xpose.msra.mxu1 %v3468_v35 }
 0x2d6   : > { %1896 = vmatprep.subr.bf16.mxu1 %v3469_v40 }
 0x2dc   : > { %1592 = vmatpush1.bf16.xpose.msra.mxu0 %v3453_v36 }
 0x2dd   : > { %1593 = vmatprep.subr.bf16.mxu0 %v3457_v47  ;;  %1897 = vmatpush1.bf16.xpose.msra.mxu1 %v3471_v5 }
 0x2de   : > { %1898 = vmatprep.subr.bf16.mxu1 %v3472_v11 }
 0x2e4   : > { %1594 = vmatpush1.bf16.xpose.msra.mxu0 %v3459_v26 }
 0x2e5   : > { %1595 = vmatprep.subr.bf16.mxu0 %v3463_v28  ;;  %1899 = vmatpush1.bf16.xpose.msra.mxu1 %v3474_v29 }
 0x2e6   : > { %1900 = vmatprep.subr.bf16.mxu1 %v3475_v33 }
 0x2ec   : > { %1596 = vmatpush1.bf16.xpose.msra.mxu0 %v3465_v19 }
 0x2ed   : > { %2447 = vmatprep.subr.bf16.mxu0 %v3480_v27  ;;  %1901 = vmatpush1.bf16.xpose.msra.mxu1 %v3477_v41 }
 0x2ee   : > { %3140 = vmatprep.subr.bf16.mxu1 %v3480_v27 }
 0x2f3   : > { %1598 = vmatmul.mubr.bf16.vlgmr.msra.gmra.mrb[0].mxu0 %v1357_v48 }
 0x2f4   : > { %1607 = vmatprep.mubr.bf16.mxu0 %v1360_v15  ;;  %2448 = vmatpush1.bf16.xpose.msra.mxu0 %v3478_v10 }
 0x2f5   : > { %2449 = vmatprep.subr.bf16.mxu0 %v3483_v38  ;;  %1903 = vmatmul.mubr.bf16.vlgmr.msra.gmra.mrb[0].mxu1 %v1357_v48 }
 0x2f6   : > { %1912 = vmatprep.mubr.bf16.mxu1 %v1360_v15  ;;  %3156 = vmatpush1.bf16.xpose.msra.mxu1 %v3478_v10 }
 0x2f7   : > { %3141 = vmatprep.subr.bf16.mxu1 %v3483_v38 }
 0x2fb   : > { %1608 = vmatmul.mubr.bf16.gmra.mrb[4].mxu0 %v1359_v24 }
 0x2fc   : > { %1617 = vmatprep.mubr.bf16.mxu0 %v1362_v42  ;;  %2450 = vmatpush1.bf16.xpose.msra.mxu0 %v3481_v25 }
 0x2fd   : > { %2451 = vmatprep.subr.bf16.mxu0 %v3486_v59  ;;  %1913 = vmatmul.mubr.bf16.gmra.mrb[4].mxu1 %v1359_v24 }
 0x2fe   : > { %1922 = vmatprep.mubr.bf16.mxu1 %v1362_v42  ;;  %3157 = vmatpush1.bf16.xpose.msra.mxu1 %v3481_v25 }
 0x2ff   : > { %3142 = vmatprep.subr.bf16.mxu1 %v3486_v59 }
 0x303   : > { %1618 = vmatmul.mubr.bf16.gmra.mrb[8].mxu0 %v1361_v31 }
 0x304   : > { %1627 = vmatprep.mubr.bf16.mxu0 %v1364_v44  ;;  %2452 = vmatpush1.bf16.xpose.msra.mxu0 %v3484_v1 }
 0x305   : > { %2453 = vmatprep.subr.bf16.mxu0 %v3489_v46  ;;  %1923 = vmatmul.mubr.bf16.gmra.mrb[8].mxu1 %v1361_v31 }
 0x306   : > { %1932 = vmatprep.mubr.bf16.mxu1 %v1364_v44  ;;  %3158 = vmatpush1.bf16.xpose.msra.mxu1 %v3484_v1 }
 0x307   : > { %3143 = vmatprep.subr.bf16.mxu1 %v3489_v46 }
 0x30b   : > { %1628 = vmatmul.mubr.bf16.gmra.mrb[12].mxu0 %v1363_v50 }
 0x30c   : > { %1637 = vmatprep.mubr.bf16.mxu0 %v1366_v7  ;;  %2454 = vmatpush1.bf16.xpose.msra.mxu0 %v3487_v52 }
 0x30d   : > { %2455 = vmatprep.subr.bf16.mxu0 %v3492_v12  ;;  %1933 = vmatmul.mubr.bf16.gmra.mrb[12].mxu1 %v1363_v50 }
 0x30e   : > { %1942 = vmatprep.mubr.bf16.mxu1 %v1366_v7  ;;  %3159 = vmatpush1.bf16.xpose.msra.mxu1 %v3487_v52 }
 0x30f   : > { %3144 = vmatprep.subr.bf16.mxu1 %v3492_v12 }
 0x313   : > { %1638 = vmatmul.mubr.bf16.gmra.mrb[16].mxu0 %v1365_v53 }
 0x314   : > { %1647 = vmatprep.mubr.bf16.mxu0 %v1368_v43  ;;  %2456 = vmatpush1.bf16.xpose.msra.mxu0 %v3490_v32 }
 0x315   : > { %2457 = vmatprep.subr.bf16.mxu0 %v3495_v54  ;;  %1943 = vmatmul.mubr.bf16.gmra.mrb[16].mxu1 %v1365_v53 }
 0x316   : > { %1952 = vmatprep.mubr.bf16.mxu1 %v1368_v43  ;;  %3160 = vmatpush1.bf16.xpose.msra.mxu1 %v3490_v32 }
 0x317   : > { %3145 = vmatprep.subr.bf16.mxu1 %v3495_v54 }
 0x31b   : > { %1648 = vmatmul.mubr.bf16.gmra.mrb[20].mxu0 %v1367_v60 }
 0x31c   : > { %1657 = vmatprep.mubr.bf16.mxu0 %v1370_v62  ;;  %2458 = vmatpush1.bf16.xpose.msra.mxu0 %v3493_v61 }
 0x31d   : > { %2459 = vmatprep.subr.bf16.mxu0 %v3498_v30  ;;  %1953 = vmatmul.mubr.bf16.gmra.mrb[20].mxu1 %v1367_v60 }
 0x31e   : > { %1962 = vmatprep.mubr.bf16.mxu1 %v1370_v62  ;;  %3161 = vmatpush1.bf16.xpose.msra.mxu1 %v3493_v61 }
 0x31f   : > { %3146 = vmatprep.subr.bf16.mxu1 %v3498_v30 }
 0x323   : > { %1658 = vmatmul.mubr.bf16.gmra.mrb[24].mxu0 %v1369_v58 }
 0x324   : > { %1667 = vmatprep.mubr.bf16.mxu0 %v1372_v2  ;;  %2460 = vmatpush1.bf16.xpose.msra.mxu0 %v3496_v0 }
 0x325   : > { %2461 = vmatprep.subr.bf16.mxu0 %v3501_v56  ;;  %1963 = vmatmul.mubr.bf16.gmra.mrb[24].mxu1 %v1369_v58 }
 0x326   : > { %1972 = vmatprep.mubr.bf16.mxu1 %v1372_v2  ;;  %3162 = vmatpush1.bf16.xpose.msra.mxu1 %v3496_v0 }
 0x327   : > { %3147 = vmatprep.subr.bf16.mxu1 %v3501_v56 }
 0x32b   : > { %1668 = vmatmul.mubr.bf16.gmra.mrb[28].mxu0 %v1371_v49 }
 0x32c   : > { %2462 = vmatpush1.bf16.xpose.msra.mxu0 %v3499_v55 }
 0x32d   : > { %2463 = vmatprep.subr.bf16.mxu0 %v3504_v3  ;;  %1973 = vmatmul.mubr.bf16.gmra.mrb[28].mxu1 %v1371_v49 }
 0x32e   : > { %3163 = vmatpush1.bf16.xpose.msra.mxu1 %v3499_v55 }
 0x32f   : > { %3148 = vmatprep.subr.bf16.mxu1 %v3504_v3 }
 0x334   : > { %2464 = vmatpush1.bf16.xpose.msra.mxu0 %v3502_v34 }
 0x335   : > { %2465 = vmatprep.subr.bf16.mxu0 %v3507_v39 }
 0x336   : > { %3164 = vmatpush1.bf16.xpose.msra.mxu1 %v3502_v34 }
 0x337   : > { %3149 = vmatprep.subr.bf16.mxu1 %v3507_v39 }
 0x33c   : > { %2466 = vmatpush1.bf16.xpose.msra.mxu0 %v3505_v37 }
 0x33d   : > { %2467 = vmatprep.subr.bf16.mxu0 %v3510_v4 }
 0x33e   : > { %3165 = vmatpush1.bf16.xpose.msra.mxu1 %v3505_v37 }
 0x33f   : > { %3150 = vmatprep.subr.bf16.mxu1 %v3510_v4 }
 0x344   : > { %2468 = vmatpush1.bf16.xpose.msra.mxu0 %v3508_v6 }
 0x345   : > { %2469 = vmatprep.subr.bf16.mxu0 %v3513_v45 }
 0x346   : > { %3166 = vmatpush1.bf16.xpose.msra.mxu1 %v3508_v6 }
 0x347   : > { %3151 = vmatprep.subr.bf16.mxu1 %v3513_v45 }
 0x34c   : > { %2470 = vmatpush1.bf16.xpose.msra.mxu0 %v3511_v8 }
 0x34d   : > { %2471 = vmatprep.subr.bf16.mxu0 %v3516_v9 }
 0x34e   : > { %3167 = vmatpush1.bf16.xpose.msra.mxu1 %v3511_v8 }
 0x34f   : > { %3152 = vmatprep.subr.bf16.mxu1 %v3516_v9 }
 0x354   : > { %2472 = vmatpush1.bf16.xpose.msra.mxu0 %v3514_v13 }
 0x355   : > { %2473 = vmatprep.subr.bf16.mxu0 %v3519_v63 }
 0x356   : > { %3168 = vmatpush1.bf16.xpose.msra.mxu1 %v3514_v13 }
 0x357   : > { %3153 = vmatprep.subr.bf16.mxu1 %v3519_v63 }
 0x35c   : > { %2474 = vmatpush1.bf16.xpose.msra.mxu0 %v3517_v51 }
 0x35d   : > { %2475 = vmatprep.subr.bf16.mxu0 %v3522_v57 }
 0x35e   : > { %3169 = vmatpush1.bf16.xpose.msra.mxu1 %v3517_v51 }
 0x35f   : > { %3154 = vmatprep.subr.bf16.mxu1 %v3522_v57 }
 0x364   : > { %2476 = vmatpush1.bf16.xpose.msra.mxu0 %v3520_v14 }
 0x365   : > { %2477 = vmatprep.subr.bf16.mxu0 %v3525_v17 }
 0x366   : > { %3170 = vmatpush1.bf16.xpose.msra.mxu1 %v3520_v14 }
 0x367   : > { %3155 = vmatprep.subr.bf16.mxu1 %v3525_v17 }
 0x36c   : > { %2478 = vmatpush1.bf16.xpose.msra.mxu0 %v3523_v18 }
 0x36e   : > { %3171 = vmatpush1.bf16.xpose.msra.mxu1 %v3523_v18 }
 0x3c6   : > { %v4514_v20 = vpop.f32.mrb[0].mxu0 }
 0x3c7   : > { %v1983_v21 = vsub.f32 0.0, %v4514_v20  ;;  %v4517_v16 = vpop.f32.mrb[1].mxu0 }
 0x3c8   : > { %v1984_v22 = vsub.f32 0.0, %v4517_v16  ;;  %v4520_v23 = vpop.f32.mrb[2].mxu0  ;;  %v4526_v28 = vpop.f32.mrb[0].mxu1 }
 0x3c9   : > { %v2015_v35 = vmul.f32 1.442695, %v1983_v21  ;;  %v1985_v40 = vsub.f32 0.0, %v4520_v23  ;;  %v4523_v36 = vpop.f32.mrb[3].mxu0  ;;  %v4528_v29 = vpop.f32.mrb[1].mxu1 }
 0x3ca   : > { %v2017_v47 = vmul.f32 1.442695, %v1984_v22  ;;  %v1986_v5 = vsub.f32 0.0, %v4523_v36  ;;  %v4532_v19 = vpop.f32.mrb[2].mxu1 }
 0x3cb   : > { %3526 = vpow2.f32 %v2015_v35  ;;  %v2019_v11 = vmul.f32 1.442695, %v1985_v40  ;;  %v4537_v48 = vpop.f32.mrb[3].mxu1 }
 0x3cc   : > { %3528 = vpow2.f32 %v2017_v47  ;;  %v2021_v26 = vmul.f32 1.442695, %v1986_v5 }
 0x3cd   : > { %3530 = vpow2.f32 %v2019_v11 }
 0x3ce   : > { %3532 = vpow2.f32 %v2021_v26  ;;  %v4530_v33 = vpop.f32.mrb[4].mxu0 }
 0x3cf   : > { %v1987_v27 = vsub.f32 0.0, %v4530_v33  ;;  %v4535_v41 = vpop.f32.mrb[5].mxu0 }
 0x3d0   : > { %v1988_v10 = vsub.f32 0.0, %v4535_v41  ;;  %v4540_v15 = vpop.f32.mrb[6].mxu0  ;;  %v4546_v44 = vpop.f32.mrb[4].mxu1 }
 0x3d1   : > { %v2023_v38 = vmul.f32 1.442695, %v1987_v27  ;;  %v1989_v24 = vsub.f32 0.0, %v4540_v15  ;;  %v4543_v25 = vpop.f32.mrb[7].mxu0  ;;  %v4548_v50 = vpop.f32.mrb[5].mxu1 }
 0x3d2   : > { %v2025_v42 = vmul.f32 1.442695, %v1988_v10  ;;  %v1990_v59 = vsub.f32 0.0, %v4543_v25  ;;  %v4552_v53 = vpop.f32.mrb[6].mxu1 }
 0x3d3   : > { %3534 = vpow2.f32 %v2023_v38  ;;  %v2027_v31 = vmul.f32 1.442695, %v1989_v24  ;;  %v4557_v61 = vpop.f32.mrb[7].mxu1 }
 0x3d4   : > { %3536 = vpow2.f32 %v2025_v42  ;;  %v2029_v1 = vmul.f32 1.442695, %v1990_v59 }
 0x3d5   : > { %v3527_v46 = vpop.eup %3526  ;;  %3538 = vpow2.f32 %v2027_v31 }
 0x3d6   : > { %v3529_v52 = vpop.eup %3528  ;;  %v2079_v7 = vadd.f32 1.0, %v3527_v46  ;;  %3540 = vpow2.f32 %v2029_v1  ;;  %v4550_v12 = vpop.f32.mrb[8].mxu0 }
 0x3d7   : > { %v3531_v32 = vpop.eup %3530  ;;  %v2080_v43 = vadd.f32 1.0, %v3529_v52  ;;  %v1991_v54 = vsub.f32 0.0, %v4550_v12  ;;  %v4555_v60 = vpop.f32.mrb[9].mxu0 }
 0x3d8   : > { %v3533_v62 = vpop.eup %3532  ;;  %3542 = vrcp.f32 %v2079_v7  ;;  %v2081_v30 = vadd.f32 1.0, %v3531_v32  ;;  %v1992_v58 = vsub.f32 0.0, %v4555_v60  ;;  %v4560_v0 = vpop.f32.mrb[10].mxu0 }
 0x3d9   : > { %3544 = vrcp.f32 %v2080_v43  ;;  %v2082_v2 = vadd.f32 1.0, %v3533_v62  ;;  %v2031_v56 = vmul.f32 1.442695, %v1991_v54  ;;  %v1993_v49 = vsub.f32 0.0, %v4560_v0  ;;  %v4563_v55 = vpop.f32.mrb[11].mxu0  ;;  %v4566_v4 = vpop.f32.mrb[8].mxu1 }
 0x3da   : > { %3546 = vrcp.f32 %v2081_v30  ;;  %v2033_v3 = vmul.f32 1.442695, %v1992_v58  ;;  %v1994_v34 = vsub.f32 0.0, %v4563_v55  ;;  %v4568_v45 = vpop.f32.mrb[9].mxu1 }
 0x3db   : > { %3548 = vrcp.f32 %v2082_v2  ;;  %v2035_v39 = vmul.f32 1.442695, %v1993_v49  ;;  %v4572_v63 = vpop.f32.mrb[10].mxu1 }
 0x3dc   : > { %3550 = vpow2.f32 %v2031_v56  ;;  %v2037_v37 = vmul.f32 1.442695, %v1994_v34  ;;  %v4577_v18 = vpop.f32.mrb[11].mxu1 }
 0x3dd   : > { %v3535_v6 = vpop.eup %3534  ;;  %3552 = vpow2.f32 %v2033_v3 }
 0x3de   : > { %v3537_v8 = vpop.eup %3536  ;;  %v2083_v9 = vadd.f32 1.0, %v3535_v6  ;;  %3554 = vpow2.f32 %v2035_v39  ;;  %v4570_v13 = vpop.f32.mrb[12].mxu0 }
 0x3df   : > { %v3539_v51 = vpop.eup %3538  ;;  %v2084_v57 = vadd.f32 1.0, %v3537_v8  ;;  %3556 = vpow2.f32 %v2037_v37  ;;  %v1995_v14 = vsub.f32 0.0, %v4570_v13  ;;  %v4575_v17 = vpop.f32.mrb[13].mxu0 }
 0x3e0   : > { %v3541_v21 = vpop.eup %3540  ;;  %3558 = vrcp.f32 %v2083_v9  ;;  %v2085_v22 = vadd.f32 1.0, %v3539_v51  ;;  %v1996_v35 = vsub.f32 0.0, %v4575_v17  ;;  %v4580_v40 = vpop.f32.mrb[14].mxu0 }
 0x3e1   : > { %3560 = vrcp.f32 %v2084_v57  ;;  %v2086_v47 = vadd.f32 1.0, %v3541_v21  ;;  %v2039_v5 = vmul.f32 1.442695, %v1995_v14  ;;  %v1997_v11 = vsub.f32 0.0, %v4580_v40  ;;  %v4583_v26 = vpop.f32.mrb[15].mxu0  ;;  %v4588_v52 = vpop.f32.mrb[12].mxu1 }
 0x3e2   : > { %v3543_v27 = vpop.eup %3542  ;;  %3562 = vrcp.f32 %v2085_v22  ;;  %v2041_v10 = vmul.f32 1.442695, %v1996_v35  ;;  %v1998_v38 = vsub.f32 0.0, %v4583_v26  ;;  %v4592_v54 = vpop.f32.mrb[13].mxu1 }
 0x3e3   : > { %v3545_v24 = vpop.eup %3544  ;;  %v2175_v42 = vmul.f32 %v3543_v27, %v4514_v20  ;;  %3564 = vrcp.f32 %v2086_v47  ;;  %v2043_v59 = vmul.f32 1.442695, %v1997_v11 }
 0x3e4   : > { %v3547_v31 = vpop.eup %3546  ;;  %v2176_v1 = vmul.f32 %v3545_v24, %v4517_v16  ;;  %3566 = vpow2.f32 %v2039_v5  ;;  %v2045_v46 = vmul.f32 1.442695, %v1998_v38  ;;  %v4598_v16 = vpop.f32.mrb[14].mxu1 }
 0x3e5   : > { %v3549_v7 = vpop.eup %3548  ;;  %v2177_v32 = vmul.f32 %v3547_v31, %v4520_v23  ;;  %3568 = vpow2.f32 %v2041_v10  ;;  %v2207_v43 = vmul.f32 %v2175_v42, %v4526_v28  ;;  %v4604_v3 = vpop.f32.mrb[15].mxu1 }
 0x3e6   : > { %v3551_v62 = vpop.eup %3550  ;;  %v2178_v20 = vmul.f32 %v3549_v7, %v4523_v36  ;;  %3570 = vpow2.f32 %v2043_v59  ;;  %v2208_v30 = vmul.f32 %v2176_v1, %v4528_v29  ;;  %v4596_v58 = vpop.f32.mrb[16].mxu0 }
 0x3e7   : > { %v3553_v2 = vpop.eup %3552  ;;  %v2087_v56 = vadd.f32 1.0, %v3551_v62  ;;  %3572 = vpow2.f32 %v2045_v46  ;;  %v2209_v23 = vmul.f32 %v2177_v32, %v4532_v19  ;;  %v1999_v49 = vsub.f32 0.0, %v4596_v58  ;;  %v4602_v28 = vpop.f32.mrb[17].mxu0 }
 0x3e8   : > { %v3555_v34 = vpop.eup %3554  ;;  %v2088_v36 = vadd.f32 1.0, %v3553_v2  ;;  %v2210_v39 = vmul.f32 %v2178_v20, %v4537_v48  ;;  %v2000_v29 = vsub.f32 0.0, %v4602_v28  ;;  %v4608_v37 = vpop.f32.mrb[18].mxu0 }
 0x3e9   : > { %v3557_v6 = vpop.eup %3556  ;;  %3574 = vrcp.f32 %v2087_v56  ;;  %v2089_v8 = vadd.f32 1.0, %v3555_v34  ;;  %v2271_v9 = vpack.c.bf16 %v2209_v23, %v2207_v43  ;;  %v2047_v51 = vmul.f32 1.442695, %v1999_v49  ;;  %v4610_v19 = vpop.f32.mrb[19].mxu0 }
 0x3ea   : > { %v3559_v57 = vpop.eup %3558  ;;  %3576 = vrcp.f32 %v2088_v36  ;;  %v2090_v14 = vadd.f32 1.0, %v3557_v6  ;;  %v2272_v21 = vpack.c.bf16 %v2210_v39, %v2208_v30  ;;  %v2049_v22 = vmul.f32 1.442695, %v2000_v29  ;;  %v4616_v10 = vpop.f32.mrb[16].mxu1 }
 0x3eb   : > { %v3561_v35 = vpop.eup %3560  ;;  %v2179_v47 = vmul.f32 %v3559_v57, %v4530_v33  ;;  %3578 = vrcp.f32 %v2089_v8  ;;  %v2001_v48 = vsub.f32 0.0, %v4608_v37  ;;  %v2002_v5 = vsub.f32 0.0, %v4610_v19  ;;  %v4619_v33 = vpop.f32.mrb[17].mxu1 }
 0x3ec   : > { %v3563_v11 = vpop.eup %3562  ;;  %v2180_v27 = vmul.f32 %v3561_v35, %v4535_v41  ;;  %3580 = vrcp.f32 %v2090_v14  ;;  %2479 = vmatprep.mubr.bf16.mxu0 %v2272_v21  ;;  %v4626_v32 = vpop.f32.mrb[18].mxu1 }
 0x3ed   : > { %v3565_v38 = vpop.eup %3564  ;;  %v2181_v24 = vmul.f32 %v3563_v11, %v4540_v15  ;;  %3582 = vpow2.f32 %v2047_v51  ;;  %v2051_v42 = vmul.f32 1.442695, %v2001_v48  ;;  %v2053_v59 = vmul.f32 1.442695, %v2002_v5  ;;  %2480 = vmatmul.mubr.bf16.vlgmr.msra.gmra.mrb[32].mxu0 %v2271_v9  ;;  %v4632_v2 = vpop.f32.mrb[19].mxu1 }
 0x3ee   : > { %v3567_v31 = vpop.eup %3566  ;;  %v2182_v1 = vmul.f32 %v3565_v38, %v4543_v25  ;;  %3584 = vpow2.f32 %v2049_v22  ;;  %v2211_v46 = vmul.f32 %v2179_v47, %v4546_v44  ;;  %v2212_v41 = vmul.f32 %v2180_v27, %v4548_v50  ;;  %v4624_v7 = vpop.f32.mrb[20].mxu0 }
 0x3ef   : > { %v3569_v43 = vpop.eup %3568  ;;  %v2091_v15 = vadd.f32 1.0, %v3567_v31  ;;  %3586 = vpow2.f32 %v2051_v42  ;;  %v2213_v62 = vmul.f32 %v2181_v24, %v4552_v53  ;;  %v2003_v20 = vsub.f32 0.0, %v4624_v7  ;;  %v4630_v30 = vpop.f32.mrb[21].mxu0 }
 0x3f0   : > { %v3571_v25 = vpop.eup %3570  ;;  %v2092_v56 = vadd.f32 1.0, %v3569_v43  ;;  %3588 = vpow2.f32 %v2053_v59  ;;  %v2214_v44 = vmul.f32 %v2182_v1, %v4557_v61  ;;  %v2004_v50 = vsub.f32 0.0, %v4630_v30  ;;  %v4636_v23 = vpop.f32.mrb[22].mxu0 }
 0x3f1   : > { %v3573_v49 = vpop.eup %3572  ;;  %3590 = vrcp.f32 %v2091_v15  ;;  %v2093_v34 = vadd.f32 1.0, %v3571_v25  ;;  %v2273_v36 = vpack.c.bf16 %v2213_v62, %v2211_v46  ;;  %v2055_v53 = vmul.f32 1.442695, %v2003_v20  ;;  %v4638_v39 = vpop.f32.mrb[23].mxu0 }
 0x3f2   : > { %3592 = vrcp.f32 %v2092_v56  ;;  %v2094_v29 = vadd.f32 1.0, %v3573_v49  ;;  %v2274_v6 = vpack.c.bf16 %v2214_v44, %v2212_v41  ;;  %v2057_v8 = vmul.f32 1.442695, %v2004_v50  ;;  %v4643_v21 = vpop.f32.mrb[20].mxu1 }
 0x3f3   : > { %v3575_v9 = vpop.eup %3574  ;;  %3594 = vrcp.f32 %v2093_v34  ;;  %v2005_v51 = vsub.f32 0.0, %v4636_v23  ;;  %v2006_v61 = vsub.f32 0.0, %v4638_v39  ;;  %v4646_v5 = vpop.f32.mrb[21].mxu1 }
 0x3f4   : > { %v3577_v57 = vpop.eup %3576  ;;  %v2183_v14 = vmul.f32 %v3575_v9, %v4550_v12  ;;  %3596 = vrcp.f32 %v2094_v29  ;;  %2489 = vmatprep.mubr.bf16.mxu0 %v2274_v6  ;;  %v4652_v24 = vpop.f32.mrb[22].mxu1 }
 0x3f5   : > { %v3579_v22 = vpop.eup %3578  ;;  %v2184_v35 = vmul.f32 %v3577_v57, %v4555_v60  ;;  %3598 = vpow2.f32 %v2055_v53  ;;  %v2059_v47 = vmul.f32 1.442695, %v2005_v51  ;;  %v2061_v48 = vmul.f32 1.442695, %v2006_v61  ;;  %2490 = vmatmul.mubr.bf16.gmra.mrb[36].mxu0 %v2273_v36  ;;  %v4659_v46 = vpop.f32.mrb[23].mxu1 }
 0x3f6   : > { %v3581_v11 = vpop.eup %3580  ;;  %v2185_v27 = vmul.f32 %v3579_v22, %v4560_v0  ;;  %3600 = vpow2.f32 %v2057_v8  ;;  %v2215_v38 = vmul.f32 %v2183_v14, %v4566_v4  ;;  %v4650_v12 = vpop.f32.mrb[24].mxu0 }
 0x3f7   : > { %v3583_v42 = vpop.eup %3582  ;;  %v2186_v59 = vmul.f32 %v3581_v11, %v4563_v55  ;;  %3602 = vpow2.f32 %v2059_v47  ;;  %v2216_v60 = vmul.f32 %v2184_v35, %v4568_v45  ;;  %v2007_v31 = vsub.f32 0.0, %v4650_v12  ;;  %v4657_v1 = vpop.f32.mrb[25].mxu0 }
 0x3f8   : > { %v3585_v0 = vpop.eup %3584  ;;  %v2095_v41 = vadd.f32 1.0, %v3583_v42  ;;  %3604 = vpow2.f32 %v2061_v48  ;;  %v2217_v4 = vmul.f32 %v2185_v27, %v4572_v63  ;;  %v2008_v43 = vsub.f32 0.0, %v4657_v1  ;;  %v4663_v15 = vpop.f32.mrb[26].mxu0 }
 0x3f9   : > { %v3587_v62 = vpop.eup %3586  ;;  %v2096_v55 = vadd.f32 1.0, %v3585_v0  ;;  %v2218_v20 = vmul.f32 %v2186_v59, %v4577_v18  ;;  %v2009_v45 = vsub.f32 0.0, %v4663_v15  ;;  %v4667_v25 = vpop.f32.mrb[27].mxu0  ;;  %v2063_v49 = vmul.f32 1.442695, %v2007_v31 }
 0x3fa   : > { %v3589_v56 = vpop.eup %3588  ;;  %3606 = vrcp.f32 %v2095_v41  ;;  %v2097_v44 = vadd.f32 1.0, %v3587_v62  ;;  %v2275_v50 = vpack.c.bf16 %v2217_v4, %v2215_v38  ;;  %v2065_v53 = vmul.f32 1.442695, %v2008_v43  ;;  %v4671_v9 = vpop.f32.mrb[24].mxu1 }
 0x3fb   : > { %v3591_v34 = vpop.eup %3590  ;;  %3608 = vrcp.f32 %v2096_v55  ;;  %v2098_v63 = vadd.f32 1.0, %v3589_v56  ;;  %v2276_v36 = vpack.c.bf16 %v2218_v20, %v2216_v60  ;;  %v2067_v8 = vmul.f32 1.442695, %v2009_v45  ;;  %v4674_v57 = vpop.f32.mrb[25].mxu1 }
 0x3fc   : > { %v3593_v29 = vpop.eup %3592  ;;  %v2187_v6 = vmul.f32 %v3591_v34, %v4570_v13  ;;  %3610 = vrcp.f32 %v2097_v44  ;;  %v2010_v18 = vsub.f32 0.0, %v4667_v25  ;;  %v4680_v48 = vpop.f32.mrb[26].mxu1 }
 0x3fd   : > { %v3595_v51 = vpop.eup %3594  ;;  %v2188_v61 = vmul.f32 %v3593_v29, %v4575_v17  ;;  %3612 = vrcp.f32 %v2098_v63  ;;  %2499 = vmatprep.mubr.bf16.mxu0 %v2276_v36 }
 0x3fe   : > { %v3597_v14 = vpop.eup %3596  ;;  %v2189_v22 = vmul.f32 %v3595_v51, %v4580_v40  ;;  %3614 = vpow2.f32 %v2063_v49  ;;  %v2069_v35 = vmul.f32 1.442695, %v2010_v18  ;;  %v2219_v13 = vmul.f32 %v2187_v6, %v4588_v52  ;;  %2500 = vmatmul.mubr.bf16.gmra.mrb[40].mxu0 %v2275_v50  ;;  %v4678_v47 = vpop.f32.mrb[28].mxu0 }
 0x3ff   : > { %v3599_v11 = vpop.eup %3598  ;;  %v2190_v27 = vmul.f32 %v3597_v14, %v4583_v26  ;;  %3616 = vpow2.f32 %v2065_v53  ;;  %v2220_v17 = vmul.f32 %v2188_v61, %v4592_v54  ;;  %v2011_v38 = vsub.f32 0.0, %v4678_v47  ;;  %v4685_v42 = vpop.f32.mrb[29].mxu0 }
 0x400   : > { %v4687_v40 = vpop.f32.mrb[27].mxu1  ;;  %v3601_v59 = vpop.eup %3600  ;;  %v2099_v60 = vadd.f32 1.0, %v3599_v11  ;;  %3618 = vpow2.f32 %v2067_v8  ;;  %v2221_v52 = vmul.f32 %v2189_v22, %v4598_v16  ;;  %v2012_v31 = vsub.f32 0.0, %v4685_v42 }
 0x401   : > { %v4691_v0 = vpop.f32.mrb[30].mxu0  ;;  %v3603_v41 = vpop.eup %3602  ;;  %v2100_v26 = vadd.f32 1.0, %v3601_v59  ;;  %3620 = vpow2.f32 %v2069_v35  ;;  %v2222_v54 = vmul.f32 %v2190_v27, %v4604_v3  ;;  %v2071_v4 = vmul.f32 1.442695, %v2011_v38 }
 0x402   : > { %v4694_v43 = vpop.f32.mrb[31].mxu0  ;;  %v3605_v62 = vpop.eup %3604  ;;  %3622 = vrcp.f32 %v2099_v60  ;;  %v2101_v55 = vadd.f32 1.0, %v3603_v41  ;;  %v2277_v20 = vpack.c.bf16 %v2221_v52, %v2219_v13  ;;  %v2073_v45 = vmul.f32 1.442695, %v2012_v31 }
 0x403   : > { %3624 = vrcp.f32 %v2100_v26  ;;  %v2102_v56 = vadd.f32 1.0, %v3605_v62  ;;  %v2278_v16 = vpack.c.bf16 %v2222_v54, %v2220_v17  ;;  %v2013_v44 = vsub.f32 0.0, %v4691_v0  ;;  %v4698_v34 = vpop.f32.mrb[28].mxu1 }
 0x404   : > { %v3607_v50 = vpop.eup %3606  ;;  %3626 = vrcp.f32 %v2101_v55  ;;  %v2014_v49 = vsub.f32 0.0, %v4694_v43  ;;  %v4701_v53 = vpop.f32.mrb[29].mxu1 }
 0x405   : > { %v3609_v3 = vpop.eup %3608  ;;  %v2191_v63 = vmul.f32 %v3607_v50, %v4596_v58  ;;  %3628 = vrcp.f32 %v2102_v56  ;;  %v2075_v36 = vmul.f32 1.442695, %v2013_v44  ;;  %2509 = vmatprep.mubr.bf16.mxu0 %v2278_v16  ;;  %v4704_v18 = vpop.f32.mrb[30].mxu1 }
 0x406   : > { %v3611_v29 = vpop.eup %3610  ;;  %v2192_v6 = vmul.f32 %v3609_v3, %v4602_v28  ;;  %3630 = vpow2.f32 %v2071_v4  ;;  %v2077_v8 = vmul.f32 1.442695, %v2014_v49  ;;  %2510 = vmatmul.mubr.bf16.gmra.mrb[44].mxu0 %v2277_v20  ;;  %v4708_v58 = vpop.f32.mrb[31].mxu1 }
 0x407   : > { %v3613_v51 = vpop.eup %3612  ;;  %v2193_v61 = vmul.f32 %v3611_v29, %v4608_v37  ;;  %3632 = vpow2.f32 %v2073_v45  ;;  %v2223_v14 = vmul.f32 %v2191_v63, %v4616_v10 }
 0x408   : > { %v3615_v22 = vpop.eup %3614  ;;  %v2194_v35 = vmul.f32 %v3613_v51, %v4610_v19  ;;  %3634 = vpow2.f32 %v2075_v36  ;;  %v2224_v13 = vmul.f32 %v2192_v6, %v4619_v33 }
 0x409   : > { %v3617_v28 = vpop.eup %3616  ;;  %v2103_v11 = vadd.f32 1.0, %v3615_v22  ;;  %3636 = vpow2.f32 %v2077_v8  ;;  %v2225_v27 = vmul.f32 %v2193_v61, %v4626_v32 }
 0x40a   : > { %v3619_v17 = vpop.eup %3618  ;;  %v2104_v38 = vadd.f32 1.0, %v3617_v28  ;;  %v2226_v37 = vmul.f32 %v2194_v35, %v4632_v2 }
 0x40b   : > { %v3621_v59 = vpop.eup %3620  ;;  %3638 = vrcp.f32 %v2103_v11  ;;  %v2105_v10 = vadd.f32 1.0, %v3619_v17  ;;  %v2279_v60 = vpack.c.bf16 %v2225_v27, %v2223_v14 }
 0x40c   : > { %v3623_v52 = vpop.eup %3622  ;;  %3640 = vrcp.f32 %v2104_v38  ;;  %v2106_v31 = vadd.f32 1.0, %v3621_v59  ;;  %v2280_v19 = vpack.c.bf16 %v2226_v37, %v2224_v13  ;;  %v2144_v38 = vld [vmem:[#allocation4 + $0x8] sm:$0xff]  ;;  %v2145_v59 = vld [vmem:[#allocation4 + $0x10] sm:$0xff] }
 0x40d   : > { %v3625_v41 = vpop.eup %3624  ;;  %v2195_v33 = vmul.f32 %v3623_v52, %v4624_v7  ;;  %3642 = vrcp.f32 %v2105_v10 }
 0x40e   : > { %v3627_v26 = vpop.eup %3626  ;;  %v2196_v54 = vmul.f32 %v3625_v41, %v4630_v30  ;;  %3644 = vrcp.f32 %v2106_v31  ;;  %2519 = vmatprep.mubr.bf16.mxu1 %v2280_v19  ;;  %v2148_v31 = vld [vmem:[#allocation4 + $0x28] sm:$0xff]  ;;  %v2149_v41 = vld [vmem:[#allocation4 + $0x30] sm:$0xff] }
 0x40f   : > { %v3629_v32 = vpop.eup %3628  ;;  %v2197_v2 = vmul.f32 %v3627_v26, %v4636_v23  ;;  %v2227_v4 = vmul.f32 %v2195_v33, %v4643_v21  ;;  %2520 = vmatmul.mubr.bf16.vlgmr.msra.gmra.mrb[32].mxu1 %v2279_v60 }
 0x410   : > { %v3631_v62 = vpop.eup %3630  ;;  %v2198_v55 = vmul.f32 %v3629_v32, %v4638_v39  ;;  %v2228_v20 = vmul.f32 %v2196_v54, %v4646_v5  ;;  %v2150_v54 = vld [vmem:[#allocation4 + $0x38] sm:$0xff] }
 0x411   : > { %v3633_v45 = vpop.eup %3632  ;;  %v2107_v56 = vadd.f32 1.0, %v3631_v62  ;;  %v2229_v7 = vmul.f32 %v2197_v2, %v4652_v24 }
 0x412   : > { %v3635_v16 = vpop.eup %3634  ;;  %v2108_v44 = vadd.f32 1.0, %v3633_v45  ;;  %v2230_v30 = vmul.f32 %v2198_v55, %v4659_v46  ;;  %v2152_v45 = vld [vmem:[#allocation4 + $0x48] sm:$0xff] }
 0x413   : > { %v3637_v50 = vpop.eup %3636  ;;  %3646 = vrcp.f32 %v2107_v56  ;;  %v2109_v49 = vadd.f32 1.0, %v3635_v16  ;;  %v2281_v23 = vpack.c.bf16 %v2229_v7, %v2227_v4  ;;  %v2153_v7 = vld [vmem:[#allocation4 + $0x50] sm:$0xff] }
 0x414   : > { %3648 = vrcp.f32 %v2108_v44  ;;  %v2110_v21 = vadd.f32 1.0, %v3637_v50  ;;  %v2282_v3 = vpack.c.bf16 %v2230_v30, %v2228_v20  ;;  %v2151_v20 = vld [vmem:[#allocation4 + $0x40] sm:$0xff]  ;;  %v2154_v30 = vld [vmem:[#allocation4 + $0x58] sm:$0xff] }
 0x415   : > { %v3639_v63 = vpop.eup %3638  ;;  %3650 = vrcp.f32 %v2109_v49 }
 0x416   : > { %v3641_v39 = vpop.eup %3640  ;;  %v2199_v5 = vmul.f32 %v3639_v63, %v4650_v12  ;;  %3652 = vrcp.f32 %v2110_v21  ;;  %2529 = vmatprep.mubr.bf16.mxu1 %v2282_v3  ;;  %v2155_v63 = vld [vmem:[#allocation4 + $0x60] sm:$0xff] }
 0x417   : > { %v3643_v36 = vpop.eup %3642  ;;  %v2200_v24 = vmul.f32 %v3641_v39, %v4657_v1  ;;  %2530 = vmatmul.mubr.bf16.gmra.mrb[36].mxu1 %v2281_v23  ;;  %v2156_v39 = vld [vmem:[#allocation4 + $0x68] sm:$0xff] }
 0x418   : > { %v3645_v29 = vpop.eup %3644  ;;  %v2201_v46 = vmul.f32 %v3643_v36, %v4663_v15  ;;  %v2231_v6 = vmul.f32 %v2199_v5, %v4671_v9  ;;  %v2157_v36 = vld [vmem:[#allocation4 + $0x70] sm:$0xff] }
 0x419   : > { %v2202_v8 = vmul.f32 %v3645_v29, %v4667_v25  ;;  %v2232_v51 = vmul.f32 %v2200_v24, %v4674_v57 }
 0x41a   : > { %v2233_v61 = vmul.f32 %v2201_v46, %v4680_v48  ;;  %v2158_v46 = vld [vmem:[#allocation4 + $0x78] sm:$0xff] }
 0x41b   : > { %v2234_v14 = vmul.f32 %v2202_v8, %v4687_v40 }
 0x41c   : > { %v2283_v12 = vpack.c.bf16 %v2233_v61, %v2231_v6 }
 0x41d   : > { %v3647_v22 = vpop.eup %3646  ;;  %v2284_v35 = vpack.c.bf16 %v2234_v14, %v2232_v51 }
 0x41e   : > { %v3649_v13 = vpop.eup %3648  ;;  %v2203_v1 = vmul.f32 %v3647_v22, %v4678_v47  ;;  %v2160_v22 = vld [vmem:[#allocation4 + $0x88] sm:$0xff] }
 0x41f   : > { %v3651_v28 = vpop.eup %3650  ;;  %v2204_v11 = vmul.f32 %v3649_v13, %v4685_v42  ;;  %2539 = vmatprep.mubr.bf16.mxu1 %v2284_v35  ;;  %v2143_v42 = vld [vmem:[#allocation4] sm:$0xff]  ;;  %v2161_v13 = vld [vmem:[#allocation4 + $0x90] sm:$0xff] }
 0x420   : > { %v3653_v15 = vpop.eup %3652  ;;  %v2205_v9 = vmul.f32 %v3651_v28, %v4691_v0  ;;  %v2235_v25 = vmul.f32 %v2203_v1, %v4698_v34  ;;  %2540 = vmatmul.mubr.bf16.gmra.mrb[40].mxu1 %v2283_v12  ;;  %v2146_v34 = vld [vmem:[#allocation4 + $0x18] sm:$0xff]  ;;  %v2159_v12 = vld [vmem:[#allocation4 + $0x80] sm:$0xff] }
 0x421   : > { %v2206_v57 = vmul.f32 %v3653_v15, %v4694_v43  ;;  %v2236_v48 = vmul.f32 %v2204_v11, %v4701_v53  ;;  %v2162_v11 = vld [vmem:[#allocation4 + $0x98] sm:$0xff] }
 0x422   : > { %v2237_v40 = vmul.f32 %v2205_v9, %v4704_v18 }
 0x423   : > { %v2238_v27 = vmul.f32 %v2206_v57, %v4708_v58  ;;  %v2147_v58 = vld [vmem:[#allocation4 + $0x20] sm:$0xff] }
 0x424   : > { %v2285_v17 = vpack.c.bf16 %v2237_v40, %v2235_v25  ;;  %v2163_v40 = vld [vmem:[#allocation4 + $0xa0] sm:$0xff] }
 0x425   : > { %v2286_v47 = vpack.c.bf16 %v2238_v27, %v2236_v48  ;;  %v2164_v27 = vld [vmem:[#allocation4 + $0xa8] sm:$0xff] }
 0x427   : > { %2549 = vmatprep.mubr.bf16.mxu1 %v2286_v47  ;;  %v2165_v47 = vld [vmem:[#allocation4 + $0xb0] sm:$0xff] }
 0x428   : > { %2550 = vmatmul.mubr.bf16.gmra.mrb[44].mxu1 %v2285_v17 }
 0x4c0   : > { %v2481_v37 = vpop.f32.mrb[32].mxu0 }
 0x4c1   : > { %v2560_v0 = vadd.f32 %v2481_v37, %v2143_v42  ;;  %v2483_v10 = vpop.f32.mrb[33].mxu0  ;;  %v2166_v37 = vld [vmem:[#allocation4 + $0xb8] sm:$0xff] }
 0x4c2   : > { %v2561_v60 = vadd.f32 %v2483_v10, %v2144_v38  ;;  %v2485_v52 = vpop.f32.mrb[34].mxu0 }
 0x4c3   : > { %2592 = vst [vmem:[#allocation4] sm:$0xff] %v2560_v0  ;;  %v2562_v43 = vadd.f32 %v2485_v52, %v2145_v59  ;;  %v2487_v53 = vpop.f32.mrb[35].mxu0  ;;  %v2167_v52 = vld [vmem:[#allocation4 + $0xc0] sm:$0xff] }
 0x4c4   : > { %2593 = vst [vmem:[#allocation4 + $0x8] sm:$0xff] %v2561_v60  ;;  %v2563_v18 = vadd.f32 %v2487_v53, %v2146_v34 }
 0x4c5   : > { %2594 = vst [vmem:[#allocation4 + $0x10] sm:$0xff] %v2562_v43  ;;  %v2168_v43 = vld [vmem:[#allocation4 + $0xc8] sm:$0xff] }
 0x4c6   : > { %2595 = vst [vmem:[#allocation4 + $0x18] sm:$0xff] %v2563_v18  ;;  %v2169_v18 = vld [vmem:[#allocation4 + $0xd0] sm:$0xff] }
 0x4c8   : > { %v2491_v19 = vpop.f32.mrb[36].mxu0 }
 0x4c9   : > { %v2564_v33 = vadd.f32 %v2491_v19, %v2147_v58  ;;  %v2493_v26 = vpop.f32.mrb[37].mxu0  ;;  %v2170_v19 = vld [vmem:[#allocation4 + $0xd8] sm:$0xff] }
 0x4ca   : > { %v2565_v32 = vadd.f32 %v2493_v26, %v2148_v31  ;;  %v2495_v2 = vpop.f32.mrb[38].mxu0 }
 0x4cb   : > { %2596 = vst [vmem:[#allocation4 + $0x20] sm:$0xff] %v2564_v33  ;;  %v2566_v4 = vadd.f32 %v2495_v2, %v2149_v41  ;;  %v2497_v62 = vpop.f32.mrb[39].mxu0  ;;  %v2171_v2 = vld [vmem:[#allocation4 + $0xe0] sm:$0xff] }
 0x4cc   : > { %2597 = vst [vmem:[#allocation4 + $0x28] sm:$0xff] %v2565_v32  ;;  %v2567_v55 = vadd.f32 %v2497_v62, %v2150_v54 }
 0x4cd   : > { %2598 = vst [vmem:[#allocation4 + $0x30] sm:$0xff] %v2566_v4  ;;  %v2172_v4 = vld [vmem:[#allocation4 + $0xe8] sm:$0xff] }
 0x4ce   : > { %2599 = vst [vmem:[#allocation4 + $0x38] sm:$0xff] %v2567_v55  ;;  %v2173_v55 = vld [vmem:[#allocation4 + $0xf0] sm:$0xff] }
 0x4d1   : > { %v2501_v56 = vpop.f32.mrb[40].mxu0 }
 0x4d2   : > { %v2568_v16 = vadd.f32 %v2501_v56, %v2151_v20  ;;  %v2503_v44 = vpop.f32.mrb[41].mxu0  ;;  %v2174_v56 = vld [vmem:[#allocation4 + $0xf8] sm:$0xff] }
 0x4d3   : > { %v2569_v50 = vadd.f32 %v2503_v44, %v2152_v45  ;;  %v2505_v49 = vpop.f32.mrb[42].mxu0 }
 0x4d4   : > { %2600 = vst [vmem:[#allocation4 + $0x40] sm:$0xff] %v2568_v16  ;;  %v2570_v23 = vadd.f32 %v2505_v49, %v2153_v7  ;;  %v2507_v21 = vpop.f32.mrb[43].mxu0  ;;  %v2628_v49 = vld [vmem:[#allocation2] sm:$0xff] (!%p3096_p8) }
 0x4d5   : > { %2601 = vst [vmem:[#allocation4 + $0x48] sm:$0xff] %v2569_v50  ;;  %v2571_v3 = vadd.f32 %v2507_v21, %v2154_v30  ;;  %v2629_v21 = vld [vmem:[#allocation2 + $0x8] sm:$0xff] (!%p3096_p8) }
 0x4d6   : > { %2602 = vst [vmem:[#allocation4 + $0x50] sm:$0xff] %v2570_v23  ;;  %v2660_v23 = vld [vmem:[#allocation4] sm:$0xff] (!%p3096_p8) }
 0x4d7   : > { %2603 = vst [vmem:[#allocation4 + $0x58] sm:$0xff] %v2571_v3  ;;  %v2692_v3 = vadd.f32 (!%p3096_p8), %v2660_v23, %v2628_v49  ;;  %v2650_v23 = vld [vmem:[#allocation2 + $0xb0] sm:$0xff] (!%p3096_p8) }
 0x4d9   : > { %v2511_v5 = vpop.f32.mrb[44].mxu0  ;;  %2724 = vst [vmem:[%s4040_s10] sm:$0xff] (!%p3096_p8), %v2692_v3 }
 0x4da   : > { %v2572_v24 = vadd.f32 %v2511_v5, %v2155_v63  ;;  %v2513_v29 = vpop.f32.mrb[45].mxu0  ;;  %v2661_v63 = vld [vmem:[#allocation4 + $0x8] sm:$0xff] (!%p3096_p8)  ;;  %v2662_v5 = vld [vmem:[#allocation4 + $0x10] sm:$0xff] (!%p3096_p8) }
 0x4db   : > { %v2573_v6 = vadd.f32 %v2513_v29, %v2156_v39  ;;  %v2515_v8 = vpop.f32.mrb[46].mxu0  ;;  %v2630_v39 = vld [vmem:[#allocation2 + $0x10] sm:$0xff] (!%p3096_p8)  ;;  %v2631_v29 = vld [vmem:[#allocation2 + $0x18] sm:$0xff] (!%p3096_p8) }
 0x4dc   : > { %2604 = vst [vmem:[#allocation4 + $0x60] sm:$0xff] %v2572_v24  ;;  %v2574_v51 = vadd.f32 %v2515_v8, %v2157_v36  ;;  %v2517_v61 = vpop.f32.mrb[47].mxu0  ;;  %v2693_v36 = vadd.f32 (!%p3096_p8), %v2661_v63, %v2629_v21  ;;  %v2694_v24 = vadd.f32 (!%p3096_p8), %v2662_v5, %v2630_v39  ;;  %v2651_v63 = vld [vmem:[#allocation2 + $0xb8] sm:$0xff] (!%p3096_p8) }
 0x4dd   : > { %2605 = vst [vmem:[#allocation4 + $0x68] sm:$0xff] %v2573_v6  ;;  %v2575_v14 = vadd.f32 %v2517_v61, %v2158_v46  ;;  %v2663_v46 = vld [vmem:[#allocation4 + $0x18] sm:$0xff] (!%p3096_p8)  ;;  %v2632_v6 = vld [vmem:[#allocation2 + $0x20] sm:$0xff] (!%p3096_p8)  ;;  %v2633_v61 = vld [vmem:[#allocation2 + $0x28] sm:$0xff] (!%p3096_p8) }
 0x4de   : > { %2606 = vst [vmem:[#allocation4 + $0x70] sm:$0xff] %v2574_v51  ;;  %v2695_v8 = vadd.f32 (!%p3096_p8), %v2663_v46, %v2631_v29  ;;  %v2664_v51 = vld [vmem:[#allocation4 + $0x20] sm:$0xff] (!%p3096_p8)  ;;  %2725 = vst [vmem:[%s4040_s10 + $0x8] sm:$0xff] (!%p3096_p8), %v2693_v36  ;;  %v2653_v46 = vld [vmem:[#allocation2 + $0xc8] sm:$0xff] (!%p3096_p8) }
 0x4df   : > { %2607 = vst [vmem:[#allocation4 + $0x78] sm:$0xff] %v2575_v14  ;;  %v2665_v14 = vld [vmem:[#allocation4 + $0x28] sm:$0xff] (!%p3096_p8)  ;;  %2726 = vst [vmem:[%s4040_s10 + $0x10] sm:$0xff] (!%p3096_p8), %v2694_v24  ;;  %v2652_v24 = vld [vmem:[#allocation2 + $0xc0] sm:$0xff] (!%p3096_p8) }
 0x4e0   : > { %2727 = vst [vmem:[%s4040_s10 + $0x18] sm:$0xff] (!%p3096_p8), %v2695_v8 }
 0x4e2   : > { %v2521_v35 = vpop.f32.mrb[32].mxu1 }
 0x4e3   : > { %v2576_v1 = vadd.f32 %v2521_v35, %v2159_v12  ;;  %v2523_v28 = vpop.f32.mrb[33].mxu1  ;;  %v2696_v12 = vadd.f32 (!%p3096_p8), %v2664_v51, %v2632_v6  ;;  %v2634_v35 = vld [vmem:[#allocation2 + $0x30] sm:$0xff] (!%p3096_p8) }
 0x4e4   : > { %v2577_v15 = vadd.f32 %v2523_v28, %v2160_v22  ;;  %v2525_v9 = vpop.f32.mrb[34].mxu1  ;;  %v2697_v22 = vadd.f32 (!%p3096_p8), %v2665_v14, %v2633_v61  ;;  %v2654_v51 = vld [vmem:[#allocation2 + $0xd0] sm:$0xff] (!%p3096_p8) }
 0x4e5   : > { %2608 = vst [vmem:[#allocation4 + $0x80] sm:$0xff] %v2576_v1  ;;  %v2578_v25 = vadd.f32 %v2525_v9, %v2161_v13  ;;  %v2527_v57 = vpop.f32.mrb[35].mxu1  ;;  %v2666_v13 = vld [vmem:[#allocation4 + $0x30] sm:$0xff] (!%p3096_p8)  ;;  %v2635_v1 = vld [vmem:[#allocation2 + $0x38] sm:$0xff] (!%p3096_p8)  ;;  %v2668_v9 = vld [vmem:[#allocation4 + $0x40] sm:$0xff] (!%p3096_p8) }
 0x4e6   : > { %2609 = vst [vmem:[#allocation4 + $0x88] sm:$0xff] %v2577_v15  ;;  %v2579_v48 = vadd.f32 %v2527_v57, %v2162_v11  ;;  %v2698_v28 = vadd.f32 (!%p3096_p8), %v2666_v13, %v2634_v35  ;;  %v2667_v11 = vld [vmem:[#allocation4 + $0x38] sm:$0xff] (!%p3096_p8)  ;;  %v2636_v15 = vld [vmem:[#allocation2 + $0x40] sm:$0xff] (!%p3096_p8)  ;;  %2728 = vst [vmem:[%s4040_s10 + $0x20] sm:$0xff] (!%p3096_p8), %v2696_v12 }
 0x4e7   : > { %2610 = vst [vmem:[#allocation4 + $0x90] sm:$0xff] %v2578_v25  ;;  %2729 = vst [vmem:[%s4040_s10 + $0x28] sm:$0xff] (!%p3096_p8), %v2697_v22  ;;  %v2699_v25 = vadd.f32 (!%p3096_p8), %v2667_v11, %v2635_v1  ;;  %v2700_v57 = vadd.f32 (!%p3096_p8), %v2668_v9, %v2636_v15  ;;  %v2655_v22 = vld [vmem:[#allocation2 + $0xd8] sm:$0xff] (!%p3096_p8)  ;;  %v2656_v13 = vld [vmem:[#allocation2 + $0xe0] sm:$0xff] (!%p3096_p8) }
 0x4e8   : > { %2611 = vst [vmem:[#allocation4 + $0x98] sm:$0xff] %v2579_v48  ;;  %v2637_v48 = vld [vmem:[#allocation2 + $0x48] sm:$0xff] (!%p3096_p8)  ;;  %2730 = vst [vmem:[%s4040_s10 + $0x30] sm:$0xff] (!%p3096_p8), %v2698_v28 }
 0x4e9   : > { %2731 = vst [vmem:[%s4040_s10 + $0x38] sm:$0xff] (!%p3096_p8), %v2699_v25  ;;  %2732 = vst [vmem:[%s4040_s10 + $0x40] sm:$0xff] (!%p3096_p8), %v2700_v57  ;;  %v2657_v11 = vld [vmem:[#allocation2 + $0xe8] sm:$0xff] (!%p3096_p8)  ;;  %v2658_v57 = vld [vmem:[#allocation2 + $0xf0] sm:$0xff] (!%p3096_p8) }
 0x4ea   : > { %v2531_v17 = vpop.f32.mrb[36].mxu1 }
 0x4eb   : > { %v2580_v42 = vadd.f32 %v2531_v17, %v2163_v40  ;;  %v2533_v38 = vpop.f32.mrb[37].mxu1  ;;  %v2669_v40 = vld [vmem:[#allocation4 + $0x48] sm:$0xff] (!%p3096_p8) }
 0x4ec   : > { %v2581_v59 = vadd.f32 %v2533_v38, %v2164_v27  ;;  %v2535_v0 = vpop.f32.mrb[38].mxu1  ;;  %v2638_v27 = vld [vmem:[#allocation2 + $0x50] sm:$0xff] (!%p3096_p8)  ;;  %v2701_v17 = vadd.f32 (!%p3096_p8), %v2669_v40, %v2637_v48  ;;  %v2671_v38 = vld [vmem:[#allocation4 + $0x58] sm:$0xff] (!%p3096_p8) }
 0x4ed   : > { %2612 = vst [vmem:[#allocation4 + $0xa0] sm:$0xff] %v2580_v42  ;;  %v2582_v10 = vadd.f32 %v2535_v0, %v2165_v47  ;;  %v2537_v34 = vpop.f32.mrb[39].mxu1  ;;  %v2670_v47 = vld [vmem:[#allocation4 + $0x50] sm:$0xff] (!%p3096_p8)  ;;  %v2639_v42 = vld [vmem:[#allocation2 + $0x58] sm:$0xff] (!%p3096_p8)  ;;  %v2640_v0 = vld [vmem:[#allocation2 + $0x60] sm:$0xff] (!%p3096_p8) }
 0x4ee   : > { %2613 = vst [vmem:[#allocation4 + $0xa8] sm:$0xff] %v2581_v59  ;;  %v2583_v60 = vadd.f32 %v2537_v34, %v2166_v37  ;;  %v2702_v37 = vadd.f32 (!%p3096_p8), %v2670_v47, %v2638_v27  ;;  %v2703_v59 = vadd.f32 (!%p3096_p8), %v2671_v38, %v2639_v42  ;;  %v2641_v34 = vld [vmem:[#allocation2 + $0x68] sm:$0xff] (!%p3096_p8)  ;;  %2733 = vst [vmem:[%s4040_s10 + $0x48] sm:$0xff] (!%p3096_p8), %v2701_v17  ;;  %v2659_v40 = vld [vmem:[#allocation2 + $0xf8] sm:$0xff] (!%p3096_p8) }
 0x4ef   : > { %2614 = vst [vmem:[#allocation4 + $0xb0] sm:$0xff] %v2582_v10  ;;  %v2672_v10 = vld [vmem:[#allocation4 + $0x60] sm:$0xff] (!%p3096_p8) }
 0x4f0   : > { %2615 = vst [vmem:[#allocation4 + $0xb8] sm:$0xff] %v2583_v60  ;;  %v2704_v60 = vadd.f32 (!%p3096_p8), %v2672_v10, %v2640_v0  ;;  %2734 = vst [vmem:[%s4040_s10 + $0x50] sm:$0xff] (!%p3096_p8), %v2702_v37 }
 0x4f1   : > { %2735 = vst [vmem:[%s4040_s10 + $0x58] sm:$0xff] (!%p3096_p8), %v2703_v59 }
 0x4f2   : > { %2736 = vst [vmem:[%s4040_s10 + $0x60] sm:$0xff] (!%p3096_p8), %v2704_v60 }
 0x4f3   : > { %v2541_v53 = vpop.f32.mrb[40].mxu1 }
 0x4f4   : > { %v2584_v58 = vadd.f32 %v2541_v53, %v2167_v52  ;;  %v2543_v31 = vpop.f32.mrb[41].mxu1  ;;  %v2673_v52 = vld [vmem:[#allocation4 + $0x68] sm:$0xff] (!%p3096_p8)  ;;  %v2674_v53 = vld [vmem:[#allocation4 + $0x70] sm:$0xff] (!%p3096_p8) }
 0x4f5   : > { %v2585_v41 = vadd.f32 %v2543_v31, %v2168_v43  ;;  %v2545_v33 = vpop.f32.mrb[42].mxu1  ;;  %v2642_v43 = vld [vmem:[#allocation2 + $0x70] sm:$0xff] (!%p3096_p8)  ;;  %v2643_v31 = vld [vmem:[#allocation2 + $0x78] sm:$0xff] (!%p3096_p8)  ;;  %v2681_v49 = vld [vmem:[#allocation4 + $0xa8] sm:$0xff] (!%p3096_p8) }
 0x4f6   : > { %2616 = vst [vmem:[#allocation4 + $0xc0] sm:$0xff] %v2584_v58  ;;  %v2586_v26 = vadd.f32 %v2545_v33, %v2169_v18  ;;  %v2547_v54 = vpop.f32.mrb[43].mxu1  ;;  %v2705_v18 = vadd.f32 (!%p3096_p8), %v2673_v52, %v2641_v34  ;;  %v2706_v58 = vadd.f32 (!%p3096_p8), %v2674_v53, %v2642_v43  ;;  %v2682_v3 = vld [vmem:[#allocation4 + $0xb0] sm:$0xff] (!%p3096_p8) }
 0x4f7   : > { %2617 = vst [vmem:[#allocation4 + $0xc8] sm:$0xff] %v2585_v41  ;;  %v2587_v32 = vadd.f32 %v2547_v54, %v2170_v19  ;;  %v2675_v19 = vld [vmem:[#allocation4 + $0x78] sm:$0xff] (!%p3096_p8)  ;;  %v2644_v41 = vld [vmem:[#allocation2 + $0x80] sm:$0xff] (!%p3096_p8)  ;;  %v2645_v54 = vld [vmem:[#allocation2 + $0x88] sm:$0xff] (!%p3096_p8)  ;;  %v2714_v5 = vadd.f32 (!%p3096_p8), %v2682_v3, %v2650_v23 }
 0x4f8   : > { %2618 = vst [vmem:[#allocation4 + $0xd0] sm:$0xff] %v2586_v26  ;;  %v2707_v33 = vadd.f32 (!%p3096_p8), %v2675_v19, %v2643_v31  ;;  %v2676_v26 = vld [vmem:[#allocation4 + $0x80] sm:$0xff] (!%p3096_p8)  ;;  %2737 = vst [vmem:[%s4040_s10 + $0x68] sm:$0xff] (!%p3096_p8), %v2705_v18  ;;  %v2683_v39 = vld [vmem:[#allocation4 + $0xb8] sm:$0xff] (!%p3096_p8) }
 0x4f9   : > { %2619 = vst [vmem:[#allocation4 + $0xd8] sm:$0xff] %v2587_v32  ;;  %v2677_v32 = vld [vmem:[#allocation4 + $0x88] sm:$0xff] (!%p3096_p8)  ;;  %2738 = vst [vmem:[%s4040_s10 + $0x70] sm:$0xff] (!%p3096_p8), %v2706_v58  ;;  %v2715_v36 = vadd.f32 (!%p3096_p8), %v2683_v39, %v2651_v63 }
 0x4fa   : > { %2739 = vst [vmem:[%s4040_s10 + $0x78] sm:$0xff] (!%p3096_p8), %v2707_v33  ;;  %2746 = vst [vmem:[%s4040_s10 + $0xb0] sm:$0xff] (!%p3096_p8), %v2714_v5 }
 0x4fb   : > { %v2551_v62 = vpop.f32.mrb[44].mxu1  ;;  %2627 = sbr.rel (%p3096_p8) target bundleno = 1292 (0x50c), region = 94  ;;  %2747 = vst [vmem:[%s4040_s10 + $0xb8] sm:$0xff] (!%p3096_p8), %v2715_v36 }
 0x4fc   : > { %v2588_v20 = vadd.f32 %v2551_v62, %v2171_v2  ;;  %v2553_v45 = vpop.f32.mrb[45].mxu1  ;;  %v2708_v2 = vadd.f32 (!%p3096_p8), %v2676_v26, %v2644_v41  ;;  %v2646_v62 = vld [vmem:[#allocation2 + $0x90] sm:$0xff] (!%p3096_p8) }
 0x4fd   : > { %v2589_v7 = vadd.f32 %v2553_v45, %v2172_v4  ;;  %v2555_v16 = vpop.f32.mrb[46].mxu1  ;;  %v2709_v4 = vadd.f32 (!%p3096_p8), %v2677_v32, %v2645_v54  ;;  %v2684_v29 = vld [vmem:[#allocation4 + $0xc0] sm:$0xff] (!%p3096_p8) }
 0x4fe   : > { %2620 = vst [vmem:[#allocation4 + $0xe0] sm:$0xff] %v2588_v20  ;;  %v2590_v44 = vadd.f32 %v2555_v16, %v2173_v55  ;;  %v2557_v30 = vpop.f32.mrb[47].mxu1  ;;  %v2678_v55 = vld [vmem:[#allocation4 + $0x90] sm:$0xff] (!%p3096_p8)  ;;  %v2647_v20 = vld [vmem:[#allocation2 + $0x98] sm:$0xff] (!%p3096_p8)  ;;  %v2680_v16 = vld [vmem:[#allocation4 + $0xa0] sm:$0xff] (!%p3096_p8)  ;;  %v2716_v6 = vadd.f32 (!%p3096_p8), %v2684_v29, %v2652_v24 }
 0x4ff   : > { %2621 = vst [vmem:[#allocation4 + $0xe8] sm:$0xff] %v2589_v7  ;;  %v2591_v50 = vadd.f32 %v2557_v30, %v2174_v56  ;;  %v2710_v45 = vadd.f32 (!%p3096_p8), %v2678_v55, %v2646_v62  ;;  %v2679_v56 = vld [vmem:[#allocation4 + $0x98] sm:$0xff] (!%p3096_p8)  ;;  %v2648_v7 = vld [vmem:[#allocation2 + $0xa0] sm:$0xff] (!%p3096_p8)  ;;  %2740 = vst [vmem:[%s4040_s10 + $0x80] sm:$0xff] (!%p3096_p8), %v2708_v2 }
 0x500   : > { %2622 = vst [vmem:[#allocation4 + $0xf0] sm:$0xff] %v2590_v44  ;;  %2741 = vst [vmem:[%s4040_s10 + $0x88] sm:$0xff] (!%p3096_p8), %v2709_v4  ;;  %v2711_v44 = vadd.f32 (!%p3096_p8), %v2679_v56, %v2647_v20  ;;  %v2712_v30 = vadd.f32 (!%p3096_p8), %v2680_v16, %v2648_v7  ;;  %v2685_v8 = vld [vmem:[#allocation4 + $0xc8] sm:$0xff] (!%p3096_p8)  ;;  %v2686_v61 = vld [vmem:[#allocation4 + $0xd0] sm:$0xff] (!%p3096_p8) }
 0x501   : > { %2623 = vst [vmem:[#allocation4 + $0xf8] sm:$0xff] %v2591_v50  ;;  %v2649_v50 = vld [vmem:[#allocation2 + $0xa8] sm:$0xff] (!%p3096_p8)  ;;  %2742 = vst [vmem:[%s4040_s10 + $0x90] sm:$0xff] (!%p3096_p8), %v2710_v45  ;;  %v2717_v14 = vadd.f32 (!%p3096_p8), %v2685_v8, %v2653_v46  ;;  %v2718_v12 = vadd.f32 (!%p3096_p8), %v2686_v61, %v2654_v51  ;;  %v2687_v35 = vld [vmem:[#allocation4 + $0xd8] sm:$0xff] (!%p3096_p8) }
 0x502   : > { %v2713_v21 = vadd.f32 %v2681_v49, %v2649_v50  ;;  %2743 = vst [vmem:[%s4040_s10 + $0x98] sm:$0xff] %v2711_v44  ;;  %2744 = vst [vmem:[%s4040_s10 + $0xa0] sm:$0xff] %v2712_v30  ;;  %v2719_v1 = vadd.f32 %v2687_v35, %v2655_v22 }
 0x503   : > { %2748 = vst [vmem:[%s4040_s10 + $0xc0] sm:$0xff] %v2716_v6  ;;  %2749 = vst [vmem:[%s4040_s10 + $0xc8] sm:$0xff] %v2717_v14 }
 0x504   : > { %2745 = vst [vmem:[%s4040_s10 + $0xa8] sm:$0xff] %v2713_v21  ;;  %2750 = vst [vmem:[%s4040_s10 + $0xd0] sm:$0xff] %v2718_v12 }
 0x505   : > { %v2688_v28 = vld [vmem:[#allocation4 + $0xe0] sm:$0xff]  ;;  %2751 = vst [vmem:[%s4040_s10 + $0xd8] sm:$0xff] %v2719_v1 }
 0x506   : > { %v2689_v15 = vld [vmem:[#allocation4 + $0xe8] sm:$0xff]  ;;  %v2720_v9 = vadd.f32 %v2688_v28, %v2656_v13 }
 0x507   : > { %v2721_v25 = vadd.f32 %v2689_v15, %v2657_v11  ;;  %v2690_v48 = vld [vmem:[#allocation4 + $0xf0] sm:$0xff] }
 0x508   : > { %v2722_v27 = vadd.f32 %v2690_v48, %v2658_v57  ;;  %v2691_v17 = vld [vmem:[#allocation4 + $0xf8] sm:$0xff]  ;;  %2752 = vst [vmem:[%s4040_s10 + $0xe0] sm:$0xff] %v2720_v9 }
 0x509   : > { %2753 = vst [vmem:[%s4040_s10 + $0xe8] sm:$0xff] %v2721_v25  ;;  %v2723_v47 = vadd.f32 %v2691_v17, %v2659_v40 }
 0x50a   : > { %2754 = vst [vmem:[%s4040_s10 + $0xf0] sm:$0xff] %v2722_v27 }
 0x50b   : > { %2755 = vst [vmem:[%s4040_s10 + $0xf8] sm:$0xff] %v2723_v47 }
 0x50c PF: > { %s3107_s29 = sshll.u32 %s3760_s30, 5  ;;  %s3100_s22 = sshll.u32 %s3764_s8, 6 }
 0x50d   : > { %s2773_s11 = sshll.u32 %s4040_s10, 4  ;;  %s2770_s28 = sadd.s32 %s3107_s29, %s3100_s22  ;;  %s4774_s11 = int_to_ptr.vmem [resolvable:$true] %s2773_s11 }
 0x50e   : > { %s3101_s15 = sshll.u32 %s2770_s28, 7  ;;  %s4885_s21 = sld [smem:[#allocation22_spill]] }
 0x50f   : > { %s4886_s19 = sand.u32 1, %s3740_s25   ;;  %s3654_s13 = scalar_lea.vmem %s4774_s11, 4096 }
 0x510   : > { %s4783_s26 = scalar_lea.sflag [#allocation7], %s4886_s19  ;;  %p3655_p10 = scmp.ne.s32.totalorder %s4774_s11, %s3654_s13 }
 0x511   : > { %s3783_s30 = smov [#allocation6]  }
 0x512   : > { %p3656_p11 = pnand %p3655_p10, %p3916_p9  ;;  %s3658_s8 = sshll.u32 %s3783_s30, 4  ;;  %s3659_s8 = int_to_ptr.vmem [resolvable:$false] %s3658_s8 }
 0x513   : > { %s3660_s10 = scalar_lea.vmem %s3659_s8, 8192  ;;  %p3661_p0 = scmp.lt.s32.totalorder %s4774_s11, %s3659_s8 }
 0x514   : > { %s4779_s24 = scalar_lea.hbm %s4885_s21, %s3101_s15  ;;  %p3657_p12 = pneg %p3656_p11 }
 0x515   : > { %p3662_p1 = scmp.lt.s32.totalorder %s3660_s10, %s3654_s13 }
 0x517   : > { %p3663_p2 = por %p3662_p1, %p3661_p0 }
 0x519   : > { %p3664_p3 = pnand %p3663_p2, %p3657_p12 }
 0x51b   : > { %3667 = shalt.err (!%p3664_p3)
}
 0x51c   : > { %s3668_s14 = scalar_lea.hbm %s4779_s24, 4096  ;;  %s3672_s17 = scalar_lea.hbm %s4885_s21, 16384 }
 0x51d   : > { %p3669_p4 = scmp.ne.s32.totalorder %s4779_s24, %s3668_s14  ;;  %p3673_p7 = scmp.lt.u32.totalorder %s4779_s24, %s4885_s21 }
 0x51e   : > { %p3674_p8 = scmp.lt.u32.totalorder %s3672_s17, %s3668_s14  ;;  %p3676_p11 = scmp.lt.u32.totalorder %s3668_s14, %s4779_s24 }
 0x51f   : > { %p3670_p5 = pnand %p3669_p4, %p3916_p9 }
 0x520   : > { %p3675_p10 = por %p3674_p8, %p3673_p7 }
 0x521   : > { %p3671_p6 = pneg %p3670_p5 }
 0x522   : > { %p3677_p12 = por %p3676_p11, %p3675_p10 }
 0x524   : > { %p3678_p0 = pnand %p3677_p12, %p3671_p6 }
 0x526   : > { %3681 = shalt.err (!%p3678_p0)
}
 0x527   : > { %s3784_s27 = smov 256   ;;  %s3785_s29 = smov 16  }
 0x528   : > { %3172 = dma.vmem_to_hbm [thread:$0]  (%p3916_p9), %s4774_s11, 4096, %s4779_s24, %s4783_s26, %s3784_s27, %s3784_s27, %s3785_s29  }
 0x529 PF: > { %s4887_s22 = sld [smem:[#allocation9_spill]]  ;;  %p3178_p1 = scmp.ge.s32.totalorder %s3780_s12, 2 }
 0x52b   : > { %p3175_p2 = pnand %p3178_p1, %p3925_p13 }
 0x52f   : > { %s2788_s15 = sand.u32 1, %s4887_s22  }
 0x530   : > { %s2789_s9 = scalar_lea.sflag [#allocation7], %s2788_s15 }
 0x531   : > { %3731 = dma.done.wait (!%p3175_p2), %s2789_s9, 4096  }
 0x532   : > { %3733 = vsyncadd (!%p3175_p2), %s2789_s9, 4294963200  ;;  %s20_s12 = sadd.s32 1, %s3780_s12   ;;  %s4889_s16 = sld [smem:[#allocation10_spill]] }
 0x533   : > { %p17_p3 = scmp.ge.s32.totalorder %s20_s12, 10   ;;  %s4890_s26 = sld [smem:[#allocation20_spill]] }
 0x534   : > { %s4891_s27 = sld [smem:[#allocation11_spill]]  ;;  %s4892_s28 = sld [smem:[#allocation17_spill]] }
 0x535   : > { %s4893_s29 = sld [smem:[#allocation12_spill]]  ;;  %s4894_s30 = sld [smem:[#allocation13_spill]] }
 0x536   : > { %s4895_s8 = sld [smem:[#allocation14_spill]]  ;;  %s4896_s9 = sld [smem:[#allocation15_spill]] }
 0x537   : > { %s4897_s10 = sld [smem:[#allocation16_spill]]  ;;  %s4898_s11 = sld [smem:[#allocation18_spill]] }
 0x538   : > { %s4899_s24 = smov %s3740_s25  ;;  %s4900_s25 = smov %s4889_s16 }
 0x539   :  { %19 = sbr.rel (!%p17_p3) target bundleno = 10 (0xa), region = 146 }
 0x540   :  { %2794 = vsyncpa [#allocation7], 1 }
 0x541   :  { %2796 = vsyncpa [#allocation7 + $0x1], 1 }

</bundles_post_ra>
